<compile_context>
chip_gen: v5e
topology: v5e:2x2
jax: 0.10.0
libtpu: 0.0.40
codegen_flags: <defaults>
</compile_context>

<pallas_src>
import functools
import math

import jax
import jax.numpy as jnp
from jax import lax
from jax.experimental import pallas as pl
from jax.experimental.pallas import tpu as pltpu

MIN_SOFTMAX_VALUE = 0.8
EPS = 1e-8
MARGIN = 1e-8
SINKHORN_ITERS = 20
_BIG = 3.0e38  # Python float -> inlined literal (stand-in for +inf when masking)


def _softmin_min_prob(cost, axis, log_const, margin):
    """Temperature-scaled softmin over `axis` with a guaranteed min probability.

    Mirrors AdaptiveProbabilisticMatchingLoss._softmin_with_min_probability.
    cost: (Bt, N, M) float32, axis is 1 or 2,
    log_const = -log((1 - min_softmax_value) / (reduced_dim - 1)) (Python float).
    """
    red = cost.shape[axis]
    cmin = jnp.min(cost, axis=axis, keepdims=True)
    shifted = cost - cmin                         # >= 0, exactly 0 at argmin
    is_zero = shifted == 0.0

    # Second-smallest value counting duplicates == torch.topk(2, largest=False)[1].
    nonzero_min = jnp.min(jnp.where(is_zero, _BIG, shifted), axis=axis, keepdims=True)
    zero_count = jnp.sum(is_zero.astype(jnp.int32), axis=axis, keepdims=True)
    second = jnp.where(zero_count >= 2, 0.0, nonzero_min)

    temp = log_const / (second + margin)          # per-row/col temperature
    # Exponent is <= 0 with max exactly 0 at the argmin -> no max-subtraction needed.
    e = jnp.exp(-shifted * temp)
    denom = jnp.sum(e, axis=axis, keepdims=True)  # >= 1, never zero
    sm = e * pl.reciprocal(denom, approx=True)

    # Duplicated minimum -> uniform distribution over the reduced dim.
    return jnp.where(second == 0.0, 1.0 / red, sm)


def _apml_kernel(pred_ref, gt_t_ref, out_ref, *, log_const_m, log_const_n,
                 eps, margin, sinkhorn_iters):
    # pred_ref : (Bt, N, 3)   gt_t_ref : (Bt, 3, M)   out_ref : (Bt, 1, 1)
    p = pred_ref[...].astype(jnp.float32)         # (Bt, N, 3)
    g = gt_t_ref[...].astype(jnp.float32)         # (Bt, 3, M)

    # Euclidean cost on the VPU: sum_k (p_k - g_k)^2 -> sqrt.  (No MXU: K=3.)
    d2 = None
    for k in range(3):
        pk = p[:, :, k:k + 1]                     # (Bt, N, 1)
        gk = g[:, k:k + 1, :]                     # (Bt, 1, M)
        diff = pk - gk                            # (Bt, N, M)
        d2 = diff * diff if d2 is None else d2 + diff * diff
    cost = jnp.sqrt(d2)                           # (Bt, N, M), d2 >= 0 by construction

    # Softmin with min-probability along M (dim=2) and along N (dim=1, no transpose).
    p1 = _softmin_min_prob(cost, 2, log_const_m, margin)
    p2 = _softmin_min_prob(cost, 1, log_const_n, margin)
    P = 0.5 * (p1 + p2)

    # Sinkhorn normalization; static trip count -> fully unrolled for the scheduler.
    def body(_, Pk):
        row_sum = jnp.sum(Pk, axis=2, keepdims=True)          # (Bt, N, 1)
        Pk = Pk * pl.reciprocal(row_sum + eps, approx=True)
        col_sum = jnp.sum(Pk, axis=1, keepdims=True)          # (Bt, 1, M)
        Pk = Pk * pl.reciprocal(col_sum + eps, approx=True)
        return Pk

    P = lax.fori_loop(0, sinkhorn_iters, body, P, unroll=True)

    # Reduce to a per-batch scalar in-kernel; only (Bt, 1, 1) goes back to HBM.
    s = jnp.sum(P * cost, axis=2, keepdims=True)              # (Bt, N, 1)
    out_ref[...] = jnp.sum(s, axis=1, keepdims=True)          # (Bt, 1, 1)


def _pick_batch_block(batch, n, m, slab_budget_bytes=2 * 1024 * 1024):
    """Largest divisor of `batch` whose (Bt, N, M) f32 cost slab stays small.

    Amortizes per-grid-step overhead for small point clouds while keeping the
    whole-slab working set comfortably inside VMEM on all generations.
    """
    per_batch = n * m * 4
    max_bt = max(1, slab_budget_bytes // max(per_batch, 1))
    best = 1
    for cand in range(1, batch + 1):
        if batch % cand == 0 and cand <= max_bt:
            best = cand
    return best


def apml_loss(predicted, ground_truth, *, min_softmax_value=MIN_SOFTMAX_VALUE,
              eps=EPS, margin=MARGIN, sinkhorn_iters=SINKHORN_ITERS):
    """predicted: [B, N, 3], ground_truth: [B, M, 3] -> scalar loss (float32)."""
    B, N, _ = predicted.shape
    _, M, _ = ground_truth.shape

    pred = predicted.astype(jnp.float32)                          # (B, N, 3)
    gt_t = jnp.swapaxes(ground_truth.astype(jnp.float32), 1, 2)   # (B, 3, M)

    # Temperature constants, hoisted to Python floats (become trace-time literals).
    log_const_m = -math.log((1.0 - min_softmax_value) / (M - 1))
    log_const_n = -math.log((1.0 - min_softmax_value) / (N - 1))

    bt = _pick_batch_block(B, N, M)

    kernel = functools.partial(
        _apml_kernel,
        log_const_m=float(log_const_m),
        log_const_n=float(log_const_n),
        eps=float(eps),
        margin=float(margin),
        sinkhorn_iters=int(sinkhorn_iters),
    )

    # ~several live (Bt, N, M) f32 slabs + double-buffered inputs + cushion,
    # clamped to [32 MiB, 64 MiB] (64 MiB keeps v7x safe; v5e/v6e have 128 MiB).
    # TODO(synk): for very large point clouds (N*M slabs > ~64 MiB budget on
    # v7x) a row-tiled softmin/Sinkhorn variant would be needed.
    slab = bt * N * M * 4
    vmem_limit = int(min(64 * 1024 * 1024,
                         max(32 * 1024 * 1024, 8 * slab + (4 << 20))))

    per_batch_loss = pl.pallas_call(
        kernel,
        out_shape=jax.ShapeDtypeStruct((B, 1, 1), jnp.float32),
        grid_spec=pltpu.PrefetchScalarGridSpec(
            num_scalar_prefetch=0,
            grid=(B // bt,),
            in_specs=[
                pl.BlockSpec((bt, N, 3), lambda b: (b, 0, 0)),
                pl.BlockSpec((bt, 3, M), lambda b: (b, 0, 0)),
            ],
            out_specs=pl.BlockSpec((bt, 1, 1), lambda b: (b, 0, 0)),
        ),
        compiler_params=pltpu.CompilerParams(
            dimension_semantics=("parallel",),
            vmem_limit_bytes=vmem_limit,
        ),
    )(pred, gt_t)

    # Tiny glue: mean over batch of the per-batch sums (B floats).
    return jnp.mean(per_batch_loss[:, 0, 0])


def _apml_loss_ref(predicted, ground_truth, *, min_softmax_value=MIN_SOFTMAX_VALUE,
                   eps=EPS, margin=MARGIN, sinkhorn_iters=SINKHORN_ITERS):
    """Pure-JAX reference replicating the PyTorch module semantics (exact divisions)."""
    pred = predicted.astype(jnp.float32)
    gt = ground_truth.astype(jnp.float32)
    d2 = (jnp.sum(pred * pred, -1)[:, :, None]
          + jnp.sum(gt * gt, -1)[:, None, :]
          - 2.0 * jnp.einsum("bnd,bmd->bnm", pred, gt))
    cost = jnp.sqrt(jnp.maximum(d2, 0.0))

    def softmin_last(c):
        m = c.shape[-1]
        shifted = c - jnp.min(c, -1, keepdims=True)
        is_zero = shifted == 0.0
        nz_min = jnp.min(jnp.where(is_zero, _BIG, shifted), -1, keepdims=True)
        cnt = jnp.sum(is_zero.astype(jnp.float32), -1, keepdims=True)
        second = jnp.where(cnt >= 2.0, 0.0, nz_min)
        T = -jnp.log((1.0 - min_softmax_value) / (m - 1)) / (second + margin)
        sm = jax.nn.softmax(-shifted * T, axis=-1)
        return jnp.where(second == 0.0, 1.0 / m, sm)

    P1 = softmin_last(cost)
    P2 = jnp.swapaxes(softmin_last(jnp.swapaxes(cost, 1, 2)), 1, 2)
    P = 0.5 * (P1 + P2)
    for _ in range(sinkhorn_iters):
        P = P / (jnp.sum(P, 2, keepdims=True) + eps)
        P = P / (jnp.sum(P, 1, keepdims=True) + eps)
    return jnp.mean(jnp.sum(P * cost, axis=(1, 2)))


if __name__ == "__main__":
    B, N, M = 2, 64, 64
    key = jax.random.PRNGKey(0)
    kp, kg = jax.random.split(key)
    predicted = jax.random.normal(kp, (B, N, 3), dtype=jnp.float32)
    ground_truth = jax.random.normal(kg, (B, M, 3), dtype=jnp.float32)

    loss = jax.block_until_ready(apml_loss(predicted, ground_truth))
    loss_ref = jax.block_until_ready(_apml_loss_ref(predicted, ground_truth))

    assert loss.shape == () and loss.dtype == jnp.float32
    # Approximate EUP reciprocals (softmax denominators + 40 Sinkhorn
    # normalizations) introduce ~1e-4-level relative deviation vs. the
    # exact-division reference, so use a slightly relaxed tolerance.
    assert jnp.allclose(loss, loss_ref, rtol=2e-3, atol=2e-3), (loss, loss_ref)
    print("KERNEL_OK")
</pallas_src>

<mosaic_0001>
module attributes {stable_mosaic.version = 11 : i64} {
  func.func @_apml_kernel(%arg0: i32, %arg1: memref<2x64x3xf32, #tpu.memory_space<vmem>>, %arg2: memref<2x3x64xf32, #tpu.memory_space<vmem>>, %arg3: memref<2x1x1xf32, #tpu.memory_space<vmem>>) attributes {dimension_semantics = [#tpu.dimension_semantics<parallel>], iteration_bounds = array<i64: 1>, scalar_prefetch = 0 : i64, scratch_operands = 0 : i64, tpu.core_type = #tpu.core_type<tc>, window_params = [{transform_indices = @transform_0, window_bounds = array<i64: 2, 64, 3>}, {transform_indices = @transform_1, window_bounds = array<i64: 2, 3, 64>}, {transform_indices = @transform_2, window_bounds = array<i64: 2, 1, 1>}]} {
    %c0 = arith.constant 0 : index
    %c0_0 = arith.constant 0 : index
    %c0_1 = arith.constant 0 : index
    %0 = vector.load %arg1[%c0, %c0_0, %c0_1] : memref<2x64x3xf32, #tpu.memory_space<vmem>>, vector<2x64x3xf32>
    %c0_2 = arith.constant 0 : index
    %c0_3 = arith.constant 0 : index
    %c0_4 = arith.constant 0 : index
    %1 = vector.load %arg2[%c0_2, %c0_3, %c0_4] : memref<2x3x64xf32, #tpu.memory_space<vmem>>, vector<2x3x64xf32>
    %2 = vector.extract_strided_slice %0 {offsets = [0, 0, 0], sizes = [2, 64, 1], strides = [1, 1, 1]} : vector<2x64x3xf32> to vector<2x64x1xf32>
    %3 = vector.extract_strided_slice %1 {offsets = [0, 0, 0], sizes = [2, 1, 64], strides = [1, 1, 1]} : vector<2x3x64xf32> to vector<2x1x64xf32>
    %4 = vector.broadcast %2 : vector<2x64x1xf32> to vector<2x64x64xf32>
    %5 = vector.broadcast %3 : vector<2x1x64xf32> to vector<2x64x64xf32>
    %6 = arith.subf %4, %5 : vector<2x64x64xf32>
    %7 = arith.mulf %6, %6 : vector<2x64x64xf32>
    %8 = vector.extract_strided_slice %0 {offsets = [0, 0, 1], sizes = [2, 64, 1], strides = [1, 1, 1]} : vector<2x64x3xf32> to vector<2x64x1xf32>
    %9 = vector.extract_strided_slice %1 {offsets = [0, 1, 0], sizes = [2, 1, 64], strides = [1, 1, 1]} : vector<2x3x64xf32> to vector<2x1x64xf32>
    %10 = vector.broadcast %8 : vector<2x64x1xf32> to vector<2x64x64xf32>
    %11 = vector.broadcast %9 : vector<2x1x64xf32> to vector<2x64x64xf32>
    %12 = arith.subf %10, %11 : vector<2x64x64xf32>
    %13 = arith.mulf %12, %12 : vector<2x64x64xf32>
    %14 = arith.addf %7, %13 : vector<2x64x64xf32>
    %15 = vector.extract_strided_slice %0 {offsets = [0, 0, 2], sizes = [2, 64, 1], strides = [1, 1, 1]} : vector<2x64x3xf32> to vector<2x64x1xf32>
    %16 = vector.extract_strided_slice %1 {offsets = [0, 2, 0], sizes = [2, 1, 64], strides = [1, 1, 1]} : vector<2x3x64xf32> to vector<2x1x64xf32>
    %17 = vector.broadcast %15 : vector<2x64x1xf32> to vector<2x64x64xf32>
    %18 = vector.broadcast %16 : vector<2x1x64xf32> to vector<2x64x64xf32>
    %19 = arith.subf %17, %18 : vector<2x64x64xf32>
    %20 = arith.mulf %19, %19 : vector<2x64x64xf32>
    %21 = arith.addf %14, %20 : vector<2x64x64xf32>
    %22 = math.sqrt %21 : vector<2x64x64xf32>
    %cst = arith.constant dense<0x7F800000> : vector<2x64xf32>
    %23 = vector.multi_reduction <minimumf>, %22, %cst [2] : vector<2x64x64xf32> to vector<2x64xf32>
    %24 = vector.shape_cast %23 : vector<2x64xf32> to vector<2x64x1xf32>
    %25 = vector.broadcast %24 : vector<2x64x1xf32> to vector<2x64x64xf32>
    %26 = arith.subf %22, %25 : vector<2x64x64xf32>
    %cst_5 = arith.constant 0.000000e+00 : f32
    %27 = vector.broadcast %cst_5 : f32 to vector<2x64x64xf32>
    %28 = arith.cmpf oeq, %26, %27 : vector<2x64x64xf32>
    %cst_6 = arith.constant 3.000000e+38 : f32
    %29 = vector.broadcast %cst_6 : f32 to vector<2x64x64xf32>
    %30 = arith.select %28, %29, %26 : vector<2x64x64xi1>, vector<2x64x64xf32>
    %cst_7 = arith.constant dense<0x7F800000> : vector<2x64xf32>
    %31 = vector.multi_reduction <minimumf>, %30, %cst_7 [2] : vector<2x64x64xf32> to vector<2x64xf32>
    %32 = vector.shape_cast %31 : vector<2x64xf32> to vector<2x64x1xf32>
    %33 = arith.extui %28 : vector<2x64x64xi1> to vector<2x64x64xi32>
    %cst_8 = arith.constant dense<0> : vector<2x64xi32>
    %34 = vector.multi_reduction <add>, %33, %cst_8 [2] : vector<2x64x64xi32> to vector<2x64xi32>
    %35 = vector.shape_cast %34 : vector<2x64xi32> to vector<2x64x1xi32>
    %c2_i32 = arith.constant 2 : i32
    %36 = vector.broadcast %c2_i32 : i32 to vector<2x64x1xi32>
    %37 = arith.cmpi sge, %35, %36 : vector<2x64x1xi32>
    %cst_9 = arith.constant 0.000000e+00 : f32
    %38 = vector.broadcast %cst_9 : f32 to vector<2x64x1xf32>
    %39 = arith.select %37, %38, %32 : vector<2x64x1xi1>, vector<2x64x1xf32>
    %cst_10 = arith.constant 9.99999993E-9 : f32
    %40 = vector.broadcast %cst_10 : f32 to vector<2x64x1xf32>
    %41 = arith.addf %39, %40 : vector<2x64x1xf32>
    %cst_11 = arith.constant 5.75257254 : f32
    %42 = vector.broadcast %cst_11 : f32 to vector<2x64x1xf32>
    %43 = arith.divf %42, %41 : vector<2x64x1xf32>
    %cst_12 = arith.constant 0.000000e+00 : f32
    %44 = vector.broadcast %cst_12 : f32 to vector<2x64x64xf32>
    %45 = arith.subf %44, %26 : vector<2x64x64xf32>
    %46 = vector.broadcast %43 : vector<2x64x1xf32> to vector<2x64x64xf32>
    %47 = arith.mulf %45, %46 : vector<2x64x64xf32>
    %48 = math.exp %47 : vector<2x64x64xf32>
    %cst_13 = arith.constant dense<0.000000e+00> : vector<2x64xf32>
    %49 = vector.multi_reduction <add>, %48, %cst_13 [2] : vector<2x64x64xf32> to vector<2x64xf32>
    %50 = vector.shape_cast %49 : vector<2x64xf32> to vector<2x64x1xf32>
    %51 = tpu.reciprocal %50 {approx = true} : vector<2x64x1xf32> -> vector<2x64x1xf32>
    %52 = vector.broadcast %51 : vector<2x64x1xf32> to vector<2x64x64xf32>
    %53 = arith.mulf %48, %52 : vector<2x64x64xf32>
    %cst_14 = arith.constant 0.000000e+00 : f32
    %54 = vector.broadcast %cst_14 : f32 to vector<2x64x1xf32>
    %55 = arith.cmpf oeq, %39, %54 : vector<2x64x1xf32>
    %cst_15 = arith.constant 1.562500e-02 : f32
    %56 = vector.shape_cast %55 : vector<2x64x1xi1> to vector<2x64x1xi1>
    %57 = vector.broadcast %56 : vector<2x64x1xi1> to vector<2x64x64xi1>
    %58 = vector.broadcast %cst_15 : f32 to vector<2x64x64xf32>
    %59 = arith.select %57, %58, %53 : vector<2x64x64xi1>, vector<2x64x64xf32>
    %cst_16 = arith.constant dense<0x7F800000> : vector<2x64xf32>
    %60 = vector.multi_reduction <minimumf>, %22, %cst_16 [1] : vector<2x64x64xf32> to vector<2x64xf32>
    %61 = vector.shape_cast %60 : vector<2x64xf32> to vector<2x1x64xf32>
    %62 = vector.broadcast %61 : vector<2x1x64xf32> to vector<2x64x64xf32>
    %63 = arith.subf %22, %62 : vector<2x64x64xf32>
    %cst_17 = arith.constant 0.000000e+00 : f32
    %64 = vector.broadcast %cst_17 : f32 to vector<2x64x64xf32>
    %65 = arith.cmpf oeq, %63, %64 : vector<2x64x64xf32>
    %cst_18 = arith.constant 3.000000e+38 : f32
    %66 = vector.broadcast %cst_18 : f32 to vector<2x64x64xf32>
    %67 = arith.select %65, %66, %63 : vector<2x64x64xi1>, vector<2x64x64xf32>
    %cst_19 = arith.constant dense<0x7F800000> : vector<2x64xf32>
    %68 = vector.multi_reduction <minimumf>, %67, %cst_19 [1] : vector<2x64x64xf32> to vector<2x64xf32>
    %69 = vector.shape_cast %68 : vector<2x64xf32> to vector<2x1x64xf32>
    %70 = arith.extui %65 : vector<2x64x64xi1> to vector<2x64x64xi32>
    %cst_20 = arith.constant dense<0> : vector<2x64xi32>
    %71 = vector.multi_reduction <add>, %70, %cst_20 [1] : vector<2x64x64xi32> to vector<2x64xi32>
    %72 = vector.shape_cast %71 : vector<2x64xi32> to vector<2x1x64xi32>
    %c2_i32_21 = arith.constant 2 : i32
    %73 = vector.broadcast %c2_i32_21 : i32 to vector<2x1x64xi32>
    %74 = arith.cmpi sge, %72, %73 : vector<2x1x64xi32>
    %cst_22 = arith.constant 0.000000e+00 : f32
    %75 = vector.broadcast %cst_22 : f32 to vector<2x1x64xf32>
    %76 = arith.select %74, %75, %69 : vector<2x1x64xi1>, vector<2x1x64xf32>
    %cst_23 = arith.constant 9.99999993E-9 : f32
    %77 = vector.broadcast %cst_23 : f32 to vector<2x1x64xf32>
    %78 = arith.addf %76, %77 : vector<2x1x64xf32>
    %cst_24 = arith.constant 5.75257254 : f32
    %79 = vector.broadcast %cst_24 : f32 to vector<2x1x64xf32>
    %80 = arith.divf %79, %78 : vector<2x1x64xf32>
    %cst_25 = arith.constant 0.000000e+00 : f32
    %81 = vector.broadcast %cst_25 : f32 to vector<2x64x64xf32>
    %82 = arith.subf %81, %63 : vector<2x64x64xf32>
    %83 = vector.broadcast %80 : vector<2x1x64xf32> to vector<2x64x64xf32>
    %84 = arith.mulf %82, %83 : vector<2x64x64xf32>
    %85 = math.exp %84 : vector<2x64x64xf32>
    %cst_26 = arith.constant dense<0.000000e+00> : vector<2x64xf32>
    %86 = vector.multi_reduction <add>, %85, %cst_26 [1] : vector<2x64x64xf32> to vector<2x64xf32>
    %87 = vector.shape_cast %86 : vector<2x64xf32> to vector<2x1x64xf32>
    %88 = tpu.reciprocal %87 {approx = true} : vector<2x1x64xf32> -> vector<2x1x64xf32>
    %89 = vector.broadcast %88 : vector<2x1x64xf32> to vector<2x64x64xf32>
    %90 = arith.mulf %85, %89 : vector<2x64x64xf32>
    %cst_27 = arith.constant 0.000000e+00 : f32
    %91 = vector.broadcast %cst_27 : f32 to vector<2x1x64xf32>
    %92 = arith.cmpf oeq, %76, %91 : vector<2x1x64xf32>
    %cst_28 = arith.constant 1.562500e-02 : f32
    %93 = vector.shape_cast %92 : vector<2x1x64xi1> to vector<2x1x64xi1>
    %94 = vector.broadcast %93 : vector<2x1x64xi1> to vector<2x64x64xi1>
    %95 = vector.broadcast %cst_28 : f32 to vector<2x64x64xf32>
    %96 = arith.select %94, %95, %90 : vector<2x64x64xi1>, vector<2x64x64xf32>
    %97 = arith.addf %59, %96 : vector<2x64x64xf32>
    %cst_29 = arith.constant 5.000000e-01 : f32
    %98 = vector.broadcast %cst_29 : f32 to vector<2x64x64xf32>
    %99 = arith.mulf %98, %97 : vector<2x64x64xf32>
    %c0_i32 = arith.constant 0 : i32
    %cst_30 = arith.constant dense<0.000000e+00> : vector<2x64xf32>
    %100 = vector.multi_reduction <add>, %99, %cst_30 [2] : vector<2x64x64xf32> to vector<2x64xf32>
    %101 = vector.shape_cast %100 : vector<2x64xf32> to vector<2x64x1xf32>
    %cst_31 = arith.constant 9.99999993E-9 : f32
    %102 = vector.broadcast %cst_31 : f32 to vector<2x64x1xf32>
    %103 = arith.addf %101, %102 : vector<2x64x1xf32>
    %104 = tpu.reciprocal %103 {approx = true} : vector<2x64x1xf32> -> vector<2x64x1xf32>
    %105 = vector.broadcast %104 : vector<2x64x1xf32> to vector<2x64x64xf32>
    %106 = arith.mulf %99, %105 : vector<2x64x64xf32>
    %cst_32 = arith.constant dense<0.000000e+00> : vector<2x64xf32>
    %107 = vector.multi_reduction <add>, %106, %cst_32 [1] : vector<2x64x64xf32> to vector<2x64xf32>
    %108 = vector.shape_cast %107 : vector<2x64xf32> to vector<2x1x64xf32>
    %cst_33 = arith.constant 9.99999993E-9 : f32
    %109 = vector.broadcast %cst_33 : f32 to vector<2x1x64xf32>
    %110 = arith.addf %108, %109 : vector<2x1x64xf32>
    %111 = tpu.reciprocal %110 {approx = true} : vector<2x1x64xf32> -> vector<2x1x64xf32>
    %112 = vector.broadcast %111 : vector<2x1x64xf32> to vector<2x64x64xf32>
    %113 = arith.mulf %106, %112 : vector<2x64x64xf32>
    %c1_i32 = arith.constant 1 : i32
    %cst_34 = arith.constant dense<0.000000e+00> : vector<2x64xf32>
    %114 = vector.multi_reduction <add>, %113, %cst_34 [2] : vector<2x64x64xf32> to vector<2x64xf32>
    %115 = vector.shape_cast %114 : vector<2x64xf32> to vector<2x64x1xf32>
    %cst_35 = arith.constant 9.99999993E-9 : f32
    %116 = vector.broadcast %cst_35 : f32 to vector<2x64x1xf32>
    %117 = arith.addf %115, %116 : vector<2x64x1xf32>
    %118 = tpu.reciprocal %117 {approx = true} : vector<2x64x1xf32> -> vector<2x64x1xf32>
    %119 = vector.broadcast %118 : vector<2x64x1xf32> to vector<2x64x64xf32>
    %120 = arith.mulf %113, %119 : vector<2x64x64xf32>
    %cst_36 = arith.constant dense<0.000000e+00> : vector<2x64xf32>
    %121 = vector.multi_reduction <add>, %120, %cst_36 [1] : vector<2x64x64xf32> to vector<2x64xf32>
    %122 = vector.shape_cast %121 : vector<2x64xf32> to vector<2x1x64xf32>
    %cst_37 = arith.constant 9.99999993E-9 : f32
    %123 = vector.broadcast %cst_37 : f32 to vector<2x1x64xf32>
    %124 = arith.addf %122, %123 : vector<2x1x64xf32>
    %125 = tpu.reciprocal %124 {approx = true} : vector<2x1x64xf32> -> vector<2x1x64xf32>
    %126 = vector.broadcast %125 : vector<2x1x64xf32> to vector<2x64x64xf32>
    %127 = arith.mulf %120, %126 : vector<2x64x64xf32>
    %c2_i32_38 = arith.constant 2 : i32
    %cst_39 = arith.constant dense<0.000000e+00> : vector<2x64xf32>
    %128 = vector.multi_reduction <add>, %127, %cst_39 [2] : vector<2x64x64xf32> to vector<2x64xf32>
    %129 = vector.shape_cast %128 : vector<2x64xf32> to vector<2x64x1xf32>
    %cst_40 = arith.constant 9.99999993E-9 : f32
    %130 = vector.broadcast %cst_40 : f32 to vector<2x64x1xf32>
    %131 = arith.addf %129, %130 : vector<2x64x1xf32>
    %132 = tpu.reciprocal %131 {approx = true} : vector<2x64x1xf32> -> vector<2x64x1xf32>
    %133 = vector.broadcast %132 : vector<2x64x1xf32> to vector<2x64x64xf32>
    %134 = arith.mulf %127, %133 : vector<2x64x64xf32>
    %cst_41 = arith.constant dense<0.000000e+00> : vector<2x64xf32>
    %135 = vector.multi_reduction <add>, %134, %cst_41 [1] : vector<2x64x64xf32> to vector<2x64xf32>
    %136 = vector.shape_cast %135 : vector<2x64xf32> to vector<2x1x64xf32>
    %cst_42 = arith.constant 9.99999993E-9 : f32
    %137 = vector.broadcast %cst_42 : f32 to vector<2x1x64xf32>
    %138 = arith.addf %136, %137 : vector<2x1x64xf32>
    %139 = tpu.reciprocal %138 {approx = true} : vector<2x1x64xf32> -> vector<2x1x64xf32>
    %140 = vector.broadcast %139 : vector<2x1x64xf32> to vector<2x64x64xf32>
    %141 = arith.mulf %134, %140 : vector<2x64x64xf32>
    %c3_i32 = arith.constant 3 : i32
    %cst_43 = arith.constant dense<0.000000e+00> : vector<2x64xf32>
    %142 = vector.multi_reduction <add>, %141, %cst_43 [2] : vector<2x64x64xf32> to vector<2x64xf32>
    %143 = vector.shape_cast %142 : vector<2x64xf32> to vector<2x64x1xf32>
    %cst_44 = arith.constant 9.99999993E-9 : f32
    %144 = vector.broadcast %cst_44 : f32 to vector<2x64x1xf32>
    %145 = arith.addf %143, %144 : vector<2x64x1xf32>
    %146 = tpu.reciprocal %145 {approx = true} : vector<2x64x1xf32> -> vector<2x64x1xf32>
    %147 = vector.broadcast %146 : vector<2x64x1xf32> to vector<2x64x64xf32>
    %148 = arith.mulf %141, %147 : vector<2x64x64xf32>
    %cst_45 = arith.constant dense<0.000000e+00> : vector<2x64xf32>
    %149 = vector.multi_reduction <add>, %148, %cst_45 [1] : vector<2x64x64xf32> to vector<2x64xf32>
    %150 = vector.shape_cast %149 : vector<2x64xf32> to vector<2x1x64xf32>
    %cst_46 = arith.constant 9.99999993E-9 : f32
    %151 = vector.broadcast %cst_46 : f32 to vector<2x1x64xf32>
    %152 = arith.addf %150, %151 : vector<2x1x64xf32>
    %153 = tpu.reciprocal %152 {approx = true} : vector<2x1x64xf32> -> vector<2x1x64xf32>
    %154 = vector.broadcast %153 : vector<2x1x64xf32> to vector<2x64x64xf32>
    %155 = arith.mulf %148, %154 : vector<2x64x64xf32>
    %c4_i32 = arith.constant 4 : i32
    %cst_47 = arith.constant dense<0.000000e+00> : vector<2x64xf32>
    %156 = vector.multi_reduction <add>, %155, %cst_47 [2] : vector<2x64x64xf32> to vector<2x64xf32>
    %157 = vector.shape_cast %156 : vector<2x64xf32> to vector<2x64x1xf32>
    %cst_48 = arith.constant 9.99999993E-9 : f32
    %158 = vector.broadcast %cst_48 : f32 to vector<2x64x1xf32>
    %159 = arith.addf %157, %158 : vector<2x64x1xf32>
    %160 = tpu.reciprocal %159 {approx = true} : vector<2x64x1xf32> -> vector<2x64x1xf32>
    %161 = vector.broadcast %160 : vector<2x64x1xf32> to vector<2x64x64xf32>
    %162 = arith.mulf %155, %161 : vector<2x64x64xf32>
    %cst_49 = arith.constant dense<0.000000e+00> : vector<2x64xf32>
    %163 = vector.multi_reduction <add>, %162, %cst_49 [1] : vector<2x64x64xf32> to vector<2x64xf32>
    %164 = vector.shape_cast %163 : vector<2x64xf32> to vector<2x1x64xf32>
    %cst_50 = arith.constant 9.99999993E-9 : f32
    %165 = vector.broadcast %cst_50 : f32 to vector<2x1x64xf32>
    %166 = arith.addf %164, %165 : vector<2x1x64xf32>
    %167 = tpu.reciprocal %166 {approx = true} : vector<2x1x64xf32> -> vector<2x1x64xf32>
    %168 = vector.broadcast %167 : vector<2x1x64xf32> to vector<2x64x64xf32>
    %169 = arith.mulf %162, %168 : vector<2x64x64xf32>
    %c5_i32 = arith.constant 5 : i32
    %cst_51 = arith.constant dense<0.000000e+00> : vector<2x64xf32>
    %170 = vector.multi_reduction <add>, %169, %cst_51 [2] : vector<2x64x64xf32> to vector<2x64xf32>
    %171 = vector.shape_cast %170 : vector<2x64xf32> to vector<2x64x1xf32>
    %cst_52 = arith.constant 9.99999993E-9 : f32
    %172 = vector.broadcast %cst_52 : f32 to vector<2x64x1xf32>
    %173 = arith.addf %171, %172 : vector<2x64x1xf32>
    %174 = tpu.reciprocal %173 {approx = true} : vector<2x64x1xf32> -> vector<2x64x1xf32>
    %175 = vector.broadcast %174 : vector<2x64x1xf32> to vector<2x64x64xf32>
    %176 = arith.mulf %169, %175 : vector<2x64x64xf32>
    %cst_53 = arith.constant dense<0.000000e+00> : vector<2x64xf32>
    %177 = vector.multi_reduction <add>, %176, %cst_53 [1] : vector<2x64x64xf32> to vector<2x64xf32>
    %178 = vector.shape_cast %177 : vector<2x64xf32> to vector<2x1x64xf32>
    %cst_54 = arith.constant 9.99999993E-9 : f32
    %179 = vector.broadcast %cst_54 : f32 to vector<2x1x64xf32>
    %180 = arith.addf %178, %179 : vector<2x1x64xf32>
    %181 = tpu.reciprocal %180 {approx = true} : vector<2x1x64xf32> -> vector<2x1x64xf32>
    %182 = vector.broadcast %181 : vector<2x1x64xf32> to vector<2x64x64xf32>
    %183 = arith.mulf %176, %182 : vector<2x64x64xf32>
    %c6_i32 = arith.constant 6 : i32
    %cst_55 = arith.constant dense<0.000000e+00> : vector<2x64xf32>
    %184 = vector.multi_reduction <add>, %183, %cst_55 [2] : vector<2x64x64xf32> to vector<2x64xf32>
    %185 = vector.shape_cast %184 : vector<2x64xf32> to vector<2x64x1xf32>
    %cst_56 = arith.constant 9.99999993E-9 : f32
    %186 = vector.broadcast %cst_56 : f32 to vector<2x64x1xf32>
    %187 = arith.addf %185, %186 : vector<2x64x1xf32>
    %188 = tpu.reciprocal %187 {approx = true} : vector<2x64x1xf32> -> vector<2x64x1xf32>
    %189 = vector.broadcast %188 : vector<2x64x1xf32> to vector<2x64x64xf32>
    %190 = arith.mulf %183, %189 : vector<2x64x64xf32>
    %cst_57 = arith.constant dense<0.000000e+00> : vector<2x64xf32>
    %191 = vector.multi_reduction <add>, %190, %cst_57 [1] : vector<2x64x64xf32> to vector<2x64xf32>
    %192 = vector.shape_cast %191 : vector<2x64xf32> to vector<2x1x64xf32>
    %cst_58 = arith.constant 9.99999993E-9 : f32
    %193 = vector.broadcast %cst_58 : f32 to vector<2x1x64xf32>
    %194 = arith.addf %192, %193 : vector<2x1x64xf32>
    %195 = tpu.reciprocal %194 {approx = true} : vector<2x1x64xf32> -> vector<2x1x64xf32>
    %196 = vector.broadcast %195 : vector<2x1x64xf32> to vector<2x64x64xf32>
    %197 = arith.mulf %190, %196 : vector<2x64x64xf32>
    %c7_i32 = arith.constant 7 : i32
    %cst_59 = arith.constant dense<0.000000e+00> : vector<2x64xf32>
    %198 = vector.multi_reduction <add>, %197, %cst_59 [2] : vector<2x64x64xf32> to vector<2x64xf32>
    %199 = vector.shape_cast %198 : vector<2x64xf32> to vector<2x64x1xf32>
    %cst_60 = arith.constant 9.99999993E-9 : f32
    %200 = vector.broadcast %cst_60 : f32 to vector<2x64x1xf32>
    %201 = arith.addf %199, %200 : vector<2x64x1xf32>
    %202 = tpu.reciprocal %201 {approx = true} : vector<2x64x1xf32> -> vector<2x64x1xf32>
    %203 = vector.broadcast %202 : vector<2x64x1xf32> to vector<2x64x64xf32>
    %204 = arith.mulf %197, %203 : vector<2x64x64xf32>
    %cst_61 = arith.constant dense<0.000000e+00> : vector<2x64xf32>
    %205 = vector.multi_reduction <add>, %204, %cst_61 [1] : vector<2x64x64xf32> to vector<2x64xf32>
    %206 = vector.shape_cast %205 : vector<2x64xf32> to vector<2x1x64xf32>
    %cst_62 = arith.constant 9.99999993E-9 : f32
    %207 = vector.broadcast %cst_62 : f32 to vector<2x1x64xf32>
    %208 = arith.addf %206, %207 : vector<2x1x64xf32>
    %209 = tpu.reciprocal %208 {approx = true} : vector<2x1x64xf32> -> vector<2x1x64xf32>
    %210 = vector.broadcast %209 : vector<2x1x64xf32> to vector<2x64x64xf32>
    %211 = arith.mulf %204, %210 : vector<2x64x64xf32>
    %c8_i32 = arith.constant 8 : i32
    %cst_63 = arith.constant dense<0.000000e+00> : vector<2x64xf32>
    %212 = vector.multi_reduction <add>, %211, %cst_63 [2] : vector<2x64x64xf32> to vector<2x64xf32>
    %213 = vector.shape_cast %212 : vector<2x64xf32> to vector<2x64x1xf32>
    %cst_64 = arith.constant 9.99999993E-9 : f32
    %214 = vector.broadcast %cst_64 : f32 to vector<2x64x1xf32>
    %215 = arith.addf %213, %214 : vector<2x64x1xf32>
    %216 = tpu.reciprocal %215 {approx = true} : vector<2x64x1xf32> -> vector<2x64x1xf32>
    %217 = vector.broadcast %216 : vector<2x64x1xf32> to vector<2x64x64xf32>
    %218 = arith.mulf %211, %217 : vector<2x64x64xf32>
    %cst_65 = arith.constant dense<0.000000e+00> : vector<2x64xf32>
    %219 = vector.multi_reduction <add>, %218, %cst_65 [1] : vector<2x64x64xf32> to vector<2x64xf32>
    %220 = vector.shape_cast %219 : vector<2x64xf32> to vector<2x1x64xf32>
    %cst_66 = arith.constant 9.99999993E-9 : f32
    %221 = vector.broadcast %cst_66 : f32 to vector<2x1x64xf32>
    %222 = arith.addf %220, %221 : vector<2x1x64xf32>
    %223 = tpu.reciprocal %222 {approx = true} : vector<2x1x64xf32> -> vector<2x1x64xf32>
    %224 = vector.broadcast %223 : vector<2x1x64xf32> to vector<2x64x64xf32>
    %225 = arith.mulf %218, %224 : vector<2x64x64xf32>
    %c9_i32 = arith.constant 9 : i32
    %cst_67 = arith.constant dense<0.000000e+00> : vector<2x64xf32>
    %226 = vector.multi_reduction <add>, %225, %cst_67 [2] : vector<2x64x64xf32> to vector<2x64xf32>
    %227 = vector.shape_cast %226 : vector<2x64xf32> to vector<2x64x1xf32>
    %cst_68 = arith.constant 9.99999993E-9 : f32
    %228 = vector.broadcast %cst_68 : f32 to vector<2x64x1xf32>
    %229 = arith.addf %227, %228 : vector<2x64x1xf32>
    %230 = tpu.reciprocal %229 {approx = true} : vector<2x64x1xf32> -> vector<2x64x1xf32>
    %231 = vector.broadcast %230 : vector<2x64x1xf32> to vector<2x64x64xf32>
    %232 = arith.mulf %225, %231 : vector<2x64x64xf32>
    %cst_69 = arith.constant dense<0.000000e+00> : vector<2x64xf32>
    %233 = vector.multi_reduction <add>, %232, %cst_69 [1] : vector<2x64x64xf32> to vector<2x64xf32>
    %234 = vector.shape_cast %233 : vector<2x64xf32> to vector<2x1x64xf32>
    %cst_70 = arith.constant 9.99999993E-9 : f32
    %235 = vector.broadcast %cst_70 : f32 to vector<2x1x64xf32>
    %236 = arith.addf %234, %235 : vector<2x1x64xf32>
    %237 = tpu.reciprocal %236 {approx = true} : vector<2x1x64xf32> -> vector<2x1x64xf32>
    %238 = vector.broadcast %237 : vector<2x1x64xf32> to vector<2x64x64xf32>
    %239 = arith.mulf %232, %238 : vector<2x64x64xf32>
    %c10_i32 = arith.constant 10 : i32
    %cst_71 = arith.constant dense<0.000000e+00> : vector<2x64xf32>
    %240 = vector.multi_reduction <add>, %239, %cst_71 [2] : vector<2x64x64xf32> to vector<2x64xf32>
    %241 = vector.shape_cast %240 : vector<2x64xf32> to vector<2x64x1xf32>
    %cst_72 = arith.constant 9.99999993E-9 : f32
    %242 = vector.broadcast %cst_72 : f32 to vector<2x64x1xf32>
    %243 = arith.addf %241, %242 : vector<2x64x1xf32>
    %244 = tpu.reciprocal %243 {approx = true} : vector<2x64x1xf32> -> vector<2x64x1xf32>
    %245 = vector.broadcast %244 : vector<2x64x1xf32> to vector<2x64x64xf32>
    %246 = arith.mulf %239, %245 : vector<2x64x64xf32>
    %cst_73 = arith.constant dense<0.000000e+00> : vector<2x64xf32>
    %247 = vector.multi_reduction <add>, %246, %cst_73 [1] : vector<2x64x64xf32> to vector<2x64xf32>
    %248 = vector.shape_cast %247 : vector<2x64xf32> to vector<2x1x64xf32>
    %cst_74 = arith.constant 9.99999993E-9 : f32
    %249 = vector.broadcast %cst_74 : f32 to vector<2x1x64xf32>
    %250 = arith.addf %248, %249 : vector<2x1x64xf32>
    %251 = tpu.reciprocal %250 {approx = true} : vector<2x1x64xf32> -> vector<2x1x64xf32>
    %252 = vector.broadcast %251 : vector<2x1x64xf32> to vector<2x64x64xf32>
    %253 = arith.mulf %246, %252 : vector<2x64x64xf32>
    %c11_i32 = arith.constant 11 : i32
    %cst_75 = arith.constant dense<0.000000e+00> : vector<2x64xf32>
    %254 = vector.multi_reduction <add>, %253, %cst_75 [2] : vector<2x64x64xf32> to vector<2x64xf32>
    %255 = vector.shape_cast %254 : vector<2x64xf32> to vector<2x64x1xf32>
    %cst_76 = arith.constant 9.99999993E-9 : f32
    %256 = vector.broadcast %cst_76 : f32 to vector<2x64x1xf32>
    %257 = arith.addf %255, %256 : vector<2x64x1xf32>
    %258 = tpu.reciprocal %257 {approx = true} : vector<2x64x1xf32> -> vector<2x64x1xf32>
    %259 = vector.broadcast %258 : vector<2x64x1xf32> to vector<2x64x64xf32>
    %260 = arith.mulf %253, %259 : vector<2x64x64xf32>
    %cst_77 = arith.constant dense<0.000000e+00> : vector<2x64xf32>
    %261 = vector.multi_reduction <add>, %260, %cst_77 [1] : vector<2x64x64xf32> to vector<2x64xf32>
    %262 = vector.shape_cast %261 : vector<2x64xf32> to vector<2x1x64xf32>
    %cst_78 = arith.constant 9.99999993E-9 : f32
    %263 = vector.broadcast %cst_78 : f32 to vector<2x1x64xf32>
    %264 = arith.addf %262, %263 : vector<2x1x64xf32>
    %265 = tpu.reciprocal %264 {approx = true} : vector<2x1x64xf32> -> vector<2x1x64xf32>
    %266 = vector.broadcast %265 : vector<2x1x64xf32> to vector<2x64x64xf32>
    %267 = arith.mulf %260, %266 : vector<2x64x64xf32>
    %c12_i32 = arith.constant 12 : i32
    %cst_79 = arith.constant dense<0.000000e+00> : vector<2x64xf32>
    %268 = vector.multi_reduction <add>, %267, %cst_79 [2] : vector<2x64x64xf32> to vector<2x64xf32>
    %269 = vector.shape_cast %268 : vector<2x64xf32> to vector<2x64x1xf32>
    %cst_80 = arith.constant 9.99999993E-9 : f32
    %270 = vector.broadcast %cst_80 : f32 to vector<2x64x1xf32>
    %271 = arith.addf %269, %270 : vector<2x64x1xf32>
    %272 = tpu.reciprocal %271 {approx = true} : vector<2x64x1xf32> -> vector<2x64x1xf32>
    %273 = vector.broadcast %272 : vector<2x64x1xf32> to vector<2x64x64xf32>
    %274 = arith.mulf %267, %273 : vector<2x64x64xf32>
    %cst_81 = arith.constant dense<0.000000e+00> : vector<2x64xf32>
    %275 = vector.multi_reduction <add>, %274, %cst_81 [1] : vector<2x64x64xf32> to vector<2x64xf32>
    %276 = vector.shape_cast %275 : vector<2x64xf32> to vector<2x1x64xf32>
    %cst_82 = arith.constant 9.99999993E-9 : f32
    %277 = vector.broadcast %cst_82 : f32 to vector<2x1x64xf32>
    %278 = arith.addf %276, %277 : vector<2x1x64xf32>
    %279 = tpu.reciprocal %278 {approx = true} : vector<2x1x64xf32> -> vector<2x1x64xf32>
    %280 = vector.broadcast %279 : vector<2x1x64xf32> to vector<2x64x64xf32>
    %281 = arith.mulf %274, %280 : vector<2x64x64xf32>
    %c13_i32 = arith.constant 13 : i32
    %cst_83 = arith.constant dense<0.000000e+00> : vector<2x64xf32>
    %282 = vector.multi_reduction <add>, %281, %cst_83 [2] : vector<2x64x64xf32> to vector<2x64xf32>
    %283 = vector.shape_cast %282 : vector<2x64xf32> to vector<2x64x1xf32>
    %cst_84 = arith.constant 9.99999993E-9 : f32
    %284 = vector.broadcast %cst_84 : f32 to vector<2x64x1xf32>
    %285 = arith.addf %283, %284 : vector<2x64x1xf32>
    %286 = tpu.reciprocal %285 {approx = true} : vector<2x64x1xf32> -> vector<2x64x1xf32>
    %287 = vector.broadcast %286 : vector<2x64x1xf32> to vector<2x64x64xf32>
    %288 = arith.mulf %281, %287 : vector<2x64x64xf32>
    %cst_85 = arith.constant dense<0.000000e+00> : vector<2x64xf32>
    %289 = vector.multi_reduction <add>, %288, %cst_85 [1] : vector<2x64x64xf32> to vector<2x64xf32>
    %290 = vector.shape_cast %289 : vector<2x64xf32> to vector<2x1x64xf32>
    %cst_86 = arith.constant 9.99999993E-9 : f32
    %291 = vector.broadcast %cst_86 : f32 to vector<2x1x64xf32>
    %292 = arith.addf %290, %291 : vector<2x1x64xf32>
    %293 = tpu.reciprocal %292 {approx = true} : vector<2x1x64xf32> -> vector<2x1x64xf32>
    %294 = vector.broadcast %293 : vector<2x1x64xf32> to vector<2x64x64xf32>
    %295 = arith.mulf %288, %294 : vector<2x64x64xf32>
    %c14_i32 = arith.constant 14 : i32
    %cst_87 = arith.constant dense<0.000000e+00> : vector<2x64xf32>
    %296 = vector.multi_reduction <add>, %295, %cst_87 [2] : vector<2x64x64xf32> to vector<2x64xf32>
    %297 = vector.shape_cast %296 : vector<2x64xf32> to vector<2x64x1xf32>
    %cst_88 = arith.constant 9.99999993E-9 : f32
    %298 = vector.broadcast %cst_88 : f32 to vector<2x64x1xf32>
    %299 = arith.addf %297, %298 : vector<2x64x1xf32>
    %300 = tpu.reciprocal %299 {approx = true} : vector<2x64x1xf32> -> vector<2x64x1xf32>
    %301 = vector.broadcast %300 : vector<2x64x1xf32> to vector<2x64x64xf32>
    %302 = arith.mulf %295, %301 : vector<2x64x64xf32>
    %cst_89 = arith.constant dense<0.000000e+00> : vector<2x64xf32>
    %303 = vector.multi_reduction <add>, %302, %cst_89 [1] : vector<2x64x64xf32> to vector<2x64xf32>
    %304 = vector.shape_cast %303 : vector<2x64xf32> to vector<2x1x64xf32>
    %cst_90 = arith.constant 9.99999993E-9 : f32
    %305 = vector.broadcast %cst_90 : f32 to vector<2x1x64xf32>
    %306 = arith.addf %304, %305 : vector<2x1x64xf32>
    %307 = tpu.reciprocal %306 {approx = true} : vector<2x1x64xf32> -> vector<2x1x64xf32>
    %308 = vector.broadcast %307 : vector<2x1x64xf32> to vector<2x64x64xf32>
    %309 = arith.mulf %302, %308 : vector<2x64x64xf32>
    %c15_i32 = arith.constant 15 : i32
    %cst_91 = arith.constant dense<0.000000e+00> : vector<2x64xf32>
    %310 = vector.multi_reduction <add>, %309, %cst_91 [2] : vector<2x64x64xf32> to vector<2x64xf32>
    %311 = vector.shape_cast %310 : vector<2x64xf32> to vector<2x64x1xf32>
    %cst_92 = arith.constant 9.99999993E-9 : f32
    %312 = vector.broadcast %cst_92 : f32 to vector<2x64x1xf32>
    %313 = arith.addf %311, %312 : vector<2x64x1xf32>
    %314 = tpu.reciprocal %313 {approx = true} : vector<2x64x1xf32> -> vector<2x64x1xf32>
    %315 = vector.broadcast %314 : vector<2x64x1xf32> to vector<2x64x64xf32>
    %316 = arith.mulf %309, %315 : vector<2x64x64xf32>
    %cst_93 = arith.constant dense<0.000000e+00> : vector<2x64xf32>
    %317 = vector.multi_reduction <add>, %316, %cst_93 [1] : vector<2x64x64xf32> to vector<2x64xf32>
    %318 = vector.shape_cast %317 : vector<2x64xf32> to vector<2x1x64xf32>
    %cst_94 = arith.constant 9.99999993E-9 : f32
    %319 = vector.broadcast %cst_94 : f32 to vector<2x1x64xf32>
    %320 = arith.addf %318, %319 : vector<2x1x64xf32>
    %321 = tpu.reciprocal %320 {approx = true} : vector<2x1x64xf32> -> vector<2x1x64xf32>
    %322 = vector.broadcast %321 : vector<2x1x64xf32> to vector<2x64x64xf32>
    %323 = arith.mulf %316, %322 : vector<2x64x64xf32>
    %c16_i32 = arith.constant 16 : i32
    %cst_95 = arith.constant dense<0.000000e+00> : vector<2x64xf32>
    %324 = vector.multi_reduction <add>, %323, %cst_95 [2] : vector<2x64x64xf32> to vector<2x64xf32>
    %325 = vector.shape_cast %324 : vector<2x64xf32> to vector<2x64x1xf32>
    %cst_96 = arith.constant 9.99999993E-9 : f32
    %326 = vector.broadcast %cst_96 : f32 to vector<2x64x1xf32>
    %327 = arith.addf %325, %326 : vector<2x64x1xf32>
    %328 = tpu.reciprocal %327 {approx = true} : vector<2x64x1xf32> -> vector<2x64x1xf32>
    %329 = vector.broadcast %328 : vector<2x64x1xf32> to vector<2x64x64xf32>
    %330 = arith.mulf %323, %329 : vector<2x64x64xf32>
    %cst_97 = arith.constant dense<0.000000e+00> : vector<2x64xf32>
    %331 = vector.multi_reduction <add>, %330, %cst_97 [1] : vector<2x64x64xf32> to vector<2x64xf32>
    %332 = vector.shape_cast %331 : vector<2x64xf32> to vector<2x1x64xf32>
    %cst_98 = arith.constant 9.99999993E-9 : f32
    %333 = vector.broadcast %cst_98 : f32 to vector<2x1x64xf32>
    %334 = arith.addf %332, %333 : vector<2x1x64xf32>
    %335 = tpu.reciprocal %334 {approx = true} : vector<2x1x64xf32> -> vector<2x1x64xf32>
    %336 = vector.broadcast %335 : vector<2x1x64xf32> to vector<2x64x64xf32>
    %337 = arith.mulf %330, %336 : vector<2x64x64xf32>
    %c17_i32 = arith.constant 17 : i32
    %cst_99 = arith.constant dense<0.000000e+00> : vector<2x64xf32>
    %338 = vector.multi_reduction <add>, %337, %cst_99 [2] : vector<2x64x64xf32> to vector<2x64xf32>
    %339 = vector.shape_cast %338 : vector<2x64xf32> to vector<2x64x1xf32>
    %cst_100 = arith.constant 9.99999993E-9 : f32
    %340 = vector.broadcast %cst_100 : f32 to vector<2x64x1xf32>
    %341 = arith.addf %339, %340 : vector<2x64x1xf32>
    %342 = tpu.reciprocal %341 {approx = true} : vector<2x64x1xf32> -> vector<2x64x1xf32>
    %343 = vector.broadcast %342 : vector<2x64x1xf32> to vector<2x64x64xf32>
    %344 = arith.mulf %337, %343 : vector<2x64x64xf32>
    %cst_101 = arith.constant dense<0.000000e+00> : vector<2x64xf32>
    %345 = vector.multi_reduction <add>, %344, %cst_101 [1] : vector<2x64x64xf32> to vector<2x64xf32>
    %346 = vector.shape_cast %345 : vector<2x64xf32> to vector<2x1x64xf32>
    %cst_102 = arith.constant 9.99999993E-9 : f32
    %347 = vector.broadcast %cst_102 : f32 to vector<2x1x64xf32>
    %348 = arith.addf %346, %347 : vector<2x1x64xf32>
    %349 = tpu.reciprocal %348 {approx = true} : vector<2x1x64xf32> -> vector<2x1x64xf32>
    %350 = vector.broadcast %349 : vector<2x1x64xf32> to vector<2x64x64xf32>
    %351 = arith.mulf %344, %350 : vector<2x64x64xf32>
    %c18_i32 = arith.constant 18 : i32
    %cst_103 = arith.constant dense<0.000000e+00> : vector<2x64xf32>
    %352 = vector.multi_reduction <add>, %351, %cst_103 [2] : vector<2x64x64xf32> to vector<2x64xf32>
    %353 = vector.shape_cast %352 : vector<2x64xf32> to vector<2x64x1xf32>
    %cst_104 = arith.constant 9.99999993E-9 : f32
    %354 = vector.broadcast %cst_104 : f32 to vector<2x64x1xf32>
    %355 = arith.addf %353, %354 : vector<2x64x1xf32>
    %356 = tpu.reciprocal %355 {approx = true} : vector<2x64x1xf32> -> vector<2x64x1xf32>
    %357 = vector.broadcast %356 : vector<2x64x1xf32> to vector<2x64x64xf32>
    %358 = arith.mulf %351, %357 : vector<2x64x64xf32>
    %cst_105 = arith.constant dense<0.000000e+00> : vector<2x64xf32>
    %359 = vector.multi_reduction <add>, %358, %cst_105 [1] : vector<2x64x64xf32> to vector<2x64xf32>
    %360 = vector.shape_cast %359 : vector<2x64xf32> to vector<2x1x64xf32>
    %cst_106 = arith.constant 9.99999993E-9 : f32
    %361 = vector.broadcast %cst_106 : f32 to vector<2x1x64xf32>
    %362 = arith.addf %360, %361 : vector<2x1x64xf32>
    %363 = tpu.reciprocal %362 {approx = true} : vector<2x1x64xf32> -> vector<2x1x64xf32>
    %364 = vector.broadcast %363 : vector<2x1x64xf32> to vector<2x64x64xf32>
    %365 = arith.mulf %358, %364 : vector<2x64x64xf32>
    %c19_i32 = arith.constant 19 : i32
    %cst_107 = arith.constant dense<0.000000e+00> : vector<2x64xf32>
    %366 = vector.multi_reduction <add>, %365, %cst_107 [2] : vector<2x64x64xf32> to vector<2x64xf32>
    %367 = vector.shape_cast %366 : vector<2x64xf32> to vector<2x64x1xf32>
    %cst_108 = arith.constant 9.99999993E-9 : f32
    %368 = vector.broadcast %cst_108 : f32 to vector<2x64x1xf32>
    %369 = arith.addf %367, %368 : vector<2x64x1xf32>
    %370 = tpu.reciprocal %369 {approx = true} : vector<2x64x1xf32> -> vector<2x64x1xf32>
    %371 = vector.broadcast %370 : vector<2x64x1xf32> to vector<2x64x64xf32>
    %372 = arith.mulf %365, %371 : vector<2x64x64xf32>
    %cst_109 = arith.constant dense<0.000000e+00> : vector<2x64xf32>
    %373 = vector.multi_reduction <add>, %372, %cst_109 [1] : vector<2x64x64xf32> to vector<2x64xf32>
    %374 = vector.shape_cast %373 : vector<2x64xf32> to vector<2x1x64xf32>
    %cst_110 = arith.constant 9.99999993E-9 : f32
    %375 = vector.broadcast %cst_110 : f32 to vector<2x1x64xf32>
    %376 = arith.addf %374, %375 : vector<2x1x64xf32>
    %377 = tpu.reciprocal %376 {approx = true} : vector<2x1x64xf32> -> vector<2x1x64xf32>
    %378 = vector.broadcast %377 : vector<2x1x64xf32> to vector<2x64x64xf32>
    %379 = arith.mulf %372, %378 : vector<2x64x64xf32>
    %380 = arith.mulf %379, %22 : vector<2x64x64xf32>
    %cst_111 = arith.constant dense<0.000000e+00> : vector<2x64xf32>
    %381 = vector.multi_reduction <add>, %380, %cst_111 [2] : vector<2x64x64xf32> to vector<2x64xf32>
    %382 = vector.shape_cast %381 : vector<2x64xf32> to vector<2x64x1xf32>
    %cst_112 = arith.constant dense<0.000000e+00> : vector<2x1xf32>
    %383 = vector.multi_reduction <add>, %382, %cst_112 [1] : vector<2x64x1xf32> to vector<2x1xf32>
    %384 = vector.shape_cast %383 : vector<2x1xf32> to vector<2x1x1xf32>
    %c0_113 = arith.constant 0 : index
    %c0_114 = arith.constant 0 : index
    %c0_115 = arith.constant 0 : index
    %385 = vector.load %arg3[%c0_113, %c0_114, %c0_115] : memref<2x1x1xf32, #tpu.memory_space<vmem>>, vector<2x1x1xf32>
    tpu.vector_store %arg3[%c0_113, %c0_114, %c0_115], %384 {strides = array<i32>} : memref<2x1x1xf32, #tpu.memory_space<vmem>>, vector<2x1x1xf32>,
    return
  }
  func.func @transform_0(%arg0: i32) -> (i32, i32, i32) {
    %c0_i32 = arith.constant 0 : i32
    %c0_i32_0 = arith.constant 0 : i32
    %c0_i32_1 = arith.constant 0 : i32
    return %arg0, %c0_i32, %c0_i32_0 : i32, i32, i32
  }
  func.func @transform_1(%arg0: i32) -> (i32, i32, i32) {
    %c0_i32 = arith.constant 0 : i32
    %c0_i32_0 = arith.constant 0 : i32
    %c0_i32_1 = arith.constant 0 : i32
    return %arg0, %c0_i32, %c0_i32_0 : i32, i32, i32
  }
  func.func @transform_2(%arg0: i32) -> (i32, i32, i32) {
    %c0_i32 = arith.constant 0 : i32
    %c0_i32_0 = arith.constant 0 : i32
    %c0_i32_1 = arith.constant 0 : i32
    return %arg0, %c0_i32, %c0_i32_0 : i32, i32, i32
  }
}

</mosaic_0001>

<bundles_post_ra>
// kernel: tpu_custom_call.1
= control target key start
LH: loop header
LB: loop body
LE: loop exit
PB: predicated region body
PF: predicated region fallthrough
CT: control target
= control target key end

     0   :  { %v5999_v0 = vmov 2   ;;  %v6000_v1 = vmov 1   ;;  %v10775_v4 = vmov 0   ;;  %vm563_vm1 = vcmask 523264   ;;  %s10772_s0 = inlined_call_operand.vmem [shape: f32[2,64,3], index: 0, kind: input, shape index: {}]   ;;  %s10773_s1 = inlined_call_operand.vmem [shape: f32[2,3,64], index: 1, kind: input, shape index: {}]   ;;  %s10774_s2 = inlined_call_operand.vmem [shape: f32[2,1,1], index: 2, kind: output, shape index: {}]  }
   0x1   :  { %5084 = vset.pattern.permute.xlu0 %v5999_v0  ;;  %5077 = vset.pattern.permute.xlu2 %v6000_v1  ;;  %v19_v2 = vld [vmem:[%s10772_s0 + $0x40] sm:$0xff]  ;;  %v22_v5 = vld [vmem:[%s10772_s0 + $0x58] sm:$0xff]  ;;  %v20_v6 = vld [vmem:[%s10772_s0 + $0x48] sm:$0xff] }
   0x2   :  { %v11_v3 = vld [vmem:[%s10772_s0] sm:$0xff]  ;;  %5076 = vset.pattern.permute.xlu1 %v10775_v4  ;;  %290 = vperm.xlu0 %5084, %v19_v2   ;;  %v12_v7 = vld [vmem:[%s10772_s0 + $0x8] sm:$0xff]  ;;  %v13_v9 = vld [vmem:[%s10772_s0 + $0x10] sm:$0xff] }
   0x3   :  { %71 = vperm.xlu1 %5076, %v19_v2   ;;  %144 = vperm.xlu2 %5077, %v11_v3   ;;  %v15_v8 = vld [vmem:[%s10772_s0 + $0x20] sm:$0xff]  ;;  %v21_v10 = vld [vmem:[%s10772_s0 + $0x50] sm:$0xff]  ;;  %v14_v12 = vld [vmem:[%s10772_s0 + $0x18] sm:$0xff] }
   0x4   :  { %v6054_v11 = vld [vmem:[%s10772_s0 + $0x70] sm:$0xff]  ;;  %v6064_v13 = vld [vmem:[%s10772_s0 + $0x38] sm:$0xff]  ;;  %v23_v14 = vld [vmem:[%s10772_s0 + $0x60] sm:$0xff] }
   0x5   :  { %v16_v15 = vld [vmem:[%s10772_s0 + $0x28] sm:$0xff]  ;;  %v6088_v17 = vld [vmem:[%s10772_s0 + $0x78] sm:$0xff]  ;;  %v17_v20 = vld [vmem:[%s10772_s0 + $0x30] sm:$0xff] }
   0x6   :  { %v24_v16 = vld [vmem:[%s10772_s0 + $0x68] sm:$0xff]  ;;  %v27_v31 = vld [vmem:[%s10773_s1] sm:$0x7]  ;;  %v28_v49 = vld [vmem:[%s10773_s1 + $0x4] sm:$0x7] }
   0x7   :  { %v6127_v34 = vperm.slane %v27_v31, 1  ;;  %v6130_v35 = vperm.slane %v27_v31, 0  ;;  %v6136_v39 = vperm.slane %v27_v31, 2  ;;  %v6146_v52 = vperm.slane %v28_v49, 1 }
   0x8   :  { %v6155_v60 = vperm.slane %v28_v49, 0  ;;  %v6159_v62 = vperm.slane %v28_v49, 2 }
   0xa   :  { %302 = vperm.xlu0 %5084, %v22_v5  }
   0xb   :  { %76 = vperm.xlu1 %5076, %v20_v6   ;;  %148 = vperm.xlu2 %5077, %v12_v7  }
  0x12   :  { %274 = vperm.xlu0 %5084, %v15_v8  }
  0x13   :  { %5078 = vset.pattern.permute.xlu1 %v6000_v1  ;;  %5079 = vset.pattern.permute.xlu2 %v10775_v4 }
  0x14   :  { %180 = vperm.xlu1 %5078, %v20_v6   ;;  %41 = vperm.xlu2 %5079, %v13_v9  }
  0x1a   :  { %5098 = vset.pattern.permute.xlu0 %v10775_v4 }
  0x1b   :  { %31 = vperm.xlu0 %5098, %v11_v3  }
  0x1c   :  { %5080 = vset.pattern.permute.xlu1 %v10775_v4  ;;  %5081 = vset.pattern.permute.xlu2 %v6000_v1 }
  0x1d   :  { %81 = vperm.xlu1 %5080, %v21_v10   ;;  %152 = vperm.xlu2 %5081, %v13_v9  }
  0x23   :  { %36 = vperm.xlu0 %5098, %v12_v7  }
  0x25   :  { %5082 = vset.pattern.permute.xlu1 %v5999_v0  ;;  %5083 = vset.pattern.permute.xlu2 %v5999_v0 }
  0x26   :  { %258 = vperm.xlu1 %5082, %v11_v3   ;;  %262 = vperm.xlu2 %5083, %v12_v7  }
  0x2b   :  { %101 = vperm.xlu0 %5098, %v6054_v11  }
  0x2e   :  { %294 = vperm.xlu1 %5082, %v20_v6   ;;  %5085 = vset.pattern.permute.xlu2 %v10775_v4 }
  0x2f   :  { %46 = vperm.xlu2 %5085, %v14_v12  }
  0x33   :  { %66 = vperm.xlu0 %5098, %v6064_v13  }
  0x36   :  { %5086 = vset.pattern.permute.xlu1 %v10775_v4 }
  0x37   :  { %86 = vperm.xlu1 %5086, %v22_v5   ;;  %5087 = vset.pattern.permute.xlu2 %v6000_v1 }
  0x38   :  { %156 = vperm.xlu2 %5087, %v14_v12  }
  0x3b   :  { %5105 = vset.pattern.permute.xlu0 %v6000_v1 }
  0x3c   :  { %176 = vperm.xlu0 %5105, %v19_v2  }
  0x3f   :  { %5088 = vset.pattern.permute.xlu1 %v5999_v0 }
  0x40   :  { %266 = vperm.xlu1 %5088, %v13_v9   ;;  %5089 = vset.pattern.permute.xlu2 %v5999_v0 }
  0x41   :  { %298 = vperm.xlu2 %5089, %v21_v10  }
  0x44   :  { %184 = vperm.xlu0 %5105, %v21_v10  }
  0x48   :  { %5090 = vset.pattern.permute.xlu1 %v10775_v4 }
  0x49   :  { %51 = vperm.xlu1 %5090, %v15_v8   ;;  %5091 = vset.pattern.permute.xlu2 %v10775_v4 }
  0x4a   :  { %91 = vperm.xlu2 %5091, %v23_v14  }
  0x4c   :  { %188 = vperm.xlu0 %5105, %v22_v5  }
  0x51   :  { %5092 = vset.pattern.permute.xlu1 %v6000_v1 }
  0x52   :  { %192 = vperm.xlu1 %5092, %v23_v14   ;;  %5093 = vset.pattern.permute.xlu2 %v5999_v0 }
  0x53   :  { %270 = vperm.xlu2 %5093, %v14_v12  }
  0x54   :  { %160 = vperm.xlu0 %5105, %v15_v8  }
  0x5a   :  { %5094 = vset.pattern.permute.xlu1 %v10775_v4 }
  0x5b   :  { %56 = vperm.xlu1 %5094, %v16_v15   ;;  %5095 = vset.pattern.permute.xlu2 %v10775_v4 }
  0x5c   :  { %96 = vperm.xlu2 %5095, %v24_v16   ;;  %204 = vperm.xlu0 %5105, %v6088_v17  }
  0x5d   :  { %v145_v18 = vpop.permute.xlu2 %144 }
  0x5e   :  { %v209_v40 = vsub.f32 %v145_v18, %v6127_v34 }
  0x60   :  { %v225_v48 = vmul.f32 %v209_v40, %v209_v40 }
  0x63   :  { %5096 = vset.pattern.permute.xlu1 %v6000_v1 }
  0x64   :  { %164 = vperm.xlu1 %5096, %v16_v15   ;;  %5097 = vset.pattern.permute.xlu2 %v6000_v1 }
  0x65   :  { %196 = vperm.xlu2 %5097, %v24_v16   ;;  %v149_v19 = vpop.permute.xlu2 %148  ;;  %5110 = vset.pattern.permute.xlu0 %v5999_v0 }
  0x66   :  { %v210_v38 = vsub.f32 %v149_v19, %v6127_v34 }
  0x68   :  { %v226_v45 = vmul.f32 %v210_v38, %v210_v38 }
  0x6c   :  { %5099 = vset.pattern.permute.xlu1 %v5999_v0 }
  0x6d   :  { %306 = vperm.xlu1 %5099, %v23_v14   ;;  %5100 = vset.pattern.permute.xlu2 %v10775_v4 }
  0x6e   :  { %61 = vperm.xlu2 %5100, %v17_v20   ;;  %v6101_v21 = vpop.permute.xlu2 %41 }
  0x6f   :  { %v113_v19 = vsub.f32 %v6101_v21, %v6130_v35 }
  0x74   :  { %v6103_v22 = vpop.permute.xlu0 %290 }
  0x75   :  { %v6105_v23 = vpop.permute.xlu1 %71  ;;  %5101 = vset.pattern.permute.xlu1 %v6000_v1  ;;  %v331_v21 = vsub.f32 %v6103_v22, %v6159_v62 }
  0x76   :  { %168 = vperm.xlu1 %5101, %v17_v20   ;;  %5102 = vset.pattern.permute.xlu2 %v6000_v1 }
  0x77   :  { %200 = vperm.xlu2 %5102, %v6054_v11   ;;  %v6110_v24 = vpop.permute.xlu2 %152  ;;  %v347_v22 = vmul.f32 %v331_v21, %v331_v21 }
  0x7c   :  { %v6112_v25 = vpop.permute.xlu0 %302 }
  0x7d   :  { %v77_v26 = vpop.permute.xlu1 %76 }
  0x7e   :  { %5103 = vset.pattern.permute.xlu1 %v5999_v0  ;;  %v120_v63 = vsub.f32 %v77_v26, %v6155_v60  ;;  %v119_v26 = vsub.f32 %v6105_v23, %v6155_v60 }
  0x7f   :  { %278 = vperm.xlu1 %5103, %v16_v15   ;;  %5104 = vset.pattern.permute.xlu2 %v5999_v0 }
  0x80   :  { %310 = vperm.xlu2 %5104, %v24_v16   ;;  %v263_v27 = vpop.permute.xlu2 %262  ;;  %v136_v5 = vmul.f32 %v120_v63, %v120_v63 }
  0x81   :  { %v324_v42 = vsub.f32 %v263_v27, %v6136_v39  ;;  %v211_v27 = vsub.f32 %v6110_v24, %v6127_v34 }
  0x83   :  { %v340_v51 = vmul.f32 %v324_v42, %v324_v42  ;;  %v135_v42 = vmul.f32 %v119_v26, %v119_v26  ;;  %v227_v23 = vmul.f32 %v211_v27, %v211_v27 }
  0x84   :  { %v6116_v28 = vpop.permute.xlu0 %274 }
  0x86   :  { %v181_v29 = vpop.permute.xlu1 %180 }
  0x87   :  { %5106 = vset.pattern.permute.xlu1 %v10775_v4  ;;  %v218_v61 = vsub.f32 %v181_v29, %v6146_v52 }
  0x88   :  { %106 = vperm.xlu1 %5106, %v6088_v17   ;;  %5107 = vset.pattern.permute.xlu2 %v6000_v1 }
  0x89   :  { %172 = vperm.xlu2 %5107, %v6064_v13   ;;  %v47_v30 = vpop.permute.xlu2 %46  ;;  %v234_v2 = vmul.f32 %v218_v61, %v218_v61 }
  0x8d   :  { %v32_v32 = vpop.permute.xlu0 %31 }
  0x8e   :  { %v111_v37 = vsub.f32 %v32_v32, %v6130_v35 }
  0x8f   :  { %v6125_v33 = vpop.permute.xlu1 %81 }
  0x90   :  { %5108 = vset.pattern.permute.xlu1 %v5999_v0  ;;  %v127_v44 = vmul.f32 %v111_v37, %v111_v37  ;;  %v129_v37 = vmul.f32 %v113_v19, %v113_v19 }
  0x91   :  { %282 = vperm.xlu1 %5108, %v17_v20   ;;  %5109 = vset.pattern.permute.xlu2 %v5999_v0 }
  0x92   :  { %314 = vperm.xlu2 %5109, %v6054_v11   ;;  %v157_v36 = vpop.permute.xlu2 %156  ;;  %v241_v54 = vadd.f32 %v225_v48, %v127_v44  ;;  %v250_v11 = vadd.f32 %v234_v2, %v136_v5  ;;  %v243_v63 = vadd.f32 %v227_v23, %v129_v37  ;;  %v121_v2 = vsub.f32 %v6125_v33, %v6155_v60 }
  0x93   :  { %v212_v14 = vsub.f32 %v157_v36, %v6127_v34 }
  0x95   :  { %v37_v41 = vpop.permute.xlu0 %36 }
  0x96   :  { %v112_v43 = vsub.f32 %v37_v41, %v6130_v35 }
  0x98   :  { %v128_v46 = vmul.f32 %v112_v43, %v112_v43  ;;  %v259_v47 = vpop.permute.xlu1 %258 }
  0x99   :  { %v323_v50 = vsub.f32 %v259_v47, %v6136_v39  ;;  %286 = vperm.xlu1 %5108, %v6064_v13   ;;  %v114_v13 = vsub.f32 %v47_v30, %v6130_v35  ;;  %v228_v30 = vmul.f32 %v212_v14, %v212_v14 }
  0x9a   :  { %v242_v53 = vadd.f32 %v226_v45, %v128_v46  ;;  %318 = vperm.xlu2 %5109, %v6088_v17  }
  0x9b   :  { %v339_v55 = vmul.f32 %v323_v50, %v323_v50  ;;  %v6149_v56 = vpop.permute.xlu2 %298  ;;  %v130_v29 = vmul.f32 %v114_v13, %v114_v13  ;;  %v137_v13 = vmul.f32 %v121_v2, %v121_v2 }
  0x9c   :  { %v6151_v57 = vadd.f32 %v340_v51, %v242_v53 }
  0x9d   :  { %v355_v58 = vadd.f32 %v339_v55, %v241_v54  ;;  %v6153_v59 = vpop.permute.xlu0 %101  ;;  %v244_v24 = vadd.f32 %v228_v30, %v130_v29 }
  0x9e   :  { %5111 = vrsqrt.f32 %v6151_v57  ;;  %vm390_vm3 = vcmp.eq.f32.partialorder %v6151_v57, inf  ;;  %v393_v29 = vand.u32 2147483648, %v6151_v57  ;;  %vm392_vm4 = vcmp.eq.f32.partialorder %v6151_v57, 0.0 }
  0x9f   :  { %5113 = vrsqrt.f32 %v355_v58  ;;  %vm378_vm0 = vcmp.eq.f32.partialorder %v355_v58, inf  ;;  %v381_v48 = vand.u32 2147483648, %v355_v58  ;;  %vm380_vm2 = vcmp.eq.f32.partialorder %v355_v58, 0.0 }
  0xa0   :  { %v295_v0 = vpop.permute.xlu1 %294 }
  0xa1   :  { %v332_v1 = vsub.f32 %v295_v0, %v6159_v62 }
  0xa3   :  { %v348_v6 = vmul.f32 %v332_v1, %v332_v1 }
  0xa4   :  { %v5112_v3 = vpop.eup %5111  ;;  %v6163_v7 = vpop.permute.xlu2 %91 }
  0xa5   :  { %v5114_v8 = vpop.eup %5113  ;;  %v6165_v9 = vpop.permute.xlu0 %66  ;;  %v384_v10 = vmul.f32 %v5112_v3, %v6151_v57  ;;  %v6170_v15 = vadd.f32 %v348_v6, %v250_v11  ;;  %v333_v11 = vsub.f32 %v6149_v56, %v6159_v62 }
  0xa6   :  { %v372_v12 = vmul.f32 %v5114_v8, %v355_v58 }
  0xa7   :  { %v385_v17 = vmul.f32 %v5112_v3, %v384_v10  ;;  %5115 = vrsqrt.f32 %v6170_v15  ;;  %v349_v19 = vmul.f32 %v333_v11, %v333_v11  ;;  %vm486_vm11 = vcmp.eq.f32.partialorder %v6170_v15, inf }
  0xa8   :  { %v373_v16 = vmul.f32 %v5114_v8, %v372_v12  ;;  %vm488_vm12 = vcmp.eq.f32.partialorder %v6170_v15, 0.0 }
  0xa9   :  { %v6172_v18 = vpop.permute.xlu1 %86  ;;  %v386_v32 = vmul.f32 0.5, %v385_v17 }
  0xaa   :  { %v374_v20 = vmul.f32 0.5, %v373_v16 }
  0xab   :  { %v387_v46 = vsub.f32 1.5, %v386_v32 }
  0xac   :  { %v375_v31 = vsub.f32 1.5, %v374_v20 }
  0xad   :  { %v271_v36 = vpop.permute.xlu2 %270  ;;  %v6185_v49 = vpop.eup %5115  ;;  %v388_v1 = vmul.f32 %v5112_v3, %v387_v46 }
  0xae   :  { %v326_v38 = vsub.f32 %v271_v36, %v6136_v39  ;;  %v177_v40 = vpop.permute.xlu0 %176  ;;  %v376_v41 = vmul.f32 %v5114_v8, %v375_v31  ;;  %v480_v6 = vmul.f32 %v6185_v49, %v6170_v15  ;;  %v122_v31 = vsub.f32 %v6172_v18, %v6155_v60 }
  0xaf   :  { %v217_v43 = vsub.f32 %v177_v40, %v6146_v52  ;;  %v389_v33 = vmul.f32 %v388_v1, %v6151_v57 }
  0xb0   :  { %v342_v44 = vmul.f32 %v326_v38, %v326_v38  ;;  %v377_v45 = vmul.f32 %v376_v41, %v355_v58  ;;  %v481_v16 = vmul.f32 %v6185_v49, %v480_v6  ;;  %v334_v38 = vsub.f32 %v6112_v25, %v6159_v62 }
  0xb1   :  { %v233_v47 = vmul.f32 %v217_v43, %v217_v43  ;;  %v391_v27 = vsel %vm390_vm3, %v6151_v57, %v389_v33 }
  0xb2   :  { %v6187_v50 = vadd.f32 %v342_v44, %v244_v24  ;;  %v267_v51 = vpop.permute.xlu1 %266  ;;  %v379_v53 = vsel %vm378_vm0, %v355_v58, %v377_v45  ;;  %v482_v36 = vmul.f32 0.5, %v481_v16  ;;  %v6232_v18 = vsel %vm392_vm4, %v393_v29, %v391_v27 }
  0xb3   :  { %v249_v54 = vadd.f32 %v233_v47, %v135_v42  ;;  %v325_v55 = vsub.f32 %v267_v51, %v6136_v39  ;;  %v6190_v61 = vsel %vm380_vm2, %v381_v48, %v379_v53  ;;  %v327_v42 = vsub.f32 %v6116_v28, %v6136_v39  ;;  %10799 = vst [vmem:[#allocation3_spill] sm:$0xff] %v6232_v18 }
  0xb4   :  { %10798 = vst [vmem:[#allocation2_spill] sm:$0xff] %v6190_v61  ;;  %5117 = vrsqrt.f32 %v6187_v50  ;;  %v6195_v0 = vsel %vm563_vm1, %v6190_v61, inf  ;;  %v138_v44 = vmul.f32 %v122_v31, %v122_v31  ;;  %v483_v57 = vsub.f32 1.5, %v482_v36 }
  0xb5   :  { %v6199_v5 = vadd.f32 %v347_v22, %v249_v54  ;;  %v341_v58 = vmul.f32 %v325_v55, %v325_v55  ;;  %565 = vmin.xlane.f32.xlu0 %v6195_v0  ;;  %v6238_v47 = vsel %vm563_vm1, %v6232_v18, inf  ;;  %v350_v51 = vmul.f32 %v334_v38, %v334_v38 }
  0xb6   :  { %v185_v8 = vpop.permute.xlu0 %184  ;;  %v6204_v10 = vpop.permute.xlu2 %96  ;;  %v343_v53 = vmul.f32 %v327_v42, %v327_v42  ;;  %vm414_vm5 = vcmp.eq.f32.partialorder %v6187_v50, inf  ;;  %vm416_vm6 = vcmp.eq.f32.partialorder %v6187_v50, 0.0  ;;  %v417_v11 = vand.u32 2147483648, %v6187_v50 }
  0xb7   :  { %v6208_v12 = vadd.f32 %v341_v58, %v243_v63  ;;  %v219_v3 = vsub.f32 %v185_v8, %v6146_v52  ;;  %5119 = vrsqrt.f32 %v6199_v5  ;;  %v484_v8 = vmul.f32 %v6185_v49, %v483_v57 }
  0xb8   :  { %vm474_vm7 = vcmp.eq.f32.partialorder %v6199_v5, inf  ;;  %vm476_vm8 = vcmp.eq.f32.partialorder %v6199_v5, 0.0 }
  0xb9   :  { %5121 = vrsqrt.f32 %v6208_v12  ;;  %v235_v14 = vmul.f32 %v219_v3, %v219_v3  ;;  %vm402_vm9 = vcmp.eq.f32.partialorder %v6208_v12, inf  ;;  %vm404_vm10 = vcmp.eq.f32.partialorder %v6208_v12, 0.0 }
  0xba   :  { %v5118_v17 = vpop.eup %5117 }
  0xbb   :  { %v251_v20 = vadd.f32 %v235_v14, %v137_v13  ;;  %v52_v26 = vpop.permute.xlu1 %51  ;;  %v408_v56 = vmul.f32 %v5118_v17, %v6187_v50 }
  0xbc   :  { %v115_v58 = vsub.f32 %v52_v26, %v6130_v35  ;;  %v477_v26 = vand.u32 2147483648, %v6199_v5 }
  0xbd   :  { %v5120_v30 = vpop.eup %5119  ;;  %v6221_v32 = vadd.f32 %v349_v19, %v251_v20  ;;  %v409_v37 = vmul.f32 %v5118_v17, %v408_v56 }
  0xbe   :  { %v189_v40 = vpop.permute.xlu0 %188  ;;  %v468_v41 = vmul.f32 %v5120_v30, %v6199_v5  ;;  %v131_v29 = vmul.f32 %v115_v58, %v115_v58 }
  0xbf   :  { %v5122_v21 = vpop.eup %5121  ;;  %v220_v23 = vsub.f32 %v189_v40, %v6146_v52  ;;  %v6230_v43 = vpop.permute.xlu2 %196  ;;  %5123 = vrsqrt.f32 %v6221_v32  ;;  %v410_v46 = vmul.f32 0.5, %v409_v37  ;;  %vm498_vm13 = vcmp.eq.f32.partialorder %v6221_v32, inf }
  0xc0   :  { %v469_v24 = vmul.f32 %v5120_v30, %v468_v41  ;;  %v396_v25 = vmul.f32 %v5122_v21, %v6208_v12  ;;  %vm500_vm14 = vcmp.eq.f32.partialorder %v6221_v32, 0.0 }
  0xc1   :  { %v236_v45 = vmul.f32 %v220_v23, %v220_v23  ;;  %v411_v54 = vsub.f32 1.5, %v410_v46 }
  0xc2   :  { %v470_v28 = vmul.f32 0.5, %v469_v24  ;;  %v397_v48 = vmul.f32 %v5122_v21, %v396_v25 }
  0xc3   :  { %v252_v22 = vadd.f32 %v236_v45, %v138_v44  ;;  %568 = vmin.xlane.f32.xlu1 %v6238_v47  ;;  %v412_v16 = vmul.f32 %v5118_v17, %v411_v54  ;;  %v485_v17 = vmul.f32 %v484_v8, %v6170_v15  ;;  %v501_v8 = vand.u32 2147483648, %v6221_v32 }
  0xc4   :  { %v6241_v55 = vpop.permute.xlu1 %192  ;;  %v471_v63 = vsub.f32 1.5, %v470_v28  ;;  %v398_v1 = vmul.f32 0.5, %v397_v48 }
  0xc5   :  { %v5124_v2 = vpop.eup %5123  ;;  %v6246_v6 = vadd.f32 %v350_v51, %v252_v22  ;;  %v413_v38 = vmul.f32 %v412_v16, %v6187_v50  ;;  %v487_v28 = vsel %vm486_vm11, %v6170_v15, %v485_v17  ;;  %v489_v22 = vand.u32 2147483648, %v6170_v15 }
  0xc6   :  { %v161_v3 = vpop.permute.xlu0 %160  ;;  %v472_v33 = vmul.f32 %v5120_v30, %v471_v63  ;;  %v399_v13 = vsub.f32 1.5, %v398_v1  ;;  %v492_v14 = vmul.f32 %v5124_v2, %v6221_v32 }
  0xc7   :  { %v213_v19 = vsub.f32 %v161_v3, %v6127_v34  ;;  %5125 = vrsqrt.f32 %v6246_v6  ;;  %v415_v25 = vsel %vm414_vm5, %v6187_v50, %v413_v38  ;;  %v6311_v58 = vsel %vm488_vm12, %v489_v22, %v487_v28 }
  0xc8   :  { %v6255_v20 = vpop.permute.xlu2 %61  ;;  %v473_v49 = vmul.f32 %v472_v33, %v6199_v5  ;;  %v400_v56 = vmul.f32 %v5122_v21, %v399_v13  ;;  %v493_v27 = vmul.f32 %v5124_v2, %v492_v14  ;;  %v405_v21 = vand.u32 2147483648, %v6208_v12  ;;  %10803 = vst [vmem:[#allocation7_spill] sm:$0xff] %v6311_v58 }
  0xc9   :  { %v229_v30 = vmul.f32 %v213_v19, %v213_v19  ;;  %v6288_v46 = vsel %vm416_vm6, %v417_v11, %v415_v25  ;;  %v6321_v33 = vsel %vm563_vm1, %v6311_v58, inf  ;;  %v124_v19 = vsub.f32 %v6204_v10, %v6155_v60 }
  0xca   :  { %v475_v31 = vsel %vm474_vm7, %v6199_v5, %v473_v49  ;;  %v401_v36 = vmul.f32 %v400_v56, %v6208_v12  ;;  %v494_v37 = vmul.f32 0.5, %v493_v27  ;;  %10802 = vst [vmem:[#allocation6_spill] sm:$0xff] %v6288_v46  ;;  %v6302_v50 = vsel %vm563_vm1, %v6288_v46, inf }
  0xcb   :  { %v245_v40 = vadd.f32 %v229_v30, %v131_v29  ;;  %v6266_v41 = vsel %vm476_vm8, %v477_v26, %v475_v31  ;;  %v1429_v1 = vmin.f32 %v6238_v47, %v6302_v50  ;;  %v222_v49 = vsub.f32 %v6230_v43, %v6146_v52 }
  0xcc   :  { %10800 = vst [vmem:[#allocation4_spill] sm:$0xff] %v6266_v41  ;;  %v6272_v42 = vsel %vm563_vm1, %v6266_v41, inf  ;;  %v403_v23 = vsel %vm402_vm9, %v6208_v12, %v401_v36  ;;  %v495_v24 = vsub.f32 1.5, %v494_v37  ;;  %v140_v17 = vmul.f32 %v124_v19, %v124_v19 }
  0xcd   :  { %v5126_v44 = vpop.eup %5125  ;;  %v6278_v45 = vadd.f32 %v343_v53, %v245_v40  ;;  %v6280_v5 = vpop.permute.xlu1 %56  ;;  %589 = vmin.xlane.f32.xlu2 %v6272_v42  ;;  %v6283_v57 = vsel %vm404_vm10, %v405_v21, %v403_v23  ;;  %v238_v31 = vmul.f32 %v222_v49, %v222_v49  ;;  %vm510_vm15 = vcmp.eq.f32.partialorder %v6246_v6, inf }
  0xce   :  { %10801 = vst [vmem:[#allocation5_spill] sm:$0xff] %v6283_v57  ;;  %v6292_v12 = vsel %vm563_vm1, %v6283_v57, inf  ;;  %v496_v48 = vmul.f32 %v5124_v2, %v495_v24  ;;  %v504_v51 = vmul.f32 %v5126_v44, %v6246_v6  ;;  %v513_v10 = vand.u32 2147483648, %v6246_v6 }
  0xcf   :  { %571 = vmin.xlane.f32.xlu0 %v6292_v12  ;;  %v1428_v53 = vmin.f32 %v6195_v0, %v6292_v12  ;;  %5127 = vrsqrt.f32 %v6278_v45  ;;  %v221_v43 = vsub.f32 %v6241_v55, %v6146_v52  ;;  %vm512_vm0 = vcmp.eq.f32.partialorder %v6246_v6, 0.0 }
  0xd0   :  { %v497_v54 = vmul.f32 %v496_v48, %v6221_v32  ;;  %v505_v63 = vmul.f32 %v5126_v44, %v504_v51  ;;  %v123_v23 = vsub.f32 %v6163_v7, %v6155_v60  ;;  %vm426_vm2 = vcmp.eq.f32.partialorder %v6278_v45, inf }
  0xd1   :  { %v6309_v2 = vpop.permute.xlu2 %200  ;;  %vm428_vm3 = vcmp.eq.f32.partialorder %v6278_v45, 0.0 }
  0xd2   :  { %v499_v11 = vsel %vm498_vm13, %v6221_v32, %v497_v54  ;;  %v506_v3 = vmul.f32 0.5, %v505_v63  ;;  %v139_v54 = vmul.f32 %v123_v23, %v123_v23  ;;  %v116_v23 = vsub.f32 %v6280_v5, %v6130_v35 }
  0xd3   :  { %v6317_v15 = vsel %vm500_vm14, %v501_v8, %v499_v11  ;;  %v429_v8 = vand.u32 2147483648, %v6278_v45 }
  0xd4   :  { %10804 = vst [vmem:[#allocation8_spill] sm:$0xff] %v6317_v15  ;;  %v6325_v13 = vsel %vm563_vm1, %v6317_v15, inf  ;;  %v507_v14 = vsub.f32 1.5, %v506_v3 }
  0xd5   :  { %v5128_v16 = vpop.eup %5127  ;;  %592 = vmin.xlane.f32.xlu2 %v6321_v33  ;;  %595 = vmin.xlane.f32.xlu1 %v6325_v13  ;;  %v1441_v32 = vmin.f32 %v6272_v42, %v6325_v13 }
  0xd6   :  { %v165_v26 = vpop.permute.xlu1 %164  ;;  %v508_v56 = vmul.f32 %v5126_v44, %v507_v14  ;;  %v420_v27 = vmul.f32 %v5128_v16, %v6278_v45  ;;  %v254_v44 = vadd.f32 %v238_v31, %v140_v17  ;;  %v125_v31 = vsub.f32 %v6153_v59, %v6155_v60 }
  0xd8   :  { %v509_v29 = vmul.f32 %v508_v56, %v6246_v6  ;;  %v421_v30 = vmul.f32 %v5128_v16, %v420_v27  ;;  %v141_v12 = vmul.f32 %v125_v31, %v125_v31 }
  0xda   :  { %v311_v36 = vpop.permute.xlu2 %310  ;;  %v511_v37 = vsel %vm510_vm15, %v6246_v6, %v509_v29  ;;  %v422_v38 = vmul.f32 0.5, %v421_v30  ;;  %v237_v6 = vmul.f32 %v221_v43, %v221_v43  ;;  %v223_v30 = vsub.f32 %v6309_v2, %v6146_v52 }
  0xdb   :  { %v336_v40 = vsub.f32 %v311_v36, %v6159_v62  ;;  %v6344_v21 = vsel %vm512_vm0, %v513_v10, %v511_v37  ;;  %v214_v37 = vsub.f32 %v165_v26, %v6127_v34  ;;  %v132_v26 = vmul.f32 %v116_v23, %v116_v23 }
  0xdc   :  { %10805 = vst [vmem:[#allocation9_spill] sm:$0xff] %v6344_v21  ;;  %v6350_v24 = vsel %vm563_vm1, %v6344_v21, inf  ;;  %v423_v25 = vsub.f32 1.5, %v422_v38  ;;  %v253_v11 = vadd.f32 %v237_v6, %v139_v54  ;;  %v239_v43 = vmul.f32 %v223_v30, %v223_v30  ;;  %v205_v30 = vpop.permute.xlu0 %204 }
  0xdd   :  { %v352_v55 = vmul.f32 %v336_v40, %v336_v40  ;;  %v1442_v28 = vmin.f32 %v6321_v33, %v6350_v24  ;;  %598 = vmin.xlane.f32.xlu0 %v6350_v24  ;;  %574 = vmin.xlane.f32.xlu2 %v6302_v50  ;;  %v230_v6 = vmul.f32 %v214_v37, %v214_v37 }
  0xde   :  { %v424_v48 = vmul.f32 %v5128_v16, %v423_v25  ;;  %v255_v25 = vadd.f32 %v239_v43, %v141_v12 }
  0xdf   :  { %v368_v51 = vadd.f32 %v352_v55, %v254_v44  ;;  %v307_v22 = vpop.permute.xlu1 %306  ;;  %v246_v5 = vadd.f32 %v230_v6, %v132_v26 }
  0xe0   :  { %v335_v7 = vsub.f32 %v307_v22, %v6159_v62  ;;  %v425_v63 = vmul.f32 %v424_v48, %v6278_v45 }
  0xe1   :  { %5129 = vrsqrt.f32 %v368_v51  ;;  %vm534_vm4 = vcmp.eq.f32.partialorder %v368_v51, inf  ;;  %vm536_vm5 = vcmp.eq.f32.partialorder %v368_v51, 0.0 }
  0xe2   :  { %v351_v3 = vmul.f32 %v335_v7, %v335_v7  ;;  %v427_v14 = vsel %vm426_vm2, %v6278_v45, %v425_v63 }
  0xe3   :  { %v6362_v19 = vpop.permute.xlu2 %172  ;;  %v6364_v16 = vsel %vm428_vm3, %v429_v8, %v427_v14  ;;  %v537_v8 = vand.u32 2147483648, %v368_v51 }
  0xe4   :  { %10806 = vst [vmem:[#allocation10_spill] sm:$0xff] %v6364_v16  ;;  %v367_v49 = vadd.f32 %v351_v3, %v253_v11  ;;  %v576_v56 = vsel %vm563_vm1, %v6364_v16, inf }
  0xe5   :  { %v6371_v27 = vmin.f32 %v1428_v53, %v576_v56  ;;  %577 = vmin.xlane.f32.xlu1 %v576_v56 }
  0xe6   :  { %5131 = vrsqrt.f32 %v367_v49  ;;  %vm522_vm6 = vcmp.eq.f32.partialorder %v367_v49, inf  ;;  %vm524_vm7 = vcmp.eq.f32.partialorder %v367_v49, 0.0 }
  0xe7   :  { %v5130_v29 = vpop.eup %5129 }
  0xe8   :  { %v169_v45 = vpop.permute.xlu1 %168  ;;  %v528_v17 = vmul.f32 %v5130_v29, %v368_v51 }
  0xea   :  { %v529_v10 = vmul.f32 %v5130_v29, %v528_v17 }
  0xec   :  { %v5132_v36 = vpop.eup %5131  ;;  %v315_v38 = vpop.permute.xlu2 %314  ;;  %v530_v0 = vmul.f32 0.5, %v529_v10 }
  0xed   :  { %v337_v53 = vsub.f32 %v315_v38, %v6159_v62  ;;  %v516_v40 = vmul.f32 %v5132_v36, %v367_v49 }
  0xee   :  { %v531_v2 = vsub.f32 1.5, %v530_v0 }
  0xef   :  { %v353_v44 = vmul.f32 %v337_v53, %v337_v53  ;;  %v517_v55 = vmul.f32 %v5132_v36, %v516_v40 }
  0xf0   :  { %v532_v59 = vmul.f32 %v5130_v29, %v531_v2 }
  0xf1   :  { %v6381_v48 = vadd.f32 %v353_v44, %v255_v25  ;;  %v279_v22 = vpop.permute.xlu1 %278  ;;  %v518_v54 = vmul.f32 0.5, %v517_v55  ;;  %v215_v44 = vsub.f32 %v169_v45, %v6127_v34 }
  0xf2   :  { %v328_v7 = vsub.f32 %v279_v22, %v6136_v39  ;;  %v533_v63 = vmul.f32 %v532_v59, %v368_v51  ;;  %v117_v59 = vsub.f32 %v6255_v20, %v6130_v35 }
  0xf3   :  { %5133 = vrsqrt.f32 %v6381_v48  ;;  %v519_v11 = vsub.f32 1.5, %v518_v54  ;;  %v231_v13 = vmul.f32 %v215_v44, %v215_v44  ;;  %vm546_vm8 = vcmp.eq.f32.partialorder %v6381_v48, inf }
  0xf4   :  { %v344_v3 = vmul.f32 %v328_v7, %v328_v7  ;;  %v535_v14 = vsel %vm534_vm4, %v368_v51, %v533_v63  ;;  %v319_v10 = vpop.permute.xlu2 %318  ;;  %v525_v51 = vand.u32 2147483648, %v367_v49  ;;  %v133_v63 = vmul.f32 %v117_v59, %v117_v59 }
  0xf5   :  { %v6385_v56 = vsel %vm536_vm5, %v537_v8, %v535_v14  ;;  %v520_v29 = vmul.f32 %v5132_v36, %v519_v11  ;;  %v224_v36 = vsub.f32 %v205_v30, %v6146_v52  ;;  %v338_v12 = vsub.f32 %v319_v10, %v6159_v62 }
  0xf6   :  { %10807 = vst [vmem:[#allocation11_spill] sm:$0xff] %v6385_v56  ;;  %v6387_v17 = vadd.f32 %v344_v3, %v246_v5  ;;  %v603_v31 = vsel %vm563_vm1, %v6385_v56, inf  ;;  %v216_v11 = vsub.f32 %v6362_v19, %v6127_v34  ;;  %v549_v20 = vand.u32 2147483648, %v6381_v48 }
  0xf7   :  { %604 = vmin.xlane.f32.xlu1 %v603_v31  ;;  %v6394_v43 = vmin.f32 %v1442_v28, %v603_v31  ;;  %v521_v37 = vmul.f32 %v520_v29, %v367_v49  ;;  %v354_v62 = vmul.f32 %v338_v12, %v338_v12  ;;  %v247_v3 = vadd.f32 %v231_v13, %v133_v63 }
  0xf8   :  { %5135 = vrsqrt.f32 %v6387_v17  ;;  %vm548_vm9 = vcmp.eq.f32.partialorder %v6381_v48, 0.0  ;;  %v118_v10 = vsub.f32 %v6165_v9, %v6130_v35  ;;  %vm438_vm10 = vcmp.eq.f32.partialorder %v6387_v17, inf }
  0xf9   :  { %v5134_v38 = vpop.eup %5133  ;;  %v523_v0 = vsel %vm522_vm6, %v367_v49, %v521_v37  ;;  %v240_v49 = vmul.f32 %v224_v36, %v224_v36  ;;  %v232_v36 = vmul.f32 %v216_v11, %v216_v11  ;;  %vm440_vm11 = vcmp.eq.f32.partialorder %v6387_v17, 0.0 }
  0xfa   :  { %v107_v53 = vpop.permute.xlu1 %106  ;;  %v6399_v40 = vsel %vm524_vm7, %v525_v51, %v523_v0  ;;  %v540_v23 = vmul.f32 %v5134_v38, %v6381_v48  ;;  %v134_v9 = vmul.f32 %v118_v10, %v118_v10 }
  0xfb   :  { %10808 = vst [vmem:[#allocation12_spill] sm:$0xff] %v6399_v40  ;;  %v126_v33 = vsub.f32 %v107_v53, %v6155_v60  ;;  %v600_v24 = vsel %vm563_vm1, %v6399_v40, inf }
  0xfc   :  { %v6408_v28 = vmin.f32 %v1441_v32, %v600_v24  ;;  %601 = vmin.xlane.f32.xlu2 %v600_v24  ;;  %v541_v52 = vmul.f32 %v5134_v38, %v540_v23 }
  0xfd   :  { %v142_v2 = vmul.f32 %v126_v33, %v126_v33 }
  0xfe   :  { %v5136_v25 = vpop.eup %5135  ;;  %v542_v55 = vmul.f32 0.5, %v541_v52 }
  0xff   :  { %v256_v6 = vadd.f32 %v240_v49, %v142_v2  ;;  %v432_v60 = vmul.f32 %v5136_v25, %v6387_v17 }
 0x100   :  { %v543_v22 = vsub.f32 1.5, %v542_v55 }
 0x101   :  { %v370_v54 = vadd.f32 %v354_v62, %v256_v6  ;;  %v433_v42 = vmul.f32 %v5136_v25, %v432_v60 }
 0x102   :  { %v544_v32 = vmul.f32 %v5134_v38, %v543_v22 }
 0x103   :  { %5137 = vrsqrt.f32 %v370_v54  ;;  %v283_v26 = vpop.permute.xlu1 %282  ;;  %v434_v7 = vmul.f32 0.5, %v433_v42  ;;  %vm558_vm12 = vcmp.eq.f32.partialorder %v370_v54, inf  ;;  %v561_v59 = vand.u32 2147483648, %v370_v54 }
 0x104   :  { %v329_v8 = vsub.f32 %v283_v26, %v6136_v39  ;;  %v545_v45 = vmul.f32 %v544_v32, %v6381_v48  ;;  %vm560_vm13 = vcmp.eq.f32.partialorder %v370_v54, 0.0 }
 0x105   :  { %v435_v5 = vsub.f32 1.5, %v434_v7 }
 0x106   :  { %v345_v14 = vmul.f32 %v329_v8, %v329_v8  ;;  %v547_v29 = vsel %vm546_vm8, %v6381_v48, %v545_v45  ;;  %v441_v48 = vand.u32 2147483648, %v6387_v17 }
 0x107   :  { %v436_v30 = vmul.f32 %v5136_v25, %v435_v5  ;;  %v6422_v31 = vsel %vm548_vm9, %v549_v20, %v547_v29 }
 0x108   :  { %10809 = vst [vmem:[#allocation13_spill] sm:$0xff] %v6422_v31  ;;  %v361_v37 = vadd.f32 %v345_v14, %v247_v3  ;;  %v606_v34 = vsel %vm563_vm1, %v6422_v31, inf }
 0x109   :  { %v5138_v19 = vpop.eup %5137  ;;  %v437_v51 = vmul.f32 %v436_v30, %v6387_v17  ;;  %v1445_v38 = vmin.f32 %v6408_v28, %v606_v34  ;;  %v248_v28 = vadd.f32 %v232_v36, %v134_v9 }
 0x10a   :  { %5139 = vrsqrt.f32 %v361_v37  ;;  %v552_v35 = vmul.f32 %v5138_v19, %v370_v54  ;;  %vm450_vm14 = vcmp.eq.f32.partialorder %v361_v37, inf  ;;  %v453_v8 = vand.u32 2147483648, %v361_v37 }
 0x10b   :  { %v287_v0 = vpop.permute.xlu1 %286  ;;  %v439_v12 = vsel %vm438_vm10, %v6387_v17, %v437_v51  ;;  %vm452_vm15 = vcmp.eq.f32.partialorder %v361_v37, 0.0 }
 0x10c   :  { %v330_v53 = vsub.f32 %v287_v0, %v6136_v39  ;;  %v6435_v23 = vsel %vm440_vm11, %v441_v48, %v439_v12  ;;  %v553_v24 = vmul.f32 %v5138_v19, %v552_v35 }
 0x10d   :  { %10810 = vst [vmem:[#allocation14_spill] sm:$0xff] %v6435_v23  ;;  %v579_v33 = vsel %vm563_vm1, %v6435_v23, inf }
 0x10e   :  { %v346_v52 = vmul.f32 %v330_v53, %v330_v53  ;;  %580 = vmin.xlane.f32.xlu0 %v579_v33  ;;  %v1431_v49 = vmin.f32 %v1429_v1, %v579_v33  ;;  %v554_v2 = vmul.f32 0.5, %v553_v24 }
 0x110   :  { %v5140_v62 = vpop.eup %5139  ;;  %v362_v17 = vadd.f32 %v346_v52, %v248_v28  ;;  %v555_v44 = vsub.f32 1.5, %v554_v2 }
 0x111   :  { %v444_v25 = vmul.f32 %v5140_v62, %v361_v37 }
 0x112   :  { %5141 = vrsqrt.f32 %v362_v17  ;;  %v556_v55 = vmul.f32 %v5138_v19, %v555_v44  ;;  %vm462_vm0 = vcmp.eq.f32.partialorder %v362_v17, inf  ;;  %v465_v19 = vand.u32 2147483648, %v362_v17 }
 0x113   :  { %v445_v39 = vmul.f32 %v5140_v62, %v444_v25  ;;  %vm464_vm2 = vcmp.eq.f32.partialorder %v362_v17, 0.0 }
 0x114   :  { %v557_v60 = vmul.f32 %v556_v55, %v370_v54 }
 0x115   :  { %v446_v6 = vmul.f32 0.5, %v445_v39 }
 0x116   :  { %607 = vmin.xlane.f32.xlu0 %v606_v34  ;;  %v559_v42 = vsel %vm558_vm12, %v370_v54, %v557_v60 }
 0x117   :  { %v447_v22 = vsub.f32 1.5, %v446_v6  ;;  %v6442_v32 = vsel %vm560_vm13, %v561_v59, %v559_v42 }
 0x118   :  { %v5142_v13 = vpop.eup %5141  ;;  %10811 = vst [vmem:[#allocation15_spill] sm:$0xff] %v6442_v32  ;;  %v609_v1 = vsel %vm563_vm1, %v6442_v32, inf }
 0x119   :  { %v448_v47 = vmul.f32 %v5140_v62, %v447_v22  ;;  %v456_v50 = vmul.f32 %v5142_v13, %v362_v17  ;;  %v1446_v26 = vmin.f32 %v6394_v43, %v609_v1 }
 0x11b   :  { %v449_v7 = vmul.f32 %v448_v47, %v361_v37  ;;  %v457_v63 = vmul.f32 %v5142_v13, %v456_v50  ;;  %v1447_v45 = vmin.f32 %v1445_v38, %v1446_v26 }
 0x11d   :  { %v451_v11 = vsel %vm450_vm14, %v361_v37, %v449_v7  ;;  %v458_v5 = vmul.f32 0.5, %v457_v63  ;;  %v1448_v54 = vrot.slane %v1447_v45, 4 }
 0x11e   :  { %v6447_v20 = vsel %vm452_vm15, %v453_v8, %v451_v11 }
 0x11f   :  { %10812 = vst [vmem:[#allocation16_spill] sm:$0xff] %v6447_v20  ;;  %v582_v3 = vsel %vm563_vm1, %v6447_v20, inf  ;;  %v459_v14 = vsub.f32 1.5, %v458_v5  ;;  %v1449_v30 = vmin.f32 %v1447_v45, %v1448_v54 }
 0x120   :  { %583 = vmin.xlane.f32.xlu2 %v582_v3  ;;  %v1432_v29 = vmin.f32 %v6371_v27, %v582_v3 }
 0x121   :  { %v460_v43 = vmul.f32 %v5142_v13, %v459_v14  ;;  %v1450_v10 = vrot.slane %v1449_v30, 2 }
 0x123   :  { %v461_v34 = vmul.f32 %v460_v43, %v362_v17  ;;  %v1451_v51 = vmin.f32 %v1449_v30, %v1450_v10 }
 0x125   :  { %v463_v38 = vsel %vm462_vm0, %v362_v17, %v461_v34  ;;  %v1452_v36 = vrot.slane %v1451_v51, 1 }
 0x126   :  { %v6452_v37 = vsel %vm464_vm2, %v465_v19, %v463_v38 }
 0x127   :  { %10813 = vst [vmem:[#allocation17_spill] sm:$0xff] %v6452_v37  ;;  %v585_v48 = vsel %vm563_vm1, %v6452_v37, inf  ;;  %v1453_v12 = vmin.f32 %v1451_v51, %v1452_v36 }
 0x128   :  { %586 = vmin.xlane.f32.xlu1 %v585_v48  ;;  %v1433_v0 = vmin.f32 %v1431_v49, %v585_v48  ;;  %610 = vmin.xlane.f32.xlu2 %v609_v1 }
 0x129   :  { %v6457_v35 = vsub.f32 %v6266_v41, %v1453_v12  ;;  %v6460_v9 = vsub.f32 %v6311_v58, %v1453_v12  ;;  %v6463_v53 = vsub.f32 %v6317_v15, %v1453_v12  ;;  %v6466_v33 = vsub.f32 %v6344_v21, %v1453_v12 }
 0x12a   :  { %v1434_v27 = vmin.f32 %v1432_v29, %v1433_v0  ;;  %v6469_v24 = vsub.f32 %v6399_v40, %v1453_v12  ;;  %v6472_v28 = vsub.f32 %v6385_v56, %v1453_v12  ;;  %v6475_v49 = vsub.f32 %v6422_v31, %v1453_v12 }
 0x12b   :  { %v6478_v2 = vsub.f32 %v6442_v32, %v1453_v12  ;;  %vm1478_vm3 = vcmp.eq.f32.partialorder %v6457_v35, 0.0  ;;  %vm1479_vm4 = vcmp.eq.f32.partialorder %v6460_v9, 0.0  ;;  %vm1480_vm5 = vcmp.eq.f32.partialorder %v6463_v53, 0.0 }
 0x12c   :  { %v1435_v52 = vrot.slane %v1434_v27, 4  ;;  %vm1481_vm6 = vcmp.eq.f32.partialorder %v6466_v33, 0.0  ;;  %vm1482_vm7 = vcmp.eq.f32.partialorder %v6469_v24, 0.0  ;;  %vm1483_vm8 = vcmp.eq.f32.partialorder %v6472_v28, 0.0 }
 0x12d   :  { %vm1484_vm9 = vcmp.eq.f32.partialorder %v6475_v49, 0.0  ;;  %v1494_v17 = vsel %vm1478_vm3, 3e+38, %v6457_v35  ;;  %v1495_v25 = vsel %vm1479_vm4, 3e+38, %v6460_v9  ;;  %vm1485_vm10 = vcmp.eq.f32.partialorder %v6478_v2, 0.0 }
 0x12e   :  { %v1436_v62 = vmin.f32 %v1434_v27, %v1435_v52  ;;  %v1496_v44 = vsel %vm1480_vm5, 3e+38, %v6463_v53  ;;  %v1497_v55 = vsel %vm1481_vm6, 3e+38, %v6466_v33  ;;  %v1523_v6 = vsel %vm563_vm1, %v1494_v17, inf }
 0x12f   :  { %v1498_v60 = vsel %vm1482_vm7, 3e+38, %v6469_v24  ;;  %v1499_v59 = vsel %vm1483_vm8, 3e+38, %v6472_v28  ;;  %v1524_v42 = vsel %vm563_vm1, %v1495_v25, inf  ;;  %v1525_v13 = vsel %vm563_vm1, %v1496_v44, inf }
 0x130   :  { %v1437_v39 = vrot.slane %v1436_v62, 2  ;;  %v1527_v47 = vsel %vm563_vm1, %v1497_v55, inf  ;;  %v1500_v50 = vsel %vm1484_vm9, 3e+38, %v6475_v49  ;;  %v1501_v1 = vsel %vm1485_vm10, 3e+38, %v6478_v2 }
 0x131   :  { %v1526_v26 = vmin.f32 %v1523_v6, %v1525_v13  ;;  %v1528_v7 = vmin.f32 %v1524_v42, %v1527_v47  ;;  %v1529_v8 = vsel %vm563_vm1, %v1498_v60, inf  ;;  %v1531_v45 = vsel %vm563_vm1, %v1499_v59, inf }
 0x132   :  { %v1438_v22 = vmin.f32 %v1436_v62, %v1437_v39  ;;  %v6519_v5 = vsel %vm563_vm1, %v1500_v50, inf  ;;  %v6522_v54 = vsel %vm563_vm1, %v1501_v1, inf  ;;  %v6527_v3 = vsel %vm1478_vm3, 1, %v10775_v4 }
 0x133   :  { %v6529_v14 = vmin.f32 %v1526_v26, %v1529_v8  ;;  %v6531_v29 = vmin.f32 %v1528_v7, %v1531_v45  ;;  %v6536_v30 = vsel %vm1479_vm4, 1, %v10775_v4  ;;  %v6541_v43 = vsel %vm1480_vm5, 1, %v10775_v4 }
 0x134   :  { %v1439_v63 = vrot.slane %v1438_v22, 1 }
 0x135   :  { %v1534_v55 = vmin.f32 %v6529_v14, %v6519_v5  ;;  %v1536_v6 = vmin.f32 %v6531_v29, %v6522_v54 }
 0x136   :  { %v1440_v11 = vmin.f32 %v1438_v22, %v1439_v63 }
 0x138   :  { %v6544_v10 = vsub.f32 %v6190_v61, %v1440_v11  ;;  %v6547_v34 = vsub.f32 %v6232_v18, %v1440_v11  ;;  %v6550_v19 = vsub.f32 %v6283_v57, %v1440_v11  ;;  %v6553_v51 = vsub.f32 %v6288_v46, %v1440_v11 }
 0x139   :  { %v6556_v38 = vsub.f32 %v6364_v16, %v1440_v11  ;;  %v6559_v36 = vsub.f32 %v6435_v23, %v1440_v11  ;;  %v6562_v48 = vsub.f32 %v6447_v20, %v1440_v11  ;;  %v6565_v0 = vsub.f32 %v6452_v37, %v1440_v11 }
 0x13a   :  { %vm1470_vm11 = vcmp.eq.f32.partialorder %v6544_v10, 0.0  ;;  %vm1471_vm12 = vcmp.eq.f32.partialorder %v6547_v34, 0.0  ;;  %vm1472_vm13 = vcmp.eq.f32.partialorder %v6550_v19, 0.0  ;;  %vm1473_vm14 = vcmp.eq.f32.partialorder %v6553_v51, 0.0 }
 0x13b   :  { %vm1474_vm15 = vcmp.eq.f32.partialorder %v6556_v38, 0.0  ;;  %vm1475_vm0 = vcmp.eq.f32.partialorder %v6559_v36, 0.0  ;;  %vm1476_vm2 = vcmp.eq.f32.partialorder %v6562_v48, 0.0  ;;  %vm1477_vm3 = vcmp.eq.f32.partialorder %v6565_v0, 0.0 }
 0x13c   :  { %v1486_v12 = vsel %vm1470_vm11, 3e+38, %v6544_v10  ;;  %v1487_v27 = vsel %vm1471_vm12, 3e+38, %v6547_v34  ;;  %v1488_v52 = vsel %vm1472_vm13, 3e+38, %v6550_v19 }
 0x13d   :  { %v1489_v62 = vsel %vm1473_vm14, 3e+38, %v6553_v51  ;;  %v1490_v17 = vsel %vm1474_vm15, 3e+38, %v6556_v38  ;;  %v1491_v25 = vsel %vm1475_vm0, 3e+38, %v6559_v36 }
 0x13e   :  { %v1502_v44 = vsel %vm563_vm1, %v1486_v12, inf  ;;  %v1503_v39 = vsel %vm563_vm1, %v1487_v27, inf  ;;  %v1492_v60 = vsel %vm1476_vm2, 3e+38, %v6562_v48  ;;  %v1493_v59 = vsel %vm1477_vm3, 3e+38, %v6565_v0 }
 0x13f   :  { %v1504_v22 = vsel %vm563_vm1, %v1488_v52, inf  ;;  %v1506_v42 = vsel %vm563_vm1, %v1489_v62, inf  ;;  %v1508_v50 = vsel %vm563_vm1, %v1490_v17, inf  ;;  %v1510_v1 = vsel %vm563_vm1, %v1491_v25, inf }
 0x140   :  { %v1505_v13 = vmin.f32 %v1502_v44, %v1504_v22  ;;  %v1507_v47 = vmin.f32 %v1503_v39, %v1506_v42  ;;  %v1544_v26 = vsel %vm1470_vm11, 1, %v10775_v4  ;;  %v1545_v7 = vsel %vm1471_vm12, 1, %v10775_v4 }
 0x141   :  { %v1546_v63 = vsel %vm1472_vm13, 1, %v10775_v4  ;;  %v1547_v8 = vsel %vm1473_vm14, 1, %v10775_v4  ;;  %v1512_v5 = vsel %vm563_vm1, %v1492_v60, inf  ;;  %v1514_v54 = vsel %vm563_vm1, %v1493_v59, inf }
 0x142   :  { %v1509_v45 = vmin.f32 %v1505_v13, %v1508_v50  ;;  %v1511_v11 = vmin.f32 %v1507_v47, %v1510_v1  ;;  %v1548_v14 = vsel %vm1474_vm15, 1, %v10775_v4  ;;  %v1549_v29 = vsel %vm1475_vm0, 1, %v10775_v4 }
 0x143   :  { %v1560_v12 = vsel %vm563_vm1, %v1544_v26, 0  ;;  %v1561_v27 = vsel %vm563_vm1, %v1545_v7, 0  ;;  %v1562_v17 = vsel %vm563_vm1, %v1546_v63, 0  ;;  %v1564_v25 = vsel %vm563_vm1, %v1547_v8, 0 }
 0x144   :  { %v1513_v52 = vmin.f32 %v1509_v45, %v1512_v5  ;;  %v1515_v62 = vmin.f32 %v1511_v11, %v1514_v54  ;;  %v1550_v44 = vsel %vm1476_vm2, 1, %v10775_v4  ;;  %v1551_v39 = vsel %vm1477_vm3, 1, %v10775_v4 }
 0x145   :  { %v1563_v60 = vadd.s32 %v1562_v17, %v1560_v12  ;;  %v1565_v59 = vadd.s32 %v1564_v25, %v1561_v27  ;;  %v1566_v42 = vsel %vm563_vm1, %v1548_v14, 0  ;;  %v1568_v13 = vsel %vm563_vm1, %v1549_v29, 0  ;;  %v566_v12 = vpop.xlane.xlu0 %565 }
 0x146   :  { %v1516_v22 = vmin.f32 %v1513_v52, %v1515_v62  ;;  %v1555_v47 = vsel %vm1481_vm6, 1, %v10775_v4  ;;  %v1556_v26 = vsel %vm1482_vm7, 1, %v10775_v4  ;;  %v1557_v7 = vsel %vm1483_vm8, 1, %v10775_v4 }
 0x147   :  { %v1567_v50 = vadd.s32 %v1566_v42, %v1563_v60  ;;  %v1569_v1 = vadd.s32 %v1568_v13, %v1565_v59  ;;  %v1570_v8 = vsel %vm563_vm1, %v1550_v44, 0  ;;  %v1572_v45 = vsel %vm563_vm1, %v1551_v39, 0  ;;  %v590_v39 = vpop.xlane.xlu2 %589 }
 0x148   :  { %v1517_v63 = vrot.slane %v1516_v22, 4  ;;  %v1537_v11 = vmin.f32 %v1534_v55, %v1536_v6  ;;  %v1558_v14 = vsel %vm1484_vm9, 1, %v10775_v4  ;;  %v1581_v29 = vsel %vm563_vm1, %v6527_v3, 0 }
 0x149   :  { %v1571_v5 = vadd.s32 %v1570_v8, %v1567_v50  ;;  %v1573_v54 = vadd.s32 %v1572_v45, %v1569_v1  ;;  %v1582_v52 = vsel %vm563_vm1, %v6536_v30, 0  ;;  %v1583_v62 = vsel %vm563_vm1, %v6541_v43, 0 }
 0x14a   :  { %v1518_v27 = vmin.f32 %v1516_v22, %v1517_v63  ;;  %v1585_v17 = vsel %vm563_vm1, %v1555_v47, 0  ;;  %v1559_v6 = vsel %vm1485_vm10, 1, %v10775_v4  ;;  %v1584_v25 = vadd.s32 %v1583_v62, %v1581_v29  ;;  %v569_v47 = vpop.xlane.xlu1 %568 }
 0x14b   :  { %v1574_v55 = vadd.s32 %v1573_v54, %v1571_v5  ;;  %v1586_v44 = vadd.s32 %v1585_v17, %v1582_v52  ;;  %v1538_v3 = vrot.slane %v1537_v11, 4  ;;  %v1587_v59 = vsel %vm563_vm1, %v1556_v26, 0 }
 0x14c   :  { %v1519_v60 = vrot.slane %v1518_v27, 2  ;;  %v1589_v22 = vsel %vm563_vm1, %v1557_v7, 0  ;;  %v6668_v30 = vsub.f32 %v6190_v61, %v566_v12  ;;  %v1588_v42 = vadd.s32 %v1587_v59, %v1584_v25 }
 0x14d   :  { %v1575_v43 = vrot.slane %v1574_v55, 4  ;;  %v1590_v13 = vadd.s32 %v1589_v22, %v1586_v44  ;;  %v1591_v1 = vsel %vm563_vm1, %v1558_v14, 0  ;;  %v1593_v63 = vsel %vm563_vm1, %v1559_v6, 0 }
 0x14e   :  { %v1520_v50 = vmin.f32 %v1518_v27, %v1519_v60  ;;  %v1592_v45 = vadd.s32 %v1591_v1, %v1588_v42  ;;  %v1539_v54 = vmin.f32 %v1537_v11, %v1538_v3  ;;  %v6673_v26 = vsub.f32 %v6232_v18, %v569_v47 }
 0x14f   :  { %v1576_v8 = vadd.s32 %v1575_v43, %v1574_v55  ;;  %v1594_v5 = vadd.s32 %v1593_v63, %v1590_v13  ;;  %vm628_vm4 = vcmp.eq.f32.partialorder %v6668_v30, 0.0  ;;  %v6682_v6 = vsub.f32 %v6266_v41, %v590_v39  ;;  %v593_v3 = vpop.xlane.xlu2 %592 }
 0x150   :  { %v1521_v12 = vrot.slane %v1520_v50, 1  ;;  %v644_v52 = vsel %vm628_vm4, 3e+38, %v6668_v30  ;;  %v708_v27 = vsel %vm628_vm4, 1, %v10775_v4  ;;  %v1540_v55 = vrot.slane %v1539_v54, 2 }
 0x151   :  { %v1577_v7 = vrot.slane %v1576_v8, 2  ;;  %v1595_v29 = vadd.s32 %v1594_v5, %v1592_v45  ;;  %v660_v17 = vsel %vm563_vm1, %v644_v52, inf  ;;  %v724_v11 = vsel %vm563_vm1, %v708_v27, 0 }
 0x152   :  { %661 = vmin.xlane.f32.xlu0 %v660_v17  ;;  %vm629_vm5 = vcmp.eq.f32.partialorder %v6673_v26, 0.0  ;;  %v1522_v59 = vmin.f32 %v1520_v50, %v1521_v12  ;;  %v726_v22 = vshrl.u32 %v724_v11, 16  ;;  %v1541_v63 = vmin.f32 %v1539_v54, %v1540_v55 }
 0x153   :  { %v1578_v62 = vadd.s32 %v1577_v7, %v1576_v8  ;;  %v1596_v14 = vrot.slane %v1595_v29, 4  ;;  %v645_v60 = vsel %vm629_vm5, 3e+38, %v6673_v26  ;;  %v709_v42 = vsel %vm629_vm5, 1, %v10775_v4 }
 0x154   :  { %v663_v43 = vsel %vm563_vm1, %v645_v60, inf  ;;  %v737_v1 = vsel %vm563_vm1, %v709_v42, 0  ;;  %v6689_v39 = vsub.f32 %v6311_v58, %v593_v3  ;;  %vm636_vm6 = vcmp.eq.f32.partialorder %v6682_v6, 0.0 }
 0x155   :  { %v1579_v25 = vrot.slane %v1578_v62, 1  ;;  %v1597_v44 = vadd.s32 %v1596_v14, %v1595_v29  ;;  %664 = vmin.xlane.f32.xlu1 %v663_v43  ;;  %v739_v45 = vshrl.u32 %v737_v1, 16  ;;  %v716_v50 = vsel %vm636_vm6, 1, %v10775_v4  ;;  %v572_v29 = vpop.xlane.xlu0 %571 }
 0x156   :  { %v728_v7 = vcvt.s32.f32 %v726_v22  ;;  %v828_v52 = vsel %vm563_vm1, %v716_v50, 0  ;;  %vm637_vm8 = vcmp.eq.f32.partialorder %v6689_v39, 0.0  ;;  %v6703_v14 = vsub.f32 %v6283_v57, %v572_v29 }
 0x157   :  { %v1580_v13 = vadd.s32 %v1579_v25, %v1578_v62  ;;  %v1598_v47 = vrot.slane %v1597_v44, 2  ;;  %v830_v27 = vshrl.u32 %v828_v52, 16  ;;  %v1542_v62 = vrot.slane %v1541_v63, 1 }
 0x158   :  { %v741_v17 = vcvt.s32.f32 %v739_v45  ;;  %v717_v60 = vsel %vm637_vm8, 1, %v10775_v4  ;;  %v725_v22 = vand.u32 65535, %v724_v11  ;;  %vm630_vm9 = vcmp.eq.f32.partialorder %v6703_v14, 0.0 }
 0x159   :  { %vm1602_vm7 = vcmp.ge.s32.totalorder %v1580_v13, 2  ;;  %v1599_v8 = vadd.s32 %v1598_v47, %v1597_v44  ;;  %v832_v25 = vcvt.s32.f32 %v830_v27  ;;  %v596_v44 = vpop.xlane.xlu1 %595  ;;  %v841_v3 = vsel %vm563_vm1, %v717_v60, 0  ;;  %v575_v13 = vpop.xlane.xlu2 %574 }
 0x15a   :  { %v6695_v5 = vsel %vm1602_vm7, 0.0, %v1522_v59  ;;  %731 = vadd.xlane.f32.xlu0 %v728_v7  ;;  %v1543_v59 = vmin.f32 %v1541_v63, %v1542_v62  ;;  %v843_v43 = vshrl.u32 %v841_v3, 16  ;;  %v6712_v42 = vsub.f32 %v6317_v15, %v596_v44 }
 0x15b   :  { %v6698_v12 = vadd.f32 1e-08, %v6695_v5  ;;  %v1600_v54 = vrot.slane %v1599_v8, 1  ;;  %835 = vadd.xlane.f32.xlu2 %v832_v25  ;;  %v738_v47 = vand.u32 65535, %v737_v1  ;;  %v727_v11 = vcvt.s32.f32 %v725_v22 }
 0x15c   :  { %v845_v45 = vcvt.s32.f32 %v843_v43  ;;  %v6723_v29 = vsub.f32 %v6288_v46, %v575_v13  ;;  %vm638_vm11 = vcmp.eq.f32.partialorder %v6712_v42, 0.0  ;;  %v842_v44 = vand.u32 65535, %v841_v3 }
 0x15d   :  { %v1601_v55 = vadd.s32 %v1600_v54, %v1599_v8  ;;  %5143 = vrcp.f32 %v6698_v12  ;;  %744 = vadd.xlane.f32.xlu1 %v741_v17  ;;  %v710_v8 = vsel %vm630_vm9, 1, %v10775_v4  ;;  %v740_v54 = vcvt.s32.f32 %v738_v47  ;;  %v599_v17 = vpop.xlane.xlu0 %598 }
 0x15e   :  { %v750_v50 = vsel %vm563_vm1, %v710_v8, 0  ;;  %v718_v25 = vsel %vm638_vm11, 1, %v10775_v4  ;;  %vm631_vm12 = vcmp.eq.f32.partialorder %v6723_v29, 0.0  ;;  %v6736_v60 = vsub.f32 %v6344_v21, %v599_v17 }
 0x15f   :  { %vm1603_vm10 = vcmp.ge.s32.totalorder %v1601_v55, 2  ;;  %v752_v1 = vshrl.u32 %v750_v50, 16  ;;  %v829_v55 = vand.u32 65535, %v828_v52  ;;  %v854_v43 = vsel %vm563_vm1, %v718_v25, 0 }
 0x160   :  { %v6720_v63 = vsel %vm1603_vm10, 0.0, %v1543_v59  ;;  %v711_v52 = vsel %vm631_vm12, 1, %v10775_v4  ;;  %v844_v47 = vcvt.s32.f32 %v842_v44  ;;  %vm639_vm13 = vcmp.eq.f32.partialorder %v6736_v60, 0.0 }
 0x161   :  { %v6729_v62 = vadd.f32 1e-08, %v6720_v63  ;;  %v754_v59 = vcvt.s32.f32 %v752_v1  ;;  %v831_v13 = vcvt.s32.f32 %v829_v55  ;;  %v578_v8 = vpop.xlane.xlu1 %577  ;;  %v763_v3 = vsel %vm563_vm1, %v711_v52, 0 }
 0x162   :  { %848 = vadd.xlane.f32.xlu0 %v845_v45  ;;  %v856_v45 = vshrl.u32 %v854_v43, 16  ;;  %v751_v1 = vand.u32 65535, %v750_v50  ;;  %v6749_v17 = vsub.f32 %v6364_v16, %v578_v8  ;;  %v765_v55 = vshrl.u32 %v763_v3, 16 }
 0x163   :  { %v6718_v7 = vpop.eup %5143  ;;  %742 = vadd.xlane.f32.xlu2 %v740_v54  ;;  %5145 = vrcp.f32 %v6729_v62  ;;  %v719_v44 = vsel %vm639_vm13, 1, %v10775_v4  ;;  %vm1613_vm15 = vweird.f32 %v6698_v12  ;;  %v1619_v50 = vand.u32 2147483648, %v6698_v12 }
 0x164   :  { %v1609_v27 = vmul.f32 %v6718_v7, %v6698_v12  ;;  %v858_v25 = vcvt.s32.f32 %v856_v45  ;;  %vm1614_vm14 = vweird.f32 %v6718_v7  ;;  %v767_v8 = vcvt.s32.f32 %v765_v55 }
 0x165   :  { %729 = vadd.xlane.f32.xlu1 %v727_v11  ;;  %v867_v45 = vsel %vm563_vm1, %v719_v44, 0  ;;  %vm632_vm0 = vcmp.eq.f32.partialorder %v6749_v17, 0.0  ;;  %vm1615_vm2 = vmor %vm1613_vm15, %vm1614_vm14  ;;  %v1620_v4 = vor.u32 1.1754944e-38, %v1619_v50  ;;  %v764_v55 = vand.u32 65535, %v763_v3 }
 0x166   :  { %v1610_v22 = vsub.f32 1.0, %v1609_v27  ;;  %v869_v16 = vshrl.u32 %v867_v45, 16  ;;  %vm1628_vm7 = vweird.f32 %v6729_v62  ;;  %v1645_v46 = vsub.f32 0.0, %v6565_v0 }
 0x167   :  { %v1220_v61 = vsub.f32 0.0, %v6668_v30 }
 0x168   :  { %v1611_v11 = vmul.f32 %v6718_v7, %v1610_v22 }
 0x169   :  { %v6746_v27 = vpop.eup %5145 }
 0x16a   :  { %757 = vadd.xlane.f32.xlu0 %v754_v59  ;;  %v1612_v22 = vadd.f32 %v6718_v7, %v1611_v11  ;;  %v1624_v52 = vmul.f32 %v6746_v27, %v6729_v62  ;;  %v855_v11 = vand.u32 65535, %v854_v43  ;;  %vm1629_vm5 = vweird.f32 %v6746_v27 }
 0x16b   :  { %846 = vadd.xlane.f32.xlu2 %v844_v47  ;;  %v1617_v47 = vand.u32 2147483647, %v6698_v12  ;;  %vm6805_vm10 = vmor %vm1628_vm7, %vm1629_vm5 }
 0x16c   :  { %v857_v43 = vcvt.s32.f32 %v855_v11  ;;  %v605_v11 = vpop.xlane.xlu1 %604 }
 0x16d   :  { %833 = vadd.xlane.f32.xlu1 %v831_v13  ;;  %v753_v13 = vcvt.s32.f32 %v751_v1  ;;  %v10814_v1 = vmov 0   ;;  %vm1618_vm4 = vcmp.eq.f32.partialorder %v1617_v47, 8.507059e+37  ;;  %v766_v47 = vcvt.s32.f32 %v764_v55 }
 0x16e   :  { %v712_v12 = vsel %vm632_vm0, 1, %v10814_v1 }
 0x16f   :  { %v602_v54 = vpop.xlane.xlu2 %601 }
 0x170   :  { %v6755_v59 = vsub.f32 %v6399_v40, %v602_v54  ;;  %v1616_v54 = vsel %vm1615_vm2, %v6718_v7, %v1612_v22  ;;  %v1625_v40 = vsub.f32 1.0, %v1624_v52  ;;  %v871_v22 = vcvt.s32.f32 %v869_v16 }
 0x171   :  { %v1621_v44 = vsel %vm1618_vm4, %v1620_v4, %v1616_v54  ;;  %v6787_v4 = vsel %vm632_vm0, 3e+38, %v6749_v17 }
 0x172   :  { %861 = vadd.xlane.f32.xlu0 %v858_v25  ;;  %vm640_vm3 = vcmp.eq.f32.partialorder %v6755_v59, 0.0  ;;  %v1626_v7 = vmul.f32 %v6746_v27, %v1625_v40  ;;  %v6781_v52 = vmul.f32 5.7525725, %v1621_v44  ;;  %v1644_v40 = vsub.f32 0.0, %v6562_v48 }
 0x173   :  { %770 = vadd.xlane.f32.xlu2 %v767_v8  ;;  %v720_v25 = vsel %vm640_vm3, 1, %v10814_v1  ;;  %v1643_v8 = vsub.f32 0.0, %v6559_v36  ;;  %v1634_v44 = vand.u32 2147483648, %v6729_v62  ;;  %v6803_v48 = vsub.f32 %v6385_v56, %v605_v11 }
 0x174   :  { %v6779_v50 = vsel %vm563_vm1, %v720_v25, 0  ;;  %v1627_v54 = vadd.f32 %v6746_v27, %v1626_v7 }
 0x175   :  { %755 = vadd.xlane.f32.xlu1 %v753_v13  ;;  %v6775_v13 = vsel %vm563_vm1, %v712_v12, 0  ;;  %v882_v16 = vshrl.u32 %v6779_v50, 16  ;;  %v868_v12 = vand.u32 65535, %v867_v45  ;;  %v1659_v25 = vmul.f32 %v1643_v8, %v6781_v52 }
 0x176   :  { %v778_v3 = vshrl.u32 %v6775_v13, 16  ;;  %v1639_v8 = vsub.f32 0.0, %v6547_v34  ;;  %v1635_v56 = vor.u32 1.1754944e-38, %v1634_v44  ;;  %vm641_vm0 = vcmp.eq.f32.partialorder %v6803_v48, 0.0 }
 0x177   :  { %v1680_v11 = vmul.f32 1.442695, %v1659_v25  ;;  %v1642_v34 = vsub.f32 0.0, %v6556_v38 }
 0x178   :  { %v780_v7 = vcvt.s32.f32 %v778_v3  ;;  %v1661_v3 = vmul.f32 %v1645_v46, %v6781_v52  ;;  %v653_v46 = vsel %vm637_vm8, 3e+38, %v6689_v39 }
 0x179   :  { %5147 = vpow2.f32 %v1680_v11  ;;  %v687_v25 = vsel %vm563_vm1, %v653_v46, inf  ;;  %v1647_v11 = vsub.f32 0.0, %v6460_v9 }
 0x17a   :  { %859 = vadd.xlane.f32.xlu0 %v857_v43  ;;  %v1660_v43 = vmul.f32 %v1644_v40, %v6781_v52  ;;  %v870_v40 = vcvt.s32.f32 %v868_v12 }
 0x17b   :  { %768 = vadd.xlane.f32.xlu2 %v766_v47  ;;  %v884_v47 = vcvt.s32.f32 %v882_v16  ;;  %v1650_v16 = vsub.f32 0.0, %v6469_v24  ;;  %v1658_v24 = vmul.f32 %v1642_v34, %v6781_v52  ;;  %v1648_v34 = vsub.f32 0.0, %v6463_v53 }
 0x17d   :  { %874 = vadd.xlane.f32.xlu1 %v871_v22  ;;  %v1632_v22 = vand.u32 2147483647, %v6729_v62  ;;  %v1641_v62 = vsub.f32 0.0, %v6553_v51  ;;  %v1651_v51 = vsub.f32 0.0, %v6472_v28  ;;  %v1684_v28 = vmul.f32 1.442695, %v1661_v3 }
 0x17f   :  { %vm1633_vm15 = vcmp.eq.f32.partialorder %v1632_v22, 8.507059e+37  ;;  %v1657_v38 = vmul.f32 %v1641_v62, %v6781_v52  ;;  %v1640_v22 = vsub.f32 0.0, %v6550_v19 }
 0x181   :  { %v581_v55 = vpop.xlane.xlu0 %580  ;;  %v1656_v62 = vmul.f32 %v1640_v22, %v6781_v52  ;;  %v1676_v9 = vmul.f32 1.442695, %v1657_v38 }
 0x182   :  { %v6798_v36 = vsub.f32 %v6435_v23, %v581_v55  ;;  %v1631_v55 = vsel %vm6805_vm10, %v6746_v27, %v1627_v54  ;;  %783 = vadd.xlane.f32.xlu0 %v780_v7  ;;  %v1682_v23 = vmul.f32 1.442695, %v1660_v43  ;;  %v1649_v27 = vsub.f32 0.0, %v6466_v33 }
 0x183   :  { %v1636_v0 = vsel %vm1633_vm15, %v1635_v56, %v1631_v55  ;;  %887 = vadd.xlane.f32.xlu2 %v884_v47  ;;  %v777_v54 = vand.u32 65535, %v6775_v13  ;;  %v721_v56 = vsel %vm641_vm0, 1, %v10814_v1  ;;  %v652_v33 = vsel %vm636_vm6, 3e+38, %v6682_v6 }
 0x184   :  { %vm633_vm14 = vcmp.eq.f32.partialorder %v6798_v36, 0.0  ;;  %5149 = vpow2.f32 %v1682_v23  ;;  %v6837_v13 = vmul.f32 5.7525725, %v1636_v0  ;;  %v1638_v43 = vsub.f32 0.0, %v6544_v10 }
 0x185   :  { %872 = vadd.xlane.f32.xlu1 %v870_v40  ;;  %v713_v12 = vsel %vm633_vm14, 1, %v10814_v1  ;;  %v779_v7 = vcvt.s32.f32 %v777_v54  ;;  %v6846_v45 = vsel %vm563_vm1, %v721_v56, 0  ;;  %v684_v47 = vsel %vm563_vm1, %v652_v33, inf  ;;  %v6858_v54 = vpop.eup %5147 }
 0x186   :  { %v6841_v44 = vsel %vm563_vm1, %v713_v12, 0  ;;  %v1646_v23 = vsub.f32 0.0, %v6457_v35  ;;  %v1654_v55 = vmul.f32 %v1638_v43, %v6781_v52  ;;  %v1655_v40 = vmul.f32 %v1639_v8, %v6781_v52 }
 0x187   :  { %v881_v10 = vand.u32 65535, %v6779_v50  ;;  %v791_v3 = vshrl.u32 %v6841_v44, 16  ;;  %v1674_v8 = vmul.f32 1.442695, %v1656_v62  ;;  %v1663_v52 = vmul.f32 %v1647_v11, %v6837_v13 }
 0x188   :  { %v1662_v0 = vmul.f32 %v1646_v23, %v6837_v13  ;;  %v1670_v35 = vmul.f32 1.442695, %v1654_v55  ;;  %v1672_v46 = vmul.f32 1.442695, %v1655_v40  ;;  %5151 = vpow2.f32 %v1684_v28 }
 0x189   :  { %v608_v19 = vpop.xlane.xlu0 %607  ;;  %v1652_v50 = vsub.f32 0.0, %v6475_v49  ;;  %v895_v56 = vshrl.u32 %v6846_v45, 16  ;;  %v1678_v33 = vmul.f32 1.442695, %v1658_v24  ;;  %v1665_v43 = vmul.f32 %v1649_v27, %v6837_v13 }
 0x18a   :  { %688 = vmin.xlane.f32.xlu0 %v687_v25  ;;  %v6861_v12 = vpop.eup %5149  ;;  %v6866_v53 = vsub.f32 %v6422_v31, %v608_v19  ;;  %5153 = vpow2.f32 %v1670_v35  ;;  %v1664_v25 = vmul.f32 %v1648_v34, %v6837_v13  ;;  %v883_v22 = vcvt.s32.f32 %v881_v10 }
 0x18b   :  { %685 = vmin.xlane.f32.xlu2 %v684_v47  ;;  %5155 = vpow2.f32 %v1672_v46  ;;  %v1686_v47 = vmul.f32 1.442695, %v1662_v0  ;;  %v793_v23 = vcvt.s32.f32 %v791_v3  ;;  %v1688_v49 = vmul.f32 1.442695, %v1663_v52 }
 0x18c   :  { %5157 = vpow2.f32 %v1674_v8  ;;  %v1653_v24 = vsub.f32 0.0, %v6478_v2  ;;  %v1666_v28 = vmul.f32 %v1650_v16, %v6837_v13  ;;  %v897_v55 = vcvt.s32.f32 %v895_v56 }
 0x18d   :  { %781 = vadd.xlane.f32.xlu1 %v779_v7  ;;  %5159 = vpow2.f32 %v1676_v9  ;;  %v1667_v40 = vmul.f32 %v1651_v51, %v6837_v13  ;;  %vm642_vm6 = vcmp.eq.f32.partialorder %v6866_v53, 0.0  ;;  %v1690_v27 = vmul.f32 1.442695, %v1664_v25 }
 0x18e   :  { %5161 = vpow2.f32 %v1678_v33  ;;  %v6877_v62 = vpop.eup %5151  ;;  %v1668_v11 = vmul.f32 %v1652_v50, %v6837_v13  ;;  %v790_v10 = vand.u32 65535, %v6841_v44  ;;  %v1692_v16 = vmul.f32 1.442695, %v1665_v43 }
 0x18f   :  { %5163 = vpow2.f32 %v1686_v47  ;;  %v654_v51 = vsel %vm638_vm11, 3e+38, %v6712_v42  ;;  %v1669_v3 = vmul.f32 %v1653_v24, %v6837_v13  ;;  %v1694_v34 = vmul.f32 1.442695, %v1666_v28 }
 0x190   :  { %v6882_v2 = vpop.eup %5153  ;;  %5165 = vpow2.f32 %v1688_v49  ;;  %v722_v44 = vsel %vm642_vm6, 1, %v10814_v1  ;;  %v1696_v46 = vmul.f32 1.442695, %v1667_v40  ;;  %v1698_v9 = vmul.f32 1.442695, %v1668_v11 }
 0x191   :  { %v6887_v19 = vpop.eup %5155  ;;  %v1702_v0 = vsel %vm563_vm1, %v6882_v2, 0.0  ;;  %5167 = vpow2.f32 %v1690_v27  ;;  %v792_v50 = vcvt.s32.f32 %v790_v10  ;;  %v690_v56 = vsel %vm563_vm1, %v654_v51, inf }
 0x192   :  { %885 = vadd.xlane.f32.xlu0 %v883_v22  ;;  %v6895_v35 = vpop.eup %5157  ;;  %v1703_v52 = vsel %vm563_vm1, %v6887_v19, 0.0  ;;  %v6908_v43 = vsel %vm563_vm1, %v722_v44, 0  ;;  %v646_v22 = vsel %vm630_vm9, 3e+38, %v6703_v14  ;;  %5169 = vpow2.f32 %v1692_v16 }
 0x193   :  { %v584_v7 = vpop.xlane.xlu2 %583  ;;  %796 = vadd.xlane.f32.xlu2 %v793_v23  ;;  %v6902_v13 = vpop.eup %5159  ;;  %v1704_v33 = vadd.f32 %v1703_v52, %v1702_v0  ;;  %v1700_v23 = vmul.f32 1.442695, %v1669_v3  ;;  %5171 = vpow2.f32 %v1694_v34  ;;  %v908_v11 = vshrl.u32 %v6908_v43, 16 }
 0x194   :  { %v6871_v38 = vsub.f32 %v6447_v20, %v584_v7  ;;  %v6905_v25 = vpop.eup %5161  ;;  %v1705_v7 = vsel %vm563_vm1, %v6895_v35, 0.0  ;;  %5173 = vpow2.f32 %v1696_v46  ;;  %v1707_v40 = vsel %vm563_vm1, %v6902_v13, 0.0 }
 0x195   :  { %900 = vadd.xlane.f32.xlu1 %v897_v55  ;;  %v6915_v47 = vpop.eup %5163  ;;  %v1706_v24 = vadd.f32 %v1705_v7, %v1704_v33  ;;  %v894_v55 = vand.u32 65535, %v6846_v45  ;;  %v666_v10 = vsel %vm563_vm1, %v646_v22, inf  ;;  %5175 = vpow2.f32 %v1698_v9 }
 0x196   :  { %vm634_vm8 = vcmp.eq.f32.partialorder %v6871_v38, 0.0  ;;  %v6918_v28 = vpop.eup %5165  ;;  %v1723_v27 = vsel %vm563_vm1, %v6915_v47, 0.0  ;;  %v1709_v44 = vsel %vm563_vm1, %v6905_v25, 0.0  ;;  %5177 = vpow2.f32 %v1700_v23 }
 0x197   :  { %v714_v8 = vsel %vm634_vm8, 1, %v10814_v1  ;;  %v1708_v16 = vadd.f32 %v1707_v40, %v1706_v24  ;;  %v1724_v51 = vsel %vm563_vm1, %v6918_v28, 0.0  ;;  %v6929_v3 = vpop.eup %5167  ;;  %v910_v22 = vcvt.s32.f32 %v908_v11 }
 0x198   :  { %v802_v49 = vsel %vm563_vm1, %v714_v8, 0  ;;  %v1725_v0 = vadd.f32 %v1724_v51, %v1723_v27  ;;  %v1726_v8 = vsel %vm563_vm1, %v6929_v3, 0.0  ;;  %v6935_v52 = vpop.eup %5169  ;;  %v1713_v23 = vsel %vm563_vm1, %v6861_v12, 0.0 }
 0x199   :  { %v804_v34 = vshrl.u32 %v802_v49, 16  ;;  %v1710_v46 = vadd.f32 %v1709_v44, %v1708_v16  ;;  %v6939_v9 = vpop.eup %5171  ;;  %v1728_v40 = vsel %vm563_vm1, %v6935_v52, 0.0 }
 0x19a   :  { %691 = vmin.xlane.f32.xlu0 %v690_v56  ;;  %v1711_v56 = vsel %vm563_vm1, %v6858_v54, 0.0  ;;  %v1727_v33 = vadd.f32 %v1726_v8, %v1725_v0  ;;  %v6946_v27 = vpop.eup %5173  ;;  %v1730_v51 = vsel %vm563_vm1, %v6939_v9, 0.0  ;;  %v803_v0 = vand.u32 65535, %v802_v49 }
 0x19b   :  { %667 = vmin.xlane.f32.xlu2 %v666_v10  ;;  %v611_v45 = vpop.xlane.xlu2 %610  ;;  %v1712_v24 = vadd.f32 %v1711_v56, %v1710_v46  ;;  %v806_v10 = vcvt.s32.f32 %v804_v34  ;;  %v6952_v11 = vpop.eup %5175  ;;  %v1732_v46 = vsel %vm563_vm1, %v6946_v27, 0.0  ;;  %v655_v56 = vsel %vm639_vm13, 3e+38, %v6736_v60 }
 0x19c   :  { %v6942_v7 = vsub.f32 %v6442_v32, %v611_v45  ;;  %v1715_v45 = vsel %vm563_vm1, %v6877_v62, 0.0  ;;  %v6959_v8 = vpop.eup %5177  ;;  %v1734_v49 = vsel %vm563_vm1, %v6952_v11, 0.0  ;;  %vm1763_vm13 = vcmp.eq.f32.partialorder %v6720_v63, 0.0 }
 0x19d   :  { %794 = vadd.xlane.f32.xlu1 %v792_v50  ;;  %v896_v50 = vcvt.s32.f32 %v894_v55  ;;  %v1729_v55 = vadd.f32 %v1728_v40, %v1727_v33  ;;  %v1714_v16 = vadd.f32 %v1713_v23, %v1712_v24  ;;  %v1736_v40 = vsel %vm563_vm1, %v6959_v8, 0.0  ;;  %v587_v23 = vpop.xlane.xlu1 %586 }
 0x19e   :  { %vm643_vm9 = vcmp.eq.f32.partialorder %v6942_v7, 0.0 }
 0x19f   :  { %v1731_v44 = vadd.f32 %v1730_v51, %v1729_v55  ;;  %v1716_v34 = vadd.f32 %v1715_v45, %v1714_v16  ;;  %v723_v33 = vsel %vm643_vm9, 1, %v10814_v1  ;;  %v805_v55 = vcvt.s32.f32 %v803_v0 }
 0x1a0   :  { %v693_v16 = vsel %vm563_vm1, %v655_v56, inf  ;;  %v647_v51 = vsel %vm631_vm12, 3e+38, %v6723_v29  ;;  %v6976_v45 = vsel %vm563_vm1, %v723_v33, 0  ;;  %v907_v0 = vand.u32 65535, %v6908_v43 }
 0x1a1   :  { %v921_v56 = vshrl.u32 %v6976_v45, 16  ;;  %vm1762_vm12 = vcmp.eq.f32.partialorder %v6695_v5, 0.0 }
 0x1a2   :  { %898 = vadd.xlane.f32.xlu0 %v896_v50  ;;  %v1733_v50 = vadd.f32 %v1732_v46, %v1731_v44 }
 0x1a3   :  { %809 = vadd.xlane.f32.xlu2 %v806_v10 }
 0x1a4   :  { %v1735_v24 = vadd.f32 %v1734_v49, %v1733_v50  ;;  %v6979_v50 = vsub.f32 %v6452_v37, %v587_v23 }
 0x1a5   :  { %913 = vadd.xlane.f32.xlu1 %v910_v22  ;;  %v1717_v22 = vrot.slane %v1716_v34, 4 }
 0x1a6   :  { %v1737_v44 = vadd.f32 %v1736_v40, %v1735_v24  ;;  %vm635_vm11 = vcmp.eq.f32.partialorder %v6979_v50, 0.0  ;;  %v909_v24 = vcvt.s32.f32 %v907_v0  ;;  %v923_v40 = vcvt.s32.f32 %v921_v56 }
 0x1a7   :  { %v1718_v10 = vadd.f32 %v1717_v22, %v1716_v34  ;;  %v669_v34 = vsel %vm563_vm1, %v647_v51, inf  ;;  %v715_v23 = vsel %vm635_vm11, 1, %v10814_v1 }
 0x1a8   :  { %v1738_v49 = vrot.slane %v1737_v44, 4  ;;  %v815_v43 = vsel %vm563_vm1, %v715_v23, 0 }
 0x1a9   :  { %v1719_v46 = vrot.slane %v1718_v10, 2  ;;  %v817_v51 = vshrl.u32 %v815_v43, 16  ;;  %v816_v0 = vand.u32 65535, %v815_v43 }
 0x1aa   :  { %694 = vmin.xlane.f32.xlu0 %v693_v16  ;;  %v1739_v32 = vadd.f32 %v1738_v49, %v1737_v44  ;;  %v656_v49 = vsel %vm640_vm3, 3e+38, %v6755_v59 }
 0x1ab   :  { %v1720_v22 = vadd.f32 %v1719_v46, %v1718_v10  ;;  %670 = vmin.xlane.f32.xlu2 %v669_v34  ;;  %v819_v44 = vcvt.s32.f32 %v817_v51  ;;  %v818_v1 = vcvt.s32.f32 %v816_v0 }
 0x1ac   :  { %v1740_v33 = vrot.slane %v1739_v32, 2 }
 0x1ad   :  { %807 = vadd.xlane.f32.xlu1 %v805_v55  ;;  %v1721_v20 = vrot.slane %v1720_v22, 1 }
 0x1ae   :  { %v1741_v16 = vadd.f32 %v1740_v33, %v1739_v32  ;;  %v649_v32 = vsel %vm633_vm14, 3e+38, %v6798_v36  ;;  %v672_v33 = vsel %vm563_vm1, %v6787_v4, inf }
 0x1af   :  { %v1722_v55 = vadd.f32 %v1721_v20, %v1720_v22  ;;  %v696_v20 = vsel %vm563_vm1, %v656_v49, inf }
 0x1b0   :  { %v1742_v10 = vrot.slane %v1741_v16, 1 }
 0x1b1   :  { %5179 = vrcp.f32 %v1722_v55  ;;  %v675_v55 = vsel %vm563_vm1, %v649_v32, inf }
 0x1b2   :  { %911 = vadd.xlane.f32.xlu0 %v909_v24  ;;  %v1743_v46 = vadd.f32 %v1742_v10, %v1741_v16 }
 0x1b3   :  { %822 = vadd.xlane.f32.xlu2 %v819_v44 }
 0x1b4   :  { %5181 = vrcp.f32 %v1743_v46 }
 0x1b5   :  { %926 = vadd.xlane.f32.xlu1 %v923_v40 }
 0x1b7   :  { %v5180_v34 = vpop.eup %5179 }
 0x1b8   :  { %v1746_v56 = vmul.f32 %v5180_v34, %v6882_v2  ;;  %v1747_v22 = vmul.f32 %v5180_v34, %v6887_v19  ;;  %v657_v2 = vsel %vm641_vm0, 3e+38, %v6803_v48  ;;  %v920_v19 = vand.u32 65535, %v6976_v45 }
 0x1b9   :  { %v1748_v63 = vmul.f32 %v5180_v34, %v6895_v35 }
 0x1ba   :  { %697 = vmin.xlane.f32.xlu0 %v696_v20  ;;  %v7003_v24 = vsel %vm1762_vm12, 0.015625, %v1746_v56  ;;  %v7007_v40 = vsel %vm1762_vm12, 0.015625, %v1747_v22  ;;  %v5182_v23 = vpop.eup %5181  ;;  %v922_v20 = vcvt.s32.f32 %v920_v19  ;;  %v651_v56 = vsel %vm635_vm11, 3e+38, %v6979_v50 }
 0x1bb   :  { %673 = vmin.xlane.f32.xlu2 %v672_v33  ;;  %v1755_v4 = vmul.f32 %v5182_v23, %v6918_v28  ;;  %v1754_v43 = vmul.f32 %v5182_v23, %v6915_v47  ;;  %v1756_v16 = vmul.f32 %v5182_v23, %v6929_v3  ;;  %v1757_v51 = vmul.f32 %v5182_v23, %v6935_v52 }
 0x1bc   :  { %v1758_v10 = vmul.f32 %v5182_v23, %v6939_v9  ;;  %v1760_v44 = vmul.f32 %v5182_v23, %v6952_v11  ;;  %v1759_v46 = vmul.f32 %v5182_v23, %v6946_v27  ;;  %v1761_v49 = vmul.f32 %v5182_v23, %v6959_v8 }
 0x1bd   :  { %820 = vadd.xlane.f32.xlu1 %v818_v1  ;;  %v7025_v45 = vsel %vm1763_vm13, 0.015625, %v1755_v4  ;;  %v7029_v28 = vsel %vm1763_vm13, 0.015625, %v1754_v43  ;;  %v7033_v47 = vsel %vm1763_vm13, 0.015625, %v1756_v16  ;;  %v7037_v3 = vsel %vm1763_vm13, 0.015625, %v1757_v51 }
 0x1be   :  { %v7041_v52 = vsel %vm1763_vm13, 0.015625, %v1758_v10  ;;  %v7045_v9 = vsel %vm1763_vm13, 0.015625, %v1760_v44  ;;  %v7049_v27 = vsel %vm1763_vm13, 0.015625, %v1759_v46  ;;  %v7053_v11 = vsel %vm1763_vm13, 0.015625, %v1761_v49 }
 0x1bf   :  { %10817 = vst [vmem:[#allocation18_spill] sm:$0xff] %v7041_v52  ;;  %v699_v8 = vsel %vm563_vm1, %v657_v2, inf  ;;  %v658_v1 = vsel %vm642_vm6, 3e+38, %v6866_v53  ;;  %v1749_v22 = vmul.f32 %v5180_v34, %v6902_v13  ;;  %v1751_v33 = vmul.f32 %v5180_v34, %v6858_v54 }
 0x1c0   :  { %10818 = vst [vmem:[#allocation19_spill] sm:$0xff] %v7045_v9  ;;  %v1750_v23 = vmul.f32 %v5180_v34, %v6905_v25  ;;  %v650_v2 = vsel %vm634_vm8, 3e+38, %v6871_v38  ;;  %v1752_v19 = vmul.f32 %v5180_v34, %v6861_v12  ;;  %v1753_v4 = vmul.f32 %v5180_v34, %v6877_v62 }
 0x1c1   :  { %10819 = vst [vmem:[#allocation20_spill] sm:$0xff] %v7049_v27  ;;  %v7074_v35 = vsel %vm1762_vm12, 0.015625, %v1748_v63  ;;  %v7078_v54 = vsel %vm1762_vm12, 0.015625, %v1749_v22  ;;  %v7082_v13 = vsel %vm1762_vm12, 0.015625, %v1751_v33  ;;  %v681_v12 = vsel %vm563_vm1, %v651_v56, inf }
 0x1c2   :  { %10820 = vst [vmem:[#allocation21_spill] sm:$0xff] %v7053_v11  ;;  %676 = vmin.xlane.f32.xlu0 %v675_v55  ;;  %v702_v55 = vsel %vm563_vm1, %v658_v1, inf  ;;  %v7086_v25 = vsel %vm1762_vm12, 0.015625, %v1750_v23  ;;  %v7091_v62 = vsel %vm1762_vm12, 0.015625, %v1752_v19  ;;  %v7095_v34 = vsel %vm1762_vm12, 0.015625, %v1753_v4 }
 0x1c3   :  { %924 = vadd.xlane.f32.xlu2 %v922_v20  ;;  %10821 = vst [vmem:[#allocation22_spill] sm:$0xff] %v7082_v13  ;;  %v678_v16 = vsel %vm563_vm1, %v650_v2, inf  ;;  %v659_v44 = vsel %vm643_vm9, 3e+38, %v6942_v7 }
 0x1c4   :  { %10822 = vst [vmem:[#allocation23_spill] sm:$0xff] %v7086_v25  ;;  %v705_v5 = vsel %vm563_vm1, %v659_v44, inf }
 0x1c5   :  { %v662_v0 = vpop.xlane.xlu0 %661  ;;  %700 = vmin.xlane.f32.xlu1 %v699_v8  ;;  %10823 = vst [vmem:[#allocation24_spill] sm:$0xff] %v7091_v62 }
 0x1c6   :  { %10824 = vst [vmem:[#allocation25_spill] sm:$0xff] %v7095_v34 }
 0x1c8   :  { %v665_v32 = vpop.xlane.xlu1 %664 }
 0x1ca   :  { %703 = vmin.xlane.f32.xlu0 %v702_v55 }
 0x1cb   :  { %679 = vmin.xlane.f32.xlu2 %v678_v16 }
 0x1cd   :  { %682 = vmin.xlane.f32.xlu1 %v681_v12  ;;  %v732_v43 = vpop.xlane.xlu0 %731 }
 0x1ce   :  { %v7098_v10 = vpop.xlane.xlu2 %835  ;;  %v734_v46 = vcvt.f32.s32 %v732_v43 }
 0x1d0   :  { %v745_v51 = vpop.xlane.xlu1 %744  ;;  %v735_v1 = vshll.u32 %v734_v46, 16 }
 0x1d1   :  { %v747_v49 = vcvt.f32.s32 %v745_v51 }
 0x1d3   :  { %706 = vmin.xlane.f32.xlu2 %v705_v5  ;;  %v748_v22 = vshll.u32 %v747_v49, 16 }
 0x1d5   :  { %v7103_v8 = vpop.xlane.xlu0 %848 }
 0x1d6   :  { %v743_v63 = vpop.xlane.xlu2 %742 }
 0x1d7   :  { %v746_v33 = vcvt.f32.s32 %v743_v63 }
 0x1d8   :  { %v730_v20 = vpop.xlane.xlu1 %729 }
 0x1d9   :  { %v733_v56 = vcvt.f32.s32 %v730_v20  ;;  %v749_v55 = vadd.s32 %v748_v22, %v746_v33 }
 0x1db   :  { %v736_v23 = vadd.s32 %v735_v1, %v733_v56  ;;  %vm933_vm3 = vcmp.ge.s32.totalorder %v749_v55, 2 }
 0x1dc   :  { %v7111_v12 = vsel %vm933_vm3, 0.0, %v665_v32 }
 0x1dd   :  { %vm932_vm2 = vcmp.ge.s32.totalorder %v736_v23, 2  ;;  %v7108_v19 = vpop.xlane.xlu0 %757  ;;  %v965_v43 = vadd.f32 1e-08, %v7111_v12 }
 0x1de   :  { %v7106_v2 = vsel %vm932_vm2, 0.0, %v662_v0  ;;  %v847_v51 = vpop.xlane.xlu2 %846 }
 0x1df   :  { %v964_v4 = vadd.f32 1e-08, %v7106_v2  ;;  %v1006_v23 = vand.u32 2147483648, %v965_v43  ;;  %v1004_v37 = vand.u32 2147483647, %v965_v43  ;;  %vm1000_vm14 = vweird.f32 %v965_v43 }
 0x1e0   :  { %v834_v16 = vpop.xlane.xlu1 %833 }
 0x1e1   :  { %5183 = vrcp.f32 %v964_v4  ;;  %v991_v32 = vand.u32 2147483648, %v964_v4  ;;  %v989_v33 = vand.u32 2147483647, %v964_v4  ;;  %vm985_vm7 = vweird.f32 %v964_v4 }
 0x1e2   :  { %5185 = vrcp.f32 %v965_v43  ;;  %vm1005_vm6 = vcmp.eq.f32.partialorder %v1004_v37, 8.507059e+37 }
 0x1e3   :  { %v992_v15 = vor.u32 1.1754944e-38, %v991_v32  ;;  %vm990_vm15 = vcmp.eq.f32.partialorder %v989_v33, 8.507059e+37 }
 0x1e5   :  { %v7114_v44 = vpop.xlane.xlu0 %861 }
 0x1e6   :  { %v7118_v1 = vpop.xlane.xlu2 %770 }
 0x1e7   :  { %v5184_v46 = vpop.eup %5183 }
 0x1e8   :  { %v5186_v49 = vpop.eup %5185  ;;  %v981_v5 = vmul.f32 %v5184_v46, %v964_v4  ;;  %v7116_v0 = vpop.xlane.xlu1 %755  ;;  %vm986_vm4 = vweird.f32 %v5184_v46  ;;  %v1221_v4 = vsub.f32 0.0, %v6673_v26 }
 0x1e9   :  { %v996_v20 = vmul.f32 %v5186_v49, %v965_v43  ;;  %vm1001_vm5 = vweird.f32 %v5186_v49  ;;  %vm987_vm10 = vmor %vm985_vm7, %vm986_vm4  ;;  %v851_v43 = vcvt.f32.s32 %v7103_v8 }
 0x1ea   :  { %v982_v56 = vsub.f32 1.0, %v981_v5  ;;  %vm1002_vm0 = vmor %vm1000_vm14, %vm1001_vm5 }
 0x1eb   :  { %v997_v63 = vsub.f32 1.0, %v996_v20  ;;  %v1007_v20 = vor.u32 1.1754944e-38, %v1006_v23  ;;  %v838_v23 = vcvt.f32.s32 %v7098_v10 }
 0x1ec   :  { %v983_v22 = vmul.f32 %v5184_v46, %v982_v56 }
 0x1ed   :  { %v998_v55 = vmul.f32 %v5186_v49, %v997_v63  ;;  %v7120_v31 = vpop.xlane.xlu0 %859 }
 0x1ee   :  { %v984_v21 = vadd.f32 %v5184_v46, %v983_v22  ;;  %v7124_v56 = vpop.xlane.xlu2 %768 }
 0x1ef   :  { %v999_v58 = vadd.f32 %v5186_v49, %v998_v55 }
 0x1f0   :  { %v7122_v57 = vpop.xlane.xlu1 %874  ;;  %v988_v5 = vsel %vm987_vm10, %v5184_v46, %v984_v21  ;;  %v850_v21 = vcvt.f32.s32 %v847_v51 }
 0x1f1   :  { %v993_v41 = vsel %vm990_vm15, %v992_v15, %v988_v5  ;;  %v1003_v63 = vsel %vm1002_vm0, %v5186_v49, %v999_v58  ;;  %v852_v58 = vshll.u32 %v851_v43, 16  ;;  %v839_v49 = vshll.u32 %v838_v23, 16 }
 0x1f2   :  { %v994_v18 = vmul.f32 5.7525725, %v993_v41  ;;  %v1008_v22 = vsel %vm1005_vm6, %v1007_v20, %v1003_v63  ;;  %v837_v41 = vcvt.f32.s32 %v834_v16  ;;  %v864_v43 = vcvt.f32.s32 %v7114_v44 }
 0x1f3   :  { %v1009_v32 = vmul.f32 5.7525725, %v1008_v22  ;;  %v853_v26 = vadd.s32 %v852_v58, %v850_v21 }
 0x1f4   :  { %v1236_v55 = vmul.f32 %v1220_v61, %v994_v18  ;;  %v840_v8 = vadd.s32 %v839_v49, %v837_v41  ;;  %v865_v58 = vshll.u32 %v864_v43, 16 }
 0x1f5   :  { %v1237_v11 = vmul.f32 %v1221_v4, %v1009_v32  ;;  %v7129_v46 = vpop.xlane.xlu0 %783  ;;  %vm941_vm8 = vcmp.ge.s32.totalorder %v853_v26, 2  ;;  %v760_v32 = vcvt.f32.s32 %v7108_v19 }
 0x1f6   :  { %v1252_v33 = vmul.f32 1.442695, %v1236_v55  ;;  %v7134_v30 = vpop.xlane.xlu2 %887  ;;  %vm940_vm9 = vcmp.ge.s32.totalorder %v840_v8, 2  ;;  %v863_v55 = vcvt.f32.s32 %v7120_v31 }
 0x1f7   :  { %v1254_v15 = vmul.f32 1.442695, %v1237_v11  ;;  %v761_v23 = vshll.u32 %v760_v32, 16 }
 0x1f8   :  { %v7132_v37 = vpop.xlane.xlu1 %872  ;;  %5187 = vpow2.f32 %v1252_v33  ;;  %v866_v8 = vadd.s32 %v865_v58, %v863_v55 }
 0x1f9   :  { %5189 = vpow2.f32 %v1254_v15  ;;  %v759_v15 = vcvt.f32.s32 %v7116_v0 }
 0x1fa   :  { %vm942_vm12 = vcmp.ge.s32.totalorder %v866_v8, 2 }
 0x1fb   :  { %v762_v44 = vadd.s32 %v761_v23, %v759_v15 }
 0x1fd   :  { %v689_v18 = vpop.xlane.xlu0 %688  ;;  %vm934_vm2 = vcmp.ge.s32.totalorder %v762_v44, 2  ;;  %v877_v44 = vcvt.f32.s32 %v7122_v57 }
 0x1fe   :  { %v7136_v61 = vpop.eup %5187  ;;  %v7142_v10 = vsel %vm941_vm8, 0.0, %v689_v18  ;;  %v686_v63 = vpop.xlane.xlu2 %685 }
 0x1ff   :  { %v7138_v51 = vpop.eup %5189  ;;  %v1284_v11 = vsel %vm563_vm1, %v7136_v61, 0.0  ;;  %v973_v16 = vadd.f32 1e-08, %v7142_v10  ;;  %v7149_v22 = vsel %vm940_vm9, 0.0, %v686_v63  ;;  %v878_v57 = vshll.u32 %v877_v44, 16 }
 0x200   :  { %v7144_v5 = vpop.xlane.xlu1 %781  ;;  %1285 = vadd.xlane.f32.xlu0 %v1284_v11  ;;  %v1287_v20 = vsel %vm563_vm1, %v7138_v51, 0.0  ;;  %v972_v4 = vadd.f32 1e-08, %v7149_v22 }
 0x201   :  { %1288 = vadd.xlane.f32.xlu1 %v1287_v20  ;;  %5191 = vrcp.f32 %v973_v16  ;;  %v1126_v63 = vand.u32 2147483648, %v973_v16  ;;  %v1124_v32 = vand.u32 2147483647, %v973_v16  ;;  %vm1120_vm13 = vweird.f32 %v973_v16 }
 0x202   :  { %5193 = vrcp.f32 %v972_v4  ;;  %v1111_v27 = vand.u32 2147483648, %v972_v4  ;;  %vm1105_vm7 = vweird.f32 %v972_v4 }
 0x203   :  { %v1127_v58 = vor.u32 1.1754944e-38, %v1126_v63  ;;  %vm1125_vm5 = vcmp.eq.f32.partialorder %v1124_v32, 8.507059e+37 }
 0x205   :  { %v7155_v21 = vpop.xlane.xlu0 %885 }
 0x206   :  { %v7160_v49 = vpop.xlane.xlu2 %796 }
 0x207   :  { %v5192_v33 = vpop.eup %5191 }
 0x208   :  { %v7158_v41 = vpop.xlane.xlu1 %900  ;;  %v1116_v26 = vmul.f32 %v5192_v33, %v973_v16  ;;  %v5194_v18 = vpop.eup %5193  ;;  %vm1121_vm11 = vweird.f32 %v5192_v33 }
 0x209   :  { %v1101_v11 = vmul.f32 %v5194_v18, %v972_v4  ;;  %vm1122_vm3 = vmor %vm1120_vm13, %vm1121_vm11  ;;  %vm1106_vm4 = vweird.f32 %v5194_v18 }
 0x20a   :  { %v1117_v19 = vsub.f32 1.0, %v1116_v26  ;;  %v1109_v26 = vand.u32 2147483647, %v972_v4  ;;  %vm1107_vm10 = vmor %vm1105_vm7, %vm1106_vm4  ;;  %v876_v4 = vcvt.f32.s32 %v7132_v37 }
 0x20b   :  { %v1102_v31 = vsub.f32 1.0, %v1101_v11  ;;  %v1229_v11 = vsub.f32 0.0, %v6689_v39 }
 0x20c   :  { %v1118_v20 = vmul.f32 %v5192_v33, %v1117_v19  ;;  %vm1110_vm14 = vcmp.eq.f32.partialorder %v1109_v26, 8.507059e+37 }
 0x20d   :  { %v692_v34 = vpop.xlane.xlu0 %691  ;;  %v1103_v62 = vmul.f32 %v5194_v18, %v1102_v31  ;;  %v773_v31 = vcvt.f32.s32 %v7118_v1 }
 0x20e   :  { %v7162_v0 = vsel %vm942_vm12, 0.0, %v692_v34  ;;  %v1119_v43 = vadd.f32 %v5192_v33, %v1118_v20  ;;  %v668_v23 = vpop.xlane.xlu2 %667 }
 0x20f   :  { %v7167_v55 = vadd.f32 1e-08, %v7162_v0  ;;  %v7170_v16 = vsel %vm934_vm2, 0.0, %v668_v23  ;;  %v1104_v19 = vadd.f32 %v5194_v18, %v1103_v62  ;;  %v1228_v62 = vsub.f32 0.0, %v6682_v6 }
 0x210   :  { %v7164_v9 = vpop.xlane.xlu1 %794  ;;  %v1123_v15 = vsel %vm1122_vm3, %v5192_v33, %v1119_v43  ;;  %v7173_v34 = vadd.f32 1e-08, %v7170_v16  ;;  %v1112_v33 = vor.u32 1.1754944e-38, %v1111_v27  ;;  %v774_v37 = vshll.u32 %v773_v31, 16 }
 0x211   :  { %5195 = vrcp.f32 %v7167_v55  ;;  %v1128_v8 = vsel %vm1125_vm5, %v1127_v58, %v1123_v15  ;;  %v1108_v63 = vsel %vm1107_vm10, %v5194_v18, %v1104_v19  ;;  %v772_v58 = vcvt.f32.s32 %v7124_v56 }
 0x212   :  { %v1129_v20 = vmul.f32 5.7525725, %v1128_v8  ;;  %5197 = vrcp.f32 %v7173_v34  ;;  %v1113_v23 = vsel %vm1110_vm14, %v1112_v33, %v1108_v63  ;;  %v879_v19 = vadd.s32 %v878_v57, %v876_v4 }
 0x213   :  { %v1114_v39 = vmul.f32 5.7525725, %v1113_v23  ;;  %v786_v63 = vcvt.f32.s32 %v7129_v46  ;;  %v775_v23 = vadd.s32 %v774_v37, %v772_v58  ;;  %v1141_v31 = vand.u32 2147483648, %v7167_v55 }
 0x214   :  { %v1245_v43 = vmul.f32 %v1229_v11, %v1129_v20  ;;  %v1230_v20 = vsub.f32 0.0, %v6712_v42  ;;  %vm943_vm0 = vcmp.ge.s32.totalorder %v879_v19, 2  ;;  %v1139_v57 = vand.u32 2147483647, %v7167_v55 }
 0x215   :  { %v7180_v32 = vpop.xlane.xlu0 %898  ;;  %v1244_v1 = vmul.f32 %v1228_v62, %v1114_v39  ;;  %vm1135_vm6 = vweird.f32 %v7167_v55  ;;  %v890_v37 = vcvt.f32.s32 %v7134_v30  ;;  %vm935_vm8 = vcmp.ge.s32.totalorder %v775_v23, 2 }
 0x216   :  { %v1270_v8 = vmul.f32 1.442695, %v1245_v43  ;;  %v7187_v26 = vpop.xlane.xlu2 %809  ;;  %vm1140_vm11 = vcmp.eq.f32.partialorder %v1139_v57, 8.507059e+37  ;;  %vm1015_vm12 = vweird.f32 %v7173_v34  ;;  %v902_v57 = vcvt.f32.s32 %v7180_v32 }
 0x217   :  { %v5196_v15 = vpop.eup %5195  ;;  %v1268_v33 = vmul.f32 1.442695, %v1244_v1  ;;  %v787_v1 = vshll.u32 %v786_v63, 16  ;;  %v1142_v63 = vor.u32 1.1754944e-38, %v1141_v31 }
 0x218   :  { %v7184_v27 = vpop.xlane.xlu1 %913  ;;  %v1131_v18 = vmul.f32 %v5196_v15, %v7167_v55  ;;  %5199 = vpow2.f32 %v1270_v8  ;;  %v7189_v11 = vpop.eup %5197  ;;  %vm1136_vm15 = vweird.f32 %v5196_v15  ;;  %v785_v55 = vcvt.f32.s32 %v7144_v5 }
 0x219   :  { %v1011_v43 = vmul.f32 %v7189_v11, %v7173_v34  ;;  %5201 = vpow2.f32 %v1268_v33  ;;  %vm7213_vm9 = vmor %vm1135_vm6, %vm1136_vm15  ;;  %v889_v5 = vcvt.f32.s32 %v7155_v21  ;;  %v1019_v21 = vand.u32 2147483647, %v7173_v34 }
 0x21a   :  { %v1132_v44 = vsub.f32 1.0, %v1131_v18  ;;  %vm1016_vm13 = vweird.f32 %v7189_v11 }
 0x21b   :  { %v1012_v46 = vsub.f32 1.0, %v1011_v43  ;;  %vm1017_vm2 = vmor %vm1015_vm12, %vm1016_vm13  ;;  %vm1020_vm3 = vcmp.eq.f32.partialorder %v1019_v21, 8.507059e+37 }
 0x21c   :  { %v1133_v62 = vmul.f32 %v5196_v15, %v1132_v44 }
 0x21d   :  { %v695_v42 = vpop.xlane.xlu0 %694  ;;  %v1013_v4 = vmul.f32 %v7189_v11, %v1012_v46  ;;  %v903_v46 = vcvt.f32.s32 %v7158_v41 }
 0x21e   :  { %v7202_v8 = vsel %vm943_vm0, 0.0, %v695_v42  ;;  %v1134_v18 = vadd.f32 %v5196_v15, %v1133_v62  ;;  %v7204_v58 = vpop.eup %5199  ;;  %v671_v62 = vpop.xlane.xlu2 %670  ;;  %v799_v42 = vcvt.f32.s32 %v7160_v49  ;;  %v1021_v49 = vand.u32 2147483648, %v7173_v34 }
 0x21f   :  { %v7208_v44 = vadd.f32 1e-08, %v7202_v8  ;;  %v1311_v43 = vsel %vm563_vm1, %v7204_v58, 0.0  ;;  %v7224_v23 = vsel %vm935_vm8, 0.0, %v671_v62  ;;  %v7226_v39 = vpop.eup %5201 }
 0x220   :  { %v7210_v33 = vpop.xlane.xlu1 %807  ;;  %v1138_v30 = vsel %vm7213_vm9, %v5196_v15, %v1134_v18  ;;  %1312 = vadd.xlane.f32.xlu0 %v1311_v43  ;;  %v7231_v56 = vadd.f32 1e-08, %v7224_v23  ;;  %v1308_v31 = vsel %vm563_vm1, %v7226_v39, 0.0  ;;  %v891_v43 = vshll.u32 %v890_v37, 16 }
 0x221   :  { %5203 = vrcp.f32 %v7208_v44  ;;  %v1143_v19 = vsel %vm1140_vm11, %v1142_v63, %v1138_v30  ;;  %1309 = vadd.xlane.f32.xlu2 %v1308_v31  ;;  %v800_v62 = vshll.u32 %v799_v42, 16  ;;  %v7243_v15 = vadd.s32 %v787_v1, %v785_v55 }
 0x222   :  { %v1144_v18 = vmul.f32 5.7525725, %v1143_v19  ;;  %5205 = vrcp.f32 %v7231_v56  ;;  %v892_v6 = vadd.s32 %v891_v43, %v889_v5  ;;  %v1014_v19 = vadd.f32 %v7189_v11, %v1013_v4 }
 0x223   :  { %v798_v31 = vcvt.f32.s32 %v7164_v9  ;;  %v1022_v42 = vor.u32 1.1754944e-38, %v1021_v49  ;;  %v812_v4 = vcvt.f32.s32 %v7187_v26  ;;  %vm936_vm4 = vcmp.ge.s32.totalorder %v7243_v15, 2 }
 0x224   :  { %v1246_v63 = vmul.f32 %v1230_v20, %v1144_v18  ;;  %v916_v20 = vcvt.f32.s32 %v7184_v27  ;;  %v1018_v34 = vsel %vm1017_vm2, %v7189_v11, %v1014_v19  ;;  %v904_v27 = vshll.u32 %v903_v46, 16 }
 0x225   :  { %v7241_v30 = vpop.xlane.xlu0 %911  ;;  %v801_v5 = vadd.s32 %v800_v62, %v798_v31  ;;  %v1023_v9 = vsel %vm1020_vm3, %v1022_v42, %v1018_v34  ;;  %vm944_vm5 = vcmp.ge.s32.totalorder %v892_v6, 2  ;;  %v10827_v62 = vsub.f32 0.0, %v6703_v14 }
 0x226   :  { %v1272_v41 = vmul.f32 1.442695, %v1246_v63  ;;  %v823_v55 = vpop.xlane.xlu2 %822  ;;  %v1024_v49 = vmul.f32 5.7525725, %v1023_v9  ;;  %v1156_v63 = vand.u32 2147483648, %v7208_v44  ;;  %v917_v26 = vshll.u32 %v916_v20, 16 }
 0x227   :  { %v5204_v37 = vpop.eup %5203  ;;  %v1154_v31 = vand.u32 2147483647, %v7208_v44  ;;  %vm1150_vm7 = vweird.f32 %v7208_v44  ;;  %vm937_vm10 = vcmp.ge.s32.totalorder %v801_v5, 2  ;;  %v905_v46 = vadd.s32 %v904_v27, %v902_v57 }
 0x228   :  { %v7250_v25 = vpop.xlane.xlu1 %926  ;;  %v1146_v1 = vmul.f32 %v5204_v37, %v7208_v44  ;;  %5207 = vpow2.f32 %v1272_v41  ;;  %v7256_v18 = vpop.eup %5205  ;;  %v1238_v19 = vmul.f32 %v10827_v62, %v1024_v49  ;;  %v813_v41 = vshll.u32 %v812_v4, 16 }
 0x229   :  { %v1026_v11 = vmul.f32 %v7256_v18, %v7231_v56  ;;  %vm1151_vm14 = vweird.f32 %v5204_v37  ;;  %v915_v20 = vcvt.f32.s32 %v7241_v30  ;;  %v1157_v4 = vor.u32 1.1754944e-38, %v1156_v63 }
 0x22a   :  { %v1147_v43 = vsub.f32 1.0, %v1146_v1  ;;  %v1256_v9 = vmul.f32 1.442695, %v1238_v19  ;;  %vm1152_vm15 = vmor %vm1150_vm7, %vm1151_vm14  ;;  %vm1155_vm0 = vcmp.eq.f32.partialorder %v1154_v31, 8.507059e+37  ;;  %v825_v30 = vcvt.f32.s32 %v823_v55 }
 0x22b   :  { %v1027_v42 = vsub.f32 1.0, %v1026_v11  ;;  %v1036_v11 = vand.u32 2147483648, %v7231_v56  ;;  %v811_v19 = vcvt.f32.s32 %v7210_v33  ;;  %vm1030_vm6 = vweird.f32 %v7231_v56 }
 0x22c   :  { %v1148_v21 = vmul.f32 %v5204_v37, %v1147_v43  ;;  %5209 = vpow2.f32 %v1256_v9  ;;  %vm1031_vm8 = vweird.f32 %v7256_v18  ;;  %v1034_v55 = vand.u32 2147483647, %v7231_v56 }
 0x22d   :  { %v698_v1 = vpop.xlane.xlu0 %697  ;;  %v1028_v14 = vmul.f32 %v7256_v18, %v1027_v42  ;;  %vm945_vm9 = vcmp.ge.s32.totalorder %v905_v46, 2  ;;  %v918_v33 = vadd.s32 %v917_v26, %v915_v20  ;;  %v10829_v15 = vsub.f32 0.0, %v6736_v60  ;;  %vm7297_vm11 = vmor %vm1030_vm6, %vm1031_vm8 }
 0x22e   :  { %v7267_v34 = vsel %vm944_vm5, 0.0, %v698_v1  ;;  %v1149_v32 = vadd.f32 %v5204_v37, %v1148_v21  ;;  %v7269_v6 = vpop.eup %5207  ;;  %v674_v21 = vpop.xlane.xlu2 %673  ;;  %v826_v9 = vshll.u32 %v825_v30, 16  ;;  %v1037_v56 = vor.u32 1.1754944e-38, %v1036_v11 }
 0x22f   :  { %v7274_v43 = vadd.f32 1e-08, %v7267_v34  ;;  %v1314_v57 = vsel %vm563_vm1, %v7269_v6, 0.0  ;;  %v7285_v44 = vsel %vm936_vm4, 0.0, %v674_v21  ;;  %v1029_v42 = vadd.f32 %v7256_v18, %v1028_v14 }
 0x230   :  { %v821_v49 = vpop.xlane.xlu1 %820  ;;  %v1153_v27 = vsel %vm1152_vm15, %v5204_v37, %v1149_v32  ;;  %1315 = vadd.xlane.f32.xlu2 %v1314_v57  ;;  %10828 = vst [vmem:[#allocation26_spill] sm:$0xff] %v7285_v44  ;;  %v7290_v37 = vadd.f32 1e-08, %v7285_v44  ;;  %v929_v32 = vcvt.f32.s32 %v7250_v25  ;;  %v7310_v26 = vadd.s32 %v813_v41, %v811_v19 }
 0x231   :  { %5211 = vrcp.f32 %v7274_v43  ;;  %v1158_v62 = vsel %vm1155_vm0, %v1157_v4, %v1153_v27  ;;  %v1033_v4 = vsel %vm7297_vm11, %v7256_v18, %v1029_v42  ;;  %vm1035_vm12 = vcmp.eq.f32.partialorder %v1034_v55, 8.507059e+37 }
 0x232   :  { %v1159_v63 = vmul.f32 5.7525725, %v1158_v62  ;;  %5213 = vrcp.f32 %v7290_v37  ;;  %v7305_v57 = vpop.eup %5209  ;;  %v824_v27 = vcvt.f32.s32 %v821_v49  ;;  %v1038_v11 = vsel %vm1035_vm12, %v1037_v56, %v1033_v4 }
 0x233   :  { %v1290_v18 = vsel %vm563_vm1, %v7305_v57, 0.0  ;;  %v1039_v41 = vmul.f32 5.7525725, %v1038_v11  ;;  %v10833_v46 = vsub.f32 0.0, %v6723_v29  ;;  %v930_v4 = vshll.u32 %v929_v32, 16 }
 0x234   :  { %v1247_v31 = vmul.f32 %v10829_v15, %v1159_v63  ;;  %1291 = vadd.xlane.f32.xlu1 %v1290_v18  ;;  %v827_v63 = vadd.s32 %v826_v9, %v824_v27  ;;  %vm946_vm13 = vcmp.ge.s32.totalorder %v918_v33, 2  ;;  %vm938_vm2 = vcmp.ge.s32.totalorder %v7310_v26, 2 }
 0x235   :  { %v677_v14 = vpop.xlane.xlu0 %676  ;;  %v1239_v1 = vmul.f32 %v10833_v46, %v1039_v41  ;;  %vm1165_vm3 = vweird.f32 %v7274_v43  ;;  %v1171_v29 = vand.u32 2147483648, %v7274_v43 }
 0x236   :  { %v7308_v25 = vsel %vm937_vm10, 0.0, %v677_v14  ;;  %v1274_v60 = vmul.f32 1.442695, %v1247_v31  ;;  %v925_v42 = vpop.xlane.xlu2 %924  ;;  %vm939_vm4 = vcmp.ge.s32.totalorder %v827_v63, 2  ;;  %vm1045_vm10 = vweird.f32 %v7290_v37 }
 0x237   :  { %v7312_v20 = vpop.eup %5211  ;;  %v7315_v30 = vadd.f32 1e-08, %v7308_v25  ;;  %v928_v56 = vcvt.f32.s32 %v925_v42  ;;  %v1258_v27 = vmul.f32 1.442695, %v1239_v1 }
 0x238   :  { %v701_v21 = vpop.xlane.xlu1 %700  ;;  %v1161_v5 = vmul.f32 %v7312_v20, %v7274_v43  ;;  %5215 = vpow2.f32 %v1274_v60  ;;  %v7333_v14 = vpop.eup %5213  ;;  %vm1166_vm7 = vweird.f32 %v7312_v20 }
 0x239   :  { %v7322_v62 = vsel %vm945_vm9, 0.0, %v701_v21  ;;  %5217 = vrcp.f32 %v7315_v30  ;;  %v1041_v9 = vmul.f32 %v7333_v14, %v7290_v37  ;;  %vm1060_vm5 = vweird.f32 %v7315_v30  ;;  %vm1167_vm14 = vmor %vm1165_vm3, %vm1166_vm7 }
 0x23a   :  { %10832 = vst [vmem:[#allocation27_spill] sm:$0xff] %v7322_v62  ;;  %v7327_v49 = vadd.f32 1e-08, %v7322_v62  ;;  %v1162_v31 = vsub.f32 1.0, %v1161_v5  ;;  %v1066_v33 = vand.u32 2147483648, %v7315_v30  ;;  %v931_v46 = vadd.s32 %v930_v4, %v928_v56 }
 0x23b   :  { %v1042_v41 = vsub.f32 1.0, %v1041_v9  ;;  %v1172_v4 = vor.u32 1.1754944e-38, %v1171_v29  ;;  %vm1046_vm11 = vweird.f32 %v7333_v14 }
 0x23c   :  { %5219 = vrcp.f32 %v7327_v49  ;;  %v1163_v60 = vmul.f32 %v7312_v20, %v1162_v31  ;;  %v1067_v29 = vor.u32 1.1754944e-38, %v1066_v33  ;;  %vm947_vm15 = vcmp.ge.s32.totalorder %v931_v46, 2 }
 0x23d   :  { %v704_v18 = vpop.xlane.xlu0 %703  ;;  %5221 = vpow2.f32 %v1258_v27  ;;  %v1043_v62 = vmul.f32 %v7333_v14, %v1042_v41  ;;  %vm1180_vm12 = vweird.f32 %v7327_v49 }
 0x23e   :  { %v7343_v32 = vpop.eup %5215  ;;  %v7347_v11 = vsel %vm946_vm13, 0.0, %v704_v18  ;;  %v1164_v27 = vadd.f32 %v7312_v20, %v1163_v60  ;;  %v1169_v18 = vand.u32 2147483647, %v7274_v43  ;;  %v680_v21 = vpop.xlane.xlu2 %679 }
 0x23f   :  { %10834 = vst [vmem:[#allocation28_spill] sm:$0xff] %v7347_v11  ;;  %v5218_v5 = vpop.eup %5217  ;;  %v7352_v42 = vadd.f32 1e-08, %v7347_v11  ;;  %v1317_v63 = vsel %vm563_vm1, %v7343_v32, 0.0  ;;  %v7372_v60 = vsel %vm938_vm2, 0.0, %v680_v21  ;;  %vm7402_vm2 = vmor %vm1045_vm10, %vm1046_vm11 }
 0x240   :  { %v683_v31 = vpop.xlane.xlu1 %682  ;;  %v1056_v1 = vmul.f32 %v5218_v5, %v7315_v30  ;;  %1318 = vadd.xlane.f32.xlu1 %v1317_v63  ;;  %10836 = vst [vmem:[#allocation30_spill] sm:$0xff] %v7372_v60  ;;  %v1064_v63 = vand.u32 2147483647, %v7315_v30  ;;  %v7378_v15 = vadd.f32 1e-08, %v7372_v60  ;;  %v1168_v21 = vsel %vm1167_vm14, %v7312_v20, %v1164_v27 }
 0x241   :  { %v7357_v55 = vsel %vm939_vm4, 0.0, %v683_v31  ;;  %5223 = vrcp.f32 %v7352_v42  ;;  %vm1170_vm0 = vcmp.eq.f32.partialorder %v1169_v18, 8.507059e+37  ;;  %v1201_v41 = vand.u32 2147483648, %v7352_v42 }
 0x242   :  { %10835 = vst [vmem:[#allocation29_spill] sm:$0xff] %v7357_v55  ;;  %v7361_v9 = vpop.eup %5219  ;;  %v7366_v19 = vadd.f32 1e-08, %v7357_v55  ;;  %v1057_v56 = vsub.f32 1.0, %v1056_v1  ;;  %v1173_v43 = vsel %vm1170_vm0, %v1172_v4, %v1168_v21  ;;  %vm1061_vm6 = vweird.f32 %v5218_v5 }
 0x243   :  { %v1176_v31 = vmul.f32 %v7361_v9, %v7327_v49  ;;  %v7384_v1 = vpop.eup %5221  ;;  %vm1195_vm8 = vweird.f32 %v7352_v42  ;;  %v1174_v27 = vmul.f32 5.7525725, %v1173_v43  ;;  %vm1062_vm9 = vmor %vm1060_vm5, %vm1061_vm6  ;;  %v1044_v18 = vadd.f32 %v7333_v14, %v1043_v62 }
 0x244   :  { %5225 = vrcp.f32 %v7366_v19  ;;  %v1058_v26 = vmul.f32 %v5218_v5, %v1057_v56  ;;  %v1293_v60 = vsel %vm563_vm1, %v7384_v1, 0.0  ;;  %vm1065_vm13 = vcmp.eq.f32.partialorder %v1064_v63, 8.507059e+37 }
 0x245   :  { %v1177_v55 = vsub.f32 1.0, %v1176_v31  ;;  %5227 = vrcp.f32 %v7378_v15  ;;  %1294 = vadd.xlane.f32.xlu0 %v1293_v60  ;;  %v1049_v60 = vand.u32 2147483647, %v7290_v37  ;;  %v10839_v21 = vsub.f32 0.0, %v6755_v59 }
 0x246   :  { %v1059_v33 = vadd.f32 %v5218_v5, %v1058_v26  ;;  %v707_v26 = vpop.xlane.xlu2 %706  ;;  %vm1090_vm4 = vweird.f32 %v7366_v19  ;;  %vm1075_vm7 = vweird.f32 %v7378_v15  ;;  %vm1181_vm14 = vweird.f32 %v7361_v9 }
 0x247   :  { %v5224_v44 = vpop.eup %5223  ;;  %v1178_v62 = vmul.f32 %v7361_v9, %v1177_v55  ;;  %v1248_v43 = vmul.f32 %v10839_v21, %v1174_v27  ;;  %v7418_v11 = vsel %vm947_vm15, 0.0, %v707_v26  ;;  %vm1050_vm3 = vcmp.eq.f32.partialorder %v1049_v60, 8.507059e+37  ;;  %vm1182_vm0 = vmor %vm1180_vm12, %vm1181_vm14 }
 0x248   :  { %v1191_v56 = vmul.f32 %v5224_v44, %v7352_v42  ;;  %v1063_v4 = vsel %vm1062_vm9, %v5218_v5, %v1059_v33  ;;  %v1048_v5 = vsel %vm7402_vm2, %v7333_v14, %v1044_v18  ;;  %v7423_v55 = vadd.f32 1e-08, %v7418_v11 }
 0x249   :  { %v1068_v20 = vsel %vm1065_vm13, %v1067_v29, %v1063_v4  ;;  %v1276_v59 = vmul.f32 1.442695, %v1248_v43  ;;  %v10840_v29 = vand.u32 2147483648, %v7290_v37  ;;  %v10841_v18 = vsub.f32 0.0, %v6798_v36 }
 0x24a   :  { %v7407_v30 = vpop.eup %5225  ;;  %v1192_v63 = vsub.f32 1.0, %v1191_v56  ;;  %v1069_v13 = vmul.f32 5.7525725, %v1068_v20  ;;  %5229 = vrcp.f32 %v7423_v55  ;;  %v1216_v56 = vand.u32 2147483648, %v7423_v55 }
 0x24b   :  { %v1086_v33 = vmul.f32 %v7407_v30, %v7366_v19  ;;  %v7420_v52 = vpop.eup %5227  ;;  %v1052_v27 = vor.u32 1.1754944e-38, %v10840_v29  ;;  %vm1196_vm5 = vweird.f32 %v5224_v44  ;;  %5231 = vpow2.f32 %v1276_v59 }
 0x24c   :  { %v1193_v4 = vmul.f32 %v5224_v44, %v1192_v63  ;;  %v1071_v46 = vmul.f32 %v7420_v52, %v7378_v15  ;;  %v1241_v20 = vmul.f32 %v10841_v18, %v1069_v13  ;;  %v1199_v63 = vand.u32 2147483647, %v7352_v42  ;;  %vm1197_vm10 = vmor %vm1195_vm8, %vm1196_vm5 }
 0x24d   :  { %v1087_v14 = vsub.f32 1.0, %v1086_v33  ;;  %v1053_v31 = vsel %vm1050_vm3, %v1052_v27, %v1048_v5  ;;  %v1202_v33 = vor.u32 1.1754944e-38, %v1201_v41  ;;  %v1179_v36 = vadd.f32 %v7361_v9, %v1178_v62 }
 0x24e   :  { %v1072_v37 = vsub.f32 1.0, %v1071_v46  ;;  %v1262_v26 = vmul.f32 1.442695, %v1241_v20  ;;  %v1054_v21 = vmul.f32 5.7525725, %v1053_v31  ;;  %v1194_v43 = vadd.f32 %v5224_v44, %v1193_v4 }
 0x24f   :  { %v1088_v60 = vmul.f32 %v7407_v30, %v1087_v14  ;;  %v10842_v13 = vsub.f32 0.0, %v6749_v17  ;;  %vm1200_vm15 = vcmp.eq.f32.partialorder %v1199_v63, 8.507059e+37  ;;  %v1184_v41 = vand.u32 2147483647, %v7327_v49 }
 0x250   :  { %v1073_v29 = vmul.f32 %v7420_v52, %v1072_v37  ;;  %5233 = vpow2.f32 %v1262_v26  ;;  %v1198_v59 = vsel %vm1197_vm10, %v5224_v44, %v1194_v43  ;;  %v1183_v4 = vsel %vm1182_vm0, %v7361_v9, %v1179_v36  ;;  %v5230_v62 = vpop.eup %5229 }
 0x251   :  { %v1240_v5 = vmul.f32 %v10842_v13, %v1054_v21  ;;  %v1203_v27 = vsel %vm1200_vm15, %v1202_v33, %v1198_v59  ;;  %v10843_v42 = vand.u32 2147483648, %v7327_v49  ;;  %vm1091_vm6 = vweird.f32 %v7407_v30  ;;  %v7452_v44 = vpop.eup %5231 }
 0x252   :  { %v1204_v18 = vmul.f32 5.7525725, %v1203_v27  ;;  %vm1185_vm8 = vcmp.eq.f32.partialorder %v1184_v41, 8.507059e+37  ;;  %v1089_v17 = vadd.f32 %v7407_v30, %v1088_v60  ;;  %v1206_v20 = vmul.f32 %v5230_v62, %v7423_v55  ;;  %vm1092_vm9 = vmor %vm1090_vm4, %vm1091_vm6 }
 0x253   :  { %v1187_v14 = vor.u32 1.1754944e-38, %v10843_v42  ;;  %v1260_v46 = vmul.f32 1.442695, %v1240_v5  ;;  %v1094_v37 = vand.u32 2147483647, %v7366_v19  ;;  %v10844_v9 = vand.u32 2147483648, %v7366_v19 }
 0x254   :  { %v1320_v49 = vsel %vm563_vm1, %v7452_v44, 0.0  ;;  %v10845_v21 = vsub.f32 0.0, %v6866_v53  ;;  %v1207_v33 = vsub.f32 1.0, %v1206_v20  ;;  %v1093_v36 = vsel %vm1092_vm9, %v7407_v30, %v1089_v17 }
 0x255   :  { %v1188_v31 = vsel %vm1185_vm8, %v1187_v14, %v1183_v4  ;;  %v1097_v26 = vor.u32 1.1754944e-38, %v10844_v9  ;;  %5235 = vpow2.f32 %v1260_v46  ;;  %1321 = vadd.xlane.f32.xlu0 %v1320_v49  ;;  %vm1095_vm11 = vcmp.eq.f32.partialorder %v1094_v37, 8.507059e+37 }
 0x256   :  { %v1250_v43 = vmul.f32 %v10845_v21, %v1204_v18  ;;  %v1189_v63 = vmul.f32 5.7525725, %v1188_v31  ;;  %v7466_v60 = vpop.eup %5233  ;;  %v1074_v13 = vadd.f32 %v7420_v52, %v1073_v29  ;;  %v10846_v59 = vsub.f32 0.0, %v6803_v48 }
 0x257   :  { %v1299_v5 = vsel %vm563_vm1, %v7466_v60, 0.0  ;;  %v1098_v27 = vsel %vm1095_vm11, %v1097_v26, %v1093_v36  ;;  %v1208_v4 = vmul.f32 %v5230_v62, %v1207_v33  ;;  %vm1076_vm12 = vweird.f32 %v7420_v52 }
 0x258   :  { %v1280_v53 = vmul.f32 1.442695, %v1250_v43  ;;  %v1249_v41 = vmul.f32 %v10846_v59, %v1189_v63  ;;  %1300 = vadd.xlane.f32.xlu1 %v1299_v5  ;;  %v1099_v19 = vmul.f32 5.7525725, %v1098_v27  ;;  %v1079_v42 = vand.u32 2147483647, %v7378_v15  ;;  %vm1077_vm13 = vmor %vm1075_vm7, %vm1076_vm12 }
 0x259   :  { %v10847_v29 = vand.u32 2147483648, %v7378_v15  ;;  %vm1211_vm2 = vweird.f32 %v5230_v62  ;;  %vm1210_vm3 = vweird.f32 %v7423_v55  ;;  %v1078_v48 = vsel %vm1077_vm13, %v7420_v52, %v1074_v13 }
 0x25a   :  { %5237 = vpow2.f32 %v1280_v53  ;;  %v1278_v30 = vmul.f32 1.442695, %v1249_v41  ;;  %vm1080_vm4 = vcmp.eq.f32.partialorder %v1079_v42, 8.507059e+37  ;;  %v1209_v46 = vadd.f32 %v5230_v62, %v1208_v4  ;;  %vm1212_vm5 = vmor %vm1210_vm3, %vm1211_vm2 }
 0x25b   :  { %v1082_v14 = vor.u32 1.1754944e-38, %v10847_v29  ;;  %v7482_v18 = vpop.eup %5235  ;;  %v10848_v17 = vsub.f32 0.0, %v6979_v50  ;;  %v1214_v37 = vand.u32 2147483647, %v7423_v55  ;;  %v1217_v52 = vor.u32 1.1754944e-38, %v1216_v56 }
 0x25c   :  { %5239 = vpow2.f32 %v1278_v30  ;;  %v1296_v15 = vsel %vm563_vm1, %v7482_v18, 0.0  ;;  %v1213_v26 = vsel %vm1212_vm5, %v5230_v62, %v1209_v46  ;;  %v10849_v49 = vsub.f32 0.0, %v6871_v38 }
 0x25d   :  { %v1243_v20 = vmul.f32 %v10848_v17, %v1099_v19  ;;  %v1083_v31 = vsel %vm1080_vm4, %v1082_v14, %v1078_v48  ;;  %1297 = vadd.xlane.f32.xlu2 %v1296_v15  ;;  %vm1215_vm7 = vcmp.eq.f32.partialorder %v1214_v37, 8.507059e+37  ;;  %v1235_v63 = vsub.f32 0.0, %v6942_v7 }
 0x25e   :  { %v1084_v9 = vmul.f32 5.7525725, %v1083_v31  ;;  %v1218_v43 = vsel %vm1215_vm7, %v1217_v52, %v1213_v26  ;;  %vm1364_vm10 = vcmp.eq.f32.partialorder %v7106_v2, 0.0  ;;  %vm1365_vm14 = vcmp.eq.f32.partialorder %v7111_v12, 0.0 }
 0x25f   :  { %v1266_v33 = vmul.f32 1.442695, %v1243_v20  ;;  %v1219_v36 = vmul.f32 5.7525725, %v1218_v43  ;;  %vm1373_vm15 = vcmp.eq.f32.partialorder %v7142_v10, 0.0  ;;  %vm1372_vm0 = vcmp.eq.f32.partialorder %v7149_v22, 0.0 }
 0x260   :  { %v1242_v21 = vmul.f32 %v10849_v49, %v1084_v9  ;;  %v7493_v50 = vpop.eup %5237  ;;  %vm1374_vm6 = vcmp.eq.f32.partialorder %v7162_v0, 0.0  ;;  %vm1366_vm8 = vcmp.eq.f32.partialorder %v7170_v16, 0.0  ;;  %vm1375_vm9 = vcmp.eq.f32.partialorder %v7202_v8, 0.0 }
 0x261   :  { %v1326_v13 = vsel %vm563_vm1, %v7493_v50, 0.0  ;;  %v1251_v55 = vmul.f32 %v1235_v63, %v1219_v36  ;;  %vm1367_vm11 = vcmp.eq.f32.partialorder %v7224_v23, 0.0  ;;  %vm1376_vm12 = vcmp.eq.f32.partialorder %v7267_v34, 0.0 }
 0x262   :  { %v1264_v5 = vmul.f32 1.442695, %v1242_v21  ;;  %v7498_v62 = vpop.eup %5239  ;;  %1327 = vadd.xlane.f32.xlu1 %v1326_v13  ;;  %vm1369_vm13 = vcmp.eq.f32.partialorder %v7308_v25, 0.0 }
 0x263   :  { %v1282_v56 = vmul.f32 1.442695, %v1251_v55  ;;  %v1323_v38 = vsel %vm563_vm1, %v7498_v62, 0.0 }
 0x264   :  { %5241 = vpow2.f32 %v1264_v5 }
 0x265   :  { %5243 = vpow2.f32 %v1266_v33  ;;  %1324 = vadd.xlane.f32.xlu2 %v1323_v38 }
 0x266   :  { %5245 = vpow2.f32 %v1282_v56 }
 0x26a   :  { %v7502_v53 = vpop.eup %5241 }
 0x26b   :  { %v7504_v7 = vpop.eup %5243  ;;  %v1302_v59 = vsel %vm563_vm1, %v7502_v53, 0.0 }
 0x26c   :  { %1303 = vadd.xlane.f32.xlu0 %v1302_v59  ;;  %v7508_v41 = vpop.eup %5245  ;;  %v1305_v27 = vsel %vm563_vm1, %v7504_v7, 0.0 }
 0x26d   :  { %1306 = vadd.xlane.f32.xlu2 %v1305_v27  ;;  %v1329_v4 = vsel %vm563_vm1, %v7508_v41, 0.0 }
 0x273   :  { %v1286_v19 = vpop.xlane.xlu0 %1285 }
 0x274   :  { %1330 = vadd.xlane.f32.xlu0 %v1329_v4  ;;  %5247 = vrcp.f32 %v1286_v19  ;;  %v1289_v42 = vpop.xlane.xlu1 %1288 }
 0x275   :  { %5249 = vrcp.f32 %v1289_v42 }
 0x27a   :  { %v5248_v30 = vpop.eup %5247 }
 0x27b   :  { %v5250_v29 = vpop.eup %5249  ;;  %v1348_v14 = vmul.f32 %v5248_v30, %v7136_v61 }
 0x27c   :  { %v1349_v48 = vmul.f32 %v5250_v29, %v7138_v51 }
 0x27d   :  { %v1412_v46 = vsel %vm1364_vm10, 0.015625, %v1348_v14  ;;  %vm1379_vm10 = vcmp.eq.f32.partialorder %v7418_v11, 0.0 }
 0x27e   :  { %v1784_v17 = vadd.f32 %v7003_v24, %v1412_v46  ;;  %v1413_v20 = vsel %vm1365_vm14, 0.015625, %v1349_v48 }
 0x27f   :  { %v1785_v31 = vadd.f32 %v7007_v40, %v1413_v20 }
 0x280   :  { %v7520_v37 = vmul.f32 0.5, %v1784_v17 }
 0x281   :  { %v7522_v15 = vmul.f32 0.5, %v1785_v31 }
 0x282   :  { %v1816_v9 = vsel %vm563_vm1, %v7520_v37, 0.0 }
 0x283   :  { %1817 = vadd.xlane.f32.xlu1 %v1816_v9  ;;  %v1819_v2 = vsel %vm563_vm1, %v7522_v15, 0.0 }
 0x284   :  { %1820 = vadd.xlane.f32.xlu2 %v1819_v2 }
 0x293   :  { %v1313_v61 = vpop.xlane.xlu0 %1312 }
 0x294   :  { %5251 = vrcp.f32 %v1313_v61  ;;  %v1310_v12 = vpop.xlane.xlu2 %1309  ;;  %v10850_v61 = vld [vmem:[#allocation18_spill] sm:$0xff] }
 0x295   :  { %5253 = vrcp.f32 %v1310_v12 }
 0x29a   :  { %v5252_v24 = vpop.eup %5251 }
 0x29b   :  { %v1357_v51 = vmul.f32 %v5252_v24, %v7204_v58  ;;  %v5254_v40 = vpop.eup %5253 }
 0x29c   :  { %v1356_v49 = vmul.f32 %v5254_v40, %v7226_v39  ;;  %v10851_v40 = vld [vmem:[#allocation22_spill] sm:$0xff] }
 0x29d   :  { %v1421_v26 = vsel %vm1373_vm15, 0.015625, %v1357_v51 }
 0x29e   :  { %v1793_v52 = vadd.f32 %v7025_v45, %v1421_v26  ;;  %v1420_v43 = vsel %vm1372_vm0, 0.015625, %v1356_v49 }
 0x29f   :  { %v1792_v63 = vadd.f32 %v7029_v28, %v1420_v43  ;;  %v10852_v43 = vld [vmem:[#allocation26_spill] sm:$0xff] }
 0x2a0   :  { %v7533_v21 = vmul.f32 0.5, %v1793_v52  ;;  %vm1368_vm2 = vcmp.eq.f32.partialorder %v10852_v43, 0.0 }
 0x2a1   :  { %v7538_v36 = vmul.f32 0.5, %v1792_v63 }
 0x2a2   :  { %v1843_v33 = vsel %vm563_vm1, %v7533_v21, 0.0 }
 0x2a3   :  { %1844 = vadd.xlane.f32.xlu1 %v1843_v33  ;;  %v1316_v58 = vpop.xlane.xlu2 %1315  ;;  %v1840_v45 = vsel %vm563_vm1, %v7538_v36, 0.0 }
 0x2a4   :  { %5255 = vrcp.f32 %v1316_v58  ;;  %1841 = vadd.xlane.f32.xlu0 %v1840_v45  ;;  %v10853_v58 = vld [vmem:[#allocation23_spill] sm:$0xff] }
 0x2a7   :  { %v1292_v39 = vpop.xlane.xlu1 %1291 }
 0x2a8   :  { %5257 = vrcp.f32 %v1292_v39  ;;  %v10854_v39 = vld [vmem:[#allocation28_spill] sm:$0xff] }
 0x2a9   :  { %vm1378_vm3 = vcmp.eq.f32.partialorder %v10854_v39, 0.0 }
 0x2aa   :  { %v5256_v10 = vpop.eup %5255 }
 0x2ab   :  { %v1358_v22 = vmul.f32 %v5256_v10, %v7269_v6 }
 0x2ad   :  { %v1422_v28 = vsel %vm1374_vm6, 0.015625, %v1358_v22 }
 0x2ae   :  { %v1794_v13 = vadd.f32 %v7033_v47, %v1422_v28  ;;  %v5258_v55 = vpop.eup %5257 }
 0x2af   :  { %v1350_v59 = vmul.f32 %v5258_v55, %v7305_v57 }
 0x2b0   :  { %v7545_v5 = vmul.f32 0.5, %v1794_v13 }
 0x2b1   :  { %v1414_v27 = vsel %vm1366_vm8, 0.015625, %v1350_v59 }
 0x2b2   :  { %v1846_v38 = vsel %vm563_vm1, %v7545_v5, 0.0  ;;  %v1786_v6 = vadd.f32 %v7074_v35, %v1414_v27 }
 0x2b3   :  { %v1319_v56 = vpop.xlane.xlu1 %1318  ;;  %1847 = vadd.xlane.f32.xlu0 %v1846_v38 }
 0x2b4   :  { %5259 = vrcp.f32 %v1319_v56  ;;  %v7552_v0 = vmul.f32 0.5, %v1786_v6  ;;  %v10855_v56 = vld [vmem:[#allocation19_spill] sm:$0xff] }
 0x2b5   :  { %v10856_v6 = vld [vmem:[#allocation27_spill] sm:$0xff] }
 0x2b6   :  { %v1822_v19 = vsel %vm563_vm1, %v7552_v0, 0.0  ;;  %vm1377_vm4 = vcmp.eq.f32.partialorder %v10856_v6, 0.0 }
 0x2b7   :  { %1823 = vadd.xlane.f32.xlu2 %v1822_v19  ;;  %v10857_v19 = vld [vmem:[#allocation20_spill] sm:$0xff] }
 0x2b8   :  { %v1295_v4 = vpop.xlane.xlu0 %1294 }
 0x2b9   :  { %5261 = vrcp.f32 %v1295_v4 }
 0x2ba   :  { %v5260_v47 = vpop.eup %5259 }
 0x2bb   :  { %v1359_v42 = vmul.f32 %v5260_v47, %v7343_v32 }
 0x2bd   :  { %v1423_v57 = vsel %vm1375_vm9, 0.015625, %v1359_v42 }
 0x2be   :  { %v1795_v16 = vadd.f32 %v7037_v3, %v1423_v57 }
 0x2bf   :  { %v5262_v30 = vpop.eup %5261 }
 0x2c0   :  { %v7559_v29 = vmul.f32 0.5, %v1795_v16  ;;  %v1351_v35 = vmul.f32 %v5262_v30, %v7384_v1 }
 0x2c2   :  { %v1849_v14 = vsel %vm563_vm1, %v7559_v29, 0.0  ;;  %v1415_v48 = vsel %vm1367_vm11, 0.015625, %v1351_v35 }
 0x2c3   :  { %1850 = vadd.xlane.f32.xlu2 %v1849_v14  ;;  %v1787_v46 = vadd.f32 %v7078_v54, %v1415_v48  ;;  %v10858_v14 = vld [vmem:[#allocation30_spill] sm:$0xff] }
 0x2c4   :  { %vm1370_vm5 = vcmp.eq.f32.partialorder %v10858_v14, 0.0 }
 0x2c5   :  { %v7566_v32 = vmul.f32 0.5, %v1787_v46 }
 0x2c7   :  { %v1825_v8 = vsel %vm563_vm1, %v7566_v32, 0.0 }
 0x2c8   :  { %v1322_v3 = vpop.xlane.xlu0 %1321  ;;  %1826 = vadd.xlane.f32.xlu1 %v1825_v8  ;;  %v10859_v8 = vld [vmem:[#allocation24_spill] sm:$0xff] }
 0x2c9   :  { %5263 = vrcp.f32 %v1322_v3 }
 0x2cb   :  { %v1301_v17 = vpop.xlane.xlu1 %1300 }
 0x2cc   :  { %5265 = vrcp.f32 %v1301_v17 }
 0x2cf   :  { %v5264_v1 = vpop.eup %5263 }
 0x2d0   :  { %v1298_v20 = vpop.xlane.xlu2 %1297  ;;  %v1360_v23 = vmul.f32 %v5264_v1, %v7452_v44  ;;  %v10860_v1 = vld [vmem:[#allocation29_spill] sm:$0xff] }
 0x2d1   :  { %5267 = vrcp.f32 %v1298_v20  ;;  %vm1371_vm7 = vcmp.eq.f32.partialorder %v10860_v1, 0.0 }
 0x2d2   :  { %v5266_v31 = vpop.eup %5265  ;;  %v1424_v9 = vsel %vm1376_vm12, 0.015625, %v1360_v23 }
 0x2d3   :  { %v1353_v54 = vmul.f32 %v5266_v31, %v7466_v60  ;;  %v1796_v12 = vadd.f32 %v10850_v61, %v1424_v9  ;;  %v10861_v31 = vld [vmem:[#allocation25_spill] sm:$0xff] }
 0x2d5   :  { %v1328_v2 = vpop.xlane.xlu1 %1327  ;;  %v1417_v24 = vsel %vm1369_vm13, 0.015625, %v1353_v54  ;;  %v7575_v51 = vmul.f32 0.5, %v1796_v12 }
 0x2d6   :  { %5269 = vrcp.f32 %v1328_v2  ;;  %v1789_v26 = vadd.f32 %v10851_v40, %v1417_v24  ;;  %v10862_v24 = vld [vmem:[#allocation21_spill] sm:$0xff] }
 0x2d7   :  { %v5268_v52 = vpop.eup %5267  ;;  %v1852_v44 = vsel %vm563_vm1, %v7575_v51, 0.0 }
 0x2d8   :  { %v1325_v49 = vpop.xlane.xlu2 %1324  ;;  %v7580_v34 = vmul.f32 0.5, %v1789_v26  ;;  %v1352_v60 = vmul.f32 %v5268_v52, %v7482_v18  ;;  %1853 = vadd.xlane.f32.xlu1 %v1852_v44 }
 0x2d9   :  { %5271 = vrcp.f32 %v1325_v49 }
 0x2da   :  { %v1831_v25 = vsel %vm563_vm1, %v7580_v34, 0.0  ;;  %v1416_v63 = vsel %vm1368_vm2, 0.015625, %v1352_v60 }
 0x2db   :  { %1832 = vadd.xlane.f32.xlu2 %v1831_v25  ;;  %v1788_v45 = vadd.f32 %v10853_v58, %v1416_v63 }
 0x2dc   :  { %v5270_v33 = vpop.eup %5269 }
 0x2dd   :  { %v1362_v10 = vmul.f32 %v5270_v33, %v7493_v50  ;;  %v7589_v28 = vmul.f32 0.5, %v1788_v45 }
 0x2df   :  { %v1304_v22 = vpop.xlane.xlu0 %1303  ;;  %v1426_v18 = vsel %vm1378_vm3, 0.015625, %v1362_v10  ;;  %v5272_v13 = vpop.eup %5271  ;;  %v1828_v55 = vsel %vm563_vm1, %v7589_v28, 0.0 }
 0x2e0   :  { %5273 = vrcp.f32 %v1304_v22  ;;  %v1798_v38 = vadd.f32 %v10855_v56, %v1426_v18  ;;  %1829 = vadd.xlane.f32.xlu0 %v1828_v55  ;;  %v1307_v59 = vpop.xlane.xlu2 %1306  ;;  %v1361_v27 = vmul.f32 %v5272_v13, %v7498_v62 }
 0x2e1   :  { %5275 = vrcp.f32 %v1307_v59 }
 0x2e2   :  { %v7596_v50 = vmul.f32 0.5, %v1798_v38  ;;  %v1425_v4 = vsel %vm1377_vm4, 0.015625, %v1361_v27 }
 0x2e3   :  { %v1797_v42 = vadd.f32 %v10857_v19, %v1425_v4 }
 0x2e4   :  { %v1858_v47 = vsel %vm563_vm1, %v7596_v50, 0.0 }
 0x2e5   :  { %1859 = vadd.xlane.f32.xlu2 %v1858_v47  ;;  %v7601_v30 = vmul.f32 0.5, %v1797_v42 }
 0x2e6   :  { %v5274_v57 = vpop.eup %5273 }
 0x2e7   :  { %v1331_v16 = vpop.xlane.xlu0 %1330  ;;  %v1354_v35 = vmul.f32 %v5274_v57, %v7502_v53  ;;  %v5276_v62 = vpop.eup %5275  ;;  %v1855_v48 = vsel %vm563_vm1, %v7601_v30, 0.0 }
 0x2e8   :  { %5277 = vrcp.f32 %v1331_v16  ;;  %1856 = vadd.xlane.f32.xlu0 %v1855_v48  ;;  %v1355_v17 = vmul.f32 %v5276_v62, %v7504_v7 }
 0x2e9   :  { %v1418_v46 = vsel %vm1370_vm5, 0.015625, %v1354_v35 }
 0x2ea   :  { %v1790_v3 = vadd.f32 %v10859_v8, %v1418_v46  ;;  %v1419_v23 = vsel %vm1371_vm7, 0.015625, %v1355_v17 }
 0x2eb   :  { %v1791_v53 = vadd.f32 %v10861_v31, %v1419_v23 }
 0x2ec   :  { %v7610_v20 = vmul.f32 0.5, %v1790_v3 }
 0x2ed   :  { %v7615_v2 = vmul.f32 0.5, %v1791_v53 }
 0x2ee   :  { %v5278_v9 = vpop.eup %5277  ;;  %v1834_v54 = vsel %vm563_vm1, %v7610_v20, 0.0 }
 0x2ef   :  { %1835 = vadd.xlane.f32.xlu1 %v1834_v54  ;;  %v1363_v61 = vmul.f32 %v5278_v9, %v7508_v41  ;;  %v1837_v7 = vsel %vm563_vm1, %v7615_v2, 0.0 }
 0x2f0   :  { %1838 = vadd.xlane.f32.xlu0 %v1837_v7 }
 0x2f1   :  { %v1427_v12 = vsel %vm1379_vm10, 0.015625, %v1363_v61 }
 0x2f2   :  { %v1799_v40 = vadd.f32 %v10862_v24, %v1427_v12 }
 0x2f4   :  { %v7622_v26 = vmul.f32 0.5, %v1799_v40 }
 0x2f6   :  { %v1861_v52 = vsel %vm563_vm1, %v7622_v26, 0.0  ;;  %v1818_v49 = vpop.xlane.xlu1 %1817 }
 0x2f7   :  { %1862 = vadd.xlane.f32.xlu1 %v1861_v52  ;;  %v1821_v44 = vpop.xlane.xlu2 %1820  ;;  %v1864_v58 = vadd.f32 1e-08, %v1818_v49 }
 0x2f8   :  { %v1865_v33 = vadd.f32 1e-08, %v1821_v44 }
 0x2fa   :  { %5279 = vrcp.f32 %v1865_v33 }
 0x2fb   :  { %5281 = vrcp.f32 %v1864_v58 }
 0x300   :  { %v5280_v59 = vpop.eup %5279 }
 0x301   :  { %v5282_v6 = vpop.eup %5281  ;;  %v7627_v42 = vmul.f32 %v5280_v59, %v7522_v15 }
 0x302   :  { %v7630_v14 = vmul.f32 %v5282_v6, %v7520_v37 }
 0x303   :  { %v1913_v17 = vsel %vm563_vm1, %v7627_v42, 0.0 }
 0x316   :  { %v1845_v43 = vpop.xlane.xlu1 %1844 }
 0x317   :  { %v1842_v41 = vpop.xlane.xlu0 %1841  ;;  %v1873_v56 = vadd.f32 1e-08, %v1845_v43 }
 0x318   :  { %v1872_v39 = vadd.f32 1e-08, %v1842_v41 }
 0x326   :  { %v1848_v25 = vpop.xlane.xlu0 %1847 }
 0x327   :  { %v1874_v18 = vadd.f32 1e-08, %v1848_v25 }
 0x32a   :  { %v1824_v60 = vpop.xlane.xlu2 %1823 }
 0x32b   :  { %v1866_v45 = vadd.f32 1e-08, %v1824_v60 }
 0x32d   :  { %5283 = vrcp.f32 %v1866_v45 }
 0x333   :  { %v5284_v47 = vpop.eup %5283 }
 0x334   :  { %v7633_v62 = vmul.f32 %v5284_v47, %v7552_v0  ;;  %v1912_v0 = vsel %vm563_vm1, %v7630_v14, 0.0 }
 0x335   :  { %v1914_v7 = vadd.f32 %v1913_v17, %v1912_v0 }
 0x336   :  { %v1851_v63 = vpop.xlane.xlu2 %1850  ;;  %v1915_v31 = vsel %vm563_vm1, %v7633_v62, 0.0 }
 0x337   :  { %v1875_v27 = vadd.f32 1e-08, %v1851_v63  ;;  %v1916_v44 = vadd.f32 %v1915_v31, %v1914_v7 }
 0x33b   :  { %v1827_v11 = vpop.xlane.xlu1 %1826 }
 0x33c   :  { %v1867_v10 = vadd.f32 1e-08, %v1827_v11 }
 0x33e   :  { %5285 = vrcp.f32 %v1867_v10 }
 0x33f   :  { %5287 = vrcp.f32 %v1872_v39 }
 0x344   :  { %v5286_v57 = vpop.eup %5285 }
 0x345   :  { %v5288_v35 = vpop.eup %5287  ;;  %v7636_v3 = vmul.f32 %v5286_v57, %v7566_v32 }
 0x346   :  { %v7648_v53 = vmul.f32 %v5288_v35, %v7538_v36 }
 0x347   :  { %v1917_v24 = vsel %vm563_vm1, %v7636_v3, 0.0 }
 0x348   :  { %v1933_v60 = vsel %vm563_vm1, %v7648_v53, 0.0  ;;  %v1918_v41 = vadd.f32 %v1917_v24, %v1916_v44 }
 0x34b   :  { %v1854_v38 = vpop.xlane.xlu1 %1853 }
 0x34c   :  { %v1876_v4 = vadd.f32 1e-08, %v1854_v38 }
 0x34e   :  { %v1833_v13 = vpop.xlane.xlu2 %1832 }
 0x34f   :  { %v1869_v19 = vadd.f32 1e-08, %v1833_v13 }
 0x353   :  { %v1830_v22 = vpop.xlane.xlu0 %1829 }
 0x354   :  { %v1868_v55 = vadd.f32 1e-08, %v1830_v22 }
 0x356   :  { %5289 = vrcp.f32 %v1868_v55 }
 0x357   :  { %5291 = vrcp.f32 %v1874_v18 }
 0x358   :  { %5293 = vrcp.f32 %v1873_v56  ;;  %v1860_v15 = vpop.xlane.xlu2 %1859 }
 0x359   :  { %5295 = vrcp.f32 %v1875_v27  ;;  %v1878_v54 = vadd.f32 1e-08, %v1860_v15 }
 0x35a   :  { %5297 = vrcp.f32 %v1876_v4 }
 0x35b   :  { %v1857_v16 = vpop.xlane.xlu0 %1856  ;;  %5299 = vrcp.f32 %v1869_v19 }
 0x35c   :  { %v1877_v48 = vadd.f32 1e-08, %v1857_v16  ;;  %v5290_v46 = vpop.eup %5289 }
 0x35d   :  { %v5292_v8 = vpop.eup %5291  ;;  %v7641_v37 = vmul.f32 %v5290_v46, %v7589_v28 }
 0x35e   :  { %v5294_v1 = vpop.eup %5293  ;;  %5301 = vrcp.f32 %v1877_v48  ;;  %v7651_v9 = vmul.f32 %v5292_v8, %v7545_v5 }
 0x35f   :  { %v5296_v32 = vpop.eup %5295  ;;  %v7654_v28 = vmul.f32 %v5294_v1, %v7533_v21  ;;  %v1919_v5 = vsel %vm563_vm1, %v7641_v37, 0.0 }
 0x360   :  { %v5298_v12 = vpop.eup %5297  ;;  %v7659_v36 = vmul.f32 %v5296_v32, %v7559_v29  ;;  %v1936_v21 = vsel %vm563_vm1, %v7651_v9, 0.0  ;;  %v1920_v63 = vadd.f32 %v1919_v5, %v1918_v41 }
 0x361   :  { %v5300_v40 = vpop.eup %5299  ;;  %v7668_v25 = vmul.f32 %v5298_v12, %v7575_v51  ;;  %v1934_v29 = vsel %vm563_vm1, %v7654_v28, 0.0 }
 0x362   :  { %v1836_v23 = vpop.xlane.xlu1 %1835  ;;  %v7671_v11 = vmul.f32 %v5300_v40, %v7580_v34  ;;  %v1935_v33 = vadd.f32 %v1934_v29, %v1933_v60  ;;  %v1938_v58 = vsel %vm563_vm1, %v7659_v36, 0.0 }
 0x363   :  { %v1870_v61 = vadd.f32 1e-08, %v1836_v23  ;;  %v1839_v52 = vpop.xlane.xlu0 %1838  ;;  %v1940_v34 = vsel %vm563_vm1, %v7668_v25, 0.0 }
 0x364   :  { %v1871_v49 = vadd.f32 1e-08, %v1839_v52  ;;  %v5302_v43 = vpop.eup %5301  ;;  %v1937_v51 = vadd.f32 %v1936_v21, %v1935_v33  ;;  %v1921_v18 = vsel %vm563_vm1, %v7671_v11, 0.0 }
 0x365   :  { %5303 = vrcp.f32 %v1870_v61  ;;  %v7678_v45 = vmul.f32 %v5302_v43, %v7601_v30  ;;  %v1922_v56 = vadd.f32 %v1921_v18, %v1920_v63 }
 0x366   :  { %5305 = vrcp.f32 %v1878_v54  ;;  %v1939_v38 = vadd.f32 %v1938_v58, %v1937_v51 }
 0x367   :  { %5307 = vrcp.f32 %v1871_v49  ;;  %v1942_v30 = vsel %vm563_vm1, %v7678_v45, 0.0 }
 0x368   :  { %v1941_v47 = vadd.f32 %v1940_v34, %v1939_v38 }
 0x36a   :  { %v1863_v10 = vpop.xlane.xlu1 %1862  ;;  %v1943_v57 = vadd.f32 %v1942_v30, %v1941_v47 }
 0x36b   :  { %v5304_v39 = vpop.eup %5303  ;;  %v1879_v22 = vadd.f32 1e-08, %v1863_v10 }
 0x36c   :  { %v7685_v13 = vmul.f32 %v5304_v39, %v7610_v20  ;;  %v5306_v55 = vpop.eup %5305 }
 0x36d   :  { %5309 = vrcp.f32 %v1879_v22  ;;  %v5308_v59 = vpop.eup %5307  ;;  %v1910_v19 = vmul.f32 %v5306_v55, %v7596_v50 }
 0x36e   :  { %v1923_v27 = vsel %vm563_vm1, %v7685_v13, 0.0  ;;  %v7692_v6 = vmul.f32 %v5308_v59, %v7615_v2 }
 0x36f   :  { %v1924_v4 = vadd.f32 %v1923_v27, %v1922_v56  ;;  %v1944_v48 = vsel %vm563_vm1, %v1910_v19, 0.0 }
 0x370   :  { %v1925_v20 = vsel %vm563_vm1, %v7692_v6, 0.0  ;;  %v1945_v15 = vadd.f32 %v1944_v48, %v1943_v57 }
 0x371   :  { %v1926_v16 = vadd.f32 %v1925_v20, %v1924_v4 }
 0x373   :  { %v5310_v35 = vpop.eup %5309  ;;  %v1927_v8 = vrot.slane %v1926_v16, 4 }
 0x374   :  { %v7699_v46 = vmul.f32 %v5310_v35, %v7622_v26 }
 0x375   :  { %v1928_v17 = vadd.f32 %v1927_v8, %v1926_v16 }
 0x376   :  { %v1946_v2 = vsel %vm563_vm1, %v7699_v46, 0.0 }
 0x377   :  { %v1947_v1 = vadd.f32 %v1946_v2, %v1945_v15  ;;  %v1929_v23 = vrot.slane %v1928_v17, 2 }
 0x379   :  { %v1948_v50 = vrot.slane %v1947_v1, 4  ;;  %v1930_v0 = vadd.f32 %v1929_v23, %v1928_v17 }
 0x37b   :  { %v1949_v31 = vadd.f32 %v1948_v50, %v1947_v1  ;;  %v1931_v32 = vrot.slane %v1930_v0, 1 }
 0x37d   :  { %v1950_v54 = vrot.slane %v1949_v31, 2  ;;  %v1932_v61 = vadd.f32 %v1931_v32, %v1930_v0 }
 0x37f   :  { %v1951_v7 = vadd.f32 %v1950_v54, %v1949_v31  ;;  %v1954_v12 = vadd.f32 1e-08, %v1932_v61 }
 0x381   :  { %v1952_v24 = vrot.slane %v1951_v7, 1  ;;  %5311 = vrcp.f32 %v1954_v12 }
 0x383   :  { %v1953_v26 = vadd.f32 %v1952_v24, %v1951_v7 }
 0x385   :  { %v1955_v40 = vadd.f32 1e-08, %v1953_v26 }
 0x387   :  { %5313 = vrcp.f32 %v1955_v40  ;;  %v5312_v52 = vpop.eup %5311 }
 0x388   :  { %v7704_v44 = vmul.f32 %v5312_v52, %v7627_v42  ;;  %v7707_v5 = vmul.f32 %v5312_v52, %v7630_v14  ;;  %v7717_v41 = vmul.f32 %v5312_v52, %v7633_v62 }
 0x38a   :  { %v1977_v49 = vsel %vm563_vm1, %v7704_v44, 0.0  ;;  %v1974_v60 = vsel %vm563_vm1, %v7707_v5, 0.0  ;;  %v1980_v29 = vsel %vm563_vm1, %v7717_v41, 0.0 }
 0x38b   :  { %1978 = vadd.xlane.f32.xlu0 %v1977_v49  ;;  %1975 = vadd.xlane.f32.xlu2 %v1974_v60 }
 0x38d   :  { %v5314_v43 = vpop.eup %5313 }
 0x38e   :  { %v7714_v21 = vmul.f32 %v5314_v43, %v7648_v53  ;;  %v7720_v42 = vmul.f32 %v5314_v43, %v7654_v28  ;;  %v7729_v53 = vmul.f32 %v5314_v43, %v7651_v9  ;;  %v7732_v62 = vmul.f32 %v5314_v43, %v7659_v36 }
 0x38f   :  { %v7735_v28 = vmul.f32 %v5312_v52, %v7636_v3  ;;  %v7744_v9 = vmul.f32 %v5312_v52, %v7641_v37  ;;  %v7747_v36 = vmul.f32 %v5312_v52, %v7671_v11  ;;  %v7750_v3 = vmul.f32 %v5314_v43, %v7668_v25 }
 0x390   :  { %v1998_v14 = vsel %vm563_vm1, %v7714_v21, 0.0  ;;  %v2001_v63 = vsel %vm563_vm1, %v7720_v42, 0.0  ;;  %v2004_v33 = vsel %vm563_vm1, %v7729_v53, 0.0  ;;  %v2007_v58 = vsel %vm563_vm1, %v7732_v62, 0.0 }
 0x391   :  { %1999 = vadd.xlane.f32.xlu1 %v1998_v14  ;;  %v1983_v10 = vsel %vm563_vm1, %v7735_v28, 0.0  ;;  %v1986_v39 = vsel %vm563_vm1, %v7744_v9, 0.0  ;;  %v1989_v22 = vsel %vm563_vm1, %v7747_v36, 0.0  ;;  %v2010_v51 = vsel %vm563_vm1, %v7750_v3, 0.0 }
 0x392   :  { %v7759_v37 = vmul.f32 %v5314_v43, %v7678_v45  ;;  %v7761_v11 = vmul.f32 %v5314_v43, %v1910_v19  ;;  %v7764_v25 = vmul.f32 %v5312_v52, %v7685_v13  ;;  %v7773_v45 = vmul.f32 %v5312_v52, %v7692_v6 }
 0x393   :  { %1981 = vadd.xlane.f32.xlu0 %v1980_v29  ;;  %2002 = vadd.xlane.f32.xlu2 %v2001_v63  ;;  %v7776_v56 = vmul.f32 %v5314_v43, %v7699_v46 }
 0x394   :  { %v2013_v34 = vsel %vm563_vm1, %v7759_v37, 0.0  ;;  %v2016_v18 = vsel %vm563_vm1, %v7761_v11, 0.0  ;;  %v1992_v55 = vsel %vm563_vm1, %v7764_v25, 0.0  ;;  %v1995_v13 = vsel %vm563_vm1, %v7773_v45, 0.0 }
 0x395   :  { %v2019_v38 = vsel %vm563_vm1, %v7776_v56, 0.0 }
 0x399   :  { %2005 = vadd.xlane.f32.xlu1 %v2004_v33 }
 0x39b   :  { %2008 = vadd.xlane.f32.xlu0 %v2007_v58  ;;  %1984 = vadd.xlane.f32.xlu2 %v1983_v10 }
 0x3a1   :  { %1987 = vadd.xlane.f32.xlu1 %v1986_v39 }
 0x3a3   :  { %1990 = vadd.xlane.f32.xlu0 %v1989_v22  ;;  %2011 = vadd.xlane.f32.xlu2 %v2010_v51 }
 0x3a9   :  { %2014 = vadd.xlane.f32.xlu1 %v2013_v34 }
 0x3ab   :  { %2017 = vadd.xlane.f32.xlu0 %v2016_v18  ;;  %1993 = vadd.xlane.f32.xlu2 %v1992_v55 }
 0x3b1   :  { %1996 = vadd.xlane.f32.xlu1 %v1995_v13 }
 0x3b3   :  { %2020 = vadd.xlane.f32.xlu2 %v2019_v38 }
 0x3fe   :  { %v1979_v59 = vpop.xlane.xlu0 %1978  ;;  %v1976_v30 = vpop.xlane.xlu2 %1975 }
 0x3ff   :  { %v2022_v20 = vadd.f32 1e-08, %v1976_v30  ;;  %v2023_v6 = vadd.f32 1e-08, %v1979_v59 }
 0x401   :  { %5315 = vrcp.f32 %v2022_v20 }
 0x402   :  { %5317 = vrcp.f32 %v2023_v6 }
 0x404   :  { %v2000_v27 = vpop.xlane.xlu1 %1999 }
 0x405   :  { %v2030_v12 = vadd.f32 1e-08, %v2000_v27 }
 0x406   :  { %v1982_v4 = vpop.xlane.xlu0 %1981  ;;  %v2003_v47 = vpop.xlane.xlu2 %2002 }
 0x407   :  { %v2024_v35 = vadd.f32 1e-08, %v1982_v4  ;;  %v5316_v17 = vpop.eup %5315  ;;  %v2031_v50 = vadd.f32 1e-08, %v2003_v47 }
 0x408   :  { %v5318_v1 = vpop.eup %5317  ;;  %v7783_v31 = vmul.f32 %v5316_v17, %v7707_v5 }
 0x409   :  { %5319 = vrcp.f32 %v2024_v35  ;;  %v7786_v61 = vmul.f32 %v5318_v1, %v7704_v44 }
 0x40a   :  { %v2070_v5 = vsel %vm563_vm1, %v7783_v31, 0.0 }
 0x40b   :  { %v2071_v43 = vsel %vm563_vm1, %v7786_v61, 0.0 }
 0x40c   :  { %v2006_v19 = vpop.xlane.xlu1 %2005  ;;  %v2072_v58 = vadd.f32 %v2071_v43, %v2070_v5 }
 0x40d   :  { %v2032_v32 = vadd.f32 1e-08, %v2006_v19 }
 0x40e   :  { %v2009_v57 = vpop.xlane.xlu0 %2008  ;;  %v1985_v16 = vpop.xlane.xlu2 %1984 }
 0x40f   :  { %v2025_v48 = vadd.f32 1e-08, %v1985_v16  ;;  %v5320_v0 = vpop.eup %5319  ;;  %v2033_v26 = vadd.f32 1e-08, %v2009_v57 }
 0x410   :  { %v7789_v24 = vmul.f32 %v5320_v0, %v7717_v41 }
 0x411   :  { %5321 = vrcp.f32 %v2025_v48 }
 0x412   :  { %v2073_v41 = vsel %vm563_vm1, %v7789_v24, 0.0 }
 0x413   :  { %v2074_v18 = vadd.f32 %v2073_v41, %v2072_v58 }
 0x414   :  { %v1988_v46 = vpop.xlane.xlu1 %1987 }
 0x415   :  { %v2026_v8 = vadd.f32 1e-08, %v1988_v46 }
 0x416   :  { %v1991_v15 = vpop.xlane.xlu0 %1990  ;;  %v2012_v2 = vpop.xlane.xlu2 %2011 }
 0x417   :  { %5323 = vrcp.f32 %v2026_v8  ;;  %v2027_v23 = vadd.f32 1e-08, %v1991_v15  ;;  %v5322_v7 = vpop.eup %5321  ;;  %v2034_v60 = vadd.f32 1e-08, %v2012_v2 }
 0x418   :  { %v7794_v49 = vmul.f32 %v5322_v7, %v7735_v28 }
 0x419   :  { %5325 = vrcp.f32 %v2027_v23 }
 0x41a   :  { %5327 = vrcp.f32 %v2031_v50  ;;  %v2075_v10 = vsel %vm563_vm1, %v7794_v49, 0.0 }
 0x41b   :  { %5329 = vrcp.f32 %v2032_v32  ;;  %v2076_v30 = vadd.f32 %v2075_v10, %v2074_v18 }
 0x41c   :  { %v2015_v54 = vpop.xlane.xlu1 %2014  ;;  %5331 = vrcp.f32 %v2030_v12 }
 0x41d   :  { %v5324_v40 = vpop.eup %5323  ;;  %5333 = vrcp.f32 %v2033_v26  ;;  %v2035_v63 = vadd.f32 1e-08, %v2015_v54 }
 0x41e   :  { %v1994_v52 = vpop.xlane.xlu2 %1993  ;;  %v2018_v14 = vpop.xlane.xlu0 %2017  ;;  %v7801_v29 = vmul.f32 %v5324_v40, %v7744_v9 }
 0x41f   :  { %v2028_v44 = vadd.f32 1e-08, %v1994_v52  ;;  %v5326_v33 = vpop.eup %5325  ;;  %v2036_v39 = vadd.f32 1e-08, %v2018_v14 }
 0x420   :  { %v5328_v28 = vpop.eup %5327  ;;  %v2077_v55 = vsel %vm563_vm1, %v7801_v29, 0.0  ;;  %v7808_v9 = vmul.f32 %v5326_v33, %v7747_v36 }
 0x421   :  { %5335 = vrcp.f32 %v2028_v44  ;;  %v5330_v51 = vpop.eup %5329  ;;  %v7811_v38 = vmul.f32 %v5328_v28, %v7720_v42  ;;  %v2078_v20 = vadd.f32 %v2077_v55, %v2076_v30 }
 0x422   :  { %5337 = vrcp.f32 %v2034_v60  ;;  %v5332_v13 = vpop.eup %5331  ;;  %v7814_v19 = vmul.f32 %v5330_v51, %v7729_v53  ;;  %v2079_v36 = vsel %vm563_vm1, %v7808_v9, 0.0 }
 0x423   :  { %5339 = vrcp.f32 %v2035_v63  ;;  %v5334_v27 = vpop.eup %5333  ;;  %v2062_v16 = vmul.f32 %v5332_v13, %v7714_v21  ;;  %v2092_v35 = vsel %vm563_vm1, %v7811_v38, 0.0  ;;  %v2080_v15 = vadd.f32 %v2079_v36, %v2078_v20 }
 0x424   :  { %v1997_v22 = vpop.xlane.xlu1 %1996  ;;  %v7822_v42 = vmul.f32 %v5334_v27, %v7732_v62  ;;  %v2094_v8 = vsel %vm563_vm1, %v7814_v19, 0.0 }
 0x425   :  { %v2029_v34 = vadd.f32 1e-08, %v1997_v22  ;;  %v2091_v62 = vsel %vm563_vm1, %v2062_v16, 0.0 }
 0x426   :  { %v2021_v59 = vpop.xlane.xlu2 %2020  ;;  %v2093_v17 = vadd.f32 %v2092_v35, %v2091_v62  ;;  %v2096_v1 = vsel %vm563_vm1, %v7822_v42, 0.0 }
 0x427   :  { %5341 = vrcp.f32 %v2029_v34  ;;  %v2037_v4 = vadd.f32 1e-08, %v2021_v59  ;;  %v5336_v47 = vpop.eup %5335 }
 0x428   :  { %5343 = vrcp.f32 %v2036_v39  ;;  %v5338_v6 = vpop.eup %5337  ;;  %v7819_v57 = vmul.f32 %v5336_v47, %v7764_v25  ;;  %v2095_v32 = vadd.f32 %v2094_v8, %v2093_v17 }
 0x429   :  { %5345 = vrcp.f32 %v2037_v4  ;;  %v5340_v48 = vpop.eup %5339  ;;  %v7832_v25 = vmul.f32 %v5338_v6, %v7750_v3 }
 0x42a   :  { %v2081_v53 = vsel %vm563_vm1, %v7819_v57, 0.0  ;;  %v7841_v23 = vmul.f32 %v5340_v48, %v7759_v37  ;;  %v2097_v12 = vadd.f32 %v2096_v1, %v2095_v32 }
 0x42b   :  { %v2082_v50 = vadd.f32 %v2081_v53, %v2080_v15  ;;  %v2098_v54 = vsel %vm563_vm1, %v7832_v25, 0.0 }
 0x42c   :  { %v2100_v26 = vsel %vm563_vm1, %v7841_v23, 0.0  ;;  %v2099_v52 = vadd.f32 %v2098_v54, %v2097_v12 }
 0x42d   :  { %v5342_v46 = vpop.eup %5341 }
 0x42e   :  { %v5344_v2 = vpop.eup %5343  ;;  %v7836_v21 = vmul.f32 %v5342_v46, %v7773_v45  ;;  %v2101_v44 = vadd.f32 %v2100_v26, %v2099_v52 }
 0x42f   :  { %v5346_v0 = vpop.eup %5345  ;;  %v2068_v7 = vmul.f32 %v5344_v2, %v7761_v11 }
 0x430   :  { %v2083_v3 = vsel %vm563_vm1, %v7836_v21, 0.0  ;;  %v7851_v40 = vmul.f32 %v5346_v0, %v7776_v56 }
 0x431   :  { %v2084_v45 = vadd.f32 %v2083_v3, %v2082_v50  ;;  %v2102_v5 = vsel %vm563_vm1, %v2068_v7, 0.0 }
 0x432   :  { %v2104_v43 = vsel %vm563_vm1, %v7851_v40, 0.0  ;;  %v2103_v41 = vadd.f32 %v2102_v5, %v2101_v44 }
 0x433   :  { %v2085_v37 = vrot.slane %v2084_v45, 4 }
 0x434   :  { %v2105_v63 = vadd.f32 %v2104_v43, %v2103_v41 }
 0x435   :  { %v2086_v60 = vadd.f32 %v2085_v37, %v2084_v45 }
 0x436   :  { %v2106_v58 = vrot.slane %v2105_v63, 4 }
 0x437   :  { %v2087_v14 = vrot.slane %v2086_v60, 2 }
 0x438   :  { %v2107_v10 = vadd.f32 %v2106_v58, %v2105_v63 }
 0x439   :  { %v2088_v11 = vadd.f32 %v2087_v14, %v2086_v60 }
 0x43a   :  { %v2108_v56 = vrot.slane %v2107_v10, 2 }
 0x43b   :  { %v2089_v33 = vrot.slane %v2088_v11, 1 }
 0x43c   :  { %v2109_v22 = vadd.f32 %v2108_v56, %v2107_v10 }
 0x43d   :  { %v2090_v28 = vadd.f32 %v2089_v33, %v2088_v11 }
 0x43e   :  { %v2110_v51 = vrot.slane %v2109_v22, 1 }
 0x43f   :  { %v2112_v39 = vadd.f32 1e-08, %v2090_v28 }
 0x440   :  { %v2111_v34 = vadd.f32 %v2110_v51, %v2109_v22 }
 0x441   :  { %5347 = vrcp.f32 %v2112_v39 }
 0x442   :  { %v2113_v59 = vadd.f32 1e-08, %v2111_v34 }
 0x444   :  { %5349 = vrcp.f32 %v2113_v59 }
 0x447   :  { %v5348_v18 = vpop.eup %5347 }
 0x448   :  { %v7857_v55 = vmul.f32 %v5348_v18, %v7786_v61  ;;  %v7860_v13 = vmul.f32 %v5348_v18, %v7783_v31  ;;  %v7867_v4 = vmul.f32 %v5348_v18, %v7789_v24  ;;  %v7925_v1 = vmul.f32 %v5348_v18, %v7836_v21 }
 0x44a   :  { %v2135_v30 = vsel %vm563_vm1, %v7857_v55, 0.0  ;;  %v2132_v27 = vsel %vm563_vm1, %v7860_v13, 0.0  ;;  %v5350_v47 = vpop.eup %5349  ;;  %v2138_v31 = vsel %vm563_vm1, %v7867_v4, 0.0 }
 0x44b   :  { %2136 = vadd.xlane.f32.xlu1 %v2135_v30  ;;  %2133 = vadd.xlane.f32.xlu0 %v2132_v27  ;;  %v7869_v20 = vmul.f32 %v5350_v47, %v2062_v16  ;;  %v7872_v61 = vmul.f32 %v5350_v47, %v7811_v38  ;;  %v7881_v24 = vmul.f32 %v5350_v47, %v7822_v42 }
 0x44c   :  { %v7884_v16 = vmul.f32 %v5350_v47, %v7814_v19  ;;  %v7887_v38 = vmul.f32 %v5348_v18, %v7794_v49  ;;  %v7896_v42 = vmul.f32 %v5348_v18, %v7808_v9  ;;  %v7899_v19 = vmul.f32 %v5348_v18, %v7801_v29 }
 0x44d   :  { %v2156_v6 = vsel %vm563_vm1, %v7869_v20, 0.0  ;;  %v2159_v36 = vsel %vm563_vm1, %v7872_v61, 0.0  ;;  %v2165_v35 = vsel %vm563_vm1, %v7881_v24, 0.0  ;;  %v7902_v49 = vmul.f32 %v5350_v47, %v7832_v25 }
 0x44e   :  { %2157 = vadd.xlane.f32.xlu2 %v2156_v6  ;;  %v2162_v48 = vsel %vm563_vm1, %v7884_v16, 0.0  ;;  %v2141_v53 = vsel %vm563_vm1, %v7887_v38, 0.0  ;;  %v2147_v46 = vsel %vm563_vm1, %v7896_v42, 0.0  ;;  %v2144_v8 = vsel %vm563_vm1, %v7899_v19, 0.0 }
 0x44f   :  { %v2168_v15 = vsel %vm563_vm1, %v7902_v49, 0.0  ;;  %v7910_v9 = vmul.f32 %v5350_v47, %v2068_v7  ;;  %v7913_v29 = vmul.f32 %v5350_v47, %v7841_v23  ;;  %v7916_v25 = vmul.f32 %v5348_v18, %v7819_v57 }
 0x450   :  { %v7928_v23 = vmul.f32 %v5350_v47, %v7851_v40  ;;  %v2153_v57 = vsel %vm563_vm1, %v7925_v1, 0.0 }
 0x451   :  { %v2174_v62 = vsel %vm563_vm1, %v7910_v9, 0.0  ;;  %v2171_v2 = vsel %vm563_vm1, %v7913_v29, 0.0  ;;  %v2150_v17 = vsel %vm563_vm1, %v7916_v25, 0.0 }
 0x452   :  { %v2177_v50 = vsel %vm563_vm1, %v7928_v23, 0.0 }
 0x453   :  { %2139 = vadd.xlane.f32.xlu1 %v2138_v31  ;;  %2160 = vadd.xlane.f32.xlu0 %v2159_v36 }
 0x456   :  { %2163 = vadd.xlane.f32.xlu2 %v2162_v48 }
 0x45b   :  { %2166 = vadd.xlane.f32.xlu1 %v2165_v35  ;;  %2142 = vadd.xlane.f32.xlu0 %v2141_v53 }
 0x45e   :  { %2145 = vadd.xlane.f32.xlu2 %v2144_v8 }
 0x463   :  { %2148 = vadd.xlane.f32.xlu1 %v2147_v46  ;;  %2169 = vadd.xlane.f32.xlu0 %v2168_v15 }
 0x466   :  { %2172 = vadd.xlane.f32.xlu2 %v2171_v2 }
 0x46b   :  { %2175 = vadd.xlane.f32.xlu1 %v2174_v62  ;;  %2151 = vadd.xlane.f32.xlu0 %v2150_v17 }
 0x46e   :  { %2154 = vadd.xlane.f32.xlu2 %v2153_v57 }
 0x473   :  { %2178 = vadd.xlane.f32.xlu0 %v2177_v50 }
 0x4be   :  { %v2137_v0 = vpop.xlane.xlu1 %2136  ;;  %v2134_v3 = vpop.xlane.xlu0 %2133 }
 0x4bf   :  { %v2181_v12 = vadd.f32 1e-08, %v2137_v0  ;;  %v2180_v37 = vadd.f32 1e-08, %v2134_v3 }
 0x4c1   :  { %v2158_v54 = vpop.xlane.xlu2 %2157  ;;  %5351 = vrcp.f32 %v2181_v12 }
 0x4c2   :  { %5353 = vrcp.f32 %v2180_v37  ;;  %v2188_v34 = vadd.f32 1e-08, %v2158_v54 }
 0x4c6   :  { %v2140_v32 = vpop.xlane.xlu1 %2139  ;;  %v2161_v7 = vpop.xlane.xlu0 %2160 }
 0x4c7   :  { %v2182_v40 = vadd.f32 1e-08, %v2140_v32  ;;  %v5352_v14 = vpop.eup %5351  ;;  %v2189_v33 = vadd.f32 1e-08, %v2161_v7 }
 0x4c8   :  { %v5354_v41 = vpop.eup %5353  ;;  %v7938_v28 = vmul.f32 %v5352_v14, %v7857_v55 }
 0x4c9   :  { %v2164_v21 = vpop.xlane.xlu2 %2163  ;;  %5355 = vrcp.f32 %v2182_v40  ;;  %v7935_v58 = vmul.f32 %v5354_v41, %v7860_v13 }
 0x4ca   :  { %v2190_v39 = vadd.f32 1e-08, %v2164_v21  ;;  %v2229_v55 = vsel %vm563_vm1, %v7938_v28, 0.0 }
 0x4cb   :  { %v2228_v13 = vsel %vm563_vm1, %v7935_v58, 0.0 }
 0x4cc   :  { %v2230_v36 = vadd.f32 %v2229_v55, %v2228_v13 }
 0x4ce   :  { %v2167_v45 = vpop.xlane.xlu1 %2166  ;;  %v2143_v26 = vpop.xlane.xlu0 %2142 }
 0x4cf   :  { %v2183_v52 = vadd.f32 1e-08, %v2143_v26  ;;  %v5356_v63 = vpop.eup %5355  ;;  %v2191_v59 = vadd.f32 1e-08, %v2167_v45 }
 0x4d0   :  { %v7941_v56 = vmul.f32 %v5356_v63, %v7867_v4 }
 0x4d1   :  { %v2146_v60 = vpop.xlane.xlu2 %2145  ;;  %5357 = vrcp.f32 %v2183_v52 }
 0x4d2   :  { %v2184_v43 = vadd.f32 1e-08, %v2146_v60  ;;  %v2231_v4 = vsel %vm563_vm1, %v7941_v56, 0.0 }
 0x4d3   :  { %v2232_v46 = vadd.f32 %v2231_v4, %v2230_v36 }
 0x4d4   :  { %5359 = vrcp.f32 %v2184_v43 }
 0x4d6   :  { %v2149_v5 = vpop.xlane.xlu1 %2148  ;;  %v2170_v44 = vpop.xlane.xlu0 %2169 }
 0x4d7   :  { %v2185_v11 = vadd.f32 1e-08, %v2149_v5  ;;  %v5358_v10 = vpop.eup %5357  ;;  %v2192_v47 = vadd.f32 1e-08, %v2170_v44 }
 0x4d8   :  { %v7944_v30 = vmul.f32 %v5358_v10, %v7887_v38 }
 0x4d9   :  { %5361 = vrcp.f32 %v2185_v11  ;;  %v2173_v22 = vpop.xlane.xlu2 %2172 }
 0x4da   :  { %5363 = vrcp.f32 %v2189_v33  ;;  %v5360_v27 = vpop.eup %5359  ;;  %v2233_v38 = vsel %vm563_vm1, %v7944_v30, 0.0  ;;  %v2193_v48 = vadd.f32 1e-08, %v2173_v22 }
 0x4db   :  { %5365 = vrcp.f32 %v2190_v39  ;;  %v7955_v35 = vmul.f32 %v5360_v27, %v7899_v19  ;;  %v2234_v50 = vadd.f32 %v2233_v38, %v2232_v46 }
 0x4dd   :  { %v2235_v3 = vsel %vm563_vm1, %v7955_v35, 0.0 }
 0x4de   :  { %v2152_v51 = vpop.xlane.xlu0 %2151  ;;  %v2176_v6 = vpop.xlane.xlu1 %2175  ;;  %v2236_v21 = vadd.f32 %v2235_v3, %v2234_v50 }
 0x4df   :  { %v2186_v18 = vadd.f32 1e-08, %v2152_v51  ;;  %v5362_v31 = vpop.eup %5361  ;;  %v2194_v15 = vadd.f32 1e-08, %v2176_v6 }
 0x4e0   :  { %v5364_v53 = vpop.eup %5363  ;;  %v7958_v8 = vmul.f32 %v5362_v31, %v7896_v42 }
 0x4e1   :  { %5367 = vrcp.f32 %v2186_v18  ;;  %v2155_v62 = vpop.xlane.xlu2 %2154  ;;  %v5366_v17 = vpop.eup %5365  ;;  %v7963_v54 = vmul.f32 %v5364_v53, %v7872_v61 }
 0x4e2   :  { %5369 = vrcp.f32 %v2188_v34  ;;  %v2187_v57 = vadd.f32 1e-08, %v2155_v62  ;;  %v2237_v45 = vsel %vm563_vm1, %v7958_v8, 0.0  ;;  %v7971_v12 = vmul.f32 %v5366_v17, %v7884_v16 }
 0x4e3   :  { %5371 = vrcp.f32 %v2191_v59  ;;  %v2250_v52 = vsel %vm563_vm1, %v7963_v54, 0.0 }
 0x4e4   :  { %5373 = vrcp.f32 %v2192_v47  ;;  %v2252_v16 = vsel %vm563_vm1, %v7971_v12, 0.0 }
 0x4e5   :  { %5375 = vrcp.f32 %v2193_v48 }
 0x4e6   :  { %v2179_v2 = vpop.xlane.xlu0 %2178  ;;  %5377 = vrcp.f32 %v2187_v57 }
 0x4e7   :  { %v5368_v0 = vpop.eup %5367  ;;  %v2195_v19 = vadd.f32 1e-08, %v2179_v2  ;;  %5379 = vrcp.f32 %v2194_v15 }
 0x4e8   :  { %v5370_v32 = vpop.eup %5369  ;;  %v7966_v42 = vmul.f32 %v5368_v0, %v7916_v25  ;;  %v2238_v25 = vadd.f32 %v2237_v45, %v2236_v21 }
 0x4e9   :  { %v5372_v7 = vpop.eup %5371  ;;  %5381 = vrcp.f32 %v2195_v19  ;;  %v2220_v40 = vmul.f32 %v5370_v32, %v7869_v20 }
 0x4ea   :  { %v5374_v26 = vpop.eup %5373  ;;  %v2239_v37 = vsel %vm563_vm1, %v7966_v42, 0.0  ;;  %v7976_v61 = vmul.f32 %v5372_v7, %v7881_v24 }
 0x4eb   :  { %v5376_v5 = vpop.eup %5375  ;;  %v7984_v44 = vmul.f32 %v5374_v26, %v7902_v49  ;;  %v2240_v43 = vadd.f32 %v2239_v37, %v2238_v25  ;;  %v2249_v14 = vsel %vm563_vm1, %v2220_v40, 0.0 }
 0x4ec   :  { %v5378_v60 = vpop.eup %5377  ;;  %v2251_v11 = vadd.f32 %v2250_v52, %v2249_v14  ;;  %v2254_v20 = vsel %vm563_vm1, %v7976_v61, 0.0  ;;  %v7993_v63 = vmul.f32 %v5376_v5, %v7913_v29 }
 0x4ed   :  { %v5380_v41 = vpop.eup %5379  ;;  %v7988_v24 = vmul.f32 %v5378_v60, %v7925_v1  ;;  %v2256_v39 = vsel %vm563_vm1, %v7984_v44, 0.0 }
 0x4ee   :  { %v2253_v49 = vadd.f32 %v2252_v16, %v2251_v11  ;;  %v2226_v22 = vmul.f32 %v5380_v41, %v7910_v9  ;;  %v2258_v34 = vsel %vm563_vm1, %v7993_v63, 0.0 }
 0x4ef   :  { %v5382_v33 = vpop.eup %5381  ;;  %v2241_v10 = vsel %vm563_vm1, %v7988_v24, 0.0 }
 0x4f0   :  { %v2242_v51 = vadd.f32 %v2241_v10, %v2240_v43  ;;  %v2255_v1 = vadd.f32 %v2254_v20, %v2253_v49  ;;  %v8003_v18 = vmul.f32 %v5382_v33, %v7928_v23  ;;  %v2260_v13 = vsel %vm563_vm1, %v2226_v22, 0.0 }
 0x4f2   :  { %v2243_v29 = vrot.slane %v2242_v51, 4  ;;  %v2257_v59 = vadd.f32 %v2256_v39, %v2255_v1  ;;  %v2262_v4 = vsel %vm563_vm1, %v8003_v18, 0.0 }
 0x4f4   :  { %v2244_v55 = vadd.f32 %v2243_v29, %v2242_v51  ;;  %v2259_v27 = vadd.f32 %v2258_v34, %v2257_v59 }
 0x4f6   :  { %v2245_v47 = vrot.slane %v2244_v55, 2  ;;  %v2261_v31 = vadd.f32 %v2260_v13, %v2259_v27 }
 0x4f8   :  { %v2246_v9 = vadd.f32 %v2245_v47, %v2244_v55  ;;  %v2263_v6 = vadd.f32 %v2262_v4, %v2261_v31 }
 0x4fa   :  { %v2247_v36 = vrot.slane %v2246_v9, 1  ;;  %v2264_v38 = vrot.slane %v2263_v6, 4 }
 0x4fc   :  { %v2248_v48 = vadd.f32 %v2247_v36, %v2246_v9  ;;  %v2265_v53 = vadd.f32 %v2264_v38, %v2263_v6 }
 0x4fe   :  { %v2270_v46 = vadd.f32 1e-08, %v2248_v48  ;;  %v2266_v23 = vrot.slane %v2265_v53, 2 }
 0x500   :  { %5383 = vrcp.f32 %v2270_v46  ;;  %v2267_v15 = vadd.f32 %v2266_v23, %v2265_v53 }
 0x502   :  { %v2268_v62 = vrot.slane %v2267_v15, 1 }
 0x504   :  { %v2269_v2 = vadd.f32 %v2268_v62, %v2267_v15 }
 0x506   :  { %v5384_v17 = vpop.eup %5383  ;;  %v2271_v0 = vadd.f32 1e-08, %v2269_v2 }
 0x507   :  { %v8009_v57 = vmul.f32 %v5384_v17, %v7938_v28  ;;  %v8012_v50 = vmul.f32 %v5384_v17, %v7935_v58  ;;  %v8019_v32 = vmul.f32 %v5384_v17, %v7941_v56  ;;  %v8077_v11 = vmul.f32 %v5384_v17, %v7988_v24 }
 0x508   :  { %5385 = vrcp.f32 %v2271_v0 }
 0x509   :  { %v2293_v3 = vsel %vm563_vm1, %v8009_v57, 0.0  ;;  %v2290_v19 = vsel %vm563_vm1, %v8012_v50, 0.0  ;;  %v2296_v58 = vsel %vm563_vm1, %v8019_v32, 0.0 }
 0x50a   :  { %2294 = vadd.xlane.f32.xlu2 %v2293_v3  ;;  %2291 = vadd.xlane.f32.xlu1 %v2290_v19 }
 0x50e   :  { %v5386_v7 = vpop.eup %5385 }
 0x50f   :  { %v8021_v45 = vmul.f32 %v5386_v7, %v2220_v40  ;;  %v8024_v28 = vmul.f32 %v5386_v7, %v7963_v54  ;;  %v8033_v56 = vmul.f32 %v5386_v7, %v7976_v61  ;;  %v8036_v37 = vmul.f32 %v5386_v7, %v7971_v12 }
 0x510   :  { %v8039_v54 = vmul.f32 %v5384_v17, %v7944_v30  ;;  %v8048_v61 = vmul.f32 %v5384_v17, %v7958_v8  ;;  %v8051_v12 = vmul.f32 %v5384_v17, %v7955_v35  ;;  %v8054_v30 = vmul.f32 %v5386_v7, %v7984_v44 }
 0x511   :  { %v2314_v21 = vsel %vm563_vm1, %v8021_v45, 0.0  ;;  %v2317_v26 = vsel %vm563_vm1, %v8024_v28, 0.0  ;;  %v2323_v25 = vsel %vm563_vm1, %v8033_v56, 0.0  ;;  %v2320_v40 = vsel %vm563_vm1, %v8036_v37, 0.0 }
 0x512   :  { %2297 = vadd.xlane.f32.xlu2 %v2296_v58  ;;  %2315 = vadd.xlane.f32.xlu0 %v2314_v21  ;;  %v2299_v52 = vsel %vm563_vm1, %v8039_v54, 0.0  ;;  %v2305_v5 = vsel %vm563_vm1, %v8048_v61, 0.0  ;;  %v2302_v60 = vsel %vm563_vm1, %v8051_v12, 0.0  ;;  %v2326_v16 = vsel %vm563_vm1, %v8054_v30, 0.0 }
 0x513   :  { %2318 = vadd.xlane.f32.xlu1 %v2317_v26  ;;  %v8062_v8 = vmul.f32 %v5386_v7, %v2226_v22  ;;  %v8065_v35 = vmul.f32 %v5386_v7, %v7993_v63  ;;  %v8068_v44 = vmul.f32 %v5384_v17, %v7966_v42  ;;  %v8080_v20 = vmul.f32 %v5386_v7, %v8003_v18 }
 0x514   :  { %v2311_v42 = vsel %vm563_vm1, %v8077_v11, 0.0 }
 0x515   :  { %v2332_v43 = vsel %vm563_vm1, %v8062_v8, 0.0  ;;  %v2329_v14 = vsel %vm563_vm1, %v8065_v35, 0.0  ;;  %v2308_v41 = vsel %vm563_vm1, %v8068_v44, 0.0  ;;  %v2335_v63 = vsel %vm563_vm1, %v8080_v20, 0.0 }
 0x51a   :  { %2324 = vadd.xlane.f32.xlu2 %v2323_v25  ;;  %2321 = vadd.xlane.f32.xlu0 %v2320_v40 }
 0x51b   :  { %2300 = vadd.xlane.f32.xlu1 %v2299_v52 }
 0x522   :  { %2306 = vadd.xlane.f32.xlu2 %v2305_v5  ;;  %2303 = vadd.xlane.f32.xlu0 %v2302_v60 }
 0x523   :  { %2327 = vadd.xlane.f32.xlu1 %v2326_v16 }
 0x52a   :  { %2333 = vadd.xlane.f32.xlu2 %v2332_v43  ;;  %2330 = vadd.xlane.f32.xlu0 %v2329_v14 }
 0x52b   :  { %2309 = vadd.xlane.f32.xlu1 %v2308_v41 }
 0x532   :  { %2312 = vadd.xlane.f32.xlu0 %v2311_v42 }
 0x533   :  { %2336 = vadd.xlane.f32.xlu1 %v2335_v63 }
 0x57d   :  { %v2295_v33 = vpop.xlane.xlu2 %2294  ;;  %v2292_v10 = vpop.xlane.xlu1 %2291 }
 0x57e   :  { %v2338_v34 = vadd.f32 1e-08, %v2292_v10  ;;  %v2339_v29 = vadd.f32 1e-08, %v2295_v33 }
 0x580   :  { %5387 = vrcp.f32 %v2338_v34 }
 0x581   :  { %5389 = vrcp.f32 %v2339_v29 }
 0x585   :  { %v2298_v49 = vpop.xlane.xlu2 %2297  ;;  %v2316_v39 = vpop.xlane.xlu0 %2315 }
 0x586   :  { %v2319_v22 = vpop.xlane.xlu1 %2318  ;;  %v2340_v18 = vadd.f32 1e-08, %v2298_v49  ;;  %v2346_v47 = vadd.f32 1e-08, %v2316_v39  ;;  %v5388_v31 = vpop.eup %5387 }
 0x587   :  { %v2347_v9 = vadd.f32 1e-08, %v2319_v22  ;;  %v5390_v6 = vpop.eup %5389  ;;  %v8087_v53 = vmul.f32 %v5388_v31, %v8012_v50 }
 0x588   :  { %5391 = vrcp.f32 %v2340_v18  ;;  %v8090_v62 = vmul.f32 %v5390_v6, %v8009_v57 }
 0x589   :  { %v2386_v7 = vsel %vm563_vm1, %v8087_v53, 0.0 }
 0x58a   :  { %v2387_v57 = vsel %vm563_vm1, %v8090_v62, 0.0 }
 0x58b   :  { %v2388_v60 = vadd.f32 %v2387_v57, %v2386_v7 }
 0x58d   :  { %v2325_v51 = vpop.xlane.xlu2 %2324  ;;  %v2322_v1 = vpop.xlane.xlu0 %2321 }
 0x58e   :  { %v2301_v24 = vpop.xlane.xlu1 %2300  ;;  %v2348_v38 = vadd.f32 1e-08, %v2322_v1  ;;  %v5392_v48 = vpop.eup %5391  ;;  %v2349_v46 = vadd.f32 1e-08, %v2325_v51 }
 0x58f   :  { %v2341_v59 = vadd.f32 1e-08, %v2301_v24  ;;  %v8093_v0 = vmul.f32 %v5392_v48, %v8019_v32 }
 0x591   :  { %5393 = vrcp.f32 %v2341_v59  ;;  %v2389_v32 = vsel %vm563_vm1, %v8093_v0, 0.0 }
 0x592   :  { %v2390_v33 = vadd.f32 %v2389_v32, %v2388_v60 }
 0x595   :  { %v2304_v13 = vpop.xlane.xlu0 %2303  ;;  %v2307_v4 = vpop.xlane.xlu2 %2306 }
 0x596   :  { %v2328_v55 = vpop.xlane.xlu1 %2327  ;;  %v2342_v27 = vadd.f32 1e-08, %v2304_v13  ;;  %v2343_v36 = vadd.f32 1e-08, %v2307_v4 }
 0x597   :  { %v5394_v2 = vpop.eup %5393  ;;  %v2350_v3 = vadd.f32 1e-08, %v2328_v55 }
 0x598   :  { %5395 = vrcp.f32 %v2342_v27  ;;  %v8098_v58 = vmul.f32 %v5394_v2, %v8039_v54 }
 0x599   :  { %5397 = vrcp.f32 %v2346_v47 }
 0x59a   :  { %5399 = vrcp.f32 %v2347_v9  ;;  %v2391_v54 = vsel %vm563_vm1, %v8098_v58, 0.0 }
 0x59b   :  { %5401 = vrcp.f32 %v2343_v36  ;;  %v2392_v51 = vadd.f32 %v2391_v54, %v2390_v33 }
 0x59c   :  { %5403 = vrcp.f32 %v2348_v38 }
 0x59d   :  { %v2331_v23 = vpop.xlane.xlu0 %2330  ;;  %5405 = vrcp.f32 %v2349_v46  ;;  %v2334_v50 = vpop.xlane.xlu2 %2333 }
 0x59e   :  { %v2310_v15 = vpop.xlane.xlu1 %2309  ;;  %v5396_v19 = vpop.eup %5395  ;;  %v2351_v21 = vadd.f32 1e-08, %v2331_v23  ;;  %v2352_v52 = vadd.f32 1e-08, %v2334_v50 }
 0x59f   :  { %v2344_v17 = vadd.f32 1e-08, %v2310_v15  ;;  %v5398_v26 = vpop.eup %5397  ;;  %v8105_v40 = vmul.f32 %v5396_v19, %v8051_v12 }
 0x5a0   :  { %v5400_v25 = vpop.eup %5399  ;;  %v2378_v34 = vmul.f32 %v5398_v26, %v8021_v45 }
 0x5a1   :  { %5407 = vrcp.f32 %v2344_v17  ;;  %v5402_v5 = vpop.eup %5401  ;;  %v2393_v12 = vsel %vm563_vm1, %v8105_v40, 0.0  ;;  %v8115_v39 = vmul.f32 %v5400_v25, %v8024_v28 }
 0x5a2   :  { %5409 = vrcp.f32 %v2350_v3  ;;  %v5404_v16 = vpop.eup %5403  ;;  %v8112_v49 = vmul.f32 %v5402_v5, %v8048_v61  ;;  %v2394_v61 = vadd.f32 %v2393_v12, %v2392_v51 }
 0x5a3   :  { %5411 = vrcp.f32 %v2351_v21  ;;  %v5406_v41 = vpop.eup %5405  ;;  %v8118_v22 = vmul.f32 %v5404_v16, %v8036_v37  ;;  %v2408_v13 = vsel %vm563_vm1, %v8115_v39, 0.0 }
 0x5a4   :  { %5413 = vrcp.f32 %v2352_v52  ;;  %v8125_v29 = vmul.f32 %v5406_v41, %v8033_v56  ;;  %v2395_v28 = vsel %vm563_vm1, %v8112_v49, 0.0 }
 0x5a5   :  { %v2313_v43 = vpop.xlane.xlu0 %2312  ;;  %v2410_v37 = vsel %vm563_vm1, %v8118_v22, 0.0  ;;  %v2396_v31 = vadd.f32 %v2395_v28, %v2394_v61 }
 0x5a6   :  { %v2337_v14 = vpop.xlane.xlu1 %2336  ;;  %v2345_v42 = vadd.f32 1e-08, %v2313_v43  ;;  %v2412_v4 = vsel %vm563_vm1, %v8125_v29, 0.0 }
 0x5a7   :  { %v2353_v63 = vadd.f32 1e-08, %v2337_v14  ;;  %v5408_v10 = vpop.eup %5407 }
 0x5a8   :  { %5415 = vrcp.f32 %v2345_v42  ;;  %v5410_v1 = vpop.eup %5409  ;;  %v8121_v24 = vmul.f32 %v5408_v10, %v8068_v44  ;;  %v2407_v44 = vsel %vm563_vm1, %v2378_v34, 0.0 }
 0x5a9   :  { %5417 = vrcp.f32 %v2353_v63  ;;  %v5412_v18 = vpop.eup %5411  ;;  %v8132_v59 = vmul.f32 %v5410_v1, %v8054_v30  ;;  %v2409_v55 = vadd.f32 %v2408_v13, %v2407_v44 }
 0x5aa   :  { %v5414_v45 = vpop.eup %5413  ;;  %v2397_v56 = vsel %vm563_vm1, %v8121_v24, 0.0  ;;  %v8142_v47 = vmul.f32 %v5412_v18, %v8065_v35 }
 0x5ab   :  { %v2411_v6 = vadd.f32 %v2410_v37, %v2409_v55  ;;  %v2414_v36 = vsel %vm563_vm1, %v8132_v59, 0.0  ;;  %v8150_v38 = vmul.f32 %v5414_v45, %v8062_v8  ;;  %v2398_v48 = vadd.f32 %v2397_v56, %v2396_v31 }
 0x5ac   :  { %v2416_v35 = vsel %vm563_vm1, %v8142_v47, 0.0 }
 0x5ad   :  { %v2413_v23 = vadd.f32 %v2412_v4, %v2411_v6  ;;  %v2418_v17 = vsel %vm563_vm1, %v8150_v38, 0.0 }
 0x5ae   :  { %v5416_v27 = vpop.eup %5415 }
 0x5af   :  { %v5418_v30 = vpop.eup %5417  ;;  %v8145_v9 = vmul.f32 %v5416_v27, %v8077_v11  ;;  %v2415_v2 = vadd.f32 %v2414_v36, %v2413_v23 }
 0x5b0   :  { %v8157_v15 = vmul.f32 %v5418_v30, %v8080_v20 }
 0x5b1   :  { %v2399_v46 = vsel %vm563_vm1, %v8145_v9, 0.0  ;;  %v2417_v19 = vadd.f32 %v2416_v35, %v2415_v2 }
 0x5b2   :  { %v2400_v11 = vadd.f32 %v2399_v46, %v2398_v48  ;;  %v2420_v8 = vsel %vm563_vm1, %v8157_v15, 0.0 }
 0x5b3   :  { %v2419_v7 = vadd.f32 %v2418_v17, %v2417_v19 }
 0x5b4   :  { %v2401_v3 = vrot.slane %v2400_v11, 4 }
 0x5b5   :  { %v2421_v57 = vadd.f32 %v2420_v8, %v2419_v7 }
 0x5b6   :  { %v2402_v50 = vadd.f32 %v2401_v3, %v2400_v11 }
 0x5b7   :  { %v2422_v25 = vrot.slane %v2421_v57, 4 }
 0x5b8   :  { %v2403_v21 = vrot.slane %v2402_v50, 2 }
 0x5b9   :  { %v2423_v52 = vadd.f32 %v2422_v25, %v2421_v57 }
 0x5ba   :  { %v2404_v26 = vadd.f32 %v2403_v21, %v2402_v50 }
 0x5bb   :  { %v2424_v5 = vrot.slane %v2423_v52, 2 }
 0x5bc   :  { %v2405_v32 = vrot.slane %v2404_v26, 1 }
 0x5bd   :  { %v2425_v16 = vadd.f32 %v2424_v5, %v2423_v52 }
 0x5be   :  { %v2406_v20 = vadd.f32 %v2405_v32, %v2404_v26 }
 0x5bf   :  { %v2426_v54 = vrot.slane %v2425_v16, 1 }
 0x5c0   :  { %v2428_v60 = vadd.f32 1e-08, %v2406_v20 }
 0x5c1   :  { %v2427_v43 = vadd.f32 %v2426_v54, %v2425_v16 }
 0x5c2   :  { %5419 = vrcp.f32 %v2428_v60 }
 0x5c3   :  { %v2429_v14 = vadd.f32 1e-08, %v2427_v43 }
 0x5c5   :  { %5421 = vrcp.f32 %v2429_v14 }
 0x5c8   :  { %v5420_v41 = vpop.eup %5419 }
 0x5c9   :  { %v8164_v42 = vmul.f32 %v5420_v41, %v8090_v62  ;;  %v8167_v63 = vmul.f32 %v5420_v41, %v8087_v53  ;;  %v8174_v51 = vmul.f32 %v5420_v41, %v8093_v0 }
 0x5cb   :  { %v2451_v33 = vsel %vm563_vm1, %v8164_v42, 0.0  ;;  %v2448_v10 = vsel %vm563_vm1, %v8167_v63, 0.0  ;;  %v5422_v12 = vpop.eup %5421  ;;  %v2454_v61 = vsel %vm563_vm1, %v8174_v51, 0.0 }
 0x5cc   :  { %2452 = vadd.xlane.f32.xlu0 %v2451_v33  ;;  %2449 = vadd.xlane.f32.xlu2 %v2448_v10  ;;  %v8176_v1 = vmul.f32 %v5422_v12, %v2378_v34  ;;  %v8179_v62 = vmul.f32 %v5422_v12, %v8115_v39  ;;  %v8188_v0 = vmul.f32 %v5422_v12, %v8118_v22 }
 0x5cd   :  { %v8191_v34 = vmul.f32 %v5422_v12, %v8125_v29  ;;  %v8194_v39 = vmul.f32 %v5420_v41, %v8098_v58  ;;  %v8203_v22 = vmul.f32 %v5420_v41, %v8105_v40  ;;  %v8206_v29 = vmul.f32 %v5420_v41, %v8112_v49 }
 0x5ce   :  { %v2472_v53 = vsel %vm563_vm1, %v8176_v1, 0.0  ;;  %v2475_v18 = vsel %vm563_vm1, %v8179_v62, 0.0  ;;  %v2478_v28 = vsel %vm563_vm1, %v8188_v0, 0.0  ;;  %v8209_v58 = vmul.f32 %v5422_v12, %v8132_v59 }
 0x5cf   :  { %2473 = vadd.xlane.f32.xlu1 %v2472_v53  ;;  %v2481_v37 = vsel %vm563_vm1, %v8191_v34, 0.0  ;;  %v2457_v44 = vsel %vm563_vm1, %v8194_v39, 0.0  ;;  %v2460_v13 = vsel %vm563_vm1, %v8203_v22, 0.0  ;;  %v2463_v45 = vsel %vm563_vm1, %v8206_v29, 0.0 }
 0x5d0   :  { %v2484_v56 = vsel %vm563_vm1, %v8209_v58, 0.0  ;;  %v8218_v40 = vmul.f32 %v5422_v12, %v8142_v47  ;;  %v8221_v49 = vmul.f32 %v5422_v12, %v8150_v38  ;;  %v8224_v59 = vmul.f32 %v5420_v41, %v8121_v24 }
 0x5d1   :  { %v8233_v47 = vmul.f32 %v5420_v41, %v8145_v9  ;;  %v8236_v31 = vmul.f32 %v5422_v12, %v8157_v15 }
 0x5d2   :  { %v2487_v55 = vsel %vm563_vm1, %v8218_v40, 0.0  ;;  %v2490_v27 = vsel %vm563_vm1, %v8221_v49, 0.0  ;;  %v2466_v4 = vsel %vm563_vm1, %v8224_v59, 0.0 }
 0x5d3   :  { %v2469_v24 = vsel %vm563_vm1, %v8233_v47, 0.0  ;;  %v2493_v30 = vsel %vm563_vm1, %v8236_v31, 0.0 }
 0x5d4   :  { %2455 = vadd.xlane.f32.xlu0 %v2454_v61  ;;  %2476 = vadd.xlane.f32.xlu2 %v2475_v18 }
 0x5d7   :  { %2479 = vadd.xlane.f32.xlu1 %v2478_v28 }
 0x5dc   :  { %2482 = vadd.xlane.f32.xlu0 %v2481_v37  ;;  %2458 = vadd.xlane.f32.xlu2 %v2457_v44 }
 0x5df   :  { %2461 = vadd.xlane.f32.xlu1 %v2460_v13 }
 0x5e4   :  { %2464 = vadd.xlane.f32.xlu0 %v2463_v45  ;;  %2485 = vadd.xlane.f32.xlu2 %v2484_v56 }
 0x5e7   :  { %2488 = vadd.xlane.f32.xlu1 %v2487_v55 }
 0x5ec   :  { %2491 = vadd.xlane.f32.xlu0 %v2490_v27  ;;  %2467 = vadd.xlane.f32.xlu2 %v2466_v4 }
 0x5ef   :  { %2470 = vadd.xlane.f32.xlu1 %v2469_v24 }
 0x5f4   :  { %2494 = vadd.xlane.f32.xlu2 %v2493_v30 }
 0x63f   :  { %v2453_v6 = vpop.xlane.xlu0 %2452  ;;  %v2450_v36 = vpop.xlane.xlu2 %2449 }
 0x640   :  { %v2496_v23 = vadd.f32 1e-08, %v2450_v36  ;;  %v2497_v9 = vadd.f32 1e-08, %v2453_v6 }
 0x642   :  { %v2474_v38 = vpop.xlane.xlu1 %2473  ;;  %5423 = vrcp.f32 %v2496_v23 }
 0x643   :  { %5425 = vrcp.f32 %v2497_v9  ;;  %v2504_v21 = vadd.f32 1e-08, %v2474_v38 }
 0x647   :  { %v2456_v48 = vpop.xlane.xlu0 %2455  ;;  %v2477_v46 = vpop.xlane.xlu2 %2476 }
 0x648   :  { %v2498_v15 = vadd.f32 1e-08, %v2456_v48  ;;  %v5424_v7 = vpop.eup %5423  ;;  %v2505_v25 = vadd.f32 1e-08, %v2477_v46 }
 0x649   :  { %v5426_v57 = vpop.eup %5425  ;;  %v8243_v52 = vmul.f32 %v5424_v7, %v8167_v63 }
 0x64a   :  { %v2480_v35 = vpop.xlane.xlu1 %2479  ;;  %5427 = vrcp.f32 %v2498_v15  ;;  %v8246_v5 = vmul.f32 %v5426_v57, %v8164_v42 }
 0x64b   :  { %v2506_v20 = vadd.f32 1e-08, %v2480_v35  ;;  %v2544_v41 = vsel %vm563_vm1, %v8243_v52, 0.0 }
 0x64c   :  { %v2545_v42 = vsel %vm563_vm1, %v8246_v5, 0.0 }
 0x64d   :  { %v2546_v37 = vadd.f32 %v2545_v42, %v2544_v41 }
 0x64f   :  { %v2483_v11 = vpop.xlane.xlu0 %2482  ;;  %v2459_v2 = vpop.xlane.xlu2 %2458 }
 0x650   :  { %v2499_v17 = vadd.f32 1e-08, %v2459_v2  ;;  %v5428_v32 = vpop.eup %5427  ;;  %v2507_v54 = vadd.f32 1e-08, %v2483_v11 }
 0x651   :  { %v8249_v16 = vmul.f32 %v5428_v32, %v8174_v51 }
 0x652   :  { %v2462_v3 = vpop.xlane.xlu1 %2461  ;;  %5429 = vrcp.f32 %v2499_v17 }
 0x653   :  { %v2500_v19 = vadd.f32 1e-08, %v2462_v3  ;;  %v2547_v61 = vsel %vm563_vm1, %v8249_v16, 0.0 }
 0x654   :  { %v2548_v55 = vadd.f32 %v2547_v61, %v2546_v37 }
 0x655   :  { %5431 = vrcp.f32 %v2500_v19 }
 0x656   :  { %5433 = vrcp.f32 %v2504_v21 }
 0x657   :  { %v2465_v8 = vpop.xlane.xlu0 %2464  ;;  %v2486_v50 = vpop.xlane.xlu2 %2485 }
 0x658   :  { %v2501_v26 = vadd.f32 1e-08, %v2465_v8  ;;  %v5430_v60 = vpop.eup %5429  ;;  %v2508_v33 = vadd.f32 1e-08, %v2486_v50 }
 0x659   :  { %v8254_v63 = vmul.f32 %v5430_v60, %v8194_v39 }
 0x65a   :  { %5435 = vrcp.f32 %v2501_v26  ;;  %v2489_v43 = vpop.xlane.xlu1 %2488 }
 0x65b   :  { %5437 = vrcp.f32 %v2505_v25  ;;  %v5432_v12 = vpop.eup %5431  ;;  %v2509_v18 = vadd.f32 1e-08, %v2489_v43  ;;  %v2549_v39 = vsel %vm563_vm1, %v8254_v63, 0.0 }
 0x65c   :  { %5439 = vrcp.f32 %v2506_v20  ;;  %v5434_v51 = vpop.eup %5433  ;;  %v8263_v13 = vmul.f32 %v5432_v12, %v8203_v22  ;;  %v2550_v6 = vadd.f32 %v2549_v39, %v2548_v55 }
 0x65d   :  { %5441 = vrcp.f32 %v2507_v54 }
 0x65e   :  { %v2551_v22 = vsel %vm563_vm1, %v8263_v13, 0.0 }
 0x65f   :  { %v2468_v14 = vpop.xlane.xlu2 %2467  ;;  %v2492_v53 = vpop.xlane.xlu0 %2491  ;;  %v2552_v2 = vadd.f32 %v2551_v22, %v2550_v6 }
 0x660   :  { %v2502_v10 = vadd.f32 1e-08, %v2468_v14  ;;  %v5436_v28 = vpop.eup %5435  ;;  %v2510_v45 = vadd.f32 1e-08, %v2492_v53 }
 0x661   :  { %v5438_v44 = vpop.eup %5437  ;;  %v8266_v27 = vmul.f32 %v5436_v28, %v8206_v29  ;;  %v2536_v29 = vmul.f32 %v5434_v51, %v8176_v1 }
 0x662   :  { %5443 = vrcp.f32 %v2502_v10  ;;  %v5440_v56 = vpop.eup %5439  ;;  %v2471_v4 = vpop.xlane.xlu1 %2470  ;;  %v8274_v23 = vmul.f32 %v5438_v44, %v8179_v62 }
 0x663   :  { %5445 = vrcp.f32 %v2508_v33  ;;  %v2503_v24 = vadd.f32 1e-08, %v2471_v4  ;;  %v5442_v36 = vpop.eup %5441  ;;  %v8269_v38 = vmul.f32 %v5440_v56, %v8188_v0  ;;  %v2553_v9 = vsel %vm563_vm1, %v8266_v27, 0.0 }
 0x664   :  { %5447 = vrcp.f32 %v2509_v18  ;;  %v8283_v0 = vmul.f32 %v5442_v36, %v8191_v34  ;;  %v2554_v3 = vadd.f32 %v2553_v9, %v2552_v2  ;;  %v2565_v19 = vsel %vm563_vm1, %v2536_v29, 0.0 }
 0x665   :  { %5449 = vrcp.f32 %v2510_v45  ;;  %v2568_v62 = vsel %vm563_vm1, %v8269_v38, 0.0 }
 0x666   :  { %5451 = vrcp.f32 %v2503_v24  ;;  %v2570_v7 = vsel %vm563_vm1, %v8283_v0, 0.0 }
 0x667   :  { %v2495_v30 = vpop.xlane.xlu2 %2494 }
 0x668   :  { %v2511_v48 = vadd.f32 1e-08, %v2495_v30  ;;  %v5444_v46 = vpop.eup %5443 }
 0x669   :  { %v5446_v35 = vpop.eup %5445  ;;  %v8280_v11 = vmul.f32 %v5444_v46, %v8224_v59  ;;  %v2566_v59 = vsel %vm563_vm1, %v8274_v23, 0.0 }
 0x66a   :  { %5453 = vrcp.f32 %v2511_v48  ;;  %v5448_v15 = vpop.eup %5447  ;;  %v8290_v1 = vmul.f32 %v5446_v35, %v8209_v58  ;;  %v2567_v34 = vadd.f32 %v2566_v59, %v2565_v19 }
 0x66b   :  { %v2555_v17 = vsel %vm563_vm1, %v8280_v11, 0.0  ;;  %v5450_v8 = vpop.eup %5449  ;;  %v8298_v21 = vmul.f32 %v5448_v15, %v8218_v40 }
 0x66c   :  { %v5452_v50 = vpop.eup %5451  ;;  %v2556_v57 = vadd.f32 %v2555_v17, %v2554_v3  ;;  %v2569_v25 = vadd.f32 %v2568_v62, %v2567_v34  ;;  %v2572_v32 = vsel %vm563_vm1, %v8290_v1, 0.0  ;;  %v8306_v20 = vmul.f32 %v5450_v8, %v8221_v49 }
 0x66d   :  { %v8301_v58 = vmul.f32 %v5452_v50, %v8233_v47  ;;  %v2574_v40 = vsel %vm563_vm1, %v8298_v21, 0.0 }
 0x66e   :  { %v2571_v54 = vadd.f32 %v2570_v7, %v2569_v25  ;;  %v2576_v41 = vsel %vm563_vm1, %v8306_v20, 0.0 }
 0x66f   :  { %v2557_v60 = vsel %vm563_vm1, %v8301_v58, 0.0 }
 0x670   :  { %v5454_v26 = vpop.eup %5453  ;;  %v2558_v14 = vadd.f32 %v2557_v60, %v2556_v57  ;;  %v2573_v47 = vadd.f32 %v2572_v32, %v2571_v54 }
 0x671   :  { %v8313_v43 = vmul.f32 %v5454_v26, %v8236_v31 }
 0x672   :  { %v2559_v33 = vrot.slane %v2558_v14, 4  ;;  %v2575_v10 = vadd.f32 %v2574_v40, %v2573_v47 }
 0x673   :  { %v2578_v49 = vsel %vm563_vm1, %v8313_v43, 0.0 }
 0x674   :  { %v2560_v42 = vadd.f32 %v2559_v33, %v2558_v14  ;;  %v2577_v12 = vadd.f32 %v2576_v41, %v2575_v10 }
 0x676   :  { %v2561_v53 = vrot.slane %v2560_v42, 2  ;;  %v2579_v51 = vadd.f32 %v2578_v49, %v2577_v12 }
 0x678   :  { %v2562_v61 = vadd.f32 %v2561_v53, %v2560_v42  ;;  %v2580_v18 = vrot.slane %v2579_v51, 4 }
 0x67a   :  { %v2563_v28 = vrot.slane %v2562_v61, 1  ;;  %v2581_v37 = vadd.f32 %v2580_v18, %v2579_v51 }
 0x67c   :  { %v2564_v31 = vadd.f32 %v2563_v28, %v2562_v61  ;;  %v2582_v44 = vrot.slane %v2581_v37, 2 }
 0x67e   :  { %v2586_v39 = vadd.f32 1e-08, %v2564_v31  ;;  %v2583_v45 = vadd.f32 %v2582_v44, %v2581_v37 }
 0x680   :  { %5455 = vrcp.f32 %v2586_v39  ;;  %v2584_v56 = vrot.slane %v2583_v45, 1 }
 0x682   :  { %v2585_v55 = vadd.f32 %v2584_v56, %v2583_v45 }
 0x684   :  { %v2587_v4 = vadd.f32 1e-08, %v2585_v55 }
 0x686   :  { %v5456_v24 = vpop.eup %5455  ;;  %5457 = vrcp.f32 %v2587_v4 }
 0x687   :  { %v8320_v30 = vmul.f32 %v5456_v24, %v8246_v5  ;;  %v8323_v6 = vmul.f32 %v5456_v24, %v8243_v52  ;;  %v8330_v46 = vmul.f32 %v5456_v24, %v8249_v16  ;;  %v8389_v7 = vmul.f32 %v5456_v24, %v8301_v58 }
 0x689   :  { %v2609_v36 = vsel %vm563_vm1, %v8320_v30, 0.0  ;;  %v2606_v22 = vsel %vm563_vm1, %v8323_v6, 0.0  ;;  %v2612_v9 = vsel %vm563_vm1, %v8330_v46, 0.0 }
 0x68a   :  { %2610 = vadd.xlane.f32.xlu1 %v2609_v36  ;;  %2607 = vadd.xlane.f32.xlu0 %v2606_v22 }
 0x68c   :  { %v5458_v48 = vpop.eup %5457 }
 0x68d   :  { %v8332_v35 = vmul.f32 %v5458_v48, %v2536_v29  ;;  %v8335_v5 = vmul.f32 %v5458_v48, %v8274_v23  ;;  %v8344_v16 = vmul.f32 %v5458_v48, %v8269_v38  ;;  %v8347_v29 = vmul.f32 %v5458_v48, %v8283_v0 }
 0x68e   :  { %v8350_v23 = vmul.f32 %v5456_v24, %v8254_v63  ;;  %v8359_v38 = vmul.f32 %v5456_v24, %v8263_v13  ;;  %v8362_v0 = vmul.f32 %v5456_v24, %v8266_v27  ;;  %v8365_v63 = vmul.f32 %v5458_v48, %v8290_v1 }
 0x68f   :  { %v2630_v52 = vsel %vm563_vm1, %v8332_v35, 0.0  ;;  %v2633_v2 = vsel %vm563_vm1, %v8335_v5, 0.0  ;;  %v2636_v15 = vsel %vm563_vm1, %v8344_v16, 0.0  ;;  %v2639_v62 = vsel %vm563_vm1, %v8347_v29, 0.0 }
 0x690   :  { %2631 = vadd.xlane.f32.xlu2 %v2630_v52  ;;  %v2615_v17 = vsel %vm563_vm1, %v8350_v23, 0.0  ;;  %v2618_v3 = vsel %vm563_vm1, %v8359_v38, 0.0  ;;  %v2621_v19 = vsel %vm563_vm1, %v8362_v0, 0.0  ;;  %v2642_v59 = vsel %vm563_vm1, %v8365_v63, 0.0 }
 0x691   :  { %v8374_v13 = vmul.f32 %v5458_v48, %v8298_v21  ;;  %v8377_v27 = vmul.f32 %v5458_v48, %v8306_v20  ;;  %v8380_v1 = vmul.f32 %v5456_v24, %v8280_v11  ;;  %v8392_v21 = vmul.f32 %v5458_v48, %v8313_v43 }
 0x692   :  { %2613 = vadd.xlane.f32.xlu1 %v2612_v9  ;;  %2634 = vadd.xlane.f32.xlu0 %v2633_v2  ;;  %v2627_v11 = vsel %vm563_vm1, %v8389_v7, 0.0 }
 0x693   :  { %v2645_v8 = vsel %vm563_vm1, %v8374_v13, 0.0  ;;  %v2648_v34 = vsel %vm563_vm1, %v8377_v27, 0.0  ;;  %v2624_v50 = vsel %vm563_vm1, %v8380_v1, 0.0  ;;  %v2651_v57 = vsel %vm563_vm1, %v8392_v21, 0.0 }
 0x698   :  { %2637 = vadd.xlane.f32.xlu2 %v2636_v15 }
 0x69a   :  { %2640 = vadd.xlane.f32.xlu1 %v2639_v62  ;;  %2616 = vadd.xlane.f32.xlu0 %v2615_v17 }
 0x6a0   :  { %2619 = vadd.xlane.f32.xlu2 %v2618_v3 }
 0x6a2   :  { %2622 = vadd.xlane.f32.xlu1 %v2621_v19  ;;  %2643 = vadd.xlane.f32.xlu0 %v2642_v59 }
 0x6a8   :  { %2646 = vadd.xlane.f32.xlu2 %v2645_v8 }
 0x6aa   :  { %2649 = vadd.xlane.f32.xlu1 %v2648_v34  ;;  %2625 = vadd.xlane.f32.xlu0 %v2624_v50 }
 0x6b0   :  { %2628 = vadd.xlane.f32.xlu2 %v2627_v11 }
 0x6b2   :  { %2652 = vadd.xlane.f32.xlu0 %v2651_v57 }
 0x6fd   :  { %v2611_v26 = vpop.xlane.xlu1 %2610  ;;  %v2608_v25 = vpop.xlane.xlu0 %2607 }
 0x6fe   :  { %v2655_v14 = vadd.f32 1e-08, %v2611_v26  ;;  %v2654_v47 = vadd.f32 1e-08, %v2608_v25 }
 0x700   :  { %5459 = vrcp.f32 %v2655_v14 }
 0x701   :  { %5461 = vrcp.f32 %v2654_v47 }
 0x703   :  { %v2632_v32 = vpop.xlane.xlu2 %2631 }
 0x704   :  { %v2662_v51 = vadd.f32 1e-08, %v2632_v32 }
 0x705   :  { %v2614_v20 = vpop.xlane.xlu1 %2613  ;;  %v2635_v60 = vpop.xlane.xlu0 %2634 }
 0x706   :  { %v2656_v43 = vadd.f32 1e-08, %v2614_v20  ;;  %v2663_v33 = vadd.f32 1e-08, %v2635_v60  ;;  %v5460_v61 = vpop.eup %5459 }
 0x707   :  { %v5462_v28 = vpop.eup %5461  ;;  %v8402_v56 = vmul.f32 %v5460_v61, %v8320_v30 }
 0x708   :  { %5463 = vrcp.f32 %v2656_v43  ;;  %v8399_v39 = vmul.f32 %v5462_v28, %v8323_v6 }
 0x709   :  { %v2703_v62 = vsel %vm563_vm1, %v8402_v56, 0.0 }
 0x70a   :  { %v2702_v30 = vsel %vm563_vm1, %v8399_v39, 0.0 }
 0x70b   :  { %v2638_v54 = vpop.xlane.xlu2 %2637  ;;  %v2704_v34 = vadd.f32 %v2703_v62, %v2702_v30 }
 0x70c   :  { %v2664_v53 = vadd.f32 1e-08, %v2638_v54 }
 0x70d   :  { %v2641_v40 = vpop.xlane.xlu1 %2640  ;;  %v2617_v58 = vpop.xlane.xlu0 %2616 }
 0x70e   :  { %v2657_v41 = vadd.f32 1e-08, %v2617_v58  ;;  %v2665_v18 = vadd.f32 1e-08, %v2641_v40  ;;  %v5464_v31 = vpop.eup %5463 }
 0x70f   :  { %v8405_v48 = vmul.f32 %v5464_v31, %v8330_v46 }
 0x710   :  { %5465 = vrcp.f32 %v2657_v41 }
 0x711   :  { %5467 = vrcp.f32 %v2663_v33  ;;  %v2705_v46 = vsel %vm563_vm1, %v8405_v48, 0.0 }
 0x712   :  { %v2706_v32 = vadd.f32 %v2705_v46, %v2704_v34 }
 0x713   :  { %v2620_v10 = vpop.xlane.xlu2 %2619 }
 0x714   :  { %v2658_v49 = vadd.f32 1e-08, %v2620_v10 }
 0x715   :  { %v2623_v42 = vpop.xlane.xlu1 %2622  ;;  %v2644_v12 = vpop.xlane.xlu0 %2643 }
 0x716   :  { %5469 = vrcp.f32 %v2658_v49  ;;  %v2659_v37 = vadd.f32 1e-08, %v2623_v42  ;;  %v2666_v44 = vadd.f32 1e-08, %v2644_v12  ;;  %v5466_v55 = vpop.eup %5465 }
 0x717   :  { %5471 = vrcp.f32 %v2664_v53  ;;  %v5468_v22 = vpop.eup %5467  ;;  %v8408_v15 = vmul.f32 %v5466_v55, %v8350_v23 }
 0x718   :  { %5473 = vrcp.f32 %v2662_v51  ;;  %v8417_v19 = vmul.f32 %v5468_v22, %v8335_v5 }
 0x719   :  { %5475 = vrcp.f32 %v2665_v18  ;;  %v2707_v50 = vsel %vm563_vm1, %v8408_v15, 0.0 }
 0x71a   :  { %5477 = vrcp.f32 %v2659_v37  ;;  %v2724_v40 = vsel %vm563_vm1, %v8417_v19, 0.0 }
 0x71b   :  { %v2647_v45 = vpop.xlane.xlu2 %2646  ;;  %5479 = vrcp.f32 %v2666_v44 }
 0x71c   :  { %v2667_v4 = vadd.f32 1e-08, %v2647_v45  ;;  %v5470_v9 = vpop.eup %5469 }
 0x71d   :  { %v2650_v24 = vpop.xlane.xlu1 %2649  ;;  %v2626_v36 = vpop.xlane.xlu0 %2625  ;;  %v8420_v59 = vmul.f32 %v5470_v9, %v8359_v38 }
 0x71e   :  { %v2660_v52 = vadd.f32 1e-08, %v2626_v36  ;;  %v2668_v2 = vadd.f32 1e-08, %v2650_v24  ;;  %v5472_v6 = vpop.eup %5471  ;;  %5481 = vrcp.f32 %v2667_v4 }
 0x71f   :  { %v5474_v17 = vpop.eup %5473  ;;  %v8423_v8 = vmul.f32 %v5472_v6, %v8344_v16  ;;  %v2709_v16 = vsel %vm563_vm1, %v8420_v59, 0.0 }
 0x720   :  { %5483 = vrcp.f32 %v2660_v52  ;;  %v5476_v3 = vpop.eup %5475  ;;  %v8428_v57 = vmul.f32 %v5474_v17, %v8332_v35 }
 0x721   :  { %v5478_v23 = vpop.eup %5477  ;;  %5485 = vrcp.f32 %v2668_v2  ;;  %v8431_v5 = vmul.f32 %v5476_v3, %v8347_v29  ;;  %v2726_v58 = vsel %vm563_vm1, %v8423_v8, 0.0  ;;  %v2708_v29 = vadd.f32 %v2707_v50, %v2706_v32 }
 0x722   :  { %v5480_v26 = vpop.eup %5479  ;;  %v8436_v60 = vmul.f32 %v5478_v23, %v8362_v0  ;;  %v2723_v0 = vsel %vm563_vm1, %v8428_v57, 0.0 }
 0x723   :  { %v2629_v11 = vpop.xlane.xlu2 %2628  ;;  %v8443_v14 = vmul.f32 %v5480_v26, %v8365_v63  ;;  %v2710_v41 = vadd.f32 %v2709_v16, %v2708_v29  ;;  %v2725_v33 = vadd.f32 %v2724_v40, %v2723_v0  ;;  %v2728_v10 = vsel %vm563_vm1, %v8431_v5, 0.0 }
 0x724   :  { %v2661_v25 = vadd.f32 1e-08, %v2629_v11  ;;  %v5482_v20 = vpop.eup %5481  ;;  %v2711_v49 = vsel %vm563_vm1, %v8436_v60, 0.0 }
 0x725   :  { %v2653_v38 = vpop.xlane.xlu0 %2652  ;;  %v8455_v42 = vmul.f32 %v5482_v20, %v8374_v13  ;;  %v2727_v63 = vadd.f32 %v2726_v58, %v2725_v33  ;;  %v2712_v61 = vadd.f32 %v2711_v49, %v2710_v41 }
 0x726   :  { %v2669_v54 = vadd.f32 1e-08, %v2653_v38  ;;  %v5484_v35 = vpop.eup %5483  ;;  %5487 = vrcp.f32 %v2661_v25 }
 0x727   :  { %v8446_v47 = vmul.f32 %v5484_v35, %v8380_v1  ;;  %v5486_v43 = vpop.eup %5485  ;;  %v2730_v1 = vsel %vm563_vm1, %v8443_v14, 0.0  ;;  %v2729_v18 = vadd.f32 %v2728_v10, %v2727_v63  ;;  %v2732_v37 = vsel %vm563_vm1, %v8455_v42, 0.0 }
 0x728   :  { %5489 = vrcp.f32 %v2669_v54  ;;  %v8460_v12 = vmul.f32 %v5486_v43, %v8377_v27 }
 0x729   :  { %v2713_v53 = vsel %vm563_vm1, %v8446_v47, 0.0  ;;  %v2731_v45 = vadd.f32 %v2730_v1, %v2729_v18 }
 0x72a   :  { %v2714_v44 = vadd.f32 %v2713_v53, %v2712_v61  ;;  %v2734_v27 = vsel %vm563_vm1, %v8460_v12, 0.0 }
 0x72b   :  { %v2733_v24 = vadd.f32 %v2732_v37, %v2731_v45 }
 0x72c   :  { %v5488_v51 = vpop.eup %5487 }
 0x72d   :  { %v8467_v13 = vmul.f32 %v5488_v51, %v8389_v7  ;;  %v2735_v52 = vadd.f32 %v2734_v27, %v2733_v24 }
 0x72e   :  { %v5490_v28 = vpop.eup %5489 }
 0x72f   :  { %v8470_v31 = vmul.f32 %v5490_v28, %v8392_v21  ;;  %v2715_v55 = vsel %vm563_vm1, %v8467_v13, 0.0 }
 0x730   :  { %v2716_v4 = vadd.f32 %v2715_v55, %v2714_v44 }
 0x731   :  { %v2736_v36 = vsel %vm563_vm1, %v8470_v31, 0.0 }
 0x732   :  { %v2717_v22 = vrot.slane %v2716_v4, 4  ;;  %v2737_v9 = vadd.f32 %v2736_v36, %v2735_v52 }
 0x734   :  { %v2718_v7 = vadd.f32 %v2717_v22, %v2716_v4  ;;  %v2738_v21 = vrot.slane %v2737_v9, 4 }
 0x736   :  { %v2719_v2 = vrot.slane %v2718_v7, 2  ;;  %v2739_v30 = vadd.f32 %v2738_v21, %v2737_v9 }
 0x738   :  { %v2720_v6 = vadd.f32 %v2719_v2, %v2718_v7  ;;  %v2740_v17 = vrot.slane %v2739_v30, 2 }
 0x73a   :  { %v2721_v62 = vrot.slane %v2720_v6, 1  ;;  %v2741_v46 = vadd.f32 %v2740_v17, %v2739_v30 }
 0x73c   :  { %v2722_v3 = vadd.f32 %v2721_v62, %v2720_v6  ;;  %v2742_v34 = vrot.slane %v2741_v46, 1 }
 0x73e   :  { %v2744_v23 = vadd.f32 1e-08, %v2722_v3  ;;  %v2743_v50 = vadd.f32 %v2742_v34, %v2741_v46 }
 0x740   :  { %5491 = vrcp.f32 %v2744_v23  ;;  %v2745_v11 = vadd.f32 1e-08, %v2743_v50 }
 0x742   :  { %5493 = vrcp.f32 %v2745_v11 }
 0x746   :  { %v5492_v26 = vpop.eup %5491 }
 0x747   :  { %v8479_v25 = vmul.f32 %v5492_v26, %v8402_v56  ;;  %v8482_v38 = vmul.f32 %v5492_v26, %v8399_v39  ;;  %v8494_v56 = vmul.f32 %v5492_v26, %v8405_v48 }
 0x748   :  { %v5494_v16 = vpop.eup %5493 }
 0x749   :  { %v2767_v32 = vsel %vm563_vm1, %v8479_v25, 0.0  ;;  %v2764_v20 = vsel %vm563_vm1, %v8482_v38, 0.0  ;;  %v8489_v54 = vmul.f32 %v5494_v16, %v8428_v57  ;;  %v8497_v39 = vmul.f32 %v5494_v16, %v8417_v19 }
 0x74a   :  { %2768 = vadd.xlane.f32.xlu2 %v2767_v32  ;;  %2765 = vadd.xlane.f32.xlu1 %v2764_v20  ;;  %v2770_v35 = vsel %vm563_vm1, %v8494_v56, 0.0  ;;  %v8504_v29 = vmul.f32 %v5494_v16, %v8423_v8  ;;  %v8509_v48 = vmul.f32 %v5494_v16, %v8431_v5  ;;  %v8512_v19 = vmul.f32 %v5492_v26, %v8408_v15 }
 0x74b   :  { %v2788_v40 = vsel %vm563_vm1, %v8489_v54, 0.0  ;;  %v2791_v58 = vsel %vm563_vm1, %v8497_v39, 0.0  ;;  %v8519_v8 = vmul.f32 %v5492_v26, %v8420_v59  ;;  %v8524_v5 = vmul.f32 %v5492_v26, %v8436_v60 }
 0x74c   :  { %2789 = vadd.xlane.f32.xlu0 %v2788_v40  ;;  %v2794_v57 = vsel %vm563_vm1, %v8504_v29, 0.0  ;;  %v2797_v0 = vsel %vm563_vm1, %v8509_v48, 0.0  ;;  %v2773_v43 = vsel %vm563_vm1, %v8512_v19, 0.0  ;;  %v8527_v15 = vmul.f32 %v5494_v16, %v8443_v14 }
 0x74d   :  { %v2776_v41 = vsel %vm563_vm1, %v8519_v8, 0.0  ;;  %v2779_v33 = vsel %vm563_vm1, %v8524_v5, 0.0  ;;  %v8534_v59 = vmul.f32 %v5494_v16, %v8455_v42  ;;  %v8539_v60 = vmul.f32 %v5494_v16, %v8460_v12 }
 0x74e   :  { %v2800_v10 = vsel %vm563_vm1, %v8527_v15, 0.0  ;;  %v8542_v14 = vmul.f32 %v5492_v26, %v8446_v47  ;;  %v8549_v42 = vmul.f32 %v5492_v26, %v8467_v13  ;;  %v8554_v12 = vmul.f32 %v5494_v16, %v8470_v31 }
 0x74f   :  { %v2803_v49 = vsel %vm563_vm1, %v8534_v59, 0.0  ;;  %v2806_v63 = vsel %vm563_vm1, %v8539_v60, 0.0 }
 0x750   :  { %v2782_v1 = vsel %vm563_vm1, %v8542_v14, 0.0  ;;  %v2785_v53 = vsel %vm563_vm1, %v8549_v42, 0.0  ;;  %v2809_v47 = vsel %vm563_vm1, %v8554_v12, 0.0 }
 0x752   :  { %2771 = vadd.xlane.f32.xlu2 %v2770_v35  ;;  %2792 = vadd.xlane.f32.xlu1 %v2791_v58 }
 0x754   :  { %2795 = vadd.xlane.f32.xlu0 %v2794_v57 }
 0x75a   :  { %2798 = vadd.xlane.f32.xlu2 %v2797_v0  ;;  %2774 = vadd.xlane.f32.xlu1 %v2773_v43 }
 0x75c   :  { %2777 = vadd.xlane.f32.xlu0 %v2776_v41 }
 0x762   :  { %2780 = vadd.xlane.f32.xlu2 %v2779_v33  ;;  %2801 = vadd.xlane.f32.xlu1 %v2800_v10 }
 0x764   :  { %2804 = vadd.xlane.f32.xlu0 %v2803_v49 }
 0x76a   :  { %2807 = vadd.xlane.f32.xlu2 %v2806_v63  ;;  %2783 = vadd.xlane.f32.xlu1 %v2782_v1 }
 0x76c   :  { %2786 = vadd.xlane.f32.xlu0 %v2785_v53 }
 0x772   :  { %2810 = vadd.xlane.f32.xlu1 %v2809_v47 }
 0x7bd   :  { %v2769_v51 = vpop.xlane.xlu2 %2768  ;;  %v2766_v61 = vpop.xlane.xlu1 %2765 }
 0x7be   :  { %v2813_v44 = vadd.f32 1e-08, %v2769_v51  ;;  %v2812_v45 = vadd.f32 1e-08, %v2766_v61 }
 0x7bf   :  { %v2790_v18 = vpop.xlane.xlu0 %2789 }
 0x7c0   :  { %5495 = vrcp.f32 %v2813_v44  ;;  %v2820_v24 = vadd.f32 1e-08, %v2790_v18 }
 0x7c1   :  { %5497 = vrcp.f32 %v2812_v45 }
 0x7c5   :  { %v2772_v28 = vpop.xlane.xlu2 %2771  ;;  %v2793_v37 = vpop.xlane.xlu1 %2792 }
 0x7c6   :  { %v2814_v27 = vadd.f32 1e-08, %v2772_v28  ;;  %v2821_v22 = vadd.f32 1e-08, %v2793_v37  ;;  %v5496_v7 = vpop.eup %5495 }
 0x7c7   :  { %v2796_v13 = vpop.xlane.xlu0 %2795  ;;  %v5498_v2 = vpop.eup %5497  ;;  %v8562_v23 = vmul.f32 %v5496_v7, %v8479_v25 }
 0x7c8   :  { %5499 = vrcp.f32 %v2814_v27  ;;  %v2822_v9 = vadd.f32 1e-08, %v2796_v13  ;;  %v8559_v3 = vmul.f32 %v5498_v2, %v8482_v38 }
 0x7c9   :  { %v2861_v25 = vsel %vm563_vm1, %v8562_v23, 0.0 }
 0x7ca   :  { %v2860_v38 = vsel %vm563_vm1, %v8559_v3, 0.0 }
 0x7cd   :  { %v2799_v55 = vpop.xlane.xlu2 %2798  ;;  %v2775_v4 = vpop.xlane.xlu1 %2774 }
 0x7ce   :  { %v2815_v31 = vadd.f32 1e-08, %v2775_v4  ;;  %v2823_v30 = vadd.f32 1e-08, %v2799_v55  ;;  %v5500_v17 = vpop.eup %5499 }
 0x7cf   :  { %v2778_v36 = vpop.xlane.xlu0 %2777  ;;  %v8565_v11 = vmul.f32 %v5500_v17, %v8494_v56 }
 0x7d0   :  { %5501 = vrcp.f32 %v2815_v31  ;;  %v2816_v52 = vadd.f32 1e-08, %v2778_v36 }
 0x7d1   :  { %5503 = vrcp.f32 %v2820_v24  ;;  %v2863_v56 = vsel %vm563_vm1, %v8565_v11, 0.0 }
 0x7d2   :  { %5505 = vrcp.f32 %v2821_v22 }
 0x7d3   :  { %5507 = vrcp.f32 %v2816_v52 }
 0x7d4   :  { %5509 = vrcp.f32 %v2822_v9 }
 0x7d5   :  { %v2781_v21 = vpop.xlane.xlu2 %2780  ;;  %v2802_v6 = vpop.xlane.xlu1 %2801 }
 0x7d6   :  { %v2817_v62 = vadd.f32 1e-08, %v2781_v21  ;;  %v2824_v46 = vadd.f32 1e-08, %v2802_v6  ;;  %v5502_v34 = vpop.eup %5501 }
 0x7d7   :  { %v2805_v50 = vpop.xlane.xlu0 %2804  ;;  %v5504_v32 = vpop.eup %5503  ;;  %v8568_v16 = vmul.f32 %v5502_v34, %v8512_v19  ;;  %v2862_v19 = vadd.f32 %v2861_v25, %v2860_v38 }
 0x7d8   :  { %5511 = vrcp.f32 %v2817_v62  ;;  %v2825_v26 = vadd.f32 1e-08, %v2805_v50  ;;  %v5506_v20 = vpop.eup %5505  ;;  %v8588_v51 = vmul.f32 %v5504_v32, %v8489_v54 }
 0x7d9   :  { %5513 = vrcp.f32 %v2823_v30  ;;  %v5508_v40 = vpop.eup %5507  ;;  %v8577_v10 = vmul.f32 %v5506_v20, %v8497_v39  ;;  %v2865_v49 = vsel %vm563_vm1, %v8568_v16, 0.0  ;;  %v2864_v47 = vadd.f32 %v2863_v56, %v2862_v19 }
 0x7da   :  { %5515 = vrcp.f32 %v2824_v46  ;;  %v5510_v57 = vpop.eup %5509  ;;  %v8582_v63 = vmul.f32 %v5508_v40, %v8519_v8 }
 0x7db   :  { %5517 = vrcp.f32 %v2825_v26  ;;  %v8585_v1 = vmul.f32 %v5510_v57, %v8504_v29  ;;  %v2866_v8 = vadd.f32 %v2865_v49, %v2864_v47 }
 0x7dc   :  { %v2867_v29 = vsel %vm563_vm1, %v8582_v63, 0.0 }
 0x7dd   :  { %v2808_v35 = vpop.xlane.xlu2 %2807  ;;  %v2784_v58 = vpop.xlane.xlu1 %2783  ;;  %v2884_v13 = vsel %vm563_vm1, %v8585_v1, 0.0  ;;  %v2868_v36 = vadd.f32 %v2867_v29, %v2866_v8 }
 0x7de   :  { %v2826_v0 = vadd.f32 1e-08, %v2808_v35  ;;  %v2818_v43 = vadd.f32 1e-08, %v2784_v58  ;;  %v5512_v41 = vpop.eup %5511 }
 0x7df   :  { %v5514_v33 = vpop.eup %5513  ;;  %v2787_v53 = vpop.xlane.xlu0 %2786  ;;  %v8591_v39 = vmul.f32 %v5512_v41, %v8524_v5  ;;  %v2881_v5 = vsel %vm563_vm1, %v8588_v51, 0.0 }
 0x7e0   :  { %5519 = vrcp.f32 %v2826_v0  ;;  %v5516_v61 = vpop.eup %5515  ;;  %v2819_v18 = vadd.f32 1e-08, %v2787_v53  ;;  %v8594_v28 = vmul.f32 %v5514_v33, %v8509_v48  ;;  %v2882_v48 = vsel %vm563_vm1, %v8577_v10, 0.0 }
 0x7e1   :  { %5521 = vrcp.f32 %v2818_v43  ;;  %v5518_v37 = vpop.eup %5517  ;;  %v8601_v54 = vmul.f32 %v5516_v61, %v8527_v15  ;;  %v2869_v27 = vsel %vm563_vm1, %v8591_v39, 0.0  ;;  %v2883_v4 = vadd.f32 %v2882_v48, %v2881_v5 }
 0x7e2   :  { %5523 = vrcp.f32 %v2819_v18  ;;  %v2886_v24 = vsel %vm563_vm1, %v8594_v28, 0.0  ;;  %v8612_v15 = vmul.f32 %v5518_v37, %v8534_v59  ;;  %v2870_v2 = vadd.f32 %v2869_v27, %v2868_v36 }
 0x7e3   :  { %v2885_v52 = vadd.f32 %v2884_v13, %v2883_v4  ;;  %v2888_v7 = vsel %vm563_vm1, %v8601_v54, 0.0 }
 0x7e4   :  { %v2890_v59 = vsel %vm563_vm1, %v8612_v15, 0.0 }
 0x7e5   :  { %v2811_v44 = vpop.xlane.xlu1 %2810  ;;  %v2887_v30 = vadd.f32 %v2886_v24, %v2885_v52 }
 0x7e6   :  { %v5520_v45 = vpop.eup %5519  ;;  %v2827_v55 = vadd.f32 1e-08, %v2811_v44 }
 0x7e7   :  { %v5522_v31 = vpop.eup %5521  ;;  %v8620_v9 = vmul.f32 %v5520_v45, %v8539_v60  ;;  %v2889_v17 = vadd.f32 %v2888_v7, %v2887_v30 }
 0x7e8   :  { %v8615_v22 = vmul.f32 %v5522_v31, %v8542_v14  ;;  %5525 = vrcp.f32 %v2827_v55  ;;  %v5524_v21 = vpop.eup %5523 }
 0x7e9   :  { %v8627_v14 = vmul.f32 %v5524_v21, %v8549_v42  ;;  %v2892_v46 = vsel %vm563_vm1, %v8620_v9, 0.0  ;;  %v2891_v26 = vadd.f32 %v2890_v59, %v2889_v17 }
 0x7ea   :  { %v2871_v6 = vsel %vm563_vm1, %v8615_v22, 0.0 }
 0x7eb   :  { %v2872_v62 = vadd.f32 %v2871_v6, %v2870_v2  ;;  %v2873_v60 = vsel %vm563_vm1, %v8627_v14, 0.0  ;;  %v2893_v38 = vadd.f32 %v2892_v46, %v2891_v26 }
 0x7ed   :  { %v2874_v50 = vadd.f32 %v2873_v60, %v2872_v62 }
 0x7ee   :  { %v5526_v34 = vpop.eup %5525 }
 0x7ef   :  { %v8634_v32 = vmul.f32 %v5526_v34, %v8554_v12  ;;  %v2875_v20 = vrot.slane %v2874_v50, 4 }
 0x7f1   :  { %v2894_v42 = vsel %vm563_vm1, %v8634_v32, 0.0  ;;  %v2876_v25 = vadd.f32 %v2875_v20, %v2874_v50 }
 0x7f2   :  { %v2895_v40 = vadd.f32 %v2894_v42, %v2893_v38 }
 0x7f3   :  { %v2877_v35 = vrot.slane %v2876_v25, 2 }
 0x7f4   :  { %v2896_v58 = vrot.slane %v2895_v40, 4 }
 0x7f5   :  { %v2878_v57 = vadd.f32 %v2877_v35, %v2876_v25 }
 0x7f6   :  { %v2897_v56 = vadd.f32 %v2896_v58, %v2895_v40 }
 0x7f7   :  { %v2879_v0 = vrot.slane %v2878_v57, 1 }
 0x7f8   :  { %v2898_v43 = vrot.slane %v2897_v56, 2 }
 0x7f9   :  { %v2880_v41 = vadd.f32 %v2879_v0, %v2878_v57 }
 0x7fa   :  { %v2899_v19 = vadd.f32 %v2898_v43, %v2897_v56 }
 0x7fb   :  { %v2902_v33 = vadd.f32 1e-08, %v2880_v41 }
 0x7fc   :  { %v2900_v49 = vrot.slane %v2899_v19, 1 }
 0x7fd   :  { %5527 = vrcp.f32 %v2902_v33 }
 0x7fe   :  { %v2901_v12 = vadd.f32 %v2900_v49, %v2899_v19 }
 0x800   :  { %v2903_v53 = vadd.f32 1e-08, %v2901_v12 }
 0x802   :  { %5529 = vrcp.f32 %v2903_v53 }
 0x803   :  { %v5528_v47 = vpop.eup %5527 }
 0x804   :  { %v8639_v61 = vmul.f32 %v5528_v47, %v8562_v23  ;;  %v8642_v18 = vmul.f32 %v5528_v47, %v8559_v3  ;;  %v8654_v23 = vmul.f32 %v5528_v47, %v8565_v11 }
 0x806   :  { %v2925_v8 = vsel %vm563_vm1, %v8639_v61, 0.0  ;;  %v2922_v37 = vsel %vm563_vm1, %v8642_v18, 0.0  ;;  %v2928_v5 = vsel %vm563_vm1, %v8654_v23, 0.0 }
 0x807   :  { %2926 = vadd.xlane.f32.xlu0 %v2925_v8  ;;  %2923 = vadd.xlane.f32.xlu2 %v2922_v37 }
 0x808   :  { %v5530_v29 = vpop.eup %5529 }
 0x809   :  { %v8649_v13 = vmul.f32 %v5530_v29, %v8588_v51  ;;  %v8657_v3 = vmul.f32 %v5530_v29, %v8577_v10  ;;  %v8664_v45 = vmul.f32 %v5530_v29, %v8585_v1  ;;  %v8669_v11 = vmul.f32 %v5530_v29, %v8594_v28 }
 0x80a   :  { %v8672_v10 = vmul.f32 %v5528_v47, %v8568_v16  ;;  %v8679_v1 = vmul.f32 %v5528_v47, %v8582_v63  ;;  %v8684_v28 = vmul.f32 %v5528_v47, %v8591_v39  ;;  %v8687_v16 = vmul.f32 %v5530_v29, %v8601_v54 }
 0x80b   :  { %v2946_v44 = vsel %vm563_vm1, %v8649_v13, 0.0  ;;  %v2949_v48 = vsel %vm563_vm1, %v8657_v3, 0.0  ;;  %v2952_v51 = vsel %vm563_vm1, %v8664_v45, 0.0  ;;  %v2955_v27 = vsel %vm563_vm1, %v8669_v11, 0.0 }
 0x80c   :  { %2947 = vadd.xlane.f32.xlu1 %v2946_v44  ;;  %v2931_v55 = vsel %vm563_vm1, %v8672_v10, 0.0  ;;  %v2934_v4 = vsel %vm563_vm1, %v8679_v1, 0.0  ;;  %v2937_v31 = vsel %vm563_vm1, %v8684_v28, 0.0  ;;  %v2958_v24 = vsel %vm563_vm1, %v8687_v16, 0.0 }
 0x80d   :  { %v8694_v63 = vmul.f32 %v5530_v29, %v8612_v15  ;;  %v8699_v39 = vmul.f32 %v5530_v29, %v8620_v9  ;;  %v8702_v54 = vmul.f32 %v5528_v47, %v8615_v22  ;;  %v8709_v15 = vmul.f32 %v5528_v47, %v8627_v14 }
 0x80e   :  { %v8714_v9 = vmul.f32 %v5530_v29, %v8634_v32 }
 0x80f   :  { %2929 = vadd.xlane.f32.xlu0 %v2928_v5  ;;  %2950 = vadd.xlane.f32.xlu2 %v2949_v48  ;;  %v2961_v36 = vsel %vm563_vm1, %v8694_v63, 0.0  ;;  %v2964_v52 = vsel %vm563_vm1, %v8699_v39, 0.0  ;;  %v2940_v7 = vsel %vm563_vm1, %v8702_v54, 0.0  ;;  %v2943_v2 = vsel %vm563_vm1, %v8709_v15, 0.0 }
 0x810   :  { %v2967_v22 = vsel %vm563_vm1, %v8714_v9, 0.0 }
 0x814   :  { %2953 = vadd.xlane.f32.xlu1 %v2952_v51 }
 0x817   :  { %2956 = vadd.xlane.f32.xlu0 %v2955_v27  ;;  %2932 = vadd.xlane.f32.xlu2 %v2931_v55 }
 0x81c   :  { %2935 = vadd.xlane.f32.xlu1 %v2934_v4 }
 0x81f   :  { %2938 = vadd.xlane.f32.xlu0 %v2937_v31  ;;  %2959 = vadd.xlane.f32.xlu2 %v2958_v24 }
 0x824   :  { %2962 = vadd.xlane.f32.xlu1 %v2961_v36 }
 0x827   :  { %2965 = vadd.xlane.f32.xlu0 %v2964_v52  ;;  %2941 = vadd.xlane.f32.xlu2 %v2940_v7 }
 0x82c   :  { %2944 = vadd.xlane.f32.xlu1 %v2943_v2 }
 0x82f   :  { %2968 = vadd.xlane.f32.xlu2 %v2967_v22 }
 0x87a   :  { %v2927_v21 = vpop.xlane.xlu0 %2926  ;;  %v2924_v6 = vpop.xlane.xlu2 %2923 }
 0x87b   :  { %v2971_v17 = vadd.f32 1e-08, %v2927_v21  ;;  %v2970_v46 = vadd.f32 1e-08, %v2924_v6 }
 0x87d   :  { %5531 = vrcp.f32 %v2971_v17 }
 0x87e   :  { %5533 = vrcp.f32 %v2970_v46 }
 0x87f   :  { %v2948_v30 = vpop.xlane.xlu1 %2947 }
 0x880   :  { %v2978_v42 = vadd.f32 1e-08, %v2948_v30 }
 0x882   :  { %v2930_v59 = vpop.xlane.xlu0 %2929  ;;  %v2951_v62 = vpop.xlane.xlu2 %2950 }
 0x883   :  { %v2972_v50 = vadd.f32 1e-08, %v2930_v59  ;;  %v2979_v32 = vadd.f32 1e-08, %v2951_v62  ;;  %v5532_v40 = vpop.eup %5531 }
 0x884   :  { %v5534_v56 = vpop.eup %5533  ;;  %v8722_v49 = vmul.f32 %v5532_v40, %v8639_v61 }
 0x885   :  { %5535 = vrcp.f32 %v2972_v50  ;;  %v8719_v19 = vmul.f32 %v5534_v56, %v8642_v18 }
 0x886   :  { %v3019_v61 = vsel %vm563_vm1, %v8722_v49, 0.0 }
 0x887   :  { %v2954_v14 = vpop.xlane.xlu1 %2953  ;;  %v3018_v48 = vsel %vm563_vm1, %v8719_v19, 0.0 }
 0x888   :  { %v2980_v25 = vadd.f32 1e-08, %v2954_v14  ;;  %v3020_v36 = vadd.f32 %v3019_v61, %v3018_v48 }
 0x88a   :  { %v2957_v60 = vpop.xlane.xlu0 %2956  ;;  %v2933_v34 = vpop.xlane.xlu2 %2932 }
 0x88b   :  { %v2973_v26 = vadd.f32 1e-08, %v2933_v34  ;;  %v2981_v35 = vadd.f32 1e-08, %v2957_v60  ;;  %v5536_v43 = vpop.eup %5535 }
 0x88c   :  { %v8725_v8 = vmul.f32 %v5536_v43, %v8654_v23 }
 0x88d   :  { %5537 = vrcp.f32 %v2973_v26 }
 0x88e   :  { %5539 = vrcp.f32 %v2979_v32  ;;  %v3021_v4 = vsel %vm563_vm1, %v8725_v8, 0.0 }
 0x88f   :  { %v2936_v20 = vpop.xlane.xlu1 %2935  ;;  %v3022_v6 = vadd.f32 %v3021_v4, %v3020_v36 }
 0x890   :  { %v2974_v38 = vadd.f32 1e-08, %v2936_v20 }
 0x892   :  { %v2939_v58 = vpop.xlane.xlu0 %2938  ;;  %v2960_v57 = vpop.xlane.xlu2 %2959  ;;  %5541 = vrcp.f32 %v2974_v38 }
 0x893   :  { %v2975_v0 = vadd.f32 1e-08, %v2939_v58  ;;  %5543 = vrcp.f32 %v2978_v42  ;;  %v2982_v41 = vadd.f32 1e-08, %v2960_v57  ;;  %v5538_v12 = vpop.eup %5537 }
 0x894   :  { %5545 = vrcp.f32 %v2980_v25  ;;  %v5540_v47 = vpop.eup %5539  ;;  %v8728_v44 = vmul.f32 %v5538_v12, %v8672_v10 }
 0x895   :  { %5547 = vrcp.f32 %v2981_v35  ;;  %v8737_v31 = vmul.f32 %v5540_v47, %v8657_v3 }
 0x896   :  { %5549 = vrcp.f32 %v2975_v0  ;;  %v3023_v7 = vsel %vm563_vm1, %v8728_v44, 0.0 }
 0x897   :  { %v2963_v33 = vpop.xlane.xlu1 %2962  ;;  %5551 = vrcp.f32 %v2982_v41  ;;  %v3040_v59 = vsel %vm563_vm1, %v8737_v31, 0.0  ;;  %v3024_v14 = vadd.f32 %v3023_v7, %v3022_v6 }
 0x898   :  { %v2983_v53 = vadd.f32 1e-08, %v2963_v33  ;;  %v5542_v37 = vpop.eup %5541 }
 0x899   :  { %v5544_v29 = vpop.eup %5543  ;;  %v8740_v10 = vmul.f32 %v5542_v37, %v8679_v1 }
 0x89a   :  { %v2966_v18 = vpop.xlane.xlu0 %2965  ;;  %v2942_v5 = vpop.xlane.xlu2 %2941  ;;  %5553 = vrcp.f32 %v2983_v53  ;;  %v8748_v22 = vmul.f32 %v5544_v29, %v8649_v13 }
 0x89b   :  { %v5546_v51 = vpop.eup %5545  ;;  %v2984_v27 = vadd.f32 1e-08, %v2966_v18  ;;  %v2976_v55 = vadd.f32 1e-08, %v2942_v5  ;;  %v3025_v30 = vsel %vm563_vm1, %v8740_v10, 0.0 }
 0x89c   :  { %v5548_v23 = vpop.eup %5547  ;;  %v8743_v52 = vmul.f32 %v5546_v51, %v8664_v45  ;;  %v3039_v46 = vsel %vm563_vm1, %v8748_v22, 0.0 }
 0x89d   :  { %v5550_v24 = vpop.eup %5549  ;;  %5555 = vrcp.f32 %v2984_v27  ;;  %v8751_v1 = vmul.f32 %v5548_v23, %v8669_v11  ;;  %v3041_v50 = vadd.f32 %v3040_v59, %v3039_v46 }
 0x89e   :  { %5557 = vrcp.f32 %v2976_v55  ;;  %v5552_v21 = vpop.eup %5551  ;;  %v8756_v45 = vmul.f32 %v5550_v24, %v8684_v28  ;;  %v3042_v13 = vsel %vm563_vm1, %v8743_v52, 0.0  ;;  %v3026_v28 = vadd.f32 %v3025_v30, %v3024_v14 }
 0x89f   :  { %v2945_v2 = vpop.xlane.xlu1 %2944  ;;  %v8763_v17 = vmul.f32 %v5552_v21, %v8687_v16  ;;  %v3044_v32 = vsel %vm563_vm1, %v8751_v1, 0.0  ;;  %v3043_v42 = vadd.f32 %v3042_v13, %v3041_v50 }
 0x8a0   :  { %v2977_v3 = vadd.f32 1e-08, %v2945_v2  ;;  %v5554_v62 = vpop.eup %5553  ;;  %v3027_v20 = vsel %vm563_vm1, %v8756_v45, 0.0 }
 0x8a1   :  { %v8772_v38 = vmul.f32 %v5554_v62, %v8694_v63  ;;  %v3046_v25 = vsel %vm563_vm1, %v8763_v17, 0.0  ;;  %v3028_v57 = vadd.f32 %v3027_v20, %v3026_v28  ;;  %v3045_v56 = vadd.f32 %v3044_v32, %v3043_v42 }
 0x8a2   :  { %5559 = vrcp.f32 %v2977_v3  ;;  %v2969_v11 = vpop.xlane.xlu2 %2968 }
 0x8a3   :  { %v5556_v60 = vpop.eup %5555  ;;  %v2985_v34 = vadd.f32 1e-08, %v2969_v11  ;;  %v3048_v63 = vsel %vm563_vm1, %v8772_v38, 0.0  ;;  %v3047_v43 = vadd.f32 %v3046_v25, %v3045_v56 }
 0x8a4   :  { %v5558_v26 = vpop.eup %5557  ;;  %v8780_v40 = vmul.f32 %v5556_v60, %v8699_v39 }
 0x8a5   :  { %v8775_v16 = vmul.f32 %v5558_v26, %v8702_v54  ;;  %5561 = vrcp.f32 %v2985_v34  ;;  %v3049_v53 = vadd.f32 %v3048_v63, %v3047_v43 }
 0x8a6   :  { %v3050_v41 = vsel %vm563_vm1, %v8780_v40, 0.0 }
 0x8a7   :  { %v3029_v58 = vsel %vm563_vm1, %v8775_v16, 0.0  ;;  %v3051_v29 = vadd.f32 %v3050_v41, %v3049_v53 }
 0x8a8   :  { %v5560_v35 = vpop.eup %5559  ;;  %v3030_v0 = vadd.f32 %v3029_v58, %v3028_v57 }
 0x8a9   :  { %v8787_v54 = vmul.f32 %v5560_v35, %v8709_v15 }
 0x8ab   :  { %v3031_v39 = vsel %vm563_vm1, %v8787_v54, 0.0  ;;  %v5562_v33 = vpop.eup %5561 }
 0x8ac   :  { %v3032_v12 = vadd.f32 %v3031_v39, %v3030_v0  ;;  %v8794_v47 = vmul.f32 %v5562_v33, %v8714_v9 }
 0x8ae   :  { %v3033_v37 = vrot.slane %v3032_v12, 4  ;;  %v3052_v15 = vsel %vm563_vm1, %v8794_v47, 0.0 }
 0x8af   :  { %v3053_v5 = vadd.f32 %v3052_v15, %v3051_v29 }
 0x8b0   :  { %v3034_v18 = vadd.f32 %v3033_v37, %v3032_v12 }
 0x8b1   :  { %v3054_v61 = vrot.slane %v3053_v5, 4 }
 0x8b2   :  { %v3035_v48 = vrot.slane %v3034_v18, 2 }
 0x8b3   :  { %v3055_v27 = vadd.f32 %v3054_v61, %v3053_v5 }
 0x8b4   :  { %v3036_v51 = vadd.f32 %v3035_v48, %v3034_v18 }
 0x8b5   :  { %v3056_v23 = vrot.slane %v3055_v27, 2 }
 0x8b6   :  { %v3037_v55 = vrot.slane %v3036_v51, 1 }
 0x8b7   :  { %v3057_v24 = vadd.f32 %v3056_v23, %v3055_v27 }
 0x8b8   :  { %v3038_v4 = vadd.f32 %v3037_v55, %v3036_v51 }
 0x8b9   :  { %v3058_v7 = vrot.slane %v3057_v24, 1 }
 0x8ba   :  { %v3060_v36 = vadd.f32 1e-08, %v3038_v4 }
 0x8bb   :  { %v3059_v9 = vadd.f32 %v3058_v7, %v3057_v24 }
 0x8bc   :  { %5563 = vrcp.f32 %v3060_v36 }
 0x8bd   :  { %v3061_v2 = vadd.f32 1e-08, %v3059_v9 }
 0x8bf   :  { %5565 = vrcp.f32 %v3061_v2 }
 0x8c2   :  { %v5564_v21 = vpop.eup %5563 }
 0x8c3   :  { %v8799_v3 = vmul.f32 %v5564_v21, %v8722_v49  ;;  %v8802_v6 = vmul.f32 %v5564_v21, %v8719_v19  ;;  %v8814_v49 = vmul.f32 %v5564_v21, %v8725_v8 }
 0x8c5   :  { %v3083_v30 = vsel %vm563_vm1, %v8799_v3, 0.0  ;;  %v3080_v59 = vsel %vm563_vm1, %v8802_v6, 0.0  ;;  %v5566_v62 = vpop.eup %5565  ;;  %v3086_v11 = vsel %vm563_vm1, %v8814_v49, 0.0 }
 0x8c6   :  { %3084 = vadd.xlane.f32.xlu1 %v3083_v30  ;;  %3081 = vadd.xlane.f32.xlu0 %v3080_v59  ;;  %v8809_v14 = vmul.f32 %v5566_v62, %v8748_v22  ;;  %v8817_v19 = vmul.f32 %v5566_v62, %v8737_v31  ;;  %v8824_v60 = vmul.f32 %v5566_v62, %v8743_v52 }
 0x8c7   :  { %v8829_v8 = vmul.f32 %v5566_v62, %v8751_v1  ;;  %v8832_v31 = vmul.f32 %v5564_v21, %v8728_v44  ;;  %v8839_v52 = vmul.f32 %v5564_v21, %v8740_v10  ;;  %v8844_v1 = vmul.f32 %v5564_v21, %v8756_v45 }
 0x8c8   :  { %v3104_v13 = vsel %vm563_vm1, %v8809_v14, 0.0  ;;  %v3107_v46 = vsel %vm563_vm1, %v8817_v19, 0.0  ;;  %v3110_v22 = vsel %vm563_vm1, %v8824_v60, 0.0  ;;  %v8847_v44 = vmul.f32 %v5566_v62, %v8763_v17 }
 0x8c9   :  { %3105 = vadd.xlane.f32.xlu2 %v3104_v13  ;;  %v3113_v34 = vsel %vm563_vm1, %v8829_v8, 0.0  ;;  %v3089_v28 = vsel %vm563_vm1, %v8832_v31, 0.0  ;;  %v3092_v50 = vsel %vm563_vm1, %v8839_v52, 0.0  ;;  %v3095_v26 = vsel %vm563_vm1, %v8844_v1, 0.0 }
 0x8ca   :  { %v3116_v32 = vsel %vm563_vm1, %v8847_v44, 0.0  ;;  %v8854_v10 = vmul.f32 %v5566_v62, %v8772_v38  ;;  %v8859_v45 = vmul.f32 %v5566_v62, %v8780_v40  ;;  %v8862_v17 = vmul.f32 %v5564_v21, %v8775_v16 }
 0x8cb   :  { %v8869_v38 = vmul.f32 %v5564_v21, %v8787_v54  ;;  %v8874_v40 = vmul.f32 %v5566_v62, %v8794_v47 }
 0x8cc   :  { %v3119_v20 = vsel %vm563_vm1, %v8854_v10, 0.0  ;;  %v3122_v42 = vsel %vm563_vm1, %v8859_v45, 0.0  ;;  %v3098_v25 = vsel %vm563_vm1, %v8862_v17, 0.0 }
 0x8cd   :  { %v3101_v35 = vsel %vm563_vm1, %v8869_v38, 0.0  ;;  %v3125_v16 = vsel %vm563_vm1, %v8874_v40, 0.0 }
 0x8ce   :  { %3087 = vadd.xlane.f32.xlu1 %v3086_v11  ;;  %3108 = vadd.xlane.f32.xlu0 %v3107_v46 }
 0x8d1   :  { %3111 = vadd.xlane.f32.xlu2 %v3110_v22 }
 0x8d6   :  { %3114 = vadd.xlane.f32.xlu1 %v3113_v34  ;;  %3090 = vadd.xlane.f32.xlu0 %v3089_v28 }
 0x8d9   :  { %3093 = vadd.xlane.f32.xlu2 %v3092_v50 }
 0x8de   :  { %3096 = vadd.xlane.f32.xlu1 %v3095_v26  ;;  %3117 = vadd.xlane.f32.xlu0 %v3116_v32 }
 0x8e1   :  { %3120 = vadd.xlane.f32.xlu2 %v3119_v20 }
 0x8e6   :  { %3123 = vadd.xlane.f32.xlu1 %v3122_v42  ;;  %3099 = vadd.xlane.f32.xlu0 %v3098_v25 }
 0x8e9   :  { %3102 = vadd.xlane.f32.xlu2 %v3101_v35 }
 0x8ee   :  { %3126 = vadd.xlane.f32.xlu0 %v3125_v16 }
 0x939   :  { %v3085_v58 = vpop.xlane.xlu1 %3084  ;;  %v3082_v57 = vpop.xlane.xlu0 %3081 }
 0x93a   :  { %v3129_v43 = vadd.f32 1e-08, %v3085_v58  ;;  %v3128_v41 = vadd.f32 1e-08, %v3082_v57 }
 0x93c   :  { %v3106_v56 = vpop.xlane.xlu2 %3105  ;;  %5567 = vrcp.f32 %v3129_v43 }
 0x93d   :  { %5569 = vrcp.f32 %v3128_v41  ;;  %v3136_v47 = vadd.f32 1e-08, %v3106_v56 }
 0x941   :  { %v3088_v63 = vpop.xlane.xlu1 %3087  ;;  %v3109_v0 = vpop.xlane.xlu0 %3108 }
 0x942   :  { %v3130_v39 = vadd.f32 1e-08, %v3088_v63  ;;  %v3137_v29 = vadd.f32 1e-08, %v3109_v0  ;;  %v5568_v18 = vpop.eup %5567 }
 0x943   :  { %v5570_v48 = vpop.eup %5569  ;;  %v8882_v36 = vmul.f32 %v5568_v18, %v8799_v3 }
 0x944   :  { %v3112_v54 = vpop.xlane.xlu2 %3111  ;;  %5571 = vrcp.f32 %v3130_v39  ;;  %v8879_v4 = vmul.f32 %v5570_v48, %v8802_v6 }
 0x945   :  { %v3138_v5 = vadd.f32 1e-08, %v3112_v54  ;;  %v3177_v3 = vsel %vm563_vm1, %v8882_v36, 0.0 }
 0x946   :  { %v3176_v6 = vsel %vm563_vm1, %v8879_v4, 0.0 }
 0x949   :  { %v3115_v33 = vpop.xlane.xlu1 %3114  ;;  %v3091_v12 = vpop.xlane.xlu0 %3090 }
 0x94a   :  { %v3131_v53 = vadd.f32 1e-08, %v3091_v12  ;;  %v3139_v27 = vadd.f32 1e-08, %v3115_v33  ;;  %v5572_v23 = vpop.eup %5571 }
 0x94b   :  { %v8885_v2 = vmul.f32 %v5572_v23, %v8814_v49 }
 0x94c   :  { %v3094_v37 = vpop.xlane.xlu2 %3093  ;;  %5573 = vrcp.f32 %v3131_v53 }
 0x94d   :  { %v3132_v15 = vadd.f32 1e-08, %v3094_v37  ;;  %5575 = vrcp.f32 %v3136_v47  ;;  %v3179_v49 = vsel %vm563_vm1, %v8885_v2, 0.0 }
 0x94e   :  { %5577 = vrcp.f32 %v3137_v29 }
 0x94f   :  { %5579 = vrcp.f32 %v3132_v15 }
 0x950   :  { %5581 = vrcp.f32 %v3138_v5 }
 0x951   :  { %v3097_v61 = vpop.xlane.xlu1 %3096  ;;  %v3118_v51 = vpop.xlane.xlu0 %3117 }
 0x952   :  { %v3133_v55 = vadd.f32 1e-08, %v3097_v61  ;;  %v3140_v24 = vadd.f32 1e-08, %v3118_v51  ;;  %v5574_v7 = vpop.eup %5573 }
 0x953   :  { %v5576_v30 = vpop.eup %5575  ;;  %v8888_v62 = vmul.f32 %v5574_v7, %v8832_v31  ;;  %v3178_v31 = vadd.f32 %v3177_v3, %v3176_v6 }
 0x954   :  { %5583 = vrcp.f32 %v3133_v55  ;;  %v3121_v9 = vpop.xlane.xlu2 %3120  ;;  %v5578_v59 = vpop.eup %5577  ;;  %v8908_v58 = vmul.f32 %v5576_v30, %v8809_v14 }
 0x955   :  { %5585 = vrcp.f32 %v3139_v27  ;;  %v3141_v21 = vadd.f32 1e-08, %v3121_v9  ;;  %v5580_v13 = vpop.eup %5579  ;;  %v8897_v32 = vmul.f32 %v5578_v59, %v8817_v19  ;;  %v3181_v20 = vsel %vm563_vm1, %v8888_v62, 0.0 }
 0x956   :  { %5587 = vrcp.f32 %v3140_v24  ;;  %v5582_v22 = vpop.eup %5581  ;;  %v8902_v42 = vmul.f32 %v5580_v13, %v8839_v52  ;;  %v3180_v16 = vadd.f32 %v3179_v49, %v3178_v31 }
 0x957   :  { %5589 = vrcp.f32 %v3141_v21  ;;  %v8905_v25 = vmul.f32 %v5582_v22, %v8824_v60 }
 0x958   :  { %v3182_v52 = vadd.f32 %v3181_v20, %v3180_v16  ;;  %v3183_v60 = vsel %vm563_vm1, %v8902_v42, 0.0 }
 0x959   :  { %v3124_v11 = vpop.xlane.xlu1 %3123  ;;  %v3100_v46 = vpop.xlane.xlu0 %3099  ;;  %v3200_v54 = vsel %vm563_vm1, %v8905_v25, 0.0 }
 0x95a   :  { %v3142_v34 = vadd.f32 1e-08, %v3124_v11  ;;  %v3134_v28 = vadd.f32 1e-08, %v3100_v46  ;;  %v5584_v50 = vpop.eup %5583  ;;  %v3184_v37 = vadd.f32 %v3183_v60, %v3182_v52 }
 0x95b   :  { %v5586_v26 = vpop.eup %5585  ;;  %v8911_v19 = vmul.f32 %v5584_v50, %v8844_v1  ;;  %v3197_v1 = vsel %vm563_vm1, %v8908_v58, 0.0 }
 0x95c   :  { %5591 = vrcp.f32 %v3142_v34  ;;  %v3103_v35 = vpop.xlane.xlu2 %3102  ;;  %v5588_v57 = vpop.eup %5587  ;;  %v8914_v63 = vmul.f32 %v5586_v26, %v8829_v8  ;;  %v3198_v8 = vsel %vm563_vm1, %v8897_v32, 0.0 }
 0x95d   :  { %5593 = vrcp.f32 %v3134_v28  ;;  %v3135_v56 = vadd.f32 1e-08, %v3103_v35  ;;  %v5590_v0 = vpop.eup %5589  ;;  %v8921_v14 = vmul.f32 %v5588_v57, %v8847_v44  ;;  %v3185_v39 = vsel %vm563_vm1, %v8911_v19, 0.0 }
 0x95e   :  { %v3199_v12 = vadd.f32 %v3198_v8, %v3197_v1  ;;  %v3202_v47 = vsel %vm563_vm1, %v8914_v63, 0.0  ;;  %v8932_v44 = vmul.f32 %v5590_v0, %v8854_v10  ;;  %v3186_v48 = vadd.f32 %v3185_v39, %v3184_v37 }
 0x95f   :  { %5595 = vrcp.f32 %v3135_v56  ;;  %v3204_v18 = vsel %vm563_vm1, %v8921_v14, 0.0 }
 0x960   :  { %v3201_v15 = vadd.f32 %v3200_v54, %v3199_v12  ;;  %v3206_v10 = vsel %vm563_vm1, %v8932_v44, 0.0 }
 0x961   :  { %v3127_v43 = vpop.xlane.xlu0 %3126 }
 0x962   :  { %v5592_v41 = vpop.eup %5591  ;;  %v3143_v33 = vadd.f32 1e-08, %v3127_v43  ;;  %v3203_v27 = vadd.f32 %v3202_v47, %v3201_v15 }
 0x963   :  { %v5594_v53 = vpop.eup %5593  ;;  %v8940_v5 = vmul.f32 %v5592_v41, %v8859_v45 }
 0x964   :  { %v8935_v29 = vmul.f32 %v5594_v53, %v8862_v17  ;;  %5597 = vrcp.f32 %v3143_v33  ;;  %v3205_v23 = vadd.f32 %v3204_v18, %v3203_v27 }
 0x965   :  { %v5596_v61 = vpop.eup %5595  ;;  %v3208_v24 = vsel %vm563_vm1, %v8940_v5, 0.0 }
 0x966   :  { %v3187_v51 = vsel %vm563_vm1, %v8935_v29, 0.0  ;;  %v8947_v17 = vmul.f32 %v5596_v61, %v8869_v38  ;;  %v3207_v21 = vadd.f32 %v3206_v10, %v3205_v23 }
 0x967   :  { %v3188_v55 = vadd.f32 %v3187_v51, %v3186_v48 }
 0x968   :  { %v3189_v45 = vsel %vm563_vm1, %v8947_v17, 0.0  ;;  %v3209_v6 = vadd.f32 %v3208_v24, %v3207_v21 }
 0x969   :  { %v3190_v9 = vadd.f32 %v3189_v45, %v3188_v55 }
 0x96a   :  { %v5598_v7 = vpop.eup %5597 }
 0x96b   :  { %v8954_v30 = vmul.f32 %v5598_v7, %v8874_v40  ;;  %v3191_v59 = vrot.slane %v3190_v9, 4 }
 0x96d   :  { %v3210_v38 = vsel %vm563_vm1, %v8954_v30, 0.0  ;;  %v3192_v3 = vadd.f32 %v3191_v59, %v3190_v9 }
 0x96e   :  { %v3211_v13 = vadd.f32 %v3210_v38, %v3209_v6 }
 0x96f   :  { %v3193_v11 = vrot.slane %v3192_v3, 2 }
 0x970   :  { %v3212_v46 = vrot.slane %v3211_v13, 4 }
 0x971   :  { %v3194_v22 = vadd.f32 %v3193_v11, %v3192_v3 }
 0x972   :  { %v3213_v49 = vadd.f32 %v3212_v46, %v3211_v13 }
 0x973   :  { %v3195_v34 = vrot.slane %v3194_v22, 1 }
 0x974   :  { %v3214_v28 = vrot.slane %v3213_v49, 2 }
 0x975   :  { %v3196_v50 = vadd.f32 %v3195_v34, %v3194_v22 }
 0x976   :  { %v3215_v31 = vadd.f32 %v3214_v28, %v3213_v49 }
 0x977   :  { %v3218_v26 = vadd.f32 1e-08, %v3196_v50 }
 0x978   :  { %v3216_v20 = vrot.slane %v3215_v31, 1 }
 0x979   :  { %5599 = vrcp.f32 %v3218_v26 }
 0x97a   :  { %v3217_v40 = vadd.f32 %v3216_v20, %v3215_v31 }
 0x97c   :  { %v3219_v35 = vadd.f32 1e-08, %v3217_v40 }
 0x97e   :  { %5601 = vrcp.f32 %v3219_v35 }
 0x97f   :  { %v5600_v16 = vpop.eup %5599 }
 0x980   :  { %v8959_v57 = vmul.f32 %v5600_v16, %v8882_v36  ;;  %v8962_v56 = vmul.f32 %v5600_v16, %v8879_v4  ;;  %v8974_v36 = vmul.f32 %v5600_v16, %v8885_v2 }
 0x982   :  { %v3241_v52 = vsel %vm563_vm1, %v8959_v57, 0.0  ;;  %v3238_v0 = vsel %vm563_vm1, %v8962_v56, 0.0  ;;  %v3244_v1 = vsel %vm563_vm1, %v8974_v36, 0.0 }
 0x983   :  { %3242 = vadd.xlane.f32.xlu2 %v3241_v52  ;;  %3239 = vadd.xlane.f32.xlu1 %v3238_v0 }
 0x984   :  { %v5602_v60 = vpop.eup %5601 }
 0x985   :  { %v8969_v54 = vmul.f32 %v5602_v60, %v8908_v58  ;;  %v8977_v4 = vmul.f32 %v5602_v60, %v8897_v32  ;;  %v8984_v41 = vmul.f32 %v5602_v60, %v8905_v25  ;;  %v8989_v2 = vmul.f32 %v5602_v60, %v8914_v63 }
 0x986   :  { %v8992_v32 = vmul.f32 %v5600_v16, %v8888_v62  ;;  %v8999_v25 = vmul.f32 %v5600_v16, %v8902_v42  ;;  %v9004_v63 = vmul.f32 %v5600_v16, %v8911_v19  ;;  %v9007_v62 = vmul.f32 %v5602_v60, %v8921_v14 }
 0x987   :  { %v3262_v43 = vsel %vm563_vm1, %v8969_v54, 0.0  ;;  %v3265_v8 = vsel %vm563_vm1, %v8977_v4, 0.0  ;;  %v3268_v58 = vsel %vm563_vm1, %v8984_v41, 0.0  ;;  %v3271_v39 = vsel %vm563_vm1, %v8989_v2, 0.0 }
 0x988   :  { %3263 = vadd.xlane.f32.xlu0 %v3262_v43  ;;  %v3247_v33 = vsel %vm563_vm1, %v8992_v32, 0.0  ;;  %v3250_v12 = vsel %vm563_vm1, %v8999_v25, 0.0  ;;  %v3253_v53 = vsel %vm563_vm1, %v9004_v63, 0.0  ;;  %v3274_v47 = vsel %vm563_vm1, %v9007_v62, 0.0 }
 0x989   :  { %v9014_v42 = vmul.f32 %v5602_v60, %v8932_v44  ;;  %v9019_v19 = vmul.f32 %v5602_v60, %v8940_v5  ;;  %v9022_v14 = vmul.f32 %v5600_v16, %v8935_v29  ;;  %v9029_v44 = vmul.f32 %v5600_v16, %v8947_v17 }
 0x98a   :  { %v9034_v5 = vmul.f32 %v5602_v60, %v8954_v30 }
 0x98b   :  { %3245 = vadd.xlane.f32.xlu2 %v3244_v1  ;;  %3266 = vadd.xlane.f32.xlu1 %v3265_v8  ;;  %v3277_v37 = vsel %vm563_vm1, %v9014_v42, 0.0  ;;  %v3280_v15 = vsel %vm563_vm1, %v9019_v19, 0.0  ;;  %v3256_v18 = vsel %vm563_vm1, %v9022_v14, 0.0  ;;  %v3259_v48 = vsel %vm563_vm1, %v9029_v44, 0.0 }
 0x98c   :  { %v3283_v29 = vsel %vm563_vm1, %v9034_v5, 0.0 }
 0x990   :  { %3269 = vadd.xlane.f32.xlu0 %v3268_v58 }
 0x993   :  { %3272 = vadd.xlane.f32.xlu2 %v3271_v39  ;;  %3248 = vadd.xlane.f32.xlu1 %v3247_v33 }
 0x998   :  { %3251 = vadd.xlane.f32.xlu0 %v3250_v12 }
 0x99b   :  { %3254 = vadd.xlane.f32.xlu2 %v3253_v53  ;;  %3275 = vadd.xlane.f32.xlu1 %v3274_v47 }
 0x9a0   :  { %3278 = vadd.xlane.f32.xlu0 %v3277_v37 }
 0x9a3   :  { %3281 = vadd.xlane.f32.xlu2 %v3280_v15  ;;  %3257 = vadd.xlane.f32.xlu1 %v3256_v18 }
 0x9a8   :  { %3260 = vadd.xlane.f32.xlu0 %v3259_v48 }
 0x9ab   :  { %3284 = vadd.xlane.f32.xlu1 %v3283_v29 }
 0x9f6   :  { %v3243_v61 = vpop.xlane.xlu2 %3242  ;;  %v3240_v51 = vpop.xlane.xlu1 %3239 }
 0x9f7   :  { %v3287_v23 = vadd.f32 1e-08, %v3243_v61  ;;  %v3286_v24 = vadd.f32 1e-08, %v3240_v51 }
 0x9f9   :  { %5603 = vrcp.f32 %v3287_v23 }
 0x9fa   :  { %5605 = vrcp.f32 %v3286_v24 }
 0x9fb   :  { %v3264_v27 = vpop.xlane.xlu0 %3263 }
 0x9fc   :  { %v3294_v38 = vadd.f32 1e-08, %v3264_v27 }
 0x9fe   :  { %v3246_v10 = vpop.xlane.xlu2 %3245  ;;  %v3267_v55 = vpop.xlane.xlu1 %3266 }
 0x9ff   :  { %v3288_v9 = vadd.f32 1e-08, %v3246_v10  ;;  %v3295_v30 = vadd.f32 1e-08, %v3267_v55  ;;  %v5604_v13 = vpop.eup %5603 }
 0xa00   :  { %v5606_v49 = vpop.eup %5605  ;;  %v9042_v20 = vmul.f32 %v5604_v13, %v8959_v57 }
 0xa01   :  { %5607 = vrcp.f32 %v3288_v9  ;;  %v9039_v31 = vmul.f32 %v5606_v49, %v8962_v56 }
 0xa02   :  { %v3335_v57 = vsel %vm563_vm1, %v9042_v20, 0.0 }
 0xa03   :  { %v3270_v17 = vpop.xlane.xlu0 %3269  ;;  %v3334_v8 = vsel %vm563_vm1, %v9039_v31, 0.0 }
 0xa04   :  { %v3296_v3 = vadd.f32 1e-08, %v3270_v17  ;;  %v3336_v37 = vadd.f32 %v3335_v57, %v3334_v8 }
 0xa06   :  { %v3273_v45 = vpop.xlane.xlu2 %3272  ;;  %v3249_v7 = vpop.xlane.xlu1 %3248 }
 0xa07   :  { %v3289_v21 = vadd.f32 1e-08, %v3249_v7  ;;  %v3297_v11 = vadd.f32 1e-08, %v3273_v45  ;;  %v5608_v28 = vpop.eup %5607 }
 0xa08   :  { %v9045_v52 = vmul.f32 %v5608_v28, %v8974_v36 }
 0xa09   :  { %5609 = vrcp.f32 %v3289_v21 }
 0xa0a   :  { %5611 = vrcp.f32 %v3295_v30  ;;  %v3337_v12 = vsel %vm563_vm1, %v9045_v52, 0.0 }
 0xa0b   :  { %v3252_v59 = vpop.xlane.xlu0 %3251  ;;  %v3338_v51 = vadd.f32 %v3337_v12, %v3336_v37 }
 0xa0c   :  { %v3290_v6 = vadd.f32 1e-08, %v3252_v59 }
 0xa0e   :  { %v3255_v46 = vpop.xlane.xlu2 %3254  ;;  %v3276_v22 = vpop.xlane.xlu1 %3275  ;;  %5613 = vrcp.f32 %v3290_v6 }
 0xa0f   :  { %v3291_v34 = vadd.f32 1e-08, %v3255_v46  ;;  %5615 = vrcp.f32 %v3294_v38  ;;  %v3298_v50 = vadd.f32 1e-08, %v3276_v22  ;;  %v5610_v40 = vpop.eup %5609 }
 0xa10   :  { %5617 = vrcp.f32 %v3296_v3  ;;  %v5612_v16 = vpop.eup %5611  ;;  %v9048_v43 = vmul.f32 %v5610_v40, %v8992_v32 }
 0xa11   :  { %5619 = vrcp.f32 %v3297_v11  ;;  %v9057_v53 = vmul.f32 %v5612_v16, %v8977_v4 }
 0xa12   :  { %5621 = vrcp.f32 %v3291_v34  ;;  %v3339_v18 = vsel %vm563_vm1, %v9048_v43, 0.0 }
 0xa13   :  { %v3279_v26 = vpop.xlane.xlu0 %3278  ;;  %5623 = vrcp.f32 %v3298_v50  ;;  %v3356_v10 = vsel %vm563_vm1, %v9057_v53, 0.0  ;;  %v3340_v17 = vadd.f32 %v3339_v18, %v3338_v51 }
 0xa14   :  { %v3299_v35 = vadd.f32 1e-08, %v3279_v26  ;;  %v5614_v0 = vpop.eup %5613 }
 0xa15   :  { %v5616_v60 = vpop.eup %5615  ;;  %v9060_v32 = vmul.f32 %v5614_v0, %v8999_v25 }
 0xa16   :  { %v3282_v56 = vpop.xlane.xlu2 %3281  ;;  %v3258_v1 = vpop.xlane.xlu1 %3257  ;;  %5625 = vrcp.f32 %v3299_v35  ;;  %v9068_v29 = vmul.f32 %v5616_v60, %v8969_v54 }
 0xa17   :  { %v5618_v58 = vpop.eup %5617  ;;  %v3300_v39 = vadd.f32 1e-08, %v3282_v56  ;;  %v3292_v33 = vadd.f32 1e-08, %v3258_v1  ;;  %v3341_v27 = vsel %vm563_vm1, %v9060_v32, 0.0 }
 0xa18   :  { %v5620_v36 = vpop.eup %5619  ;;  %v9063_v15 = vmul.f32 %v5618_v58, %v8984_v41  ;;  %v3355_v24 = vsel %vm563_vm1, %v9068_v29, 0.0 }
 0xa19   :  { %v5622_v47 = vpop.eup %5621  ;;  %5627 = vrcp.f32 %v3300_v39  ;;  %v9071_v25 = vmul.f32 %v5620_v36, %v8989_v2  ;;  %v3357_v9 = vadd.f32 %v3356_v10, %v3355_v24 }
 0xa1a   :  { %5629 = vrcp.f32 %v3292_v33  ;;  %v5624_v61 = vpop.eup %5623  ;;  %v9076_v41 = vmul.f32 %v5622_v47, %v9004_v63  ;;  %v3358_v54 = vsel %vm563_vm1, %v9063_v15, 0.0  ;;  %v3342_v63 = vadd.f32 %v3341_v27, %v3340_v17 }
 0xa1b   :  { %v3261_v48 = vpop.xlane.xlu0 %3260  ;;  %v9083_v23 = vmul.f32 %v5624_v61, %v9007_v62  ;;  %v3360_v30 = vsel %vm563_vm1, %v9071_v25, 0.0  ;;  %v3359_v38 = vadd.f32 %v3358_v54, %v3357_v9 }
 0xa1c   :  { %v3293_v4 = vadd.f32 1e-08, %v3261_v48  ;;  %v5626_v55 = vpop.eup %5625  ;;  %v3343_v59 = vsel %vm563_vm1, %v9076_v41, 0.0 }
 0xa1d   :  { %v9092_v6 = vmul.f32 %v5626_v55, %v9014_v42  ;;  %v3362_v3 = vsel %vm563_vm1, %v9083_v23, 0.0  ;;  %v3344_v22 = vadd.f32 %v3343_v59, %v3342_v63  ;;  %v3361_v49 = vadd.f32 %v3360_v30, %v3359_v38 }
 0xa1e   :  { %5631 = vrcp.f32 %v3293_v4  ;;  %v3285_v2 = vpop.xlane.xlu1 %3284 }
 0xa1f   :  { %v5628_v45 = vpop.eup %5627  ;;  %v3301_v7 = vadd.f32 1e-08, %v3285_v2  ;;  %v3364_v42 = vsel %vm563_vm1, %v9092_v6, 0.0  ;;  %v3363_v28 = vadd.f32 %v3362_v3, %v3361_v49 }
 0xa20   :  { %v5630_v21 = vpop.eup %5629  ;;  %v9100_v13 = vmul.f32 %v5628_v45, %v9019_v19 }
 0xa21   :  { %v9095_v62 = vmul.f32 %v5630_v21, %v9022_v14  ;;  %5633 = vrcp.f32 %v3301_v7  ;;  %v3365_v35 = vadd.f32 %v3364_v42, %v3363_v28 }
 0xa22   :  { %v3366_v50 = vsel %vm563_vm1, %v9100_v13, 0.0 }
 0xa23   :  { %v3345_v46 = vsel %vm563_vm1, %v9095_v62, 0.0  ;;  %v3367_v60 = vadd.f32 %v3366_v50, %v3365_v35 }
 0xa24   :  { %v5632_v11 = vpop.eup %5631  ;;  %v3346_v34 = vadd.f32 %v3345_v46, %v3344_v22 }
 0xa25   :  { %v9107_v14 = vmul.f32 %v5632_v11, %v9029_v44 }
 0xa27   :  { %v3347_v19 = vsel %vm563_vm1, %v9107_v14, 0.0  ;;  %v5634_v26 = vpop.eup %5633 }
 0xa28   :  { %v3348_v40 = vadd.f32 %v3347_v19, %v3346_v34  ;;  %v9114_v16 = vmul.f32 %v5634_v26, %v9034_v5 }
 0xa2a   :  { %v3349_v0 = vrot.slane %v3348_v40, 4  ;;  %v3368_v44 = vsel %vm563_vm1, %v9114_v16, 0.0 }
 0xa2b   :  { %v3369_v1 = vadd.f32 %v3368_v44, %v3367_v60 }
 0xa2c   :  { %v3350_v56 = vadd.f32 %v3349_v0, %v3348_v40 }
 0xa2d   :  { %v3370_v57 = vrot.slane %v3369_v1, 4 }
 0xa2e   :  { %v3351_v8 = vrot.slane %v3350_v56, 2 }
 0xa2f   :  { %v3371_v39 = vadd.f32 %v3370_v57, %v3369_v1 }
 0xa30   :  { %v3352_v58 = vadd.f32 %v3351_v8, %v3350_v56 }
 0xa31   :  { %v3372_v36 = vrot.slane %v3371_v39, 2 }
 0xa32   :  { %v3353_v33 = vrot.slane %v3352_v58, 1 }
 0xa33   :  { %v3373_v47 = vadd.f32 %v3372_v36, %v3371_v39 }
 0xa34   :  { %v3354_v12 = vadd.f32 %v3353_v33, %v3352_v58 }
 0xa35   :  { %v3374_v18 = vrot.slane %v3373_v47, 1 }
 0xa36   :  { %v3376_v37 = vadd.f32 1e-08, %v3354_v12 }
 0xa37   :  { %v3375_v5 = vadd.f32 %v3374_v18, %v3373_v47 }
 0xa38   :  { %5635 = vrcp.f32 %v3376_v37 }
 0xa39   :  { %v3377_v48 = vadd.f32 1e-08, %v3375_v5 }
 0xa3b   :  { %5637 = vrcp.f32 %v3377_v48 }
 0xa3e   :  { %v5636_v61 = vpop.eup %5635 }
 0xa3f   :  { %v9119_v4 = vmul.f32 %v5636_v61, %v9042_v20  ;;  %v9122_v51 = vmul.f32 %v5636_v61, %v9039_v31  ;;  %v9134_v20 = vmul.f32 %v5636_v61, %v9045_v52 }
 0xa41   :  { %v3399_v27 = vsel %vm563_vm1, %v9119_v4, 0.0  ;;  %v3396_v10 = vsel %vm563_vm1, %v9122_v51, 0.0  ;;  %v5638_v55 = vpop.eup %5637  ;;  %v3402_v2 = vsel %vm563_vm1, %v9134_v20, 0.0 }
 0xa42   :  { %3400 = vadd.xlane.f32.xlu0 %v3399_v27  ;;  %3397 = vadd.xlane.f32.xlu2 %v3396_v10  ;;  %v9129_v17 = vmul.f32 %v5638_v55, %v9068_v29  ;;  %v9137_v31 = vmul.f32 %v5638_v55, %v9057_v53  ;;  %v9144_v45 = vmul.f32 %v5638_v55, %v9063_v15 }
 0xa43   :  { %v9149_v52 = vmul.f32 %v5638_v55, %v9071_v25  ;;  %v9152_v53 = vmul.f32 %v5636_v61, %v9048_v43  ;;  %v9159_v15 = vmul.f32 %v5636_v61, %v9060_v32  ;;  %v9164_v25 = vmul.f32 %v5636_v61, %v9076_v41 }
 0xa44   :  { %v3420_v54 = vsel %vm563_vm1, %v9129_v17, 0.0  ;;  %v3423_v24 = vsel %vm563_vm1, %v9137_v31, 0.0  ;;  %v3426_v29 = vsel %vm563_vm1, %v9144_v45, 0.0  ;;  %v9167_v43 = vmul.f32 %v5638_v55, %v9083_v23 }
 0xa45   :  { %3421 = vadd.xlane.f32.xlu1 %v3420_v54  ;;  %v3429_v7 = vsel %vm563_vm1, %v9149_v52, 0.0  ;;  %v3405_v63 = vsel %vm563_vm1, %v9152_v53, 0.0  ;;  %v3408_v9 = vsel %vm563_vm1, %v9159_v15, 0.0  ;;  %v3411_v21 = vsel %vm563_vm1, %v9164_v25, 0.0 }
 0xa46   :  { %v3432_v30 = vsel %vm563_vm1, %v9167_v43, 0.0  ;;  %v9174_v32 = vmul.f32 %v5638_v55, %v9092_v6  ;;  %v9179_v41 = vmul.f32 %v5638_v55, %v9100_v13  ;;  %v9182_v23 = vmul.f32 %v5636_v61, %v9095_v62 }
 0xa47   :  { %v9189_v6 = vmul.f32 %v5636_v61, %v9107_v14  ;;  %v9194_v13 = vmul.f32 %v5638_v55, %v9114_v16 }
 0xa48   :  { %v3435_v59 = vsel %vm563_vm1, %v9174_v32, 0.0  ;;  %v3438_v38 = vsel %vm563_vm1, %v9179_v41, 0.0  ;;  %v3414_v3 = vsel %vm563_vm1, %v9182_v23, 0.0 }
 0xa49   :  { %v3417_v11 = vsel %vm563_vm1, %v9189_v6, 0.0  ;;  %v3441_v62 = vsel %vm563_vm1, %v9194_v13, 0.0 }
 0xa4a   :  { %3403 = vadd.xlane.f32.xlu0 %v3402_v2  ;;  %3424 = vadd.xlane.f32.xlu2 %v3423_v24 }
 0xa4d   :  { %3427 = vadd.xlane.f32.xlu1 %v3426_v29 }
 0xa52   :  { %3430 = vadd.xlane.f32.xlu0 %v3429_v7  ;;  %3406 = vadd.xlane.f32.xlu2 %v3405_v63 }
 0xa55   :  { %3409 = vadd.xlane.f32.xlu1 %v3408_v9 }
 0xa5a   :  { %3412 = vadd.xlane.f32.xlu0 %v3411_v21  ;;  %3433 = vadd.xlane.f32.xlu2 %v3432_v30 }
 0xa5d   :  { %3436 = vadd.xlane.f32.xlu1 %v3435_v59 }
 0xa62   :  { %3439 = vadd.xlane.f32.xlu0 %v3438_v38  ;;  %3415 = vadd.xlane.f32.xlu2 %v3414_v3 }
 0xa65   :  { %3418 = vadd.xlane.f32.xlu1 %v3417_v11 }
 0xa6a   :  { %3442 = vadd.xlane.f32.xlu2 %v3441_v62 }
 0xab5   :  { %v3401_v46 = vpop.xlane.xlu0 %3400  ;;  %v3398_v22 = vpop.xlane.xlu2 %3397 }
 0xab6   :  { %v3445_v28 = vadd.f32 1e-08, %v3401_v46  ;;  %v3444_v50 = vadd.f32 1e-08, %v3398_v22 }
 0xab8   :  { %v3422_v49 = vpop.xlane.xlu1 %3421  ;;  %5639 = vrcp.f32 %v3445_v28 }
 0xab9   :  { %5641 = vrcp.f32 %v3444_v50  ;;  %v3452_v16 = vadd.f32 1e-08, %v3422_v49 }
 0xabd   :  { %v3404_v42 = vpop.xlane.xlu0 %3403  ;;  %v3425_v34 = vpop.xlane.xlu2 %3424 }
 0xabe   :  { %v3446_v19 = vadd.f32 1e-08, %v3404_v42  ;;  %v3453_v60 = vadd.f32 1e-08, %v3425_v34  ;;  %v5640_v56 = vpop.eup %5639 }
 0xabf   :  { %v5642_v8 = vpop.eup %5641  ;;  %v9202_v37 = vmul.f32 %v5640_v56, %v9119_v4 }
 0xac0   :  { %v3428_v14 = vpop.xlane.xlu1 %3427  ;;  %5643 = vrcp.f32 %v3446_v19  ;;  %v9199_v12 = vmul.f32 %v5642_v8, %v9122_v51 }
 0xac1   :  { %v3454_v1 = vadd.f32 1e-08, %v3428_v14  ;;  %v3493_v4 = vsel %vm563_vm1, %v9202_v37, 0.0 }
 0xac2   :  { %v3492_v51 = vsel %vm563_vm1, %v9199_v12, 0.0 }
 0xac5   :  { %v3431_v26 = vpop.xlane.xlu0 %3430  ;;  %v3407_v40 = vpop.xlane.xlu2 %3406 }
 0xac6   :  { %v3447_v35 = vadd.f32 1e-08, %v3407_v40  ;;  %v3455_v39 = vadd.f32 1e-08, %v3431_v26  ;;  %v5644_v36 = vpop.eup %5643 }
 0xac7   :  { %v9205_v48 = vmul.f32 %v5644_v36, %v9134_v20 }
 0xac8   :  { %v3410_v0 = vpop.xlane.xlu1 %3409  ;;  %5645 = vrcp.f32 %v3447_v35 }
 0xac9   :  { %v3448_v44 = vadd.f32 1e-08, %v3410_v0  ;;  %5647 = vrcp.f32 %v3452_v16  ;;  %v3495_v20 = vsel %vm563_vm1, %v9205_v48, 0.0 }
 0xaca   :  { %5649 = vrcp.f32 %v3453_v60 }
 0xacb   :  { %5651 = vrcp.f32 %v3448_v44 }
 0xacc   :  { %5653 = vrcp.f32 %v3454_v1 }
 0xacd   :  { %v3413_v57 = vpop.xlane.xlu0 %3412  ;;  %v3434_v58 = vpop.xlane.xlu2 %3433 }
 0xace   :  { %v3449_v33 = vadd.f32 1e-08, %v3413_v57  ;;  %v3456_v47 = vadd.f32 1e-08, %v3434_v58  ;;  %v5646_v18 = vpop.eup %5645 }
 0xacf   :  { %v5648_v27 = vpop.eup %5647  ;;  %v9208_v55 = vmul.f32 %v5646_v18, %v9152_v53  ;;  %v3494_v53 = vadd.f32 %v3493_v4, %v3492_v51 }
 0xad0   :  { %5655 = vrcp.f32 %v3449_v33  ;;  %v3437_v5 = vpop.xlane.xlu1 %3436  ;;  %v5650_v10 = vpop.eup %5649  ;;  %v9228_v46 = vmul.f32 %v5648_v27, %v9129_v17 }
 0xad1   :  { %5657 = vrcp.f32 %v3455_v39  ;;  %v3457_v61 = vadd.f32 1e-08, %v3437_v5  ;;  %v5652_v54 = vpop.eup %5651  ;;  %v9217_v30 = vmul.f32 %v5650_v10, %v9137_v31  ;;  %v3497_v59 = vsel %vm563_vm1, %v9208_v55, 0.0 }
 0xad2   :  { %5659 = vrcp.f32 %v3456_v47  ;;  %v5654_v29 = vpop.eup %5653  ;;  %v9222_v38 = vmul.f32 %v5652_v54, %v9159_v15  ;;  %v3496_v62 = vadd.f32 %v3495_v20, %v3494_v53 }
 0xad3   :  { %5661 = vrcp.f32 %v3457_v61  ;;  %v9225_v3 = vmul.f32 %v5654_v29, %v9144_v45 }
 0xad4   :  { %v3498_v15 = vadd.f32 %v3497_v59, %v3496_v62  ;;  %v3499_v45 = vsel %vm563_vm1, %v9222_v38, 0.0 }
 0xad5   :  { %v3440_v2 = vpop.xlane.xlu0 %3439  ;;  %v3416_v24 = vpop.xlane.xlu2 %3415  ;;  %v3516_v14 = vsel %vm563_vm1, %v9225_v3, 0.0 }
 0xad6   :  { %v3458_v7 = vadd.f32 1e-08, %v3440_v2  ;;  %v3450_v63 = vadd.f32 1e-08, %v3416_v24  ;;  %v5656_v9 = vpop.eup %5655  ;;  %v3500_v0 = vadd.f32 %v3499_v45, %v3498_v15 }
 0xad7   :  { %v5658_v21 = vpop.eup %5657  ;;  %v9231_v31 = vmul.f32 %v5656_v9, %v9164_v25  ;;  %v3513_v25 = vsel %vm563_vm1, %v9228_v46, 0.0 }
 0xad8   :  { %5663 = vrcp.f32 %v3458_v7  ;;  %v3419_v11 = vpop.xlane.xlu1 %3418  ;;  %v5660_v22 = vpop.eup %5659  ;;  %v9234_v42 = vmul.f32 %v5658_v21, %v9149_v52  ;;  %v3514_v52 = vsel %vm563_vm1, %v9217_v30, 0.0 }
 0xad9   :  { %5665 = vrcp.f32 %v3450_v63  ;;  %v3451_v49 = vadd.f32 1e-08, %v3419_v11  ;;  %v5662_v34 = vpop.eup %5661  ;;  %v9241_v17 = vmul.f32 %v5660_v22, %v9167_v43  ;;  %v3501_v19 = vsel %vm563_vm1, %v9231_v31, 0.0 }
 0xada   :  { %v3515_v40 = vadd.f32 %v3514_v52, %v3513_v25  ;;  %v3518_v16 = vsel %vm563_vm1, %v9234_v42, 0.0  ;;  %v9252_v43 = vmul.f32 %v5662_v34, %v9174_v32  ;;  %v3502_v8 = vadd.f32 %v3501_v19, %v3500_v0 }
 0xadb   :  { %5667 = vrcp.f32 %v3451_v49  ;;  %v3520_v56 = vsel %vm563_vm1, %v9241_v17, 0.0 }
 0xadc   :  { %v3517_v44 = vadd.f32 %v3516_v14, %v3515_v40  ;;  %v3522_v32 = vsel %vm563_vm1, %v9252_v43, 0.0 }
 0xadd   :  { %v3443_v28 = vpop.xlane.xlu2 %3442 }
 0xade   :  { %v5664_v50 = vpop.eup %5663  ;;  %v3459_v26 = vadd.f32 1e-08, %v3443_v28  ;;  %v3519_v39 = vadd.f32 %v3518_v16, %v3517_v44 }
 0xadf   :  { %v5666_v35 = vpop.eup %5665  ;;  %v9260_v1 = vmul.f32 %v5664_v50, %v9179_v41 }
 0xae0   :  { %v9255_v60 = vmul.f32 %v5666_v35, %v9182_v23  ;;  %5669 = vrcp.f32 %v3459_v26  ;;  %v3521_v36 = vadd.f32 %v3520_v56, %v3519_v39 }
 0xae1   :  { %v5668_v57 = vpop.eup %5667  ;;  %v3524_v47 = vsel %vm563_vm1, %v9260_v1, 0.0 }
 0xae2   :  { %v3503_v58 = vsel %vm563_vm1, %v9255_v60, 0.0  ;;  %v9267_v23 = vmul.f32 %v5668_v57, %v9189_v6  ;;  %v3523_v61 = vadd.f32 %v3522_v32, %v3521_v36 }
 0xae3   :  { %v3504_v33 = vadd.f32 %v3503_v58, %v3502_v8 }
 0xae4   :  { %v3505_v41 = vsel %vm563_vm1, %v9267_v23, 0.0  ;;  %v3525_v51 = vadd.f32 %v3524_v47, %v3523_v61 }
 0xae5   :  { %v3506_v5 = vadd.f32 %v3505_v41, %v3504_v33 }
 0xae6   :  { %v5670_v18 = vpop.eup %5669 }
 0xae7   :  { %v9274_v27 = vmul.f32 %v5670_v18, %v9194_v13  ;;  %v3507_v10 = vrot.slane %v3506_v5, 4 }
 0xae9   :  { %v3526_v6 = vsel %vm563_vm1, %v9274_v27, 0.0  ;;  %v3508_v4 = vadd.f32 %v3507_v10, %v3506_v5 }
 0xaea   :  { %v3527_v54 = vadd.f32 %v3526_v6, %v3525_v51 }
 0xaeb   :  { %v3509_v2 = vrot.slane %v3508_v4, 2 }
 0xaec   :  { %v3528_v24 = vrot.slane %v3527_v54, 4 }
 0xaed   :  { %v3510_v29 = vadd.f32 %v3509_v2, %v3508_v4 }
 0xaee   :  { %v3529_v20 = vadd.f32 %v3528_v24, %v3527_v54 }
 0xaef   :  { %v3511_v7 = vrot.slane %v3510_v29, 1 }
 0xaf0   :  { %v3530_v63 = vrot.slane %v3529_v20, 2 }
 0xaf1   :  { %v3512_v9 = vadd.f32 %v3511_v7, %v3510_v29 }
 0xaf2   :  { %v3531_v53 = vadd.f32 %v3530_v63, %v3529_v20 }
 0xaf3   :  { %v3534_v21 = vadd.f32 1e-08, %v3512_v9 }
 0xaf4   :  { %v3532_v59 = vrot.slane %v3531_v53, 1 }
 0xaf5   :  { %5671 = vrcp.f32 %v3534_v21 }
 0xaf6   :  { %v3533_v13 = vadd.f32 %v3532_v59, %v3531_v53 }
 0xaf8   :  { %v3535_v11 = vadd.f32 1e-08, %v3533_v13 }
 0xafa   :  { %5673 = vrcp.f32 %v3535_v11 }
 0xafb   :  { %v5672_v62 = vpop.eup %5671 }
 0xafc   :  { %v9279_v22 = vmul.f32 %v5672_v62, %v9202_v37  ;;  %v9282_v49 = vmul.f32 %v5672_v62, %v9199_v12  ;;  %v9294_v37 = vmul.f32 %v5672_v62, %v9205_v48 }
 0xafe   :  { %v3557_v15 = vsel %vm563_vm1, %v9279_v22, 0.0  ;;  %v3554_v34 = vsel %vm563_vm1, %v9282_v49, 0.0  ;;  %v3560_v25 = vsel %vm563_vm1, %v9294_v37, 0.0 }
 0xaff   :  { %3558 = vadd.xlane.f32.xlu1 %v3557_v15  ;;  %3555 = vadd.xlane.f32.xlu0 %v3554_v34 }
 0xb00   :  { %v5674_v45 = vpop.eup %5673 }
 0xb01   :  { %v9289_v14 = vmul.f32 %v5674_v45, %v9228_v46  ;;  %v9297_v12 = vmul.f32 %v5674_v45, %v9217_v30  ;;  %v9304_v50 = vmul.f32 %v5674_v45, %v9225_v3  ;;  %v9309_v48 = vmul.f32 %v5674_v45, %v9234_v42 }
 0xb02   :  { %v9312_v30 = vmul.f32 %v5672_v62, %v9208_v55  ;;  %v9319_v3 = vmul.f32 %v5672_v62, %v9222_v38  ;;  %v9324_v42 = vmul.f32 %v5672_v62, %v9231_v31  ;;  %v9327_v55 = vmul.f32 %v5674_v45, %v9241_v17 }
 0xb03   :  { %v3578_v28 = vsel %vm563_vm1, %v9289_v14, 0.0  ;;  %v3581_v52 = vsel %vm563_vm1, %v9297_v12, 0.0  ;;  %v3584_v46 = vsel %vm563_vm1, %v9304_v50, 0.0  ;;  %v3587_v19 = vsel %vm563_vm1, %v9309_v48, 0.0 }
 0xb04   :  { %3579 = vadd.xlane.f32.xlu2 %v3578_v28  ;;  %v3563_v26 = vsel %vm563_vm1, %v9312_v30, 0.0  ;;  %v3566_v40 = vsel %vm563_vm1, %v9319_v3, 0.0  ;;  %v3569_v35 = vsel %vm563_vm1, %v9324_v42, 0.0  ;;  %v3590_v16 = vsel %vm563_vm1, %v9327_v55, 0.0 }
 0xb05   :  { %v9334_v38 = vmul.f32 %v5674_v45, %v9252_v43  ;;  %v9339_v31 = vmul.f32 %v5674_v45, %v9260_v1  ;;  %v9342_v17 = vmul.f32 %v5672_v62, %v9255_v60  ;;  %v9349_v43 = vmul.f32 %v5672_v62, %v9267_v23 }
 0xb06   :  { %v9354_v1 = vmul.f32 %v5674_v45, %v9274_v27 }
 0xb07   :  { %3561 = vadd.xlane.f32.xlu1 %v3560_v25  ;;  %3582 = vadd.xlane.f32.xlu0 %v3581_v52  ;;  %v3593_v0 = vsel %vm563_vm1, %v9334_v38, 0.0  ;;  %v3596_v44 = vsel %vm563_vm1, %v9339_v31, 0.0  ;;  %v3572_v56 = vsel %vm563_vm1, %v9342_v17, 0.0  ;;  %v3575_v8 = vsel %vm563_vm1, %v9349_v43, 0.0 }
 0xb08   :  { %v3599_v60 = vsel %vm563_vm1, %v9354_v1, 0.0 }
 0xb0c   :  { %3585 = vadd.xlane.f32.xlu2 %v3584_v46 }
 0xb0f   :  { %3588 = vadd.xlane.f32.xlu1 %v3587_v19  ;;  %3564 = vadd.xlane.f32.xlu0 %v3563_v26 }
 0xb14   :  { %3567 = vadd.xlane.f32.xlu2 %v3566_v40 }
 0xb17   :  { %3570 = vadd.xlane.f32.xlu1 %v3569_v35  ;;  %3591 = vadd.xlane.f32.xlu0 %v3590_v16 }
 0xb1c   :  { %3594 = vadd.xlane.f32.xlu2 %v3593_v0 }
 0xb1f   :  { %3597 = vadd.xlane.f32.xlu1 %v3596_v44  ;;  %3573 = vadd.xlane.f32.xlu0 %v3572_v56 }
 0xb24   :  { %3576 = vadd.xlane.f32.xlu2 %v3575_v8 }
 0xb27   :  { %3600 = vadd.xlane.f32.xlu0 %v3599_v60 }
 0xb72   :  { %v3559_v57 = vpop.xlane.xlu1 %3558  ;;  %v3556_v58 = vpop.xlane.xlu0 %3555 }
 0xb73   :  { %v3603_v36 = vadd.f32 1e-08, %v3559_v57  ;;  %v3602_v47 = vadd.f32 1e-08, %v3556_v58 }
 0xb75   :  { %5675 = vrcp.f32 %v3603_v36 }
 0xb76   :  { %5677 = vrcp.f32 %v3602_v47 }
 0xb77   :  { %v3580_v39 = vpop.xlane.xlu2 %3579 }
 0xb78   :  { %v3610_v6 = vadd.f32 1e-08, %v3580_v39 }
 0xb7a   :  { %v3562_v32 = vpop.xlane.xlu1 %3561  ;;  %v3583_v33 = vpop.xlane.xlu0 %3582 }
 0xb7b   :  { %v3604_v5 = vadd.f32 1e-08, %v3562_v32  ;;  %v3611_v27 = vadd.f32 1e-08, %v3583_v33  ;;  %v5676_v54 = vpop.eup %5675 }
 0xb7c   :  { %v5678_v20 = vpop.eup %5677  ;;  %v9362_v59 = vmul.f32 %v5676_v54, %v9279_v22 }
 0xb7d   :  { %5679 = vrcp.f32 %v3604_v5  ;;  %v9359_v53 = vmul.f32 %v5678_v20, %v9282_v49 }
 0xb7e   :  { %v3651_v22 = vsel %vm563_vm1, %v9362_v59, 0.0 }
 0xb7f   :  { %v3586_v23 = vpop.xlane.xlu2 %3585  ;;  %v3650_v52 = vsel %vm563_vm1, %v9359_v53, 0.0 }
 0xb80   :  { %v3612_v4 = vadd.f32 1e-08, %v3586_v23  ;;  %v3652_v0 = vadd.f32 %v3651_v22, %v3650_v52 }
 0xb82   :  { %v3589_v41 = vpop.xlane.xlu1 %3588  ;;  %v3565_v18 = vpop.xlane.xlu0 %3564 }
 0xb83   :  { %v3605_v61 = vadd.f32 1e-08, %v3565_v18  ;;  %v3613_v2 = vadd.f32 1e-08, %v3589_v41  ;;  %v5680_v63 = vpop.eup %5679 }
 0xb84   :  { %v9365_v15 = vmul.f32 %v5680_v63, %v9294_v37 }
 0xb85   :  { %5681 = vrcp.f32 %v3605_v61 }
 0xb86   :  { %5683 = vrcp.f32 %v3611_v27  ;;  %v3653_v40 = vsel %vm563_vm1, %v9365_v15, 0.0 }
 0xb87   :  { %v3568_v10 = vpop.xlane.xlu2 %3567  ;;  %v3654_v58 = vadd.f32 %v3653_v40, %v3652_v0 }
 0xb88   :  { %v3606_v51 = vadd.f32 1e-08, %v3568_v10 }
 0xb8a   :  { %v3571_v24 = vpop.xlane.xlu1 %3570  ;;  %v3592_v29 = vpop.xlane.xlu0 %3591  ;;  %5685 = vrcp.f32 %v3606_v51 }
 0xb8b   :  { %v3607_v7 = vadd.f32 1e-08, %v3571_v24  ;;  %5687 = vrcp.f32 %v3610_v6  ;;  %v3614_v9 = vadd.f32 1e-08, %v3592_v29  ;;  %v5682_v13 = vpop.eup %5681 }
 0xb8c   :  { %5689 = vrcp.f32 %v3612_v4  ;;  %v5684_v62 = vpop.eup %5683  ;;  %v9368_v28 = vmul.f32 %v5682_v13, %v9312_v30 }
 0xb8d   :  { %5691 = vrcp.f32 %v3613_v2  ;;  %v9377_v35 = vmul.f32 %v5684_v62, %v9297_v12 }
 0xb8e   :  { %5693 = vrcp.f32 %v3607_v7  ;;  %v3655_v56 = vsel %vm563_vm1, %v9368_v28, 0.0 }
 0xb8f   :  { %v3595_v21 = vpop.xlane.xlu2 %3594  ;;  %5695 = vrcp.f32 %v3614_v9  ;;  %v3672_v32 = vsel %vm563_vm1, %v9377_v35, 0.0  ;;  %v3656_v23 = vadd.f32 %v3655_v56, %v3654_v58 }
 0xb90   :  { %v3615_v11 = vadd.f32 1e-08, %v3595_v21  ;;  %v5686_v34 = vpop.eup %5685 }
 0xb91   :  { %v5688_v45 = vpop.eup %5687  ;;  %v9380_v30 = vmul.f32 %v5686_v34, %v9319_v3 }
 0xb92   :  { %v3598_v49 = vpop.xlane.xlu1 %3597  ;;  %v3574_v25 = vpop.xlane.xlu0 %3573  ;;  %5697 = vrcp.f32 %v3615_v11  ;;  %v9388_v60 = vmul.f32 %v5688_v45, %v9289_v14 }
 0xb93   :  { %v5690_v46 = vpop.eup %5689  ;;  %v3616_v19 = vadd.f32 1e-08, %v3598_v49  ;;  %v3608_v26 = vadd.f32 1e-08, %v3574_v25  ;;  %v3657_v39 = vsel %vm563_vm1, %v9380_v30, 0.0 }
 0xb94   :  { %v5692_v37 = vpop.eup %5691  ;;  %v9383_v44 = vmul.f32 %v5690_v46, %v9304_v50  ;;  %v3671_v47 = vsel %vm563_vm1, %v9388_v60, 0.0 }
 0xb95   :  { %v5694_v16 = vpop.eup %5693  ;;  %5699 = vrcp.f32 %v3616_v19  ;;  %v9391_v3 = vmul.f32 %v5692_v37, %v9309_v48  ;;  %v3673_v5 = vadd.f32 %v3672_v32, %v3671_v47 }
 0xb96   :  { %5701 = vrcp.f32 %v3608_v26  ;;  %v5696_v57 = vpop.eup %5695  ;;  %v9396_v50 = vmul.f32 %v5694_v16, %v9324_v42  ;;  %v3674_v14 = vsel %vm563_vm1, %v9383_v44, 0.0  ;;  %v3658_v42 = vadd.f32 %v3657_v39, %v3656_v23 }
 0xb97   :  { %v3577_v8 = vpop.xlane.xlu2 %3576  ;;  %v9403_v36 = vmul.f32 %v5696_v57, %v9327_v55  ;;  %v3676_v27 = vsel %vm563_vm1, %v9391_v3, 0.0  ;;  %v3675_v6 = vadd.f32 %v3674_v14, %v3673_v5 }
 0xb98   :  { %v3609_v12 = vadd.f32 1e-08, %v3577_v8  ;;  %v5698_v33 = vpop.eup %5697  ;;  %v3659_v10 = vsel %vm563_vm1, %v9396_v50, 0.0 }
 0xb99   :  { %v9412_v51 = vmul.f32 %v5698_v33, %v9334_v38  ;;  %v3678_v4 = vsel %vm563_vm1, %v9403_v36, 0.0  ;;  %v3660_v29 = vadd.f32 %v3659_v10, %v3658_v42  ;;  %v3677_v20 = vadd.f32 %v3676_v27, %v3675_v6 }
 0xb9a   :  { %5703 = vrcp.f32 %v3609_v12  ;;  %v3601_v48 = vpop.xlane.xlu0 %3600 }
 0xb9b   :  { %v5700_v41 = vpop.eup %5699  ;;  %v3617_v18 = vadd.f32 1e-08, %v3601_v48  ;;  %v3680_v38 = vsel %vm563_vm1, %v9412_v51, 0.0  ;;  %v3679_v63 = vadd.f32 %v3678_v4, %v3677_v20 }
 0xb9c   :  { %v5702_v61 = vpop.eup %5701  ;;  %v9420_v54 = vmul.f32 %v5700_v41, %v9339_v31 }
 0xb9d   :  { %v9415_v55 = vmul.f32 %v5702_v61, %v9342_v17  ;;  %5705 = vrcp.f32 %v3617_v18  ;;  %v3681_v11 = vadd.f32 %v3680_v38, %v3679_v63 }
 0xb9e   :  { %v3682_v9 = vsel %vm563_vm1, %v9420_v54, 0.0 }
 0xb9f   :  { %v3661_v24 = vsel %vm563_vm1, %v9415_v55, 0.0  ;;  %v3683_v45 = vadd.f32 %v3682_v9, %v3681_v11 }
 0xba0   :  { %v5704_v2 = vpop.eup %5703  ;;  %v3662_v7 = vadd.f32 %v3661_v24, %v3660_v29 }
 0xba1   :  { %v9427_v17 = vmul.f32 %v5704_v2, %v9349_v43 }
 0xba3   :  { %v3663_v31 = vsel %vm563_vm1, %v9427_v17, 0.0  ;;  %v5706_v21 = vpop.eup %5705 }
 0xba4   :  { %v3664_v13 = vadd.f32 %v3663_v31, %v3662_v7  ;;  %v9434_v62 = vmul.f32 %v5706_v21, %v9354_v1 }
 0xba6   :  { %v3665_v34 = vrot.slane %v3664_v13, 4  ;;  %v3684_v43 = vsel %vm563_vm1, %v9434_v62, 0.0 }
 0xba7   :  { %v3685_v25 = vadd.f32 %v3684_v43, %v3683_v45 }
 0xba8   :  { %v3666_v49 = vadd.f32 %v3665_v34, %v3664_v13 }
 0xba9   :  { %v3686_v22 = vrot.slane %v3685_v25, 4 }
 0xbaa   :  { %v3667_v52 = vrot.slane %v3666_v49, 2 }
 0xbab   :  { %v3687_v19 = vadd.f32 %v3686_v22, %v3685_v25 }
 0xbac   :  { %v3668_v46 = vadd.f32 %v3667_v52, %v3666_v49 }
 0xbad   :  { %v3688_v37 = vrot.slane %v3687_v19, 2 }
 0xbae   :  { %v3669_v26 = vrot.slane %v3668_v46, 1 }
 0xbaf   :  { %v3689_v16 = vadd.f32 %v3688_v37, %v3687_v19 }
 0xbb0   :  { %v3670_v40 = vadd.f32 %v3669_v26, %v3668_v46 }
 0xbb1   :  { %v3690_v56 = vrot.slane %v3689_v16, 1 }
 0xbb2   :  { %v3692_v0 = vadd.f32 1e-08, %v3670_v40 }
 0xbb3   :  { %v3691_v1 = vadd.f32 %v3690_v56, %v3689_v16 }
 0xbb4   :  { %5707 = vrcp.f32 %v3692_v0 }
 0xbb5   :  { %v3693_v8 = vadd.f32 1e-08, %v3691_v1 }
 0xbb7   :  { %5709 = vrcp.f32 %v3693_v8 }
 0xbba   :  { %v5708_v57 = vpop.eup %5707 }
 0xbbb   :  { %v9439_v12 = vmul.f32 %v5708_v57, %v9362_v59  ;;  %v9442_v58 = vmul.f32 %v5708_v57, %v9359_v53  ;;  %v9454_v59 = vmul.f32 %v5708_v57, %v9365_v15 }
 0xbbd   :  { %v3715_v39 = vsel %vm563_vm1, %v9439_v12, 0.0  ;;  %v3712_v32 = vsel %vm563_vm1, %v9442_v58, 0.0  ;;  %v5710_v33 = vpop.eup %5709  ;;  %v3718_v48 = vsel %vm563_vm1, %v9454_v59, 0.0 }
 0xbbe   :  { %3716 = vadd.xlane.f32.xlu2 %v3715_v39  ;;  %3713 = vadd.xlane.f32.xlu1 %v3712_v32  ;;  %v9449_v23 = vmul.f32 %v5710_v33, %v9388_v60  ;;  %v9457_v53 = vmul.f32 %v5710_v33, %v9377_v35  ;;  %v9464_v41 = vmul.f32 %v5710_v33, %v9383_v44 }
 0xbbf   :  { %v9469_v15 = vmul.f32 %v5710_v33, %v9391_v3  ;;  %v9472_v35 = vmul.f32 %v5708_v57, %v9368_v28  ;;  %v9479_v44 = vmul.f32 %v5708_v57, %v9380_v30  ;;  %v9484_v3 = vmul.f32 %v5708_v57, %v9396_v50 }
 0xbc0   :  { %v3736_v14 = vsel %vm563_vm1, %v9449_v23, 0.0  ;;  %v3739_v47 = vsel %vm563_vm1, %v9457_v53, 0.0  ;;  %v3742_v60 = vsel %vm563_vm1, %v9464_v41, 0.0  ;;  %v9487_v28 = vmul.f32 %v5710_v33, %v9403_v36 }
 0xbc1   :  { %3737 = vadd.xlane.f32.xlu0 %v3736_v14  ;;  %v3745_v18 = vsel %vm563_vm1, %v9469_v15, 0.0  ;;  %v3721_v42 = vsel %vm563_vm1, %v9472_v35, 0.0  ;;  %v3724_v5 = vsel %vm563_vm1, %v9479_v44, 0.0  ;;  %v3727_v61 = vsel %vm563_vm1, %v9484_v3, 0.0 }
 0xbc2   :  { %v3748_v27 = vsel %vm563_vm1, %v9487_v28, 0.0  ;;  %v9494_v30 = vmul.f32 %v5710_v33, %v9412_v51  ;;  %v9499_v50 = vmul.f32 %v5710_v33, %v9420_v54  ;;  %v9502_v36 = vmul.f32 %v5708_v57, %v9415_v55 }
 0xbc3   :  { %v9509_v51 = vmul.f32 %v5708_v57, %v9427_v17  ;;  %v9514_v54 = vmul.f32 %v5710_v33, %v9434_v62 }
 0xbc4   :  { %v3751_v10 = vsel %vm563_vm1, %v9494_v30, 0.0  ;;  %v3754_v6 = vsel %vm563_vm1, %v9499_v50, 0.0  ;;  %v3730_v4 = vsel %vm563_vm1, %v9502_v36, 0.0 }
 0xbc5   :  { %v3733_v2 = vsel %vm563_vm1, %v9509_v51, 0.0  ;;  %v3757_v55 = vsel %vm563_vm1, %v9514_v54, 0.0 }
 0xbc6   :  { %3719 = vadd.xlane.f32.xlu2 %v3718_v48  ;;  %3740 = vadd.xlane.f32.xlu1 %v3739_v47 }
 0xbc9   :  { %3743 = vadd.xlane.f32.xlu0 %v3742_v60 }
 0xbce   :  { %3746 = vadd.xlane.f32.xlu2 %v3745_v18  ;;  %3722 = vadd.xlane.f32.xlu1 %v3721_v42 }
 0xbd1   :  { %3725 = vadd.xlane.f32.xlu0 %v3724_v5 }
 0xbd6   :  { %3728 = vadd.xlane.f32.xlu2 %v3727_v61  ;;  %3749 = vadd.xlane.f32.xlu1 %v3748_v27 }
 0xbd9   :  { %3752 = vadd.xlane.f32.xlu0 %v3751_v10 }
 0xbde   :  { %3755 = vadd.xlane.f32.xlu2 %v3754_v6  ;;  %3731 = vadd.xlane.f32.xlu1 %v3730_v4 }
 0xbe1   :  { %3734 = vadd.xlane.f32.xlu0 %v3733_v2 }
 0xbe6   :  { %3758 = vadd.xlane.f32.xlu1 %v3757_v55 }
 0xc31   :  { %v3717_v24 = vpop.xlane.xlu2 %3716  ;;  %v3714_v29 = vpop.xlane.xlu1 %3713 }
 0xc32   :  { %v3761_v63 = vadd.f32 1e-08, %v3717_v24  ;;  %v3760_v9 = vadd.f32 1e-08, %v3714_v29 }
 0xc34   :  { %v3738_v20 = vpop.xlane.xlu0 %3737  ;;  %5711 = vrcp.f32 %v3761_v63 }
 0xc35   :  { %5713 = vrcp.f32 %v3760_v9  ;;  %v3768_v62 = vadd.f32 1e-08, %v3738_v20 }
 0xc39   :  { %v3720_v38 = vpop.xlane.xlu2 %3719  ;;  %v3741_v7 = vpop.xlane.xlu1 %3740 }
 0xc3a   :  { %v3762_v31 = vadd.f32 1e-08, %v3720_v38  ;;  %v3769_v45 = vadd.f32 1e-08, %v3741_v7  ;;  %v5712_v49 = vpop.eup %5711 }
 0xc3b   :  { %v5714_v52 = vpop.eup %5713  ;;  %v9522_v0 = vmul.f32 %v5712_v49, %v9439_v12 }
 0xc3c   :  { %v3744_v17 = vpop.xlane.xlu0 %3743  ;;  %5715 = vrcp.f32 %v3762_v31  ;;  %v9519_v40 = vmul.f32 %v5714_v52, %v9442_v58 }
 0xc3d   :  { %v3770_v25 = vadd.f32 1e-08, %v3744_v17  ;;  %v3809_v12 = vsel %vm563_vm1, %v9522_v0, 0.0 }
 0xc3e   :  { %v3808_v58 = vsel %vm563_vm1, %v9519_v40, 0.0 }
 0xc41   :  { %v3747_v21 = vpop.xlane.xlu2 %3746  ;;  %v3723_v13 = vpop.xlane.xlu1 %3722 }
 0xc42   :  { %v3763_v11 = vadd.f32 1e-08, %v3723_v13  ;;  %v3771_v19 = vadd.f32 1e-08, %v3747_v21  ;;  %v5716_v37 = vpop.eup %5715 }
 0xc43   :  { %v9525_v8 = vmul.f32 %v5716_v37, %v9454_v59 }
 0xc44   :  { %v3726_v34 = vpop.xlane.xlu0 %3725  ;;  %5717 = vrcp.f32 %v3763_v11 }
 0xc45   :  { %v3764_v43 = vadd.f32 1e-08, %v3726_v34  ;;  %5719 = vrcp.f32 %v3768_v62  ;;  %v3811_v59 = vsel %vm563_vm1, %v9525_v8, 0.0 }
 0xc46   :  { %5721 = vrcp.f32 %v3769_v45 }
 0xc47   :  { %5723 = vrcp.f32 %v3764_v43 }
 0xc48   :  { %5725 = vrcp.f32 %v3770_v25 }
 0xc49   :  { %v3729_v22 = vpop.xlane.xlu2 %3728  ;;  %v3750_v46 = vpop.xlane.xlu1 %3749 }
 0xc4a   :  { %v3765_v26 = vadd.f32 1e-08, %v3729_v22  ;;  %v3772_v16 = vadd.f32 1e-08, %v3750_v46  ;;  %v5718_v56 = vpop.eup %5717 }
 0xc4b   :  { %v5720_v39 = vpop.eup %5719  ;;  %v9528_v33 = vmul.f32 %v5718_v56, %v9472_v35  ;;  %v3810_v35 = vadd.f32 %v3809_v12, %v3808_v58 }
 0xc4c   :  { %5727 = vrcp.f32 %v3765_v26  ;;  %v3753_v1 = vpop.xlane.xlu0 %3752  ;;  %v5722_v32 = vpop.eup %5721  ;;  %v9548_v24 = vmul.f32 %v5720_v39, %v9449_v23 }
 0xc4d   :  { %5729 = vrcp.f32 %v3771_v19  ;;  %v3773_v57 = vadd.f32 1e-08, %v3753_v1  ;;  %v5724_v14 = vpop.eup %5723  ;;  %v9537_v27 = vmul.f32 %v5722_v32, %v9457_v53  ;;  %v3813_v10 = vsel %vm563_vm1, %v9528_v33, 0.0 }
 0xc4e   :  { %5731 = vrcp.f32 %v3772_v16  ;;  %v5726_v60 = vpop.eup %5725  ;;  %v9542_v6 = vmul.f32 %v5724_v14, %v9479_v44  ;;  %v3812_v55 = vadd.f32 %v3811_v59, %v3810_v35 }
 0xc4f   :  { %5733 = vrcp.f32 %v3773_v57  ;;  %v9545_v4 = vmul.f32 %v5726_v60, %v9464_v41 }
 0xc50   :  { %v3814_v44 = vadd.f32 %v3813_v10, %v3812_v55  ;;  %v3815_v41 = vsel %vm563_vm1, %v9542_v6, 0.0 }
 0xc51   :  { %v3756_v48 = vpop.xlane.xlu2 %3755  ;;  %v3732_v47 = vpop.xlane.xlu1 %3731  ;;  %v3832_v17 = vsel %vm563_vm1, %v9545_v4, 0.0 }
 0xc52   :  { %v3774_v18 = vadd.f32 1e-08, %v3756_v48  ;;  %v3766_v42 = vadd.f32 1e-08, %v3732_v47  ;;  %v5728_v5 = vpop.eup %5727  ;;  %v3816_v34 = vadd.f32 %v3815_v41, %v3814_v44 }
 0xc53   :  { %v5730_v61 = vpop.eup %5729  ;;  %v9551_v53 = vmul.f32 %v5728_v5, %v9484_v3  ;;  %v3829_v3 = vsel %vm563_vm1, %v9548_v24, 0.0 }
 0xc54   :  { %5735 = vrcp.f32 %v3774_v18  ;;  %v3735_v2 = vpop.xlane.xlu0 %3734  ;;  %v5732_v29 = vpop.eup %5731  ;;  %v9554_v38 = vmul.f32 %v5730_v61, %v9469_v15  ;;  %v3830_v15 = vsel %vm563_vm1, %v9537_v27, 0.0 }
 0xc55   :  { %5737 = vrcp.f32 %v3766_v42  ;;  %v3767_v20 = vadd.f32 1e-08, %v3735_v2  ;;  %v5734_v7 = vpop.eup %5733  ;;  %v9561_v23 = vmul.f32 %v5732_v29, %v9487_v28  ;;  %v3817_v31 = vsel %vm563_vm1, %v9551_v53, 0.0 }
 0xc56   :  { %v3831_v13 = vadd.f32 %v3830_v15, %v3829_v3  ;;  %v3834_v62 = vsel %vm563_vm1, %v9554_v38, 0.0  ;;  %v9572_v28 = vmul.f32 %v5734_v7, %v9494_v30  ;;  %v3818_v52 = vadd.f32 %v3817_v31, %v3816_v34 }
 0xc57   :  { %5739 = vrcp.f32 %v3767_v20  ;;  %v3836_v49 = vsel %vm563_vm1, %v9561_v23, 0.0 }
 0xc58   :  { %v3833_v43 = vadd.f32 %v3832_v17, %v3831_v13  ;;  %v3838_v30 = vsel %vm563_vm1, %v9572_v28, 0.0 }
 0xc59   :  { %v3759_v63 = vpop.xlane.xlu1 %3758 }
 0xc5a   :  { %v5736_v9 = vpop.eup %5735  ;;  %v3775_v21 = vadd.f32 1e-08, %v3759_v63  ;;  %v3835_v19 = vadd.f32 %v3834_v62, %v3833_v43 }
 0xc5b   :  { %v5738_v11 = vpop.eup %5737  ;;  %v9580_v25 = vmul.f32 %v5736_v9, %v9499_v50 }
 0xc5c   :  { %v9575_v45 = vmul.f32 %v5738_v11, %v9502_v36  ;;  %5741 = vrcp.f32 %v3775_v21  ;;  %v3837_v37 = vadd.f32 %v3836_v49, %v3835_v19 }
 0xc5d   :  { %v5740_v22 = vpop.eup %5739  ;;  %v3840_v16 = vsel %vm563_vm1, %v9580_v25, 0.0 }
 0xc5e   :  { %v3819_v46 = vsel %vm563_vm1, %v9575_v45, 0.0  ;;  %v9587_v36 = vmul.f32 %v5740_v22, %v9509_v51  ;;  %v3839_v57 = vadd.f32 %v3838_v30, %v3837_v37 }
 0xc5f   :  { %v3820_v26 = vadd.f32 %v3819_v46, %v3818_v52 }
 0xc60   :  { %v3821_v50 = vsel %vm563_vm1, %v9587_v36, 0.0  ;;  %v3841_v58 = vadd.f32 %v3840_v16, %v3839_v57 }
 0xc61   :  { %v3822_v1 = vadd.f32 %v3821_v50, %v3820_v26 }
 0xc62   :  { %v5742_v56 = vpop.eup %5741 }
 0xc63   :  { %v9594_v39 = vmul.f32 %v5742_v56, %v9514_v54  ;;  %v3823_v32 = vrot.slane %v3822_v1, 4 }
 0xc65   :  { %v3842_v51 = vsel %vm563_vm1, %v9594_v39, 0.0  ;;  %v3824_v12 = vadd.f32 %v3823_v32, %v3822_v1 }
 0xc66   :  { %v3843_v14 = vadd.f32 %v3842_v51, %v3841_v58 }
 0xc67   :  { %v3825_v48 = vrot.slane %v3824_v12, 2 }
 0xc68   :  { %v3844_v47 = vrot.slane %v3843_v14, 4 }
 0xc69   :  { %v3826_v60 = vadd.f32 %v3825_v48, %v3824_v12 }
 0xc6a   :  { %v3845_v59 = vadd.f32 %v3844_v47, %v3843_v14 }
 0xc6b   :  { %v3827_v18 = vrot.slane %v3826_v60, 1 }
 0xc6c   :  { %v3846_v42 = vrot.slane %v3845_v59, 2 }
 0xc6d   :  { %v3828_v5 = vadd.f32 %v3827_v18, %v3826_v60 }
 0xc6e   :  { %v3847_v35 = vadd.f32 %v3846_v42, %v3845_v59 }
 0xc6f   :  { %v3850_v61 = vadd.f32 1e-08, %v3828_v5 }
 0xc70   :  { %v3848_v10 = vrot.slane %v3847_v35, 1 }
 0xc71   :  { %5743 = vrcp.f32 %v3850_v61 }
 0xc72   :  { %v3849_v54 = vadd.f32 %v3848_v10, %v3847_v35 }
 0xc74   :  { %v3851_v2 = vadd.f32 1e-08, %v3849_v54 }
 0xc76   :  { %5745 = vrcp.f32 %v3851_v2 }
 0xc77   :  { %v5744_v55 = vpop.eup %5743 }
 0xc78   :  { %v9599_v29 = vmul.f32 %v5744_v55, %v9522_v0  ;;  %v9602_v20 = vmul.f32 %v5744_v55, %v9519_v40  ;;  %v9614_v0 = vmul.f32 %v5744_v55, %v9525_v8 }
 0xc7a   :  { %v3873_v44 = vsel %vm563_vm1, %v9599_v29, 0.0  ;;  %v3870_v7 = vsel %vm563_vm1, %v9602_v20, 0.0  ;;  %v3876_v3 = vsel %vm563_vm1, %v9614_v0, 0.0 }
 0xc7b   :  { %3874 = vadd.xlane.f32.xlu0 %v3873_v44  ;;  %3871 = vadd.xlane.f32.xlu2 %v3870_v7 }
 0xc7c   :  { %v5746_v41 = vpop.eup %5745 }
 0xc7d   :  { %v9609_v17 = vmul.f32 %v5746_v41, %v9548_v24  ;;  %v9617_v40 = vmul.f32 %v5746_v41, %v9537_v27  ;;  %v9624_v9 = vmul.f32 %v5746_v41, %v9545_v4  ;;  %v9629_v8 = vmul.f32 %v5746_v41, %v9554_v38 }
 0xc7e   :  { %v9632_v27 = vmul.f32 %v5744_v55, %v9528_v33  ;;  %v9639_v4 = vmul.f32 %v5744_v55, %v9542_v6  ;;  %v9644_v38 = vmul.f32 %v5744_v55, %v9551_v53  ;;  %v9647_v33 = vmul.f32 %v5746_v41, %v9561_v23 }
 0xc7f   :  { %v3894_v63 = vsel %vm563_vm1, %v9609_v17, 0.0  ;;  %v3897_v15 = vsel %vm563_vm1, %v9617_v40, 0.0  ;;  %v3900_v24 = vsel %vm563_vm1, %v9624_v9, 0.0  ;;  %v3903_v31 = vsel %vm563_vm1, %v9629_v8, 0.0 }
 0xc80   :  { %3895 = vadd.xlane.f32.xlu1 %v3894_v63  ;;  %v3879_v21 = vsel %vm563_vm1, %v9632_v27, 0.0  ;;  %v3882_v13 = vsel %vm563_vm1, %v9639_v4, 0.0  ;;  %v3885_v11 = vsel %vm563_vm1, %v9644_v38, 0.0  ;;  %v3906_v62 = vsel %vm563_vm1, %v9647_v33, 0.0 }
 0xc81   :  { %v9654_v6 = vmul.f32 %v5746_v41, %v9572_v28  ;;  %v9659_v53 = vmul.f32 %v5746_v41, %v9580_v25  ;;  %v9662_v23 = vmul.f32 %v5744_v55, %v9575_v45  ;;  %v9669_v28 = vmul.f32 %v5744_v55, %v9587_v36 }
 0xc82   :  { %v9674_v25 = vmul.f32 %v5746_v41, %v9594_v39 }
 0xc83   :  { %3877 = vadd.xlane.f32.xlu0 %v3876_v3  ;;  %3898 = vadd.xlane.f32.xlu2 %v3897_v15  ;;  %v3909_v34 = vsel %vm563_vm1, %v9654_v6, 0.0  ;;  %v3912_v43 = vsel %vm563_vm1, %v9659_v53, 0.0  ;;  %v3888_v49 = vsel %vm563_vm1, %v9662_v23, 0.0  ;;  %v3891_v52 = vsel %vm563_vm1, %v9669_v28, 0.0 }
 0xc84   :  { %v3915_v45 = vsel %vm563_vm1, %v9674_v25, 0.0 }
 0xc88   :  { %3901 = vadd.xlane.f32.xlu1 %v3900_v24 }
 0xc8b   :  { %3904 = vadd.xlane.f32.xlu0 %v3903_v31  ;;  %3880 = vadd.xlane.f32.xlu2 %v3879_v21 }
 0xc90   :  { %3883 = vadd.xlane.f32.xlu1 %v3882_v13 }
 0xc93   :  { %3886 = vadd.xlane.f32.xlu0 %v3885_v11  ;;  %3907 = vadd.xlane.f32.xlu2 %v3906_v62 }
 0xc98   :  { %3910 = vadd.xlane.f32.xlu1 %v3909_v34 }
 0xc9b   :  { %3913 = vadd.xlane.f32.xlu0 %v3912_v43  ;;  %3889 = vadd.xlane.f32.xlu2 %v3888_v49 }
 0xca0   :  { %3892 = vadd.xlane.f32.xlu1 %v3891_v52 }
 0xca3   :  { %3916 = vadd.xlane.f32.xlu2 %v3915_v45 }
 0xcee   :  { %v3875_v22 = vpop.xlane.xlu0 %3874  ;;  %v3872_v46 = vpop.xlane.xlu2 %3871 }
 0xcef   :  { %v3919_v37 = vadd.f32 1e-08, %v3875_v22  ;;  %v3918_v16 = vadd.f32 1e-08, %v3872_v46 }
 0xcf1   :  { %5747 = vrcp.f32 %v3919_v37 }
 0xcf2   :  { %5749 = vrcp.f32 %v3918_v16 }
 0xcf3   :  { %v3896_v19 = vpop.xlane.xlu1 %3895 }
 0xcf4   :  { %v3926_v51 = vadd.f32 1e-08, %v3896_v19 }
 0xcf6   :  { %v3878_v30 = vpop.xlane.xlu0 %3877  ;;  %v3899_v26 = vpop.xlane.xlu2 %3898 }
 0xcf7   :  { %v3920_v1 = vadd.f32 1e-08, %v3878_v30  ;;  %v3927_v39 = vadd.f32 1e-08, %v3899_v26  ;;  %v5748_v14 = vpop.eup %5747 }
 0xcf8   :  { %v5750_v59 = vpop.eup %5749  ;;  %v9682_v10 = vmul.f32 %v5748_v14, %v9599_v29 }
 0xcf9   :  { %5751 = vrcp.f32 %v3920_v1  ;;  %v9679_v35 = vmul.f32 %v5750_v59, %v9602_v20 }
 0xcfa   :  { %v3967_v29 = vsel %vm563_vm1, %v9682_v10, 0.0 }
 0xcfb   :  { %v3902_v36 = vpop.xlane.xlu1 %3901  ;;  %v3966_v15 = vsel %vm563_vm1, %v9679_v35, 0.0 }
 0xcfc   :  { %v3928_v12 = vadd.f32 1e-08, %v3902_v36  ;;  %v3968_v34 = vadd.f32 %v3967_v29, %v3966_v15 }
 0xcfe   :  { %v3905_v50 = vpop.xlane.xlu0 %3904  ;;  %v3881_v56 = vpop.xlane.xlu2 %3880 }
 0xcff   :  { %v3921_v57 = vadd.f32 1e-08, %v3881_v56  ;;  %v3929_v48 = vadd.f32 1e-08, %v3905_v50  ;;  %v5752_v42 = vpop.eup %5751 }
 0xd00   :  { %v9685_v44 = vmul.f32 %v5752_v42, %v9614_v0 }
 0xd01   :  { %5753 = vrcp.f32 %v3921_v57 }
 0xd02   :  { %5755 = vrcp.f32 %v3927_v39  ;;  %v3969_v13 = vsel %vm563_vm1, %v9685_v44, 0.0 }
 0xd03   :  { %v3884_v32 = vpop.xlane.xlu1 %3883  ;;  %v3970_v46 = vadd.f32 %v3969_v13, %v3968_v34 }
 0xd04   :  { %v3922_v58 = vadd.f32 1e-08, %v3884_v32 }
 0xd06   :  { %v3887_v47 = vpop.xlane.xlu0 %3886  ;;  %v3908_v60 = vpop.xlane.xlu2 %3907  ;;  %5757 = vrcp.f32 %v3922_v58 }
 0xd07   :  { %v3923_v18 = vadd.f32 1e-08, %v3887_v47  ;;  %5759 = vrcp.f32 %v3926_v51  ;;  %v3930_v5 = vadd.f32 1e-08, %v3908_v60  ;;  %v5754_v54 = vpop.eup %5753 }
 0xd08   :  { %5761 = vrcp.f32 %v3928_v12  ;;  %v5756_v55 = vpop.eup %5755  ;;  %v9688_v63 = vmul.f32 %v5754_v54, %v9632_v27 }
 0xd09   :  { %5763 = vrcp.f32 %v3929_v48  ;;  %v9697_v11 = vmul.f32 %v5756_v55, %v9617_v40 }
 0xd0a   :  { %5765 = vrcp.f32 %v3923_v18  ;;  %v3971_v49 = vsel %vm563_vm1, %v9688_v63, 0.0 }
 0xd0b   :  { %v3911_v61 = vpop.xlane.xlu1 %3910  ;;  %5767 = vrcp.f32 %v3930_v5  ;;  %v3988_v30 = vsel %vm563_vm1, %v9697_v11, 0.0  ;;  %v3972_v36 = vadd.f32 %v3971_v49, %v3970_v46 }
 0xd0c   :  { %v3931_v2 = vadd.f32 1e-08, %v3911_v61  ;;  %v5758_v7 = vpop.eup %5757 }
 0xd0d   :  { %v5760_v41 = vpop.eup %5759  ;;  %v9700_v27 = vmul.f32 %v5758_v7, %v9639_v4 }
 0xd0e   :  { %v3914_v20 = vpop.xlane.xlu0 %3913  ;;  %v3890_v3 = vpop.xlane.xlu2 %3889  ;;  %5769 = vrcp.f32 %v3931_v2  ;;  %v9708_v45 = vmul.f32 %v5760_v41, %v9609_v17 }
 0xd0f   :  { %v5762_v24 = vpop.eup %5761  ;;  %v3932_v31 = vadd.f32 1e-08, %v3914_v20  ;;  %v3924_v21 = vadd.f32 1e-08, %v3890_v3  ;;  %v3973_v19 = vsel %vm563_vm1, %v9700_v27, 0.0 }
 0xd10   :  { %v5764_v0 = vpop.eup %5763  ;;  %v9703_v43 = vmul.f32 %v5762_v24, %v9624_v9  ;;  %v3987_v16 = vsel %vm563_vm1, %v9708_v45, 0.0 }
 0xd11   :  { %v5766_v62 = vpop.eup %5765  ;;  %5771 = vrcp.f32 %v3932_v31  ;;  %v9711_v4 = vmul.f32 %v5764_v0, %v9629_v8  ;;  %v3989_v1 = vadd.f32 %v3988_v30, %v3987_v16 }
 0xd12   :  { %5773 = vrcp.f32 %v3924_v21  ;;  %v5768_v22 = vpop.eup %5767  ;;  %v9716_v9 = vmul.f32 %v5766_v62, %v9644_v38  ;;  %v3990_v17 = vsel %vm563_vm1, %v9703_v43, 0.0  ;;  %v3974_v38 = vadd.f32 %v3973_v19, %v3972_v36 }
 0xd13   :  { %v3893_v52 = vpop.xlane.xlu1 %3892  ;;  %v9723_v37 = vmul.f32 %v5768_v22, %v9647_v33  ;;  %v3992_v39 = vsel %vm563_vm1, %v9711_v4, 0.0  ;;  %v3991_v51 = vadd.f32 %v3990_v17, %v3989_v1 }
 0xd14   :  { %v3925_v40 = vadd.f32 1e-08, %v3893_v52  ;;  %v5770_v26 = vpop.eup %5769  ;;  %v3975_v32 = vsel %vm563_vm1, %v9716_v9, 0.0 }
 0xd15   :  { %v9732_v58 = vmul.f32 %v5770_v26, %v9654_v6  ;;  %v3994_v12 = vsel %vm563_vm1, %v9723_v37, 0.0  ;;  %v3976_v60 = vadd.f32 %v3975_v32, %v3974_v38  ;;  %v3993_v59 = vadd.f32 %v3992_v39, %v3991_v51 }
 0xd16   :  { %5775 = vrcp.f32 %v3925_v40  ;;  %v3917_v8 = vpop.xlane.xlu2 %3916 }
 0xd17   :  { %v5772_v50 = vpop.eup %5771  ;;  %v3933_v56 = vadd.f32 1e-08, %v3917_v8  ;;  %v3996_v6 = vsel %vm563_vm1, %v9732_v58, 0.0  ;;  %v3995_v42 = vadd.f32 %v3994_v12, %v3993_v59 }
 0xd18   :  { %v5774_v57 = vpop.eup %5773  ;;  %v9740_v14 = vmul.f32 %v5772_v50, %v9659_v53 }
 0xd19   :  { %v9735_v33 = vmul.f32 %v5774_v57, %v9662_v23  ;;  %5777 = vrcp.f32 %v3933_v56  ;;  %v3997_v2 = vadd.f32 %v3996_v6, %v3995_v42 }
 0xd1a   :  { %v3998_v5 = vsel %vm563_vm1, %v9740_v14, 0.0 }
 0xd1b   :  { %v3977_v47 = vsel %vm563_vm1, %v9735_v33, 0.0  ;;  %v3999_v41 = vadd.f32 %v3998_v5, %v3997_v2 }
 0xd1c   :  { %v5776_v48 = vpop.eup %5775  ;;  %v3978_v18 = vadd.f32 %v3977_v47, %v3976_v60 }
 0xd1d   :  { %v9747_v23 = vmul.f32 %v5776_v48, %v9669_v28 }
 0xd1f   :  { %v3979_v53 = vsel %vm563_vm1, %v9747_v23, 0.0  ;;  %v5778_v61 = vpop.eup %5777 }
 0xd20   :  { %v3980_v54 = vadd.f32 %v3979_v53, %v3978_v18  ;;  %v9754_v55 = vmul.f32 %v5778_v61, %v9674_v25 }
 0xd22   :  { %v3981_v7 = vrot.slane %v3980_v54, 4  ;;  %v4000_v28 = vsel %vm563_vm1, %v9754_v55, 0.0 }
 0xd23   :  { %v4001_v3 = vadd.f32 %v4000_v28, %v3999_v41 }
 0xd24   :  { %v3982_v20 = vadd.f32 %v3981_v7, %v3980_v54 }
 0xd25   :  { %v4002_v29 = vrot.slane %v4001_v3, 4 }
 0xd26   :  { %v3983_v15 = vrot.slane %v3982_v20, 2 }
 0xd27   :  { %v4003_v31 = vadd.f32 %v4002_v29, %v4001_v3 }
 0xd28   :  { %v3984_v24 = vadd.f32 %v3983_v15, %v3982_v20 }
 0xd29   :  { %v4004_v0 = vrot.slane %v4003_v31, 2 }
 0xd2a   :  { %v3985_v21 = vrot.slane %v3984_v24, 1 }
 0xd2b   :  { %v4005_v62 = vadd.f32 %v4004_v0, %v4003_v31 }
 0xd2c   :  { %v3986_v13 = vadd.f32 %v3985_v21, %v3984_v24 }
 0xd2d   :  { %v4006_v49 = vrot.slane %v4005_v62, 1 }
 0xd2e   :  { %v4008_v34 = vadd.f32 1e-08, %v3986_v13 }
 0xd2f   :  { %v4007_v25 = vadd.f32 %v4006_v49, %v4005_v62 }
 0xd30   :  { %5779 = vrcp.f32 %v4008_v34 }
 0xd31   :  { %v4009_v52 = vadd.f32 1e-08, %v4007_v25 }
 0xd33   :  { %5781 = vrcp.f32 %v4009_v52 }
 0xd36   :  { %v5780_v22 = vpop.eup %5779 }
 0xd37   :  { %v9759_v40 = vmul.f32 %v5780_v22, %v9682_v10  ;;  %v9762_v46 = vmul.f32 %v5780_v22, %v9679_v35  ;;  %v9774_v10 = vmul.f32 %v5780_v22, %v9685_v44 }
 0xd39   :  { %v4031_v19 = vsel %vm563_vm1, %v9759_v40, 0.0  ;;  %v4028_v30 = vsel %vm563_vm1, %v9762_v46, 0.0  ;;  %v5782_v26 = vpop.eup %5781  ;;  %v4034_v8 = vsel %vm563_vm1, %v9774_v10, 0.0 }
 0xd3a   :  { %4032 = vadd.xlane.f32.xlu1 %v4031_v19  ;;  %4029 = vadd.xlane.f32.xlu0 %v4028_v30  ;;  %v9769_v36 = vmul.f32 %v5782_v26, %v9708_v45  ;;  %v9777_v35 = vmul.f32 %v5782_v26, %v9697_v11  ;;  %v9784_v50 = vmul.f32 %v5782_v26, %v9703_v43 }
 0xd3b   :  { %v9789_v44 = vmul.f32 %v5782_v26, %v9711_v4  ;;  %v9792_v11 = vmul.f32 %v5780_v22, %v9688_v63  ;;  %v9799_v43 = vmul.f32 %v5780_v22, %v9700_v27  ;;  %v9804_v4 = vmul.f32 %v5780_v22, %v9716_v9 }
 0xd3c   :  { %v4052_v17 = vsel %vm563_vm1, %v9769_v36, 0.0  ;;  %v4055_v16 = vsel %vm563_vm1, %v9777_v35, 0.0  ;;  %v4058_v45 = vsel %vm563_vm1, %v9784_v50, 0.0  ;;  %v9807_v63 = vmul.f32 %v5782_v26, %v9723_v37 }
 0xd3d   :  { %4053 = vadd.xlane.f32.xlu2 %v4052_v17  ;;  %v4061_v56 = vsel %vm563_vm1, %v9789_v44, 0.0  ;;  %v4037_v38 = vsel %vm563_vm1, %v9792_v11, 0.0  ;;  %v4040_v1 = vsel %vm563_vm1, %v9799_v43, 0.0  ;;  %v4043_v57 = vsel %vm563_vm1, %v9804_v4, 0.0 }
 0xd3e   :  { %v4064_v39 = vsel %vm563_vm1, %v9807_v63, 0.0  ;;  %v9814_v27 = vmul.f32 %v5782_v26, %v9732_v58  ;;  %v9819_v9 = vmul.f32 %v5782_v26, %v9740_v14  ;;  %v9822_v37 = vmul.f32 %v5780_v22, %v9735_v33 }
 0xd3f   :  { %v9829_v58 = vmul.f32 %v5780_v22, %v9747_v23  ;;  %v9834_v14 = vmul.f32 %v5782_v26, %v9754_v55 }
 0xd40   :  { %v4067_v32 = vsel %vm563_vm1, %v9814_v27, 0.0  ;;  %v4070_v51 = vsel %vm563_vm1, %v9819_v9, 0.0  ;;  %v4046_v12 = vsel %vm563_vm1, %v9822_v37, 0.0 }
 0xd41   :  { %v4049_v48 = vsel %vm563_vm1, %v9829_v58, 0.0  ;;  %v4073_v33 = vsel %vm563_vm1, %v9834_v14, 0.0 }
 0xd42   :  { %4035 = vadd.xlane.f32.xlu1 %v4034_v8  ;;  %4056 = vadd.xlane.f32.xlu0 %v4055_v16 }
 0xd45   :  { %4059 = vadd.xlane.f32.xlu2 %v4058_v45 }
 0xd4a   :  { %4062 = vadd.xlane.f32.xlu1 %v4061_v56  ;;  %4038 = vadd.xlane.f32.xlu0 %v4037_v38 }
 0xd4d   :  { %4041 = vadd.xlane.f32.xlu2 %v4040_v1 }
 0xd52   :  { %4044 = vadd.xlane.f32.xlu1 %v4043_v57  ;;  %4065 = vadd.xlane.f32.xlu0 %v4064_v39 }
 0xd55   :  { %4068 = vadd.xlane.f32.xlu2 %v4067_v32 }
 0xd5a   :  { %4071 = vadd.xlane.f32.xlu1 %v4070_v51  ;;  %4047 = vadd.xlane.f32.xlu0 %v4046_v12 }
 0xd5d   :  { %4050 = vadd.xlane.f32.xlu2 %v4049_v48 }
 0xd62   :  { %4074 = vadd.xlane.f32.xlu0 %v4073_v33 }
 0xdad   :  { %v4033_v47 = vpop.xlane.xlu1 %4032  ;;  %v4030_v60 = vpop.xlane.xlu0 %4029 }
 0xdae   :  { %v4077_v42 = vadd.f32 1e-08, %v4033_v47  ;;  %v4076_v5 = vadd.f32 1e-08, %v4030_v60 }
 0xdb0   :  { %v4054_v59 = vpop.xlane.xlu2 %4053  ;;  %5783 = vrcp.f32 %v4077_v42 }
 0xdb1   :  { %5785 = vrcp.f32 %v4076_v5  ;;  %v4084_v55 = vadd.f32 1e-08, %v4054_v59 }
 0xdb5   :  { %v4036_v6 = vpop.xlane.xlu1 %4035  ;;  %v4057_v18 = vpop.xlane.xlu0 %4056 }
 0xdb6   :  { %v4078_v53 = vadd.f32 1e-08, %v4036_v6  ;;  %v4085_v41 = vadd.f32 1e-08, %v4057_v18  ;;  %v5784_v20 = vpop.eup %5783 }
 0xdb7   :  { %v5786_v15 = vpop.eup %5785  ;;  %v9842_v34 = vmul.f32 %v5784_v20, %v9759_v40 }
 0xdb8   :  { %v4060_v23 = vpop.xlane.xlu2 %4059  ;;  %5787 = vrcp.f32 %v4078_v53  ;;  %v9839_v13 = vmul.f32 %v5786_v15, %v9762_v46 }
 0xdb9   :  { %v4086_v3 = vadd.f32 1e-08, %v4060_v23  ;;  %v4125_v40 = vsel %vm563_vm1, %v9842_v34, 0.0 }
 0xdba   :  { %v4124_v46 = vsel %vm563_vm1, %v9839_v13, 0.0 }
 0xdbd   :  { %v4063_v61 = vpop.xlane.xlu1 %4062  ;;  %v4039_v54 = vpop.xlane.xlu0 %4038 }
 0xdbe   :  { %v4079_v2 = vadd.f32 1e-08, %v4039_v54  ;;  %v4087_v31 = vadd.f32 1e-08, %v4063_v61  ;;  %v5788_v0 = vpop.eup %5787 }
 0xdbf   :  { %v9845_v52 = vmul.f32 %v5788_v0, %v9774_v10 }
 0xdc0   :  { %v4042_v7 = vpop.xlane.xlu2 %4041  ;;  %5789 = vrcp.f32 %v4079_v2 }
 0xdc1   :  { %v4080_v28 = vadd.f32 1e-08, %v4042_v7  ;;  %5791 = vrcp.f32 %v4084_v55  ;;  %v4127_v10 = vsel %vm563_vm1, %v9845_v52, 0.0 }
 0xdc2   :  { %5793 = vrcp.f32 %v4085_v41 }
 0xdc3   :  { %5795 = vrcp.f32 %v4080_v28 }
 0xdc4   :  { %5797 = vrcp.f32 %v4086_v3 }
 0xdc5   :  { %v4045_v29 = vpop.xlane.xlu1 %4044  ;;  %v4066_v24 = vpop.xlane.xlu0 %4065 }
 0xdc6   :  { %v4081_v21 = vadd.f32 1e-08, %v4045_v29  ;;  %v4088_v62 = vadd.f32 1e-08, %v4066_v24  ;;  %v5790_v49 = vpop.eup %5789 }
 0xdc7   :  { %v5792_v19 = vpop.eup %5791  ;;  %v9848_v26 = vmul.f32 %v5790_v49, %v9792_v11  ;;  %v4126_v11 = vadd.f32 %v4125_v40, %v4124_v46 }
 0xdc8   :  { %5799 = vrcp.f32 %v4081_v21  ;;  %v4069_v25 = vpop.xlane.xlu2 %4068  ;;  %v5794_v30 = vpop.eup %5793  ;;  %v9868_v47 = vmul.f32 %v5792_v19, %v9769_v36 }
 0xdc9   :  { %5801 = vrcp.f32 %v4087_v31  ;;  %v4089_v22 = vadd.f32 1e-08, %v4069_v25  ;;  %v5796_v17 = vpop.eup %5795  ;;  %v9857_v39 = vmul.f32 %v5794_v30, %v9777_v35  ;;  %v4129_v32 = vsel %vm563_vm1, %v9848_v26, 0.0 }
 0xdca   :  { %5803 = vrcp.f32 %v4088_v62  ;;  %v5798_v45 = vpop.eup %5797  ;;  %v9862_v51 = vmul.f32 %v5796_v17, %v9799_v43  ;;  %v4128_v33 = vadd.f32 %v4127_v10, %v4126_v11 }
 0xdcb   :  { %5805 = vrcp.f32 %v4089_v22  ;;  %v9865_v12 = vmul.f32 %v5798_v45, %v9784_v50 }
 0xdcc   :  { %v4130_v43 = vadd.f32 %v4129_v32, %v4128_v33  ;;  %v4131_v50 = vsel %vm563_vm1, %v9862_v51, 0.0 }
 0xdcd   :  { %v4072_v8 = vpop.xlane.xlu1 %4071  ;;  %v4048_v16 = vpop.xlane.xlu0 %4047  ;;  %v4148_v23 = vsel %vm563_vm1, %v9865_v12, 0.0 }
 0xdce   :  { %v4090_v56 = vadd.f32 1e-08, %v4072_v8  ;;  %v4082_v38 = vadd.f32 1e-08, %v4048_v16  ;;  %v5800_v1 = vpop.eup %5799  ;;  %v4132_v7 = vadd.f32 %v4131_v50, %v4130_v43 }
 0xdcf   :  { %v5802_v57 = vpop.eup %5801  ;;  %v9871_v35 = vmul.f32 %v5800_v1, %v9804_v4  ;;  %v4145_v4 = vsel %vm563_vm1, %v9868_v47, 0.0 }
 0xdd0   :  { %5807 = vrcp.f32 %v4090_v56  ;;  %v4051_v48 = vpop.xlane.xlu2 %4050  ;;  %v5804_v60 = vpop.eup %5803  ;;  %v9874_v6 = vmul.f32 %v5802_v57, %v9789_v44  ;;  %v4146_v44 = vsel %vm563_vm1, %v9857_v39, 0.0 }
 0xdd1   :  { %5809 = vrcp.f32 %v4082_v38  ;;  %v4083_v59 = vadd.f32 1e-08, %v4051_v48  ;;  %v5806_v18 = vpop.eup %5805  ;;  %v9881_v36 = vmul.f32 %v5804_v60, %v9807_v63  ;;  %v4133_v53 = vsel %vm563_vm1, %v9871_v35, 0.0 }
 0xdd2   :  { %v4147_v54 = vadd.f32 %v4146_v44, %v4145_v4  ;;  %v4150_v55 = vsel %vm563_vm1, %v9874_v6, 0.0  ;;  %v9892_v63 = vmul.f32 %v5806_v18, %v9814_v27  ;;  %v4134_v15 = vadd.f32 %v4133_v53, %v4132_v7 }
 0xdd3   :  { %5811 = vrcp.f32 %v4083_v59  ;;  %v4152_v20 = vsel %vm563_vm1, %v9881_v36, 0.0 }
 0xdd4   :  { %v4149_v28 = vadd.f32 %v4148_v23, %v4147_v54  ;;  %v4154_v27 = vsel %vm563_vm1, %v9892_v63, 0.0 }
 0xdd5   :  { %v4075_v42 = vpop.xlane.xlu0 %4074 }
 0xdd6   :  { %v5808_v5 = vpop.eup %5807  ;;  %v4091_v61 = vadd.f32 1e-08, %v4075_v42  ;;  %v4151_v31 = vadd.f32 %v4150_v55, %v4149_v28 }
 0xdd7   :  { %v5810_v2 = vpop.eup %5809  ;;  %v9900_v3 = vmul.f32 %v5808_v5, %v9819_v9 }
 0xdd8   :  { %v9895_v41 = vmul.f32 %v5810_v2, %v9822_v37  ;;  %5813 = vrcp.f32 %v4091_v61  ;;  %v4153_v0 = vadd.f32 %v4152_v20, %v4151_v31 }
 0xdd9   :  { %v5812_v29 = vpop.eup %5811  ;;  %v4156_v62 = vsel %vm563_vm1, %v9900_v3, 0.0 }
 0xdda   :  { %v4135_v24 = vsel %vm563_vm1, %v9895_v41, 0.0  ;;  %v9907_v37 = vmul.f32 %v5812_v29, %v9829_v58  ;;  %v4155_v22 = vadd.f32 %v4154_v27, %v4153_v0 }
 0xddb   :  { %v4136_v21 = vadd.f32 %v4135_v24, %v4134_v15 }
 0xddc   :  { %v4137_v9 = vsel %vm563_vm1, %v9907_v37, 0.0  ;;  %v4157_v46 = vadd.f32 %v4156_v62, %v4155_v22 }
 0xddd   :  { %v4138_v25 = vadd.f32 %v4137_v9, %v4136_v21 }
 0xdde   :  { %v5814_v49 = vpop.eup %5813 }
 0xddf   :  { %v9914_v19 = vmul.f32 %v5814_v49, %v9834_v14  ;;  %v4139_v30 = vrot.slane %v4138_v25, 4 }
 0xde1   :  { %v4158_v58 = vsel %vm563_vm1, %v9914_v19, 0.0  ;;  %v4140_v40 = vadd.f32 %v4139_v30, %v4138_v25 }
 0xde2   :  { %v4159_v17 = vadd.f32 %v4158_v58, %v4157_v46 }
 0xde3   :  { %v4141_v8 = vrot.slane %v4140_v40, 2 }
 0xde4   :  { %v4160_v16 = vrot.slane %v4159_v17, 4 }
 0xde5   :  { %v4142_v45 = vadd.f32 %v4141_v8, %v4140_v40 }
 0xde6   :  { %v4161_v10 = vadd.f32 %v4160_v16, %v4159_v17 }
 0xde7   :  { %v4143_v56 = vrot.slane %v4142_v45, 1 }
 0xde8   :  { %v4162_v38 = vrot.slane %v4161_v10, 2 }
 0xde9   :  { %v4144_v1 = vadd.f32 %v4143_v56, %v4142_v45 }
 0xdea   :  { %v4163_v11 = vadd.f32 %v4162_v38, %v4161_v10 }
 0xdeb   :  { %v4166_v57 = vadd.f32 1e-08, %v4144_v1 }
 0xdec   :  { %v4164_v32 = vrot.slane %v4163_v11, 1 }
 0xded   :  { %5815 = vrcp.f32 %v4166_v57 }
 0xdee   :  { %v4165_v14 = vadd.f32 %v4164_v32, %v4163_v11 }
 0xdf0   :  { %v4167_v48 = vadd.f32 1e-08, %v4165_v14 }
 0xdf2   :  { %5817 = vrcp.f32 %v4167_v48 }
 0xdf3   :  { %v5816_v33 = vpop.eup %5815 }
 0xdf4   :  { %v9919_v60 = vmul.f32 %v5816_v33, %v9842_v34  ;;  %v9922_v59 = vmul.f32 %v5816_v33, %v9839_v13  ;;  %v9934_v34 = vmul.f32 %v5816_v33, %v9845_v52 }
 0xdf6   :  { %v4189_v43 = vsel %vm563_vm1, %v9919_v60, 0.0  ;;  %v4186_v18 = vsel %vm563_vm1, %v9922_v59, 0.0  ;;  %v4192_v4 = vsel %vm563_vm1, %v9934_v34, 0.0 }
 0xdf7   :  { %4190 = vadd.xlane.f32.xlu2 %v4189_v43  ;;  %4187 = vadd.xlane.f32.xlu1 %v4186_v18 }
 0xdf8   :  { %v5818_v50 = vpop.eup %5817 }
 0xdf9   :  { %v9929_v23 = vmul.f32 %v5818_v50, %v9868_v47  ;;  %v9937_v13 = vmul.f32 %v5818_v50, %v9857_v39  ;;  %v9944_v5 = vmul.f32 %v5818_v50, %v9865_v12  ;;  %v9949_v52 = vmul.f32 %v5818_v50, %v9874_v6 }
 0xdfa   :  { %v9952_v39 = vmul.f32 %v5816_v33, %v9848_v26  ;;  %v9959_v12 = vmul.f32 %v5816_v33, %v9862_v51  ;;  %v9964_v6 = vmul.f32 %v5816_v33, %v9871_v35  ;;  %v9967_v26 = vmul.f32 %v5818_v50, %v9881_v36 }
 0xdfb   :  { %v4210_v42 = vsel %vm563_vm1, %v9929_v23, 0.0  ;;  %v4213_v44 = vsel %vm563_vm1, %v9937_v13, 0.0  ;;  %v4216_v47 = vsel %vm563_vm1, %v9944_v5, 0.0  ;;  %v4219_v53 = vsel %vm563_vm1, %v9949_v52, 0.0 }
 0xdfc   :  { %4211 = vadd.xlane.f32.xlu0 %v4210_v42  ;;  %v4195_v61 = vsel %vm563_vm1, %v9952_v39, 0.0  ;;  %v4198_v54 = vsel %vm563_vm1, %v9959_v12, 0.0  ;;  %v4201_v2 = vsel %vm563_vm1, %v9964_v6, 0.0  ;;  %v4222_v55 = vsel %vm563_vm1, %v9967_v26, 0.0 }
 0xdfd   :  { %v9974_v51 = vmul.f32 %v5818_v50, %v9892_v63  ;;  %v9979_v35 = vmul.f32 %v5818_v50, %v9900_v3  ;;  %v9982_v36 = vmul.f32 %v5816_v33, %v9895_v41  ;;  %v9989_v63 = vmul.f32 %v5816_v33, %v9907_v37 }
 0xdfe   :  { %v9994_v3 = vmul.f32 %v5818_v50, %v9914_v19 }
 0xdff   :  { %4193 = vadd.xlane.f32.xlu2 %v4192_v4  ;;  %4214 = vadd.xlane.f32.xlu1 %v4213_v44  ;;  %v4225_v7 = vsel %vm563_vm1, %v9974_v51, 0.0  ;;  %v4228_v28 = vsel %vm563_vm1, %v9979_v35, 0.0  ;;  %v4204_v20 = vsel %vm563_vm1, %v9982_v36, 0.0  ;;  %v4207_v15 = vsel %vm563_vm1, %v9989_v63, 0.0 }
 0xe00   :  { %v4231_v41 = vsel %vm563_vm1, %v9994_v3, 0.0 }
 0xe04   :  { %4217 = vadd.xlane.f32.xlu0 %v4216_v47 }
 0xe07   :  { %4220 = vadd.xlane.f32.xlu2 %v4219_v53  ;;  %4196 = vadd.xlane.f32.xlu1 %v4195_v61 }
 0xe0c   :  { %4199 = vadd.xlane.f32.xlu0 %v4198_v54 }
 0xe0f   :  { %4202 = vadd.xlane.f32.xlu2 %v4201_v2  ;;  %4223 = vadd.xlane.f32.xlu1 %v4222_v55 }
 0xe14   :  { %4226 = vadd.xlane.f32.xlu0 %v4225_v7 }
 0xe17   :  { %4229 = vadd.xlane.f32.xlu2 %v4228_v28  ;;  %4205 = vadd.xlane.f32.xlu1 %v4204_v20 }
 0xe1c   :  { %4208 = vadd.xlane.f32.xlu0 %v4207_v15 }
 0xe1f   :  { %4232 = vadd.xlane.f32.xlu1 %v4231_v41 }
 0xe6a   :  { %v4191_v29 = vpop.xlane.xlu2 %4190  ;;  %v4188_v24 = vpop.xlane.xlu1 %4187 }
 0xe6b   :  { %v4235_v0 = vadd.f32 1e-08, %v4191_v29  ;;  %v4234_v62 = vadd.f32 1e-08, %v4188_v24 }
 0xe6d   :  { %5819 = vrcp.f32 %v4235_v0 }
 0xe6e   :  { %5821 = vrcp.f32 %v4234_v62 }
 0xe6f   :  { %v4212_v31 = vpop.xlane.xlu0 %4211 }
 0xe70   :  { %v4242_v58 = vadd.f32 1e-08, %v4212_v31 }
 0xe72   :  { %v4194_v27 = vpop.xlane.xlu2 %4193  ;;  %v4215_v21 = vpop.xlane.xlu1 %4214 }
 0xe73   :  { %v4236_v25 = vadd.f32 1e-08, %v4194_v27  ;;  %v4243_v19 = vadd.f32 1e-08, %v4215_v21  ;;  %v5820_v17 = vpop.eup %5819 }
 0xe74   :  { %v5822_v10 = vpop.eup %5821  ;;  %v10002_v32 = vmul.f32 %v5820_v17, %v9919_v60 }
 0xe75   :  { %5823 = vrcp.f32 %v4236_v25  ;;  %v9999_v11 = vmul.f32 %v5822_v10, %v9922_v59 }
 0xe76   :  { %v4283_v60 = vsel %vm563_vm1, %v10002_v32, 0.0 }
 0xe77   :  { %v4218_v37 = vpop.xlane.xlu0 %4217  ;;  %v4282_v44 = vsel %vm563_vm1, %v9999_v11, 0.0 }
 0xe78   :  { %v4244_v40 = vadd.f32 1e-08, %v4218_v37  ;;  %v4284_v7 = vadd.f32 %v4283_v60, %v4282_v44 }
 0xe7a   :  { %v4221_v9 = vpop.xlane.xlu2 %4220  ;;  %v4197_v49 = vpop.xlane.xlu1 %4196 }
 0xe7b   :  { %v4237_v22 = vadd.f32 1e-08, %v4197_v49  ;;  %v4245_v8 = vadd.f32 1e-08, %v4221_v9  ;;  %v5824_v38 = vpop.eup %5823 }
 0xe7c   :  { %v10005_v43 = vmul.f32 %v5824_v38, %v9934_v34 }
 0xe7d   :  { %5825 = vrcp.f32 %v4237_v22 }
 0xe7e   :  { %5827 = vrcp.f32 %v4243_v19  ;;  %v4285_v54 = vsel %vm563_vm1, %v10005_v43, 0.0 }
 0xe7f   :  { %v4200_v30 = vpop.xlane.xlu0 %4199  ;;  %v4286_v24 = vadd.f32 %v4285_v54, %v4284_v7 }
 0xe80   :  { %v4238_v46 = vadd.f32 1e-08, %v4200_v30 }
 0xe82   :  { %v4203_v16 = vpop.xlane.xlu2 %4202  ;;  %v4224_v45 = vpop.xlane.xlu1 %4223  ;;  %5829 = vrcp.f32 %v4238_v46 }
 0xe83   :  { %v4239_v56 = vadd.f32 1e-08, %v4203_v16  ;;  %5831 = vrcp.f32 %v4242_v58  ;;  %v4246_v1 = vadd.f32 1e-08, %v4224_v45  ;;  %v5826_v14 = vpop.eup %5825 }
 0xe84   :  { %5833 = vrcp.f32 %v4244_v40  ;;  %v5828_v33 = vpop.eup %5827  ;;  %v10008_v42 = vmul.f32 %v5826_v14, %v9952_v39 }
 0xe85   :  { %5835 = vrcp.f32 %v4245_v8  ;;  %v10017_v2 = vmul.f32 %v5828_v33, %v9937_v13 }
 0xe86   :  { %5837 = vrcp.f32 %v4239_v56  ;;  %v4287_v20 = vsel %vm563_vm1, %v10008_v42, 0.0 }
 0xe87   :  { %v4227_v57 = vpop.xlane.xlu0 %4226  ;;  %5839 = vrcp.f32 %v4246_v1  ;;  %v4304_v27 = vsel %vm563_vm1, %v10017_v2, 0.0  ;;  %v4288_v37 = vadd.f32 %v4287_v20, %v4286_v24 }
 0xe88   :  { %v4247_v48 = vadd.f32 1e-08, %v4227_v57  ;;  %v5830_v18 = vpop.eup %5829 }
 0xe89   :  { %v5832_v50 = vpop.eup %5831  ;;  %v10020_v39 = vmul.f32 %v5830_v18, %v9959_v12 }
 0xe8a   :  { %v4230_v59 = vpop.xlane.xlu2 %4229  ;;  %v4206_v4 = vpop.xlane.xlu1 %4205  ;;  %5841 = vrcp.f32 %v4247_v48  ;;  %v10028_v41 = vmul.f32 %v5832_v50, %v9929_v23 }
 0xe8b   :  { %v5834_v47 = vpop.eup %5833  ;;  %v4248_v53 = vadd.f32 1e-08, %v4230_v59  ;;  %v4240_v61 = vadd.f32 1e-08, %v4206_v4  ;;  %v4289_v31 = vsel %vm563_vm1, %v10020_v39, 0.0 }
 0xe8c   :  { %v5836_v34 = vpop.eup %5835  ;;  %v10023_v28 = vmul.f32 %v5834_v47, %v9944_v5  ;;  %v4303_v62 = vsel %vm563_vm1, %v10028_v41, 0.0 }
 0xe8d   :  { %v5838_v55 = vpop.eup %5837  ;;  %5843 = vrcp.f32 %v4248_v53  ;;  %v10031_v12 = vmul.f32 %v5836_v34, %v9949_v52  ;;  %v4305_v25 = vadd.f32 %v4304_v27, %v4303_v62 }
 0xe8e   :  { %5845 = vrcp.f32 %v4240_v61  ;;  %v5840_v29 = vpop.eup %5839  ;;  %v10036_v5 = vmul.f32 %v5838_v55, %v9964_v6  ;;  %v4306_v23 = vsel %vm563_vm1, %v10023_v28, 0.0  ;;  %v4290_v6 = vadd.f32 %v4289_v31, %v4288_v37 }
 0xe8f   :  { %v4209_v15 = vpop.xlane.xlu0 %4208  ;;  %v10043_v0 = vmul.f32 %v5840_v29, %v9967_v26  ;;  %v4308_v19 = vsel %vm563_vm1, %v10031_v12, 0.0  ;;  %v4307_v58 = vadd.f32 %v4306_v23, %v4305_v25 }
 0xe90   :  { %v4241_v13 = vadd.f32 1e-08, %v4209_v15  ;;  %v5842_v21 = vpop.eup %5841  ;;  %v4291_v30 = vsel %vm563_vm1, %v10036_v5, 0.0 }
 0xe91   :  { %v10052_v46 = vmul.f32 %v5842_v21, %v9974_v51  ;;  %v4310_v40 = vsel %vm563_vm1, %v10043_v0, 0.0  ;;  %v4292_v45 = vadd.f32 %v4291_v30, %v4290_v6  ;;  %v4309_v10 = vadd.f32 %v4308_v19, %v4307_v58 }
 0xe92   :  { %5847 = vrcp.f32 %v4241_v13  ;;  %v4233_v52 = vpop.xlane.xlu1 %4232 }
 0xe93   :  { %v5844_v9 = vpop.eup %5843  ;;  %v4249_v49 = vadd.f32 1e-08, %v4233_v52  ;;  %v4312_v51 = vsel %vm563_vm1, %v10052_v46, 0.0  ;;  %v4311_v38 = vadd.f32 %v4310_v40, %v4309_v10 }
 0xe94   :  { %v5846_v22 = vpop.eup %5845  ;;  %v10060_v17 = vmul.f32 %v5844_v9, %v9979_v35 }
 0xe95   :  { %v10055_v26 = vmul.f32 %v5846_v22, %v9982_v36  ;;  %5849 = vrcp.f32 %v4249_v49  ;;  %v4313_v48 = vadd.f32 %v4312_v51, %v4311_v38 }
 0xe96   :  { %v4314_v1 = vsel %vm563_vm1, %v10060_v17, 0.0 }
 0xe97   :  { %v4293_v16 = vsel %vm563_vm1, %v10055_v26, 0.0  ;;  %v4315_v50 = vadd.f32 %v4314_v1, %v4313_v48 }
 0xe98   :  { %v5848_v8 = vpop.eup %5847  ;;  %v4294_v56 = vadd.f32 %v4293_v16, %v4292_v45 }
 0xe99   :  { %v10067_v36 = vmul.f32 %v5848_v8, %v9989_v63 }
 0xe9b   :  { %v4295_v35 = vsel %vm563_vm1, %v10067_v36, 0.0  ;;  %v5850_v57 = vpop.eup %5849 }
 0xe9c   :  { %v4296_v14 = vadd.f32 %v4295_v35, %v4294_v56  ;;  %v10074_v33 = vmul.f32 %v5850_v57, %v9994_v3 }
 0xe9e   :  { %v4297_v18 = vrot.slane %v4296_v14, 4  ;;  %v4316_v63 = vsel %vm563_vm1, %v10074_v33, 0.0 }
 0xe9f   :  { %v4317_v4 = vadd.f32 %v4316_v63, %v4315_v50 }
 0xea0   :  { %v4298_v59 = vadd.f32 %v4297_v18, %v4296_v14 }
 0xea1   :  { %v4318_v60 = vrot.slane %v4317_v4, 4 }
 0xea2   :  { %v4299_v44 = vrot.slane %v4298_v59, 2 }
 0xea3   :  { %v4319_v53 = vadd.f32 %v4318_v60, %v4317_v4 }
 0xea4   :  { %v4300_v47 = vadd.f32 %v4299_v44, %v4298_v59 }
 0xea5   :  { %v4320_v34 = vrot.slane %v4319_v53, 2 }
 0xea6   :  { %v4301_v61 = vrot.slane %v4300_v47, 1 }
 0xea7   :  { %v4321_v55 = vadd.f32 %v4320_v34, %v4319_v53 }
 0xea8   :  { %v4302_v54 = vadd.f32 %v4301_v61, %v4300_v47 }
 0xea9   :  { %v4322_v20 = vrot.slane %v4321_v55, 1 }
 0xeaa   :  { %v4324_v7 = vadd.f32 1e-08, %v4302_v54 }
 0xeab   :  { %v4323_v3 = vadd.f32 %v4322_v20, %v4321_v55 }
 0xeac   :  { %5851 = vrcp.f32 %v4324_v7 }
 0xead   :  { %v4325_v15 = vadd.f32 1e-08, %v4323_v3 }
 0xeaf   :  { %5853 = vrcp.f32 %v4325_v15 }
 0xeb2   :  { %v5852_v29 = vpop.eup %5851 }
 0xeb3   :  { %v10079_v13 = vmul.f32 %v5852_v29, %v10002_v32  ;;  %v10082_v24 = vmul.f32 %v5852_v29, %v9999_v11  ;;  %v10094_v32 = vmul.f32 %v5852_v29, %v10005_v43 }
 0xeb5   :  { %v4347_v31 = vsel %vm563_vm1, %v10079_v13, 0.0  ;;  %v4344_v27 = vsel %vm563_vm1, %v10082_v24, 0.0  ;;  %v5854_v21 = vpop.eup %5853  ;;  %v4350_v52 = vsel %vm563_vm1, %v10094_v32, 0.0 }
 0xeb6   :  { %4348 = vadd.xlane.f32.xlu0 %v4347_v31  ;;  %4345 = vadd.xlane.f32.xlu2 %v4344_v27  ;;  %v10089_v37 = vmul.f32 %v5854_v21, %v10028_v41  ;;  %v10097_v11 = vmul.f32 %v5854_v21, %v10017_v2  ;;  %v10104_v9 = vmul.f32 %v5854_v21, %v10023_v28 }
 0xeb7   :  { %v10109_v43 = vmul.f32 %v5854_v21, %v10031_v12  ;;  %v10112_v2 = vmul.f32 %v5852_v29, %v10008_v42  ;;  %v10119_v28 = vmul.f32 %v5852_v29, %v10020_v39  ;;  %v10124_v12 = vmul.f32 %v5852_v29, %v10036_v5 }
 0xeb8   :  { %v4368_v23 = vsel %vm563_vm1, %v10089_v37, 0.0  ;;  %v4371_v62 = vsel %vm563_vm1, %v10097_v11, 0.0  ;;  %v4374_v41 = vsel %vm563_vm1, %v10104_v9, 0.0  ;;  %v10127_v42 = vmul.f32 %v5854_v21, %v10043_v0 }
 0xeb9   :  { %4369 = vadd.xlane.f32.xlu1 %v4368_v23  ;;  %v4377_v49 = vsel %vm563_vm1, %v10109_v43, 0.0  ;;  %v4353_v6 = vsel %vm563_vm1, %v10112_v2, 0.0  ;;  %v4356_v25 = vsel %vm563_vm1, %v10119_v28, 0.0  ;;  %v4359_v22 = vsel %vm563_vm1, %v10124_v12, 0.0 }
 0xeba   :  { %v4380_v19 = vsel %vm563_vm1, %v10127_v42, 0.0  ;;  %v10134_v39 = vmul.f32 %v5854_v21, %v10052_v46  ;;  %v10139_v5 = vmul.f32 %v5854_v21, %v10060_v17  ;;  %v10142_v0 = vmul.f32 %v5852_v29, %v10055_v26 }
 0xebb   :  { %v10149_v46 = vmul.f32 %v5852_v29, %v10067_v36  ;;  %v10154_v17 = vmul.f32 %v5854_v21, %v10074_v33 }
 0xebc   :  { %v4383_v30 = vsel %vm563_vm1, %v10134_v39, 0.0  ;;  %v4386_v58 = vsel %vm563_vm1, %v10139_v5, 0.0  ;;  %v4362_v40 = vsel %vm563_vm1, %v10142_v0, 0.0 }
 0xebd   :  { %v4365_v8 = vsel %vm563_vm1, %v10149_v46, 0.0  ;;  %v4389_v26 = vsel %vm563_vm1, %v10154_v17, 0.0 }
 0xebe   :  { %4351 = vadd.xlane.f32.xlu0 %v4350_v52  ;;  %4372 = vadd.xlane.f32.xlu2 %v4371_v62 }
 0xec1   :  { %4375 = vadd.xlane.f32.xlu1 %v4374_v41 }
 0xec6   :  { %4378 = vadd.xlane.f32.xlu0 %v4377_v49  ;;  %4354 = vadd.xlane.f32.xlu2 %v4353_v6 }
 0xec9   :  { %4357 = vadd.xlane.f32.xlu1 %v4356_v25 }
 0xece   :  { %4360 = vadd.xlane.f32.xlu0 %v4359_v22  ;;  %4381 = vadd.xlane.f32.xlu2 %v4380_v19 }
 0xed1   :  { %4384 = vadd.xlane.f32.xlu1 %v4383_v30 }
 0xed6   :  { %4387 = vadd.xlane.f32.xlu0 %v4386_v58  ;;  %4363 = vadd.xlane.f32.xlu2 %v4362_v40 }
 0xed9   :  { %4366 = vadd.xlane.f32.xlu1 %v4365_v8 }
 0xede   :  { %4390 = vadd.xlane.f32.xlu2 %v4389_v26 }
 0xf29   :  { %v4349_v16 = vpop.xlane.xlu0 %4348  ;;  %v4346_v45 = vpop.xlane.xlu2 %4345 }
 0xf2a   :  { %v4393_v38 = vadd.f32 1e-08, %v4349_v16  ;;  %v4392_v1 = vadd.f32 1e-08, %v4346_v45 }
 0xf2c   :  { %v4370_v10 = vpop.xlane.xlu1 %4369  ;;  %5855 = vrcp.f32 %v4393_v38 }
 0xf2d   :  { %5857 = vrcp.f32 %v4392_v1  ;;  %v4400_v33 = vadd.f32 1e-08, %v4370_v10 }
 0xf31   :  { %v4352_v51 = vpop.xlane.xlu0 %4351  ;;  %v4373_v56 = vpop.xlane.xlu2 %4372 }
 0xf32   :  { %v4394_v35 = vadd.f32 1e-08, %v4352_v51  ;;  %v4401_v50 = vadd.f32 1e-08, %v4373_v56  ;;  %v5856_v59 = vpop.eup %5855 }
 0xf33   :  { %v5858_v44 = vpop.eup %5857  ;;  %v10162_v7 = vmul.f32 %v5856_v59, %v10079_v13 }
 0xf34   :  { %v4376_v36 = vpop.xlane.xlu1 %4375  ;;  %5859 = vrcp.f32 %v4394_v35  ;;  %v10159_v54 = vmul.f32 %v5858_v44, %v10082_v24 }
 0xf35   :  { %v4402_v4 = vadd.f32 1e-08, %v4376_v36  ;;  %v4441_v13 = vsel %vm563_vm1, %v10162_v7, 0.0 }
 0xf36   :  { %v4440_v24 = vsel %vm563_vm1, %v10159_v54, 0.0 }
 0xf39   :  { %v4379_v57 = vpop.xlane.xlu0 %4378  ;;  %v4355_v14 = vpop.xlane.xlu2 %4354 }
 0xf3a   :  { %v4395_v48 = vadd.f32 1e-08, %v4355_v14  ;;  %v4403_v53 = vadd.f32 1e-08, %v4379_v57  ;;  %v5860_v34 = vpop.eup %5859 }
 0xf3b   :  { %v10165_v15 = vmul.f32 %v5860_v34, %v10094_v32 }
 0xf3c   :  { %v4358_v18 = vpop.xlane.xlu1 %4357  ;;  %5861 = vrcp.f32 %v4395_v48 }
 0xf3d   :  { %v4396_v63 = vadd.f32 1e-08, %v4358_v18  ;;  %5863 = vrcp.f32 %v4400_v33  ;;  %v4443_v32 = vsel %vm563_vm1, %v10165_v15, 0.0 }
 0xf3e   :  { %5865 = vrcp.f32 %v4401_v50 }
 0xf3f   :  { %5867 = vrcp.f32 %v4396_v63 }
 0xf40   :  { %5869 = vrcp.f32 %v4402_v4 }
 0xf41   :  { %v4361_v60 = vpop.xlane.xlu0 %4360  ;;  %v4382_v47 = vpop.xlane.xlu2 %4381 }
 0xf42   :  { %v4397_v61 = vadd.f32 1e-08, %v4361_v60  ;;  %v4404_v55 = vadd.f32 1e-08, %v4382_v47  ;;  %v5862_v20 = vpop.eup %5861 }
 0xf43   :  { %v5864_v31 = vpop.eup %5863  ;;  %v10168_v21 = vmul.f32 %v5862_v20, %v10112_v2  ;;  %v4442_v2 = vadd.f32 %v4441_v13, %v4440_v24 }
 0xf44   :  { %5871 = vrcp.f32 %v4397_v61  ;;  %v4385_v3 = vpop.xlane.xlu1 %4384  ;;  %v5866_v27 = vpop.eup %5865  ;;  %v10188_v16 = vmul.f32 %v5864_v31, %v10089_v37 }
 0xf45   :  { %5873 = vrcp.f32 %v4403_v53  ;;  %v4405_v29 = vadd.f32 1e-08, %v4385_v3  ;;  %v5868_v23 = vpop.eup %5867  ;;  %v10177_v19 = vmul.f32 %v5866_v27, %v10097_v11  ;;  %v4445_v30 = vsel %vm563_vm1, %v10168_v21, 0.0 }
 0xf46   :  { %5875 = vrcp.f32 %v4404_v55  ;;  %v5870_v41 = vpop.eup %5869  ;;  %v10182_v58 = vmul.f32 %v5868_v23, %v10119_v28  ;;  %v4444_v26 = vadd.f32 %v4443_v32, %v4442_v2 }
 0xf47   :  { %5877 = vrcp.f32 %v4405_v29  ;;  %v10185_v40 = vmul.f32 %v5870_v41, %v10104_v9 }
 0xf48   :  { %v4446_v28 = vadd.f32 %v4445_v30, %v4444_v26  ;;  %v4447_v9 = vsel %vm563_vm1, %v10182_v58, 0.0 }
 0xf49   :  { %v4388_v52 = vpop.xlane.xlu0 %4387  ;;  %v4364_v62 = vpop.xlane.xlu2 %4363  ;;  %v4464_v36 = vsel %vm563_vm1, %v10185_v40, 0.0 }
 0xf4a   :  { %v4406_v49 = vadd.f32 1e-08, %v4388_v52  ;;  %v4398_v6 = vadd.f32 1e-08, %v4364_v62  ;;  %v5872_v25 = vpop.eup %5871  ;;  %v4448_v18 = vadd.f32 %v4447_v9, %v4446_v28 }
 0xf4b   :  { %v5874_v22 = vpop.eup %5873  ;;  %v10191_v11 = vmul.f32 %v5872_v25, %v10124_v12  ;;  %v4461_v12 = vsel %vm563_vm1, %v10188_v16, 0.0 }
 0xf4c   :  { %5879 = vrcp.f32 %v4406_v49  ;;  %v4367_v8 = vpop.xlane.xlu1 %4366  ;;  %v5876_v45 = vpop.eup %5875  ;;  %v10194_v51 = vmul.f32 %v5874_v22, %v10109_v43  ;;  %v4462_v43 = vsel %vm563_vm1, %v10177_v19, 0.0 }
 0xf4d   :  { %5881 = vrcp.f32 %v4398_v6  ;;  %v4399_v10 = vadd.f32 1e-08, %v4367_v8  ;;  %v5878_v56 = vpop.eup %5877  ;;  %v10201_v37 = vmul.f32 %v5876_v45, %v10127_v42  ;;  %v4449_v35 = vsel %vm563_vm1, %v10191_v11, 0.0 }
 0xf4e   :  { %v4463_v14 = vadd.f32 %v4462_v43, %v4461_v12  ;;  %v4466_v33 = vsel %vm563_vm1, %v10194_v51, 0.0  ;;  %v10212_v42 = vmul.f32 %v5878_v56, %v10134_v39  ;;  %v4450_v44 = vadd.f32 %v4449_v35, %v4448_v18 }
 0xf4f   :  { %5883 = vrcp.f32 %v4399_v10  ;;  %v4468_v59 = vsel %vm563_vm1, %v10201_v37, 0.0 }
 0xf50   :  { %v4465_v63 = vadd.f32 %v4464_v36, %v4463_v14  ;;  %v4470_v39 = vsel %vm563_vm1, %v10212_v42, 0.0 }
 0xf51   :  { %v4391_v38 = vpop.xlane.xlu2 %4390 }
 0xf52   :  { %v5880_v1 = vpop.eup %5879  ;;  %v4407_v57 = vadd.f32 1e-08, %v4391_v38  ;;  %v4467_v53 = vadd.f32 %v4466_v33, %v4465_v63 }
 0xf53   :  { %v5882_v48 = vpop.eup %5881  ;;  %v10220_v4 = vmul.f32 %v5880_v1, %v10139_v5 }
 0xf54   :  { %v10215_v50 = vmul.f32 %v5882_v48, %v10142_v0  ;;  %5885 = vrcp.f32 %v4407_v57  ;;  %v4469_v34 = vadd.f32 %v4468_v59, %v4467_v53 }
 0xf55   :  { %v5884_v60 = vpop.eup %5883  ;;  %v4472_v55 = vsel %vm563_vm1, %v10220_v4, 0.0 }
 0xf56   :  { %v4451_v47 = vsel %vm563_vm1, %v10215_v50, 0.0  ;;  %v10227_v0 = vmul.f32 %v5884_v60, %v10149_v46  ;;  %v4471_v29 = vadd.f32 %v4470_v39, %v4469_v34 }
 0xf57   :  { %v4452_v61 = vadd.f32 %v4451_v47, %v4450_v44 }
 0xf58   :  { %v4453_v5 = vsel %vm563_vm1, %v10227_v0, 0.0  ;;  %v4473_v24 = vadd.f32 %v4472_v55, %v4471_v29 }
 0xf59   :  { %v4454_v3 = vadd.f32 %v4453_v5, %v4452_v61 }
 0xf5a   :  { %v5886_v20 = vpop.eup %5885 }
 0xf5b   :  { %v10234_v31 = vmul.f32 %v5886_v20, %v10154_v17  ;;  %v4455_v27 = vrot.slane %v4454_v3, 4 }
 0xf5d   :  { %v4474_v46 = vsel %vm563_vm1, %v10234_v31, 0.0  ;;  %v4456_v13 = vadd.f32 %v4455_v27, %v4454_v3 }
 0xf5e   :  { %v4475_v23 = vadd.f32 %v4474_v46, %v4473_v24 }
 0xf5f   :  { %v4457_v52 = vrot.slane %v4456_v13, 2 }
 0xf60   :  { %v4476_v62 = vrot.slane %v4475_v23, 4 }
 0xf61   :  { %v4458_v41 = vadd.f32 %v4457_v52, %v4456_v13 }
 0xf62   :  { %v4477_v32 = vadd.f32 %v4476_v62, %v4475_v23 }
 0xf63   :  { %v4459_v49 = vrot.slane %v4458_v41, 1 }
 0xf64   :  { %v4478_v6 = vrot.slane %v4477_v32, 2 }
 0xf65   :  { %v4460_v25 = vadd.f32 %v4459_v49, %v4458_v41 }
 0xf66   :  { %v4479_v2 = vadd.f32 %v4478_v6, %v4477_v32 }
 0xf67   :  { %v4482_v22 = vadd.f32 1e-08, %v4460_v25 }
 0xf68   :  { %v4480_v30 = vrot.slane %v4479_v2, 1 }
 0xf69   :  { %5887 = vrcp.f32 %v4482_v22 }
 0xf6a   :  { %v4481_v17 = vadd.f32 %v4480_v30, %v4479_v2 }
 0xf6c   :  { %v4483_v8 = vadd.f32 1e-08, %v4481_v17 }
 0xf6e   :  { %5889 = vrcp.f32 %v4483_v8 }
 0xf6f   :  { %v5888_v26 = vpop.eup %5887 }
 0xf70   :  { %v10239_v45 = vmul.f32 %v5888_v26, %v10162_v7  ;;  %v10242_v10 = vmul.f32 %v5888_v26, %v10159_v54  ;;  %v10254_v7 = vmul.f32 %v5888_v26, %v10165_v15 }
 0xf72   :  { %v4505_v28 = vsel %vm563_vm1, %v10239_v45, 0.0  ;;  %v4502_v56 = vsel %vm563_vm1, %v10242_v10, 0.0  ;;  %v4508_v12 = vsel %vm563_vm1, %v10254_v7, 0.0 }
 0xf73   :  { %4506 = vadd.xlane.f32.xlu1 %v4505_v28  ;;  %4503 = vadd.xlane.f32.xlu0 %v4502_v56 }
 0xf74   :  { %v5890_v9 = vpop.eup %5889 }
 0xf75   :  { %v10249_v36 = vmul.f32 %v5890_v9, %v10188_v16  ;;  %v10257_v54 = vmul.f32 %v5890_v9, %v10177_v19  ;;  %v10264_v1 = vmul.f32 %v5890_v9, %v10185_v40  ;;  %v10269_v15 = vmul.f32 %v5890_v9, %v10194_v51 }
 0xf76   :  { %v10272_v19 = vmul.f32 %v5888_v26, %v10168_v21  ;;  %v10279_v40 = vmul.f32 %v5888_v26, %v10182_v58  ;;  %v10284_v51 = vmul.f32 %v5888_v26, %v10191_v11  ;;  %v10287_v21 = vmul.f32 %v5890_v9, %v10201_v37 }
 0xf77   :  { %v4526_v38 = vsel %vm563_vm1, %v10249_v36, 0.0  ;;  %v4529_v43 = vsel %vm563_vm1, %v10257_v54, 0.0  ;;  %v4532_v16 = vsel %vm563_vm1, %v10264_v1, 0.0  ;;  %v4535_v35 = vsel %vm563_vm1, %v10269_v15, 0.0 }
 0xf78   :  { %4527 = vadd.xlane.f32.xlu2 %v4526_v38  ;;  %v4511_v57 = vsel %vm563_vm1, %v10272_v19, 0.0  ;;  %v4514_v14 = vsel %vm563_vm1, %v10279_v40, 0.0  ;;  %v4517_v48 = vsel %vm563_vm1, %v10284_v51, 0.0  ;;  %v4538_v33 = vsel %vm563_vm1, %v10287_v21, 0.0 }
 0xf79   :  { %v10294_v58 = vmul.f32 %v5890_v9, %v10212_v42  ;;  %v10299_v11 = vmul.f32 %v5890_v9, %v10220_v4  ;;  %v10302_v37 = vmul.f32 %v5888_v26, %v10215_v50  ;;  %v10309_v42 = vmul.f32 %v5888_v26, %v10227_v0 }
 0xf7a   :  { %v10314_v4 = vmul.f32 %v5890_v9, %v10234_v31 }
 0xf7b   :  { %4509 = vadd.xlane.f32.xlu1 %v4508_v12  ;;  %4530 = vadd.xlane.f32.xlu0 %v4529_v43  ;;  %v4541_v18 = vsel %vm563_vm1, %v10294_v58, 0.0  ;;  %v4544_v63 = vsel %vm563_vm1, %v10299_v11, 0.0  ;;  %v4520_v59 = vsel %vm563_vm1, %v10302_v37, 0.0  ;;  %v4523_v44 = vsel %vm563_vm1, %v10309_v42, 0.0 }
 0xf7c   :  { %v4547_v50 = vsel %vm563_vm1, %v10314_v4, 0.0 }
 0xf80   :  { %4533 = vadd.xlane.f32.xlu2 %v4532_v16 }
 0xf83   :  { %4536 = vadd.xlane.f32.xlu1 %v4535_v35  ;;  %4512 = vadd.xlane.f32.xlu0 %v4511_v57 }
 0xf88   :  { %4515 = vadd.xlane.f32.xlu2 %v4514_v14 }
 0xf8b   :  { %4518 = vadd.xlane.f32.xlu1 %v4517_v48  ;;  %4539 = vadd.xlane.f32.xlu0 %v4538_v33 }
 0xf90   :  { %4542 = vadd.xlane.f32.xlu2 %v4541_v18 }
 0xf93   :  { %4545 = vadd.xlane.f32.xlu1 %v4544_v63  ;;  %4521 = vadd.xlane.f32.xlu0 %v4520_v59 }
 0xf98   :  { %4524 = vadd.xlane.f32.xlu2 %v4523_v44 }
 0xf9b   :  { %4548 = vadd.xlane.f32.xlu0 %v4547_v50 }
 0xfe6   :  { %v4507_v60 = vpop.xlane.xlu1 %4506  ;;  %v4504_v47 = vpop.xlane.xlu0 %4503 }
 0xfe7   :  { %v4551_v34 = vadd.f32 1e-08, %v4507_v60  ;;  %v4550_v55 = vadd.f32 1e-08, %v4504_v47 }
 0xfe9   :  { %5891 = vrcp.f32 %v4551_v34 }
 0xfea   :  { %5893 = vrcp.f32 %v4550_v55 }
 0xfeb   :  { %v4528_v53 = vpop.xlane.xlu2 %4527 }
 0xfec   :  { %v4558_v46 = vadd.f32 1e-08, %v4528_v53 }
 0xfee   :  { %v4510_v39 = vpop.xlane.xlu1 %4509  ;;  %v4531_v61 = vpop.xlane.xlu0 %4530 }
 0xfef   :  { %v4552_v3 = vadd.f32 1e-08, %v4510_v39  ;;  %v4559_v31 = vadd.f32 1e-08, %v4531_v61  ;;  %v5892_v23 = vpop.eup %5891 }
 0xff0   :  { %v5894_v32 = vpop.eup %5893  ;;  %v10322_v30 = vmul.f32 %v5892_v23, %v10239_v45 }
 0xff1   :  { %5895 = vrcp.f32 %v4552_v3  ;;  %v10319_v2 = vmul.f32 %v5894_v32, %v10242_v10 }
 0xff2   :  { %v4599_v45 = vsel %vm563_vm1, %v10322_v30, 0.0 }
 0xff3   :  { %v4534_v0 = vpop.xlane.xlu2 %4533  ;;  %v4598_v43 = vsel %vm563_vm1, %v10319_v2, 0.0 }
 0xff4   :  { %v4560_v13 = vadd.f32 1e-08, %v4534_v0  ;;  %v4600_v18 = vadd.f32 %v4599_v45, %v4598_v43 }
 0xff6   :  { %v4537_v5 = vpop.xlane.xlu1 %4536  ;;  %v4513_v20 = vpop.xlane.xlu0 %4512 }
 0xff7   :  { %v4553_v29 = vadd.f32 1e-08, %v4513_v20  ;;  %v4561_v52 = vadd.f32 1e-08, %v4537_v5  ;;  %v5896_v6 = vpop.eup %5895 }
 0xff8   :  { %v10325_v28 = vmul.f32 %v5896_v6, %v10254_v7 }
 0xff9   :  { %5897 = vrcp.f32 %v4553_v29 }
 0xffa   :  { %5899 = vrcp.f32 %v4559_v31  ;;  %v4601_v14 = vsel %vm563_vm1, %v10325_v28, 0.0 }
 0xffb   :  { %v4516_v27 = vpop.xlane.xlu2 %4515  ;;  %v4602_v47 = vadd.f32 %v4601_v14, %v4600_v18 }
 0xffc   :  { %v4554_v24 = vadd.f32 1e-08, %v4516_v27 }
 0xffe   :  { %v4519_v62 = vpop.xlane.xlu1 %4518  ;;  %v4540_v41 = vpop.xlane.xlu0 %4539  ;;  %5901 = vrcp.f32 %v4554_v24 }
 0xfff   :  { %v4555_v49 = vadd.f32 1e-08, %v4519_v62  ;;  %5903 = vrcp.f32 %v4558_v46  ;;  %v4562_v25 = vadd.f32 1e-08, %v4540_v41  ;;  %v5898_v17 = vpop.eup %5897 }
0x1000   :  { %5905 = vrcp.f32 %v4560_v13  ;;  %v5900_v26 = vpop.eup %5899  ;;  %v10328_v38 = vmul.f32 %v5898_v17, %v10272_v19 }
0x1001   :  { %5907 = vrcp.f32 %v4561_v52  ;;  %v10337_v48 = vmul.f32 %v5900_v26, %v10257_v54 }
0x1002   :  { %5909 = vrcp.f32 %v4555_v49  ;;  %v4603_v59 = vsel %vm563_vm1, %v10328_v38, 0.0 }
0x1003   :  { %v4543_v22 = vpop.xlane.xlu2 %4542  ;;  %5911 = vrcp.f32 %v4562_v25  ;;  %v4620_v39 = vsel %vm563_vm1, %v10337_v48, 0.0  ;;  %v4604_v0 = vadd.f32 %v4603_v59, %v4602_v47 }
0x1004   :  { %v4563_v8 = vadd.f32 1e-08, %v4543_v22  ;;  %v5902_v56 = vpop.eup %5901 }
0x1005   :  { %v5904_v9 = vpop.eup %5903  ;;  %v10340_v19 = vmul.f32 %v5902_v56, %v10279_v40 }
0x1006   :  { %v4546_v10 = vpop.xlane.xlu1 %4545  ;;  %v4522_v12 = vpop.xlane.xlu0 %4521  ;;  %5913 = vrcp.f32 %v4563_v8  ;;  %v10348_v50 = vmul.f32 %v5904_v9, %v10249_v36 }
0x1007   :  { %v5906_v16 = vpop.eup %5905  ;;  %v4564_v35 = vadd.f32 1e-08, %v4546_v10  ;;  %v4556_v57 = vadd.f32 1e-08, %v4522_v12  ;;  %v4605_v53 = vsel %vm563_vm1, %v10340_v19, 0.0 }
0x1008   :  { %v5908_v7 = vpop.eup %5907  ;;  %v10343_v63 = vmul.f32 %v5906_v16, %v10264_v1  ;;  %v4619_v55 = vsel %vm563_vm1, %v10348_v50, 0.0 }
0x1009   :  { %v5910_v33 = vpop.eup %5909  ;;  %5915 = vrcp.f32 %v4564_v35  ;;  %v10351_v40 = vmul.f32 %v5908_v7, %v10269_v15  ;;  %v4621_v3 = vadd.f32 %v4620_v39, %v4619_v55 }
0x100a   :  { %5917 = vrcp.f32 %v4556_v57  ;;  %v5912_v60 = vpop.eup %5911  ;;  %v10356_v1 = vmul.f32 %v5910_v33, %v10284_v51  ;;  %v4622_v36 = vsel %vm563_vm1, %v10343_v63, 0.0  ;;  %v4606_v51 = vadd.f32 %v4605_v53, %v4604_v0 }
0x100b   :  { %v4525_v44 = vpop.xlane.xlu2 %4524  ;;  %v10363_v34 = vmul.f32 %v5912_v60, %v10287_v21  ;;  %v4624_v31 = vsel %vm563_vm1, %v10351_v40, 0.0  ;;  %v4623_v46 = vadd.f32 %v4622_v36, %v4621_v3 }
0x100c   :  { %v4557_v54 = vadd.f32 1e-08, %v4525_v44  ;;  %v5914_v61 = vpop.eup %5913  ;;  %v4607_v27 = vsel %vm563_vm1, %v10356_v1, 0.0 }
0x100d   :  { %v10372_v24 = vmul.f32 %v5914_v61, %v10294_v58  ;;  %v4626_v13 = vsel %vm563_vm1, %v10363_v34, 0.0  ;;  %v4608_v41 = vadd.f32 %v4607_v27, %v4606_v51  ;;  %v4625_v32 = vadd.f32 %v4624_v31, %v4623_v46 }
0x100e   :  { %5919 = vrcp.f32 %v4557_v54  ;;  %v4549_v15 = vpop.xlane.xlu0 %4548 }
0x100f   :  { %v5916_v5 = vpop.eup %5915  ;;  %v4565_v20 = vadd.f32 1e-08, %v4549_v15  ;;  %v4628_v58 = vsel %vm563_vm1, %v10372_v24, 0.0  ;;  %v4627_v6 = vadd.f32 %v4626_v13, %v4625_v32 }
0x1010   :  { %v5918_v29 = vpop.eup %5917  ;;  %v10380_v23 = vmul.f32 %v5916_v5, %v10299_v11 }
0x1011   :  { %v10375_v21 = vmul.f32 %v5918_v29, %v10302_v37  ;;  %5921 = vrcp.f32 %v4565_v20  ;;  %v4629_v8 = vadd.f32 %v4628_v58, %v4627_v6 }
0x1012   :  { %v4630_v25 = vsel %vm563_vm1, %v10380_v23, 0.0 }
0x1013   :  { %v4609_v62 = vsel %vm563_vm1, %v10375_v21, 0.0  ;;  %v4631_v9 = vadd.f32 %v4630_v25, %v4629_v8 }
0x1014   :  { %v5920_v52 = vpop.eup %5919  ;;  %v4610_v49 = vadd.f32 %v4609_v62, %v4608_v41 }
0x1015   :  { %v10387_v37 = vmul.f32 %v5920_v52, %v10309_v42 }
0x1017   :  { %v4611_v11 = vsel %vm563_vm1, %v10387_v37, 0.0  ;;  %v5922_v22 = vpop.eup %5921 }
0x1018   :  { %v4612_v17 = vadd.f32 %v4611_v11, %v4610_v49  ;;  %v10394_v26 = vmul.f32 %v5922_v22, %v10314_v4 }
0x101a   :  { %v4613_v56 = vrot.slane %v4612_v17, 4  ;;  %v4632_v42 = vsel %vm563_vm1, %v10394_v26, 0.0 }
0x101b   :  { %v4633_v12 = vadd.f32 %v4632_v42, %v4631_v9 }
0x101c   :  { %v4614_v10 = vadd.f32 %v4613_v56, %v4612_v17 }
0x101d   :  { %v4634_v45 = vrot.slane %v4633_v12, 4 }
0x101e   :  { %v4615_v43 = vrot.slane %v4614_v10, 2 }
0x101f   :  { %v4635_v35 = vadd.f32 %v4634_v45, %v4633_v12 }
0x1020   :  { %v4616_v16 = vadd.f32 %v4615_v43, %v4614_v10 }
0x1021   :  { %v4636_v7 = vrot.slane %v4635_v35, 2 }
0x1022   :  { %v4617_v57 = vrot.slane %v4616_v16, 1 }
0x1023   :  { %v4637_v33 = vadd.f32 %v4636_v7, %v4635_v35 }
0x1024   :  { %v4618_v14 = vadd.f32 %v4617_v57, %v4616_v16 }
0x1025   :  { %v4638_v59 = vrot.slane %v4637_v33, 1 }
0x1026   :  { %v4640_v18 = vadd.f32 1e-08, %v4618_v14 }
0x1027   :  { %v4639_v4 = vadd.f32 %v4638_v59, %v4637_v33 }
0x1028   :  { %5923 = vrcp.f32 %v4640_v18 }
0x1029   :  { %v4641_v44 = vadd.f32 1e-08, %v4639_v4 }
0x102b   :  { %5925 = vrcp.f32 %v4641_v44 }
0x102e   :  { %v5924_v60 = vpop.eup %5923 }
0x102f   :  { %v10399_v54 = vmul.f32 %v5924_v60, %v10322_v30  ;;  %v10402_v47 = vmul.f32 %v5924_v60, %v10319_v2  ;;  %v10414_v30 = vmul.f32 %v5924_v60, %v10325_v28 }
0x1031   :  { %v4663_v53 = vsel %vm563_vm1, %v10399_v54, 0.0  ;;  %v4660_v39 = vsel %vm563_vm1, %v10402_v47, 0.0  ;;  %v5926_v61 = vpop.eup %5925  ;;  %v4666_v15 = vsel %vm563_vm1, %v10414_v30, 0.0 }
0x1032   :  { %4664 = vadd.xlane.f32.xlu2 %v4663_v53  ;;  %4661 = vadd.xlane.f32.xlu1 %v4660_v39  ;;  %v10409_v0 = vmul.f32 %v5926_v61, %v10348_v50  ;;  %v10417_v2 = vmul.f32 %v5926_v61, %v10337_v48  ;;  %v10424_v5 = vmul.f32 %v5926_v61, %v10343_v63 }
0x1033   :  { %v10429_v28 = vmul.f32 %v5926_v61, %v10351_v40  ;;  %v10432_v48 = vmul.f32 %v5924_v60, %v10328_v38  ;;  %v10439_v63 = vmul.f32 %v5924_v60, %v10340_v19  ;;  %v10444_v40 = vmul.f32 %v5924_v60, %v10356_v1 }
0x1034   :  { %v4684_v36 = vsel %vm563_vm1, %v10409_v0, 0.0  ;;  %v4687_v55 = vsel %vm563_vm1, %v10417_v2, 0.0  ;;  %v4690_v50 = vsel %vm563_vm1, %v10424_v5, 0.0  ;;  %v10447_v38 = vmul.f32 %v5926_v61, %v10363_v34 }
0x1035   :  { %4685 = vadd.xlane.f32.xlu0 %v4684_v36  ;;  %v4693_v20 = vsel %vm563_vm1, %v10429_v28, 0.0  ;;  %v4669_v51 = vsel %vm563_vm1, %v10432_v48, 0.0  ;;  %v4672_v3 = vsel %vm563_vm1, %v10439_v63, 0.0  ;;  %v4675_v29 = vsel %vm563_vm1, %v10444_v40, 0.0 }
0x1036   :  { %v4696_v31 = vsel %vm563_vm1, %v10447_v38, 0.0  ;;  %v10454_v19 = vmul.f32 %v5926_v61, %v10372_v24  ;;  %v10459_v1 = vmul.f32 %v5926_v61, %v10380_v23  ;;  %v10462_v34 = vmul.f32 %v5924_v60, %v10375_v21 }
0x1037   :  { %v10469_v24 = vmul.f32 %v5924_v60, %v10387_v37  ;;  %v10474_v23 = vmul.f32 %v5926_v61, %v10394_v26 }
0x1038   :  { %v4699_v27 = vsel %vm563_vm1, %v10454_v19, 0.0  ;;  %v4702_v46 = vsel %vm563_vm1, %v10459_v1, 0.0  ;;  %v4678_v13 = vsel %vm563_vm1, %v10462_v34, 0.0 }
0x1039   :  { %v4681_v52 = vsel %vm563_vm1, %v10469_v24, 0.0  ;;  %v4705_v21 = vsel %vm563_vm1, %v10474_v23, 0.0 }
0x103a   :  { %4667 = vadd.xlane.f32.xlu2 %v4666_v15  ;;  %4688 = vadd.xlane.f32.xlu1 %v4687_v55 }
0x103d   :  { %4691 = vadd.xlane.f32.xlu0 %v4690_v50 }
0x1042   :  { %4694 = vadd.xlane.f32.xlu2 %v4693_v20  ;;  %4670 = vadd.xlane.f32.xlu1 %v4669_v51 }
0x1045   :  { %4673 = vadd.xlane.f32.xlu0 %v4672_v3 }
0x104a   :  { %4676 = vadd.xlane.f32.xlu2 %v4675_v29  ;;  %4697 = vadd.xlane.f32.xlu1 %v4696_v31 }
0x104d   :  { %4700 = vadd.xlane.f32.xlu0 %v4699_v27 }
0x1052   :  { %4703 = vadd.xlane.f32.xlu2 %v4702_v46  ;;  %4679 = vadd.xlane.f32.xlu1 %v4678_v13 }
0x1055   :  { %4682 = vadd.xlane.f32.xlu0 %v4681_v52 }
0x105a   :  { %4706 = vadd.xlane.f32.xlu1 %v4705_v21 }
0x10a5   :  { %v4665_v62 = vpop.xlane.xlu2 %4664  ;;  %v4662_v41 = vpop.xlane.xlu1 %4661 }
0x10a6   :  { %v4709_v6 = vadd.f32 1e-08, %v4665_v62  ;;  %v4708_v25 = vadd.f32 1e-08, %v4662_v41 }
0x10a8   :  { %v4686_v32 = vpop.xlane.xlu0 %4685  ;;  %5927 = vrcp.f32 %v4709_v6 }
0x10a9   :  { %5929 = vrcp.f32 %v4708_v25  ;;  %v4716_v26 = vadd.f32 1e-08, %v4686_v32 }
0x10ad   :  { %v4668_v58 = vpop.xlane.xlu2 %4667  ;;  %v4689_v49 = vpop.xlane.xlu1 %4688 }
0x10ae   :  { %v4710_v11 = vadd.f32 1e-08, %v4668_v58  ;;  %v4717_v9 = vadd.f32 1e-08, %v4689_v49  ;;  %v5928_v10 = vpop.eup %5927 }
0x10af   :  { %v5930_v43 = vpop.eup %5929  ;;  %v10482_v18 = vmul.f32 %v5928_v10, %v10399_v54 }
0x10b0   :  { %v4692_v37 = vpop.xlane.xlu0 %4691  ;;  %5931 = vrcp.f32 %v4710_v11  ;;  %v10479_v14 = vmul.f32 %v5930_v43, %v10402_v47 }
0x10b1   :  { %v4718_v12 = vadd.f32 1e-08, %v4692_v37  ;;  %v4757_v54 = vsel %vm563_vm1, %v10482_v18, 0.0 }
0x10b2   :  { %v4756_v47 = vsel %vm563_vm1, %v10479_v14, 0.0 }
0x10b5   :  { %v4695_v22 = vpop.xlane.xlu2 %4694  ;;  %v4671_v17 = vpop.xlane.xlu1 %4670 }
0x10b6   :  { %v4711_v8 = vadd.f32 1e-08, %v4671_v17  ;;  %v4719_v35 = vadd.f32 1e-08, %v4695_v22  ;;  %v5932_v7 = vpop.eup %5931 }
0x10b7   :  { %v10485_v44 = vmul.f32 %v5932_v7, %v10414_v30 }
0x10b8   :  { %v4674_v56 = vpop.xlane.xlu0 %4673  ;;  %5933 = vrcp.f32 %v4711_v8 }
0x10b9   :  { %v4712_v42 = vadd.f32 1e-08, %v4674_v56  ;;  %5935 = vrcp.f32 %v4716_v26  ;;  %v4759_v30 = vsel %vm563_vm1, %v10485_v44, 0.0 }
0x10ba   :  { %5937 = vrcp.f32 %v4717_v9 }
0x10bb   :  { %5939 = vrcp.f32 %v4712_v42 }
0x10bc   :  { %5941 = vrcp.f32 %v4718_v12 }
0x10bd   :  { %v4677_v45 = vpop.xlane.xlu2 %4676  ;;  %v4698_v16 = vpop.xlane.xlu1 %4697 }
0x10be   :  { %v4713_v57 = vadd.f32 1e-08, %v4677_v45  ;;  %v4720_v33 = vadd.f32 1e-08, %v4698_v16  ;;  %v5934_v59 = vpop.eup %5933 }
0x10bf   :  { %v5936_v53 = vpop.eup %5935  ;;  %v10488_v61 = vmul.f32 %v5934_v59, %v10432_v48  ;;  %v4758_v48 = vadd.f32 %v4757_v54, %v4756_v47 }
0x10c0   :  { %5943 = vrcp.f32 %v4713_v57  ;;  %v4701_v4 = vpop.xlane.xlu0 %4700  ;;  %v5938_v39 = vpop.eup %5937  ;;  %v10508_v62 = vmul.f32 %v5936_v53, %v10409_v0 }
0x10c1   :  { %5945 = vrcp.f32 %v4719_v35  ;;  %v4721_v60 = vadd.f32 1e-08, %v4701_v4  ;;  %v5940_v36 = vpop.eup %5939  ;;  %v10497_v31 = vmul.f32 %v5938_v39, %v10417_v2  ;;  %v4761_v27 = vsel %vm563_vm1, %v10488_v61, 0.0 }
0x10c2   :  { %5947 = vrcp.f32 %v4720_v33  ;;  %v5942_v50 = vpop.eup %5941  ;;  %v10502_v46 = vmul.f32 %v5940_v36, %v10439_v63  ;;  %v4760_v21 = vadd.f32 %v4759_v30, %v4758_v48 }
0x10c3   :  { %5949 = vrcp.f32 %v4721_v60  ;;  %v10505_v13 = vmul.f32 %v5942_v50, %v10424_v5 }
0x10c4   :  { %v4762_v63 = vadd.f32 %v4761_v27, %v4760_v21  ;;  %v4763_v5 = vsel %vm563_vm1, %v10502_v46, 0.0 }
0x10c5   :  { %v4704_v15 = vpop.xlane.xlu2 %4703  ;;  %v4680_v55 = vpop.xlane.xlu1 %4679  ;;  %v4780_v37 = vsel %vm563_vm1, %v10505_v13, 0.0 }
0x10c6   :  { %v4722_v20 = vadd.f32 1e-08, %v4704_v15  ;;  %v4714_v51 = vadd.f32 1e-08, %v4680_v55  ;;  %v5944_v3 = vpop.eup %5943  ;;  %v4764_v56 = vadd.f32 %v4763_v5, %v4762_v63 }
0x10c7   :  { %v5946_v29 = vpop.eup %5945  ;;  %v10511_v2 = vmul.f32 %v5944_v3, %v10444_v40  ;;  %v4777_v40 = vsel %vm563_vm1, %v10508_v62, 0.0 }
0x10c8   :  { %5951 = vrcp.f32 %v4722_v20  ;;  %v4683_v52 = vpop.xlane.xlu0 %4682  ;;  %v5948_v41 = vpop.eup %5947  ;;  %v10514_v58 = vmul.f32 %v5946_v29, %v10429_v28  ;;  %v4778_v28 = vsel %vm563_vm1, %v10497_v31, 0.0 }
0x10c9   :  { %5953 = vrcp.f32 %v4714_v51  ;;  %v4715_v32 = vadd.f32 1e-08, %v4683_v52  ;;  %v5950_v49 = vpop.eup %5949  ;;  %v10521_v0 = vmul.f32 %v5948_v41, %v10447_v38  ;;  %v4765_v11 = vsel %vm563_vm1, %v10511_v2, 0.0 }
0x10ca   :  { %v4779_v17 = vadd.f32 %v4778_v28, %v4777_v40  ;;  %v4782_v26 = vsel %vm563_vm1, %v10514_v58, 0.0  ;;  %v10532_v38 = vmul.f32 %v5950_v49, %v10454_v19  ;;  %v4766_v43 = vadd.f32 %v4765_v11, %v4764_v56 }
0x10cb   :  { %5955 = vrcp.f32 %v4715_v32  ;;  %v4784_v10 = vsel %vm563_vm1, %v10521_v0, 0.0 }
0x10cc   :  { %v4781_v42 = vadd.f32 %v4780_v37, %v4779_v17  ;;  %v4786_v19 = vsel %vm563_vm1, %v10532_v38, 0.0 }
0x10cd   :  { %v4707_v6 = vpop.xlane.xlu1 %4706 }
0x10ce   :  { %v5952_v25 = vpop.eup %5951  ;;  %v4723_v22 = vadd.f32 1e-08, %v4707_v6  ;;  %v4783_v35 = vadd.f32 %v4782_v26, %v4781_v42 }
0x10cf   :  { %v5954_v8 = vpop.eup %5953  ;;  %v10540_v12 = vmul.f32 %v5952_v25, %v10459_v1 }
0x10d0   :  { %v10535_v9 = vmul.f32 %v5954_v8, %v10462_v34  ;;  %5957 = vrcp.f32 %v4723_v22  ;;  %v4785_v7 = vadd.f32 %v4784_v10, %v4783_v35 }
0x10d1   :  { %v5956_v45 = vpop.eup %5955  ;;  %v4788_v33 = vsel %vm563_vm1, %v10540_v12, 0.0 }
0x10d2   :  { %v4767_v16 = vsel %vm563_vm1, %v10535_v9, 0.0  ;;  %v10547_v34 = vmul.f32 %v5956_v45, %v10469_v24  ;;  %v4787_v60 = vadd.f32 %v4786_v19, %v4785_v7 }
0x10d3   :  { %v4768_v57 = vadd.f32 %v4767_v16, %v4766_v43 }
0x10d4   :  { %v4769_v1 = vsel %vm563_vm1, %v10547_v34, 0.0  ;;  %v4789_v47 = vadd.f32 %v4788_v33, %v4787_v60 }
0x10d5   :  { %v4770_v4 = vadd.f32 %v4769_v1, %v4768_v57 }
0x10d6   :  { %v5958_v59 = vpop.eup %5957 }
0x10d7   :  { %v10554_v53 = vmul.f32 %v5958_v59, %v10474_v23  ;;  %v4771_v39 = vrot.slane %v4770_v4, 4 }
0x10d9   :  { %v4790_v24 = vsel %vm563_vm1, %v10554_v53, 0.0  ;;  %v4772_v54 = vadd.f32 %v4771_v39, %v4770_v4 }
0x10da   :  { %v4791_v36 = vadd.f32 %v4790_v24, %v4789_v47 }
0x10db   :  { %v4773_v15 = vrot.slane %v4772_v54, 2 }
0x10dc   :  { %v4792_v55 = vrot.slane %v4791_v36, 4 }
0x10dd   :  { %v4774_v50 = vadd.f32 %v4773_v15, %v4772_v54 }
0x10de   :  { %v4793_v30 = vadd.f32 %v4792_v55, %v4791_v36 }
0x10df   :  { %v4775_v20 = vrot.slane %v4774_v50, 1 }
0x10e0   :  { %v4794_v51 = vrot.slane %v4793_v30, 2 }
0x10e1   :  { %v4776_v3 = vadd.f32 %v4775_v20, %v4774_v50 }
0x10e2   :  { %v4795_v48 = vadd.f32 %v4794_v51, %v4793_v30 }
0x10e3   :  { %v4798_v29 = vadd.f32 1e-08, %v4776_v3 }
0x10e4   :  { %v4796_v27 = vrot.slane %v4795_v48, 1 }
0x10e5   :  { %5959 = vrcp.f32 %v4798_v29 }
0x10e6   :  { %v4797_v23 = vadd.f32 %v4796_v27, %v4795_v48 }
0x10e8   :  { %v4799_v52 = vadd.f32 1e-08, %v4797_v23 }
0x10ea   :  { %5961 = vrcp.f32 %v4799_v52 }
0x10eb   :  { %v5960_v21 = vpop.eup %5959 }
0x10ec   :  { %v10559_v41 = vmul.f32 %v5960_v21, %v10482_v18  ;;  %v10562_v32 = vmul.f32 %v5960_v21, %v10479_v14  ;;  %v10574_v18 = vmul.f32 %v5960_v21, %v10485_v44 }
0x10ee   :  { %v4821_v63 = vsel %vm563_vm1, %v10559_v41, 0.0  ;;  %v4818_v49 = vsel %vm563_vm1, %v10562_v32, 0.0  ;;  %v4824_v40 = vsel %vm563_vm1, %v10574_v18, 0.0 }
0x10ef   :  { %4822 = vadd.xlane.f32.xlu0 %v4821_v63  ;;  %4819 = vadd.xlane.f32.xlu2 %v4818_v49 }
0x10f0   :  { %v5962_v5 = vpop.eup %5961 }
0x10f1   :  { %v10569_v37 = vmul.f32 %v5962_v5, %v10508_v62  ;;  %v10577_v14 = vmul.f32 %v5962_v5, %v10497_v31  ;;  %v10584_v25 = vmul.f32 %v5962_v5, %v10505_v13  ;;  %v10589_v44 = vmul.f32 %v5962_v5, %v10514_v58 }
0x10f2   :  { %v10592_v31 = vmul.f32 %v5960_v21, %v10488_v61  ;;  %v10599_v13 = vmul.f32 %v5960_v21, %v10502_v46  ;;  %v10604_v58 = vmul.f32 %v5960_v21, %v10511_v2  ;;  %v10607_v61 = vmul.f32 %v5962_v5, %v10521_v0 }
0x10f3   :  { %v4842_v6 = vsel %vm563_vm1, %v10569_v37, 0.0  ;;  %v4845_v28 = vsel %vm563_vm1, %v10577_v14, 0.0  ;;  %v4848_v62 = vsel %vm563_vm1, %v10584_v25, 0.0  ;;  %v4851_v11 = vsel %vm563_vm1, %v10589_v44, 0.0 }
0x10f4   :  { %4843 = vadd.xlane.f32.xlu1 %v4842_v6  ;;  %v4827_v22 = vsel %vm563_vm1, %v10592_v31, 0.0  ;;  %v4830_v17 = vsel %vm563_vm1, %v10599_v13, 0.0  ;;  %v4833_v8 = vsel %vm563_vm1, %v10604_v58, 0.0  ;;  %v4854_v26 = vsel %vm563_vm1, %v10607_v61, 0.0 }
0x10f5   :  { %v10614_v46 = vmul.f32 %v5962_v5, %v10532_v38  ;;  %v10619_v2 = vmul.f32 %v5962_v5, %v10540_v12  ;;  %v10622_v0 = vmul.f32 %v5960_v21, %v10535_v9  ;;  %v10629_v38 = vmul.f32 %v5960_v21, %v10547_v34 }
0x10f6   :  { %v10634_v12 = vmul.f32 %v5962_v5, %v10554_v53 }
0x10f7   :  { %4825 = vadd.xlane.f32.xlu0 %v4824_v40  ;;  %4846 = vadd.xlane.f32.xlu2 %v4845_v28  ;;  %v4857_v56 = vsel %vm563_vm1, %v10614_v46, 0.0  ;;  %v4860_v42 = vsel %vm563_vm1, %v10619_v2, 0.0  ;;  %v4836_v10 = vsel %vm563_vm1, %v10622_v0, 0.0  ;;  %v4839_v43 = vsel %vm563_vm1, %v10629_v38, 0.0 }
0x10f8   :  { %v4863_v9 = vsel %vm563_vm1, %v10634_v12, 0.0 }
0x10fc   :  { %4849 = vadd.xlane.f32.xlu1 %v4848_v62 }
0x10ff   :  { %4852 = vadd.xlane.f32.xlu0 %v4851_v11  ;;  %4828 = vadd.xlane.f32.xlu2 %v4827_v22 }
0x1104   :  { %4831 = vadd.xlane.f32.xlu1 %v4830_v17 }
0x1107   :  { %4834 = vadd.xlane.f32.xlu0 %v4833_v8  ;;  %4855 = vadd.xlane.f32.xlu2 %v4854_v26 }
0x110c   :  { %4858 = vadd.xlane.f32.xlu1 %v4857_v56 }
0x110f   :  { %4861 = vadd.xlane.f32.xlu0 %v4860_v42  ;;  %4837 = vadd.xlane.f32.xlu2 %v4836_v10 }
0x1114   :  { %4840 = vadd.xlane.f32.xlu1 %v4839_v43 }
0x1117   :  { %4864 = vadd.xlane.f32.xlu2 %v4863_v9 }
0x1162   :  { %v4823_v45 = vpop.xlane.xlu0 %4822  ;;  %v4820_v16 = vpop.xlane.xlu2 %4819 }
0x1163   :  { %v4867_v7 = vadd.f32 1e-08, %v4823_v45  ;;  %v4866_v33 = vadd.f32 1e-08, %v4820_v16 }
0x1165   :  { %5963 = vrcp.f32 %v4867_v7 }
0x1166   :  { %5965 = vrcp.f32 %v4866_v33 }
0x1167   :  { %v4844_v35 = vpop.xlane.xlu1 %4843 }
0x1168   :  { %v4874_v47 = vadd.f32 1e-08, %v4844_v35 }
0x116a   :  { %v4826_v19 = vpop.xlane.xlu0 %4825  ;;  %v4847_v57 = vpop.xlane.xlu2 %4846 }
0x116b   :  { %v4868_v4 = vadd.f32 1e-08, %v4826_v19  ;;  %v4875_v24 = vadd.f32 1e-08, %v4847_v57  ;;  %v5964_v54 = vpop.eup %5963 }
0x116c   :  { %v5966_v50 = vpop.eup %5965  ;;  %v10642_v29 = vmul.f32 %v5964_v54, %v10559_v41 }
0x116d   :  { %5967 = vrcp.f32 %v4868_v4  ;;  %v10639_v3 = vmul.f32 %v5966_v50, %v10562_v32 }
0x116e   :  { %v4915_v41 = vsel %vm563_vm1, %v10642_v29, 0.0 }
0x116f   :  { %v4850_v34 = vpop.xlane.xlu1 %4849  ;;  %v4914_v5 = vsel %vm563_vm1, %v10639_v3, 0.0 }
0x1170   :  { %v4876_v36 = vadd.f32 1e-08, %v4850_v34 }
0x1172   :  { %v4853_v1 = vpop.xlane.xlu0 %4852  ;;  %v4829_v59 = vpop.xlane.xlu2 %4828 }
0x1173   :  { %v4869_v60 = vadd.f32 1e-08, %v4829_v59  ;;  %v5968_v20 = vpop.eup %5967  ;;  %v4877_v51 = vadd.f32 1e-08, %v4853_v1 }
0x1174   :  { %v10645_v52 = vmul.f32 %v5968_v20, %v10574_v18 }
0x1175   :  { %5969 = vrcp.f32 %v4869_v60 }
0x1176   :  { %v4917_v22 = vsel %vm563_vm1, %v10645_v52, 0.0 }
0x1177   :  { %v4832_v53 = vpop.xlane.xlu1 %4831 }
0x1178   :  { %v4870_v39 = vadd.f32 1e-08, %v4832_v53 }
0x117a   :  { %v4835_v15 = vpop.xlane.xlu0 %4834  ;;  %v4856_v55 = vpop.xlane.xlu2 %4855  ;;  %5971 = vrcp.f32 %v4870_v39 }
0x117b   :  { %v4871_v30 = vadd.f32 1e-08, %v4835_v15  ;;  %5973 = vrcp.f32 %v4874_v47  ;;  %v5970_v27 = vpop.eup %5969  ;;  %v4878_v23 = vadd.f32 1e-08, %v4856_v55 }
0x117c   :  { %5975 = vrcp.f32 %v4875_v24  ;;  %v10650_v32 = vmul.f32 %v5970_v27, %v10592_v31  ;;  %v4916_v31 = vadd.f32 %v4915_v41, %v4914_v5 }
0x117d   :  { %5977 = vrcp.f32 %v4876_v36 }
0x117e   :  { %5979 = vrcp.f32 %v4871_v30  ;;  %v4919_v56 = vsel %vm563_vm1, %v10650_v32, 0.0  ;;  %v4918_v9 = vadd.f32 %v4917_v22, %v4916_v31 }
0x117f   :  { %v4859_v48 = vpop.xlane.xlu1 %4858  ;;  %5981 = vrcp.f32 %v4877_v51 }
0x1180   :  { %v5972_v21 = vpop.eup %5971  ;;  %v4879_v63 = vadd.f32 1e-08, %v4859_v48  ;;  %5983 = vrcp.f32 %v4878_v23  ;;  %v4920_v19 = vadd.f32 %v4919_v56, %v4918_v9 }
0x1181   :  { %v5974_v49 = vpop.eup %5973  ;;  %v10657_v17 = vmul.f32 %v5972_v21, %v10599_v13 }
0x1182   :  { %v4862_v6 = vpop.xlane.xlu0 %4861  ;;  %v4838_v40 = vpop.xlane.xlu2 %4837  ;;  %5985 = vrcp.f32 %v4879_v63 }
0x1183   :  { %v5976_v28 = vpop.eup %5975  ;;  %v4880_v62 = vadd.f32 1e-08, %v4862_v6  ;;  %v4872_v18 = vadd.f32 1e-08, %v4838_v40  ;;  %v4921_v13 = vsel %vm563_vm1, %v10657_v17, 0.0 }
0x1184   :  { %v5978_v11 = vpop.eup %5977  ;;  %v10660_v26 = vmul.f32 %v5976_v28, %v10577_v14  ;;  %v10673_v14 = vmul.f32 %v5974_v49, %v10569_v37  ;;  %v4922_v1 = vadd.f32 %v4921_v13, %v4920_v19 }
0x1185   :  { %v5980_v8 = vpop.eup %5979  ;;  %5987 = vrcp.f32 %v4872_v18  ;;  %v10665_v45 = vmul.f32 %v5978_v11, %v10584_v25 }
0x1186   :  { %v5982_v10 = vpop.eup %5981  ;;  %5989 = vrcp.f32 %v4880_v62  ;;  %v10670_v16 = vmul.f32 %v5980_v8, %v10604_v58  ;;  %v4936_v57 = vsel %vm563_vm1, %v10660_v26, 0.0  ;;  %v4935_v60 = vsel %vm563_vm1, %v10673_v14, 0.0 }
0x1187   :  { %v4841_v42 = vpop.xlane.xlu1 %4840  ;;  %v5984_v35 = vpop.eup %5983  ;;  %v10678_v34 = vmul.f32 %v5982_v10, %v10589_v44  ;;  %v4938_v58 = vsel %vm563_vm1, %v10665_v45, 0.0  ;;  %v4937_v39 = vadd.f32 %v4936_v57, %v4935_v60  ;;  %v10864_v57 = vld [vmem:[#allocation2_spill] sm:$0xff] }
0x1188   :  { %v4873_v43 = vadd.f32 1e-08, %v4841_v42  ;;  %v5986_v7 = vpop.eup %5985  ;;  %v4923_v37 = vsel %vm563_vm1, %v10670_v16, 0.0  ;;  %v10685_v4 = vmul.f32 %v5984_v35, %v10607_v61  ;;  %v10863_v35 = vld [vmem:[#allocation3_spill] sm:$0xff] }
0x1189   :  { %v4940_v47 = vsel %vm563_vm1, %v10678_v34, 0.0  ;;  %v10695_v24 = vmul.f32 %v5986_v7, %v10614_v46  ;;  %v4924_v36 = vadd.f32 %v4923_v37, %v4922_v1  ;;  %v4939_v15 = vadd.f32 %v4938_v58, %v4937_v39  ;;  %v10867_v39 = vld [vmem:[#allocation7_spill] sm:$0xff] }
0x118a   :  { %5991 = vrcp.f32 %v4873_v43  ;;  %v4865_v25 = vpop.xlane.xlu2 %4864  ;;  %v4942_v55 = vsel %vm563_vm1, %v10685_v4, 0.0 }
0x118b   :  { %v4881_v33 = vadd.f32 1e-08, %v4865_v25  ;;  %v5988_v59 = vpop.eup %5987  ;;  %v4941_v20 = vadd.f32 %v4940_v47, %v4939_v15  ;;  %v4944_v46 = vsel %vm563_vm1, %v10695_v24, 0.0 }
0x118c   :  { %v5990_v53 = vpop.eup %5989  ;;  %v10690_v44 = vmul.f32 %v5988_v59, %v10622_v0 }
0x118d   :  { %5993 = vrcp.f32 %v4881_v33  ;;  %v10702_v0 = vmul.f32 %v5990_v53, %v10619_v2  ;;  %v4943_v23 = vadd.f32 %v4942_v55, %v4941_v20 }
0x118e   :  { %v4925_v61 = vsel %vm563_vm1, %v10690_v44, 0.0 }
0x118f   :  { %v4926_v30 = vadd.f32 %v4925_v61, %v4924_v36  ;;  %v4946_v21 = vsel %vm563_vm1, %v10702_v0, 0.0 }
0x1190   :  { %v5992_v54 = vpop.eup %5991 }
0x1191   :  { %v10705_v50 = vmul.f32 %v5992_v54, %v10629_v38  ;;  %v4945_v38 = vadd.f32 %v4944_v46, %v4943_v23  ;;  %v10870_v46 = vld [vmem:[#allocation6_spill] sm:$0xff] }
0x1193   :  { %v4927_v51 = vsel %vm563_vm1, %v10705_v50, 0.0  ;;  %v5994_v48 = vpop.eup %5993  ;;  %v4947_v6 = vadd.f32 %v4946_v21, %v4945_v38  ;;  %v10871_v21 = vld [vmem:[#allocation10_spill] sm:$0xff] }
0x1194   :  { %v4928_v27 = vadd.f32 %v4927_v51, %v4926_v30  ;;  %v10714_v2 = vmul.f32 %v5994_v48, %v10634_v12  ;;  %v10869_v30 = vld [vmem:[#allocation9_spill] sm:$0xff]  ;;  %v10872_v38 = vld [vmem:[#allocation14_spill] sm:$0xff] }
0x1196   :  { %v4929_v63 = vrot.slane %v4928_v27, 4  ;;  %v4948_v49 = vsel %vm563_vm1, %v10714_v2, 0.0 }
0x1197   :  { %v4949_v41 = vadd.f32 %v4948_v49, %v4947_v6 }
0x1198   :  { %v4930_v5 = vadd.f32 %v4929_v63, %v4928_v27 }
0x1199   :  { %v4950_v62 = vrot.slane %v4949_v41, 4 }
0x119a   :  { %v4931_v40 = vrot.slane %v4930_v5, 2 }
0x119b   :  { %v4951_v11 = vadd.f32 %v4950_v62, %v4949_v41  ;;  %v10874_v62 = vld [vmem:[#allocation11_spill] sm:$0xff] }
0x119c   :  { %v4932_v28 = vadd.f32 %v4931_v40, %v4930_v5  ;;  %v10873_v5 = vld [vmem:[#allocation12_spill] sm:$0xff] }
0x119d   :  { %v4952_v8 = vrot.slane %v4951_v11, 2 }
0x119e   :  { %v4933_v18 = vrot.slane %v4932_v28, 1 }
0x119f   :  { %v4953_v56 = vadd.f32 %v4952_v8, %v4951_v11  ;;  %v10875_v11 = vld [vmem:[#allocation13_spill] sm:$0xff]  ;;  %v10876_v8 = vld [vmem:[#allocation16_spill] sm:$0xff] }
0x11a0   :  { %v4934_v22 = vadd.f32 %v4933_v18, %v4932_v28 }
0x11a1   :  { %v4954_v12 = vrot.slane %v4953_v56, 1 }
0x11a2   :  { %v4956_v31 = vadd.f32 1e-08, %v4934_v22 }
0x11a3   :  { %v4955_v42 = vadd.f32 %v4954_v12, %v4953_v56 }
0x11a4   :  { %5995 = vrcp.f32 %v4956_v31 }
0x11a5   :  { %v4957_v10 = vadd.f32 1e-08, %v4955_v42 }
0x11a7   :  { %5997 = vrcp.f32 %v4957_v10 }
0x11aa   :  { %v5996_v43 = vpop.eup %5995 }
0x11ab   :  { %v4961_v9 = vmul.f32 %v5996_v43, %v10642_v29  ;;  %v4960_v13 = vmul.f32 %v5996_v43, %v10639_v3  ;;  %v4962_v1 = vmul.f32 %v5996_v43, %v10645_v52  ;;  %v10865_v29 = vld [vmem:[#allocation4_spill] sm:$0xff]  ;;  %v10866_v3 = vld [vmem:[#allocation5_spill] sm:$0xff] }
0x11ad   :  { %v4977_v19 = vmul.f32 %v4961_v9, %v10863_v35  ;;  %v4976_v25 = vmul.f32 %v4960_v13, %v10864_v57  ;;  %v5998_v59 = vpop.eup %5997  ;;  %v4978_v53 = vmul.f32 %v4962_v1, %v10866_v3  ;;  %v10878_v9 = vld [vmem:[#allocation15_spill] sm:$0xff] }
0x11ae   :  { %v4968_v58 = vmul.f32 %v5998_v59, %v10673_v14  ;;  %v4969_v37 = vmul.f32 %v5998_v59, %v10660_v26  ;;  %v4970_v61 = vmul.f32 %v5998_v59, %v10665_v45  ;;  %v4971_v15 = vmul.f32 %v5998_v59, %v10678_v34  ;;  %v10868_v26 = vld [vmem:[#allocation8_spill] sm:$0xff] }
0x11af   :  { %v4995_v7 = vsel %vm563_vm1, %v4977_v19, 0.0  ;;  %v4992_v33 = vsel %vm563_vm1, %v4976_v25, 0.0  ;;  %v4998_v52 = vsel %vm563_vm1, %v4978_v53, 0.0  ;;  %v4963_v14 = vmul.f32 %v5996_v43, %v10650_v32 }
0x11b0   :  { %4996 = vadd.xlane.f32.xlu1 %v4995_v7  ;;  %4993 = vadd.xlane.f32.xlu0 %v4992_v33  ;;  %v4984_v60 = vmul.f32 %v4968_v58, %v10865_v29  ;;  %v4985_v47 = vmul.f32 %v4969_v37, %v10867_v39  ;;  %v4986_v55 = vmul.f32 %v4970_v61, %v10868_v26 }
0x11b1   :  { %v4987_v20 = vmul.f32 %v4971_v15, %v10869_v30  ;;  %v4979_v51 = vmul.f32 %v4963_v14, %v10870_v46  ;;  %v4964_v45 = vmul.f32 %v5996_v43, %v10657_v17  ;;  %v4965_v34 = vmul.f32 %v5996_v43, %v10670_v16 }
0x11b2   :  { %v5016_v54 = vsel %vm563_vm1, %v4984_v60, 0.0  ;;  %v5019_v36 = vsel %vm563_vm1, %v4985_v47, 0.0  ;;  %v5022_v48 = vsel %vm563_vm1, %v4986_v55, 0.0  ;;  %v4972_v32 = vmul.f32 %v5998_v59, %v10685_v4 }
0x11b3   :  { %5017 = vadd.xlane.f32.xlu2 %v5016_v54  ;;  %v5025_v27 = vsel %vm563_vm1, %v4987_v20, 0.0  ;;  %v5001_v23 = vsel %vm563_vm1, %v4979_v51, 0.0  ;;  %v4980_v63 = vmul.f32 %v4964_v45, %v10871_v21  ;;  %v4981_v49 = vmul.f32 %v4965_v34, %v10872_v38 }
0x11b4   :  { %v4988_v6 = vmul.f32 %v4972_v32, %v10873_v5  ;;  %v4973_v17 = vmul.f32 %v5998_v59, %v10695_v24  ;;  %v4974_v16 = vmul.f32 %v5998_v59, %v10702_v0  ;;  %v4966_v4 = vmul.f32 %v5996_v43, %v10690_v44  ;;  %v10877_v44 = vld [vmem:[#allocation17_spill] sm:$0xff] }
0x11b5   :  { %v5004_v40 = vsel %vm563_vm1, %v4980_v63, 0.0  ;;  %v5007_v41 = vsel %vm563_vm1, %v4981_v49, 0.0  ;;  %v4967_v24 = vmul.f32 %v5996_v43, %v10705_v50  ;;  %v4975_v0 = vmul.f32 %v5998_v59, %v10714_v2 }
0x11b6   :  { %v5028_v28 = vsel %vm563_vm1, %v4988_v6, 0.0  ;;  %v4989_v18 = vmul.f32 %v4973_v17, %v10874_v62  ;;  %v4990_v22 = vmul.f32 %v4974_v16, %v10875_v11  ;;  %v4982_v31 = vmul.f32 %v4966_v4, %v10876_v8 }
0x11b7   :  { %v4983_v10 = vmul.f32 %v4967_v24, %v10877_v44  ;;  %v4991_v13 = vmul.f32 %v4975_v0, %v10878_v9 }
0x11b8   :  { %4999 = vadd.xlane.f32.xlu1 %v4998_v52  ;;  %5020 = vadd.xlane.f32.xlu0 %v5019_v36  ;;  %v5031_v56 = vsel %vm563_vm1, %v4989_v18, 0.0  ;;  %v5034_v12 = vsel %vm563_vm1, %v4990_v22, 0.0  ;;  %v5010_v42 = vsel %vm563_vm1, %v4982_v31, 0.0 }
0x11b9   :  { %v5013_v35 = vsel %vm563_vm1, %v4983_v10, 0.0  ;;  %v5037_v19 = vsel %vm563_vm1, %v4991_v13, 0.0  ;;  %vm5066_vm1 = vcmask 0  }
0x11bb   :  { %5023 = vadd.xlane.f32.xlu2 %v5022_v48 }
0x11c0   :  { %5026 = vadd.xlane.f32.xlu1 %v5025_v27  ;;  %5002 = vadd.xlane.f32.xlu0 %v5001_v23 }
0x11c3   :  { %5005 = vadd.xlane.f32.xlu2 %v5004_v40 }
0x11c8   :  { %5008 = vadd.xlane.f32.xlu1 %v5007_v41  ;;  %5029 = vadd.xlane.f32.xlu0 %v5028_v28 }
0x11cb   :  { %5032 = vadd.xlane.f32.xlu2 %v5031_v56 }
0x11d0   :  { %5035 = vadd.xlane.f32.xlu1 %v5034_v12  ;;  %5011 = vadd.xlane.f32.xlu0 %v5010_v42 }
0x11d3   :  { %5014 = vadd.xlane.f32.xlu2 %v5013_v35 }
0x11d8   :  { %5038 = vadd.xlane.f32.xlu0 %v5037_v19 }
0x1223   :  { %v4997_v50 = vpop.xlane.xlu1 %4996  ;;  %v4994_v43 = vpop.xlane.xlu0 %4993 }
0x1224   :  { %v5040_v58 = vadd.f32 %v4997_v50, %v4994_v43 }
0x1226   :  { %v5018_v57 = vpop.xlane.xlu2 %5017 }
0x122b   :  { %v5000_v25 = vpop.xlane.xlu1 %4999  ;;  %v5021_v7 = vpop.xlane.xlu0 %5020 }
0x122c   :  { %v5041_v29 = vadd.f32 %v5040_v58, %v5000_v25  ;;  %v5053_v60 = vadd.f32 %v5021_v7, %v5018_v57 }
0x122e   :  { %v5024_v33 = vpop.xlane.xlu2 %5023 }
0x122f   :  { %v5054_v39 = vadd.f32 %v5053_v60, %v5024_v33 }
0x1233   :  { %v5027_v1 = vpop.xlane.xlu1 %5026  ;;  %v5003_v2 = vpop.xlane.xlu0 %5002 }
0x1234   :  { %v5042_v53 = vadd.f32 %v5041_v29, %v5003_v2  ;;  %v5055_v54 = vadd.f32 %v5054_v39, %v5027_v1 }
0x1236   :  { %v5006_v59 = vpop.xlane.xlu2 %5005 }
0x1237   :  { %v5043_v61 = vadd.f32 %v5042_v53, %v5006_v59 }
0x123b   :  { %v5030_v37 = vpop.xlane.xlu0 %5029  ;;  %v5009_v3 = vpop.xlane.xlu1 %5008 }
0x123c   :  { %v5044_v36 = vadd.f32 %v5043_v61, %v5009_v3  ;;  %v5056_v15 = vadd.f32 %v5055_v54, %v5030_v37 }
0x123e   :  { %v5033_v47 = vpop.xlane.xlu2 %5032 }
0x123f   :  { %v5057_v55 = vadd.f32 %v5056_v15, %v5033_v47 }
0x1243   :  { %v5012_v52 = vpop.xlane.xlu0 %5011  ;;  %v5036_v26 = vpop.xlane.xlu1 %5035 }
0x1244   :  { %v5045_v14 = vadd.f32 %v5044_v36, %v5012_v52  ;;  %v5058_v20 = vadd.f32 %v5057_v55, %v5036_v26 }
0x1246   :  { %v5015_v30 = vpop.xlane.xlu2 %5014 }
0x1247   :  { %v5046_v46 = vadd.f32 %v5045_v14, %v5015_v30 }
0x1249   :  { %v5047_v48 = vrot.slane %v5046_v46, 4 }
0x124b   :  { %v5039_v51 = vpop.xlane.xlu0 %5038  ;;  %v5048_v27 = vadd.f32 %v5047_v48, %v5046_v46 }
0x124c   :  { %v5059_v45 = vadd.f32 %v5058_v20, %v5039_v51 }
0x124d   :  { %v5049_v34 = vrot.slane %v5048_v27, 2 }
0x124e   :  { %v5060_v23 = vrot.slane %v5059_v45, 4 }
0x124f   :  { %v5050_v21 = vadd.f32 %v5049_v34, %v5048_v27 }
0x1250   :  { %v5061_v32 = vadd.f32 %v5060_v23, %v5059_v45 }
0x1251   :  { %v5051_v38 = vrot.slane %v5050_v21, 1 }
0x1252   :  { %v5062_v63 = vrot.slane %v5061_v32, 2 }
0x1253   :  { %v5052_v5 = vadd.f32 %v5051_v38, %v5050_v21 }
0x1254   :  { %v5063_v49 = vadd.f32 %v5062_v63, %v5061_v32 }
0x1255   :  { %5067 = vst.msk [vmem:[%s10774_s2] sm:$0x1] %vm5066_vm1, %v5052_v5 }
0x1256   :  { %v5064_v6 = vrot.slane %v5063_v49, 1 }
0x1258   :  { %v5065_v40 = vadd.f32 %v5064_v6, %v5063_v49 }
0x125a   :  { %5068 = vst.msk [vmem:[%s10774_s2 + $0x1] sm:$0x1] %vm5066_vm1, %v5065_v40 }

</bundles_post_ra>
